<compile_context>
chip_gen: v7x
topology: tpu7x:2x2x1
jax: 0.10.0
libtpu: 0.0.40
codegen_flags: <defaults>
</compile_context>

<pallas_src>
import jax
import jax.numpy as jnp
from jax import lax
from jax.experimental import pallas as pl
from jax.experimental.pallas import tpu as pltpu

# ----------------------------- configuration ------------------------------
LATENT = 32
PFS = 6
HID = 64                       # hidden width per branch
D_HAND_IN = LATENT + PFS       # 38
D_OBJ_IN = LATENT + 3          # 35
EPS = 1e-5                     # nn.LayerNorm default eps
FUSED = 2 * HID                # 128 fused lanes (hand: 0..63, obj: 64..127)

DIMS_HAND = [D_HAND_IN, HID, HID, HID, 1]
DIMS_OBJ = [D_OBJ_IN, HID, HID, HID, 1]


# ------------------------------- kernel -----------------------------------
def _fused_layernorm(h, g, b, half_mask):
    """Per-half LayerNorm over the fused 128 lanes (hand half / obj half).

    Single pass: sum and sum-of-squares computed together, var = E[h^2]-mu^2.
    half_mask is (1, 128) bool, True on the hand half (lanes 0..63).
    """
    hm = jnp.where(half_mask, h, 0.0)      # hand-half values, obj lanes zeroed
    ho = h - hm                            # obj-half values, hand lanes zeroed
    inv_n = 1.0 / float(HID)
    s1 = jnp.sum(hm, axis=-1, keepdims=True)
    s2 = jnp.sum(ho, axis=-1, keepdims=True)
    q1 = jnp.sum(hm * hm, axis=-1, keepdims=True)
    q2 = jnp.sum(ho * ho, axis=-1, keepdims=True)
    mu = jnp.where(half_mask, s1, s2) * inv_n
    ex2 = jnp.where(half_mask, q1, q2) * inv_n
    var = ex2 - mu * mu
    return (h - mu) * lax.rsqrt(var + EPS) * g + b


def decoder_kernel(x_ref, w0_ref, w12_ref, w3_ref, vec_ref, b3_ref, out_ref):
    half_mask = lax.broadcasted_iota(jnp.int32, (1, FUSED), 1) < HID

    # Layer 0: (tile, 38) @ (38, 128).  Obj columns have zero rows for the
    # last 3 input features, so the obj half only sees input[:, :35].
    x = x_ref[...].astype(jnp.bfloat16)
    h = jnp.dot(x, w0_ref[...], preferred_element_type=jnp.float32)
    h = h + vec_ref[0:1, :]
    h = _fused_layernorm(h, vec_ref[1:2, :], vec_ref[2:3, :], half_mask)
    h = jnp.maximum(h, 0.0)

    # Layer 1: block-diagonal (128, 128)
    h = jnp.dot(h.astype(jnp.bfloat16), w12_ref[0],
                preferred_element_type=jnp.float32)
    h = h + vec_ref[3:4, :]
    h = _fused_layernorm(h, vec_ref[4:5, :], vec_ref[5:6, :], half_mask)
    h = jnp.maximum(h, 0.0)

    # Layer 2: block-diagonal (128, 128)
    h = jnp.dot(h.astype(jnp.bfloat16), w12_ref[1],
                preferred_element_type=jnp.float32)
    h = h + vec_ref[6:7, :]
    h = _fused_layernorm(h, vec_ref[7:8, :], vec_ref[8:9, :], half_mask)
    h = jnp.maximum(h, 0.0)

    # Final layer: block-diagonal (128, 2) -> single (tile, 2) store, tanh (self.th)
    y = jnp.dot(h.astype(jnp.bfloat16), w3_ref[...],
                preferred_element_type=jnp.float32)
    out_ref[...] = jnp.tanh(y + b3_ref[...])


# ------------------------------- wrapper -----------------------------------
def separate_decoder(x, packed, *, tile_n=512):
    """x: (N, 38) f32.  packed: output of pack_params().  Returns (oh, oo, dummy)."""
    w0, w12, w3, vecs, b3 = packed
    N, D = x.shape
    assert D == D_HAND_IN
    assert N % tile_n == 0, "pad N to a multiple of tile_n"

    out = pl.pallas_call(
        decoder_kernel,
        grid=(N // tile_n,),
        in_specs=[
            pl.BlockSpec((tile_n, D), lambda i: (i, 0)),
            pl.BlockSpec(w0.shape, lambda i: (0, 0)),
            pl.BlockSpec(w12.shape, lambda i: (0, 0, 0)),
            pl.BlockSpec(w3.shape, lambda i: (0, 0)),
            pl.BlockSpec(vecs.shape, lambda i: (0, 0)),
            pl.BlockSpec(b3.shape, lambda i: (0, 0)),
        ],
        out_specs=pl.BlockSpec((tile_n, 2), lambda i: (i, 0)),
        out_shape=jax.ShapeDtypeStruct((N, 2), jnp.float32),
        compiler_params=pltpu.CompilerParams(
            dimension_semantics=("parallel",)),
    )(x, w0, w12, w3, vecs, b3)

    # use_classifier=False -> third output is the dummy tensor([0.])
    return out[:, 0:1], out[:, 1:2], jnp.zeros((1,), jnp.float32)


# ------------------------ parameter packing (fusion) ------------------------
def _block_diag(a, b):
    top = jnp.concatenate([a, jnp.zeros((a.shape[0], b.shape[1]), a.dtype)], axis=1)
    bot = jnp.concatenate([jnp.zeros((b.shape[0], a.shape[1]), b.dtype), b], axis=1)
    return jnp.concatenate([top, bot], axis=0)


def pack_params(hand_layers, obj_layers):
    (wh0, bh0, gh0, eh0), (wh1, bh1, gh1, eh1), (wh2, bh2, gh2, eh2), (wh3, bh3) = hand_layers
    (wo0, bo0, go0, eo0), (wo1, bo1, go1, eo1), (wo2, bo2, go2, eo2), (wo3, bo3) = obj_layers

    # Layer 0: obj weight zero-padded from 35 -> 38 input rows, concat on lanes.
    wo0p = jnp.pad(wo0, ((0, D_HAND_IN - D_OBJ_IN), (0, 0)))
    w0 = jnp.concatenate([wh0, wo0p], axis=1).astype(jnp.bfloat16)          # (38, 128)
    # Hidden layers 1, 2: block-diagonal, stacked.
    w12 = jnp.stack([_block_diag(wh1, wo1),
                     _block_diag(wh2, wo2)]).astype(jnp.bfloat16)           # (2, 128, 128)
    # Final layer: block-diagonal (128, 2).
    w3 = _block_diag(wh3, wo3).astype(jnp.bfloat16)                         # (128, 2)

    def lane_cat(a, b):
        return jnp.concatenate([a, b], axis=1)

    # One fused vector buffer: rows = [b0, g0, e0, b1, g1, e1, b2, g2, e2].
    vecs = jnp.concatenate([
        lane_cat(bh0, bo0), lane_cat(gh0, go0), lane_cat(eh0, eo0),
        lane_cat(bh1, bo1), lane_cat(gh1, go1), lane_cat(eh1, eo1),
        lane_cat(bh2, bo2), lane_cat(gh2, go2), lane_cat(eh2, eo2),
    ], axis=0).astype(jnp.float32)                                          # (9, 128)
    b3 = lane_cat(bh3, bo3).astype(jnp.float32)                             # (1, 2)
    return w0, w12, w3, vecs, b3


# ---------------------- deterministic parameter init -----------------------
def make_branch(key, dims_list):
    layers = []
    n_lin = len(dims_list) - 1
    for layer in range(n_lin):
        key, k1, k2 = jax.random.split(key, 3)
        fan_in, fan_out = dims_list[layer], dims_list[layer + 1]
        w = jax.random.normal(k1, (fan_in, fan_out), jnp.float32) / jnp.sqrt(
            jnp.float32(fan_in))
        b = jax.random.normal(k2, (1, fan_out), jnp.float32) * 0.01
        if layer < n_lin - 1:
            g = jnp.ones((1, fan_out), jnp.float32)    # LayerNorm weight
            e = jnp.zeros((1, fan_out), jnp.float32)   # LayerNorm bias
            layers.append((w, b, g, e))
        else:
            layers.append((w, b))
    return key, layers


# ------------------------------ reference ----------------------------------
def reference(x, hand_layers, obj_layers):
    """Pure-f32, unfused two-branch implementation (module semantics)."""
    def branch(h, layers):
        for (w, b, g, e) in layers[:-1]:
            h = h @ w + b
            mu = h.mean(-1, keepdims=True)
            var = ((h - mu) ** 2).mean(-1, keepdims=True)
            h = (h - mu) / jnp.sqrt(var + EPS) * g + e
            h = jnp.maximum(h, 0.0)
        w, b = layers[-1]
        return jnp.tanh(h @ w + b)

    xh = branch(x, hand_layers)
    xo = branch(x[:, :D_OBJ_IN], obj_layers)
    return xh, xo


# --------------------------------- main -------------------------------------
if __name__ == "__main__":
    key = jax.random.PRNGKey(0)
    key, hand_layers = make_branch(key, DIMS_HAND)
    key, obj_layers = make_branch(key, DIMS_OBJ)
    packed = pack_params(hand_layers, obj_layers)

    key, kx = jax.random.split(key)
    N = 2048                      # 4 grid steps at tile_n=512 (>=2 TCs on v7x)
    x = jax.random.normal(kx, (N, D_HAND_IN), jnp.float32)

    oh, oo, dummy = separate_decoder(x, packed, tile_n=512)
    jax.block_until_ready((oh, oo, dummy))

    ref_h, ref_o = reference(x, hand_layers, obj_layers)
    assert oh.shape == (N, 1) and oo.shape == (N, 1) and dummy.shape == (1,)
    # bf16 matmul operands (f32 accumulation) -> relaxed tolerance vs f32 ref.
    err_h = float(jnp.max(jnp.abs(oh - ref_h)))
    err_o = float(jnp.max(jnp.abs(oo - ref_o)))
    assert err_h < 1e-1 and err_o < 1e-1, (err_h, err_o)

    print("KERNEL_OK")
</pallas_src>

<mosaic_0001>
module attributes {stable_mosaic.version = 11 : i64} {
  func.func @decoder_kernel(%arg0: i32, %arg1: memref<512x38xf32, #tpu.memory_space<vmem>>, %arg2: memref<38x128xbf16, #tpu.memory_space<vmem>>, %arg3: memref<2x128x128xbf16, #tpu.memory_space<vmem>>, %arg4: memref<128x2xbf16, #tpu.memory_space<vmem>>, %arg5: memref<9x128xf32, #tpu.memory_space<vmem>>, %arg6: memref<1x2xf32, #tpu.memory_space<vmem>>, %arg7: memref<512x2xf32, #tpu.memory_space<vmem>>) attributes {dimension_semantics = [#tpu.dimension_semantics<parallel>], iteration_bounds = array<i64: 4>, scalar_prefetch = 0 : i64, scratch_operands = 0 : i64, tpu.core_type = #tpu.core_type<tc>, window_params = [{transform_indices = @transform_0, window_bounds = array<i64: 512, 38>}, {pipeline_mode = #tpu.pipeline_mode<synchronous>, transform_indices = @transform_1, window_bounds = array<i64: 38, 128>}, {pipeline_mode = #tpu.pipeline_mode<synchronous>, transform_indices = @transform_2, window_bounds = array<i64: 2, 128, 128>}, {pipeline_mode = #tpu.pipeline_mode<synchronous>, transform_indices = @transform_3, window_bounds = array<i64: 128, 2>}, {pipeline_mode = #tpu.pipeline_mode<synchronous>, transform_indices = @transform_4, window_bounds = array<i64: 9, 128>}, {pipeline_mode = #tpu.pipeline_mode<synchronous>, transform_indices = @transform_5, window_bounds = array<i64: 1, 2>}, {transform_indices = @transform_6, window_bounds = array<i64: 512, 2>}]} {
    %0 = tpu.iota {dimensions = array<i32: 1>} : vector<1x128xi32>
    %c64_i32 = arith.constant 64 : i32
    %1 = vector.broadcast %c64_i32 : i32 to vector<1x128xi32>
    %2 = arith.cmpi slt, %0, %1 : vector<1x128xi32>
    %c0 = arith.constant 0 : index
    %c0_0 = arith.constant 0 : index
    %3 = vector.load %arg1[%c0, %c0_0] : memref<512x38xf32, #tpu.memory_space<vmem>>, vector<512x38xf32>
    %4 = arith.truncf %3 : vector<512x38xf32> to vector<512x38xbf16>
    %c0_1 = arith.constant 0 : index
    %c0_2 = arith.constant 0 : index
    %5 = vector.load %arg2[%c0_1, %c0_2] : memref<38x128xbf16, #tpu.memory_space<vmem>>, vector<38x128xbf16>
    %cst = arith.constant dense<0.000000e+00> : vector<512x128xf32>
    %6 = tpu.matmul %4, %5, %cst {dimension_numbers = #tpu.dot_dimension_numbers<[1], [0], [0], [1], [0, 0, 1, 1], [], []>} : vector<512x38xbf16>, vector<38x128xbf16>, vector<512x128xf32> -> vector<512x128xf32>
    %c0_3 = arith.constant 0 : index
    %c0_4 = arith.constant 0 : index
    %7 = vector.load %arg5[%c0_3, %c0_4] : memref<9x128xf32, #tpu.memory_space<vmem>>, vector<1x128xf32>
    %8 = vector.broadcast %7 : vector<1x128xf32> to vector<512x128xf32>
    %9 = arith.addf %6, %8 : vector<512x128xf32>
    %c1 = arith.constant 1 : index
    %c0_5 = arith.constant 0 : index
    %10 = vector.load %arg5[%c1, %c0_5] : memref<9x128xf32, #tpu.memory_space<vmem>>, vector<1x128xf32>
    %c2 = arith.constant 2 : index
    %c0_6 = arith.constant 0 : index
    %11 = vector.load %arg5[%c2, %c0_6] : memref<9x128xf32, #tpu.memory_space<vmem>>, vector<1x128xf32>
    %cst_7 = arith.constant 0.000000e+00 : f32
    %12 = vector.shape_cast %2 : vector<1x128xi1> to vector<1x128xi1>
    %13 = vector.broadcast %12 : vector<1x128xi1> to vector<512x128xi1>
    %14 = vector.broadcast %cst_7 : f32 to vector<512x128xf32>
    %15 = arith.select %13, %9, %14 : vector<512x128xi1>, vector<512x128xf32>
    %16 = arith.subf %9, %15 : vector<512x128xf32>
    %cst_8 = arith.constant dense<0.000000e+00> : vector<512xf32>
    %17 = vector.multi_reduction <add>, %15, %cst_8 [1] : vector<512x128xf32> to vector<512xf32>
    %18 = vector.shape_cast %17 : vector<512xf32> to vector<512x1xf32>
    %cst_9 = arith.constant dense<0.000000e+00> : vector<512xf32>
    %19 = vector.multi_reduction <add>, %16, %cst_9 [1] : vector<512x128xf32> to vector<512xf32>
    %20 = vector.shape_cast %19 : vector<512xf32> to vector<512x1xf32>
    %21 = arith.mulf %15, %15 : vector<512x128xf32>
    %cst_10 = arith.constant dense<0.000000e+00> : vector<512xf32>
    %22 = vector.multi_reduction <add>, %21, %cst_10 [1] : vector<512x128xf32> to vector<512xf32>
    %23 = vector.shape_cast %22 : vector<512xf32> to vector<512x1xf32>
    %24 = arith.mulf %16, %16 : vector<512x128xf32>
    %cst_11 = arith.constant dense<0.000000e+00> : vector<512xf32>
    %25 = vector.multi_reduction <add>, %24, %cst_11 [1] : vector<512x128xf32> to vector<512xf32>
    %26 = vector.shape_cast %25 : vector<512xf32> to vector<512x1xf32>
    %27 = vector.shape_cast %2 : vector<1x128xi1> to vector<1x128xi1>
    %28 = vector.broadcast %27 : vector<1x128xi1> to vector<512x128xi1>
    %29 = vector.shape_cast %18 : vector<512x1xf32> to vector<512x1xf32>
    %30 = vector.broadcast %29 : vector<512x1xf32> to vector<512x128xf32>
    %31 = vector.shape_cast %20 : vector<512x1xf32> to vector<512x1xf32>
    %32 = vector.broadcast %31 : vector<512x1xf32> to vector<512x128xf32>
    %33 = arith.select %28, %30, %32 : vector<512x128xi1>, vector<512x128xf32>
    %cst_12 = arith.constant 1.562500e-02 : f32
    %34 = vector.broadcast %cst_12 : f32 to vector<512x128xf32>
    %35 = arith.mulf %33, %34 : vector<512x128xf32>
    %36 = vector.shape_cast %2 : vector<1x128xi1> to vector<1x128xi1>
    %37 = vector.broadcast %36 : vector<1x128xi1> to vector<512x128xi1>
    %38 = vector.shape_cast %23 : vector<512x1xf32> to vector<512x1xf32>
    %39 = vector.broadcast %38 : vector<512x1xf32> to vector<512x128xf32>
    %40 = vector.shape_cast %26 : vector<512x1xf32> to vector<512x1xf32>
    %41 = vector.broadcast %40 : vector<512x1xf32> to vector<512x128xf32>
    %42 = arith.select %37, %39, %41 : vector<512x128xi1>, vector<512x128xf32>
    %cst_13 = arith.constant 1.562500e-02 : f32
    %43 = vector.broadcast %cst_13 : f32 to vector<512x128xf32>
    %44 = arith.mulf %42, %43 : vector<512x128xf32>
    %45 = arith.mulf %35, %35 : vector<512x128xf32>
    %46 = arith.subf %44, %45 : vector<512x128xf32>
    %47 = arith.subf %9, %35 : vector<512x128xf32>
    %cst_14 = arith.constant 9.99999974E-6 : f32
    %48 = vector.broadcast %cst_14 : f32 to vector<512x128xf32>
    %49 = arith.addf %46, %48 : vector<512x128xf32>
    %50 = math.rsqrt %49 : vector<512x128xf32>
    %51 = arith.mulf %47, %50 : vector<512x128xf32>
    %52 = vector.broadcast %10 : vector<1x128xf32> to vector<512x128xf32>
    %53 = arith.mulf %51, %52 : vector<512x128xf32>
    %54 = vector.broadcast %11 : vector<1x128xf32> to vector<512x128xf32>
    %55 = arith.addf %53, %54 : vector<512x128xf32>
    %cst_15 = arith.constant 0.000000e+00 : f32
    %56 = vector.broadcast %cst_15 : f32 to vector<512x128xf32>
    %57 = arith.maximumf %55, %56 : vector<512x128xf32>
    %58 = arith.truncf %57 : vector<512x128xf32> to vector<512x128xbf16>
    %c0_16 = arith.constant 0 : index
    %c0_17 = arith.constant 0 : index
    %c0_18 = arith.constant 0 : index
    %59 = vector.load %arg3[%c0_16, %c0_17, %c0_18] : memref<2x128x128xbf16, #tpu.memory_space<vmem>>, vector<1x128x128xbf16>
    %60 = vector.shape_cast %59 : vector<1x128x128xbf16> to vector<128x128xbf16>
    %cst_19 = arith.constant dense<0.000000e+00> : vector<512x128xf32>
    %61 = tpu.matmul %58, %60, %cst_19 {dimension_numbers = #tpu.dot_dimension_numbers<[1], [0], [0], [1], [0, 0, 1, 1], [], []>} : vector<512x128xbf16>, vector<128x128xbf16>, vector<512x128xf32> -> vector<512x128xf32>
    %c3 = arith.constant 3 : index
    %c0_20 = arith.constant 0 : index
    %62 = vector.load %arg5[%c3, %c0_20] : memref<9x128xf32, #tpu.memory_space<vmem>>, vector<1x128xf32>
    %63 = vector.broadcast %62 : vector<1x128xf32> to vector<512x128xf32>
    %64 = arith.addf %61, %63 : vector<512x128xf32>
    %c4 = arith.constant 4 : index
    %c0_21 = arith.constant 0 : index
    %65 = vector.load %arg5[%c4, %c0_21] : memref<9x128xf32, #tpu.memory_space<vmem>>, vector<1x128xf32>
    %c5 = arith.constant 5 : index
    %c0_22 = arith.constant 0 : index
    %66 = vector.load %arg5[%c5, %c0_22] : memref<9x128xf32, #tpu.memory_space<vmem>>, vector<1x128xf32>
    %cst_23 = arith.constant 0.000000e+00 : f32
    %67 = vector.shape_cast %2 : vector<1x128xi1> to vector<1x128xi1>
    %68 = vector.broadcast %67 : vector<1x128xi1> to vector<512x128xi1>
    %69 = vector.broadcast %cst_23 : f32 to vector<512x128xf32>
    %70 = arith.select %68, %64, %69 : vector<512x128xi1>, vector<512x128xf32>
    %71 = arith.subf %64, %70 : vector<512x128xf32>
    %cst_24 = arith.constant dense<0.000000e+00> : vector<512xf32>
    %72 = vector.multi_reduction <add>, %70, %cst_24 [1] : vector<512x128xf32> to vector<512xf32>
    %73 = vector.shape_cast %72 : vector<512xf32> to vector<512x1xf32>
    %cst_25 = arith.constant dense<0.000000e+00> : vector<512xf32>
    %74 = vector.multi_reduction <add>, %71, %cst_25 [1] : vector<512x128xf32> to vector<512xf32>
    %75 = vector.shape_cast %74 : vector<512xf32> to vector<512x1xf32>
    %76 = arith.mulf %70, %70 : vector<512x128xf32>
    %cst_26 = arith.constant dense<0.000000e+00> : vector<512xf32>
    %77 = vector.multi_reduction <add>, %76, %cst_26 [1] : vector<512x128xf32> to vector<512xf32>
    %78 = vector.shape_cast %77 : vector<512xf32> to vector<512x1xf32>
    %79 = arith.mulf %71, %71 : vector<512x128xf32>
    %cst_27 = arith.constant dense<0.000000e+00> : vector<512xf32>
    %80 = vector.multi_reduction <add>, %79, %cst_27 [1] : vector<512x128xf32> to vector<512xf32>
    %81 = vector.shape_cast %80 : vector<512xf32> to vector<512x1xf32>
    %82 = vector.shape_cast %2 : vector<1x128xi1> to vector<1x128xi1>
    %83 = vector.broadcast %82 : vector<1x128xi1> to vector<512x128xi1>
    %84 = vector.shape_cast %73 : vector<512x1xf32> to vector<512x1xf32>
    %85 = vector.broadcast %84 : vector<512x1xf32> to vector<512x128xf32>
    %86 = vector.shape_cast %75 : vector<512x1xf32> to vector<512x1xf32>
    %87 = vector.broadcast %86 : vector<512x1xf32> to vector<512x128xf32>
    %88 = arith.select %83, %85, %87 : vector<512x128xi1>, vector<512x128xf32>
    %cst_28 = arith.constant 1.562500e-02 : f32
    %89 = vector.broadcast %cst_28 : f32 to vector<512x128xf32>
    %90 = arith.mulf %88, %89 : vector<512x128xf32>
    %91 = vector.shape_cast %2 : vector<1x128xi1> to vector<1x128xi1>
    %92 = vector.broadcast %91 : vector<1x128xi1> to vector<512x128xi1>
    %93 = vector.shape_cast %78 : vector<512x1xf32> to vector<512x1xf32>
    %94 = vector.broadcast %93 : vector<512x1xf32> to vector<512x128xf32>
    %95 = vector.shape_cast %81 : vector<512x1xf32> to vector<512x1xf32>
    %96 = vector.broadcast %95 : vector<512x1xf32> to vector<512x128xf32>
    %97 = arith.select %92, %94, %96 : vector<512x128xi1>, vector<512x128xf32>
    %cst_29 = arith.constant 1.562500e-02 : f32
    %98 = vector.broadcast %cst_29 : f32 to vector<512x128xf32>
    %99 = arith.mulf %97, %98 : vector<512x128xf32>
    %100 = arith.mulf %90, %90 : vector<512x128xf32>
    %101 = arith.subf %99, %100 : vector<512x128xf32>
    %102 = arith.subf %64, %90 : vector<512x128xf32>
    %cst_30 = arith.constant 9.99999974E-6 : f32
    %103 = vector.broadcast %cst_30 : f32 to vector<512x128xf32>
    %104 = arith.addf %101, %103 : vector<512x128xf32>
    %105 = math.rsqrt %104 : vector<512x128xf32>
    %106 = arith.mulf %102, %105 : vector<512x128xf32>
    %107 = vector.broadcast %65 : vector<1x128xf32> to vector<512x128xf32>
    %108 = arith.mulf %106, %107 : vector<512x128xf32>
    %109 = vector.broadcast %66 : vector<1x128xf32> to vector<512x128xf32>
    %110 = arith.addf %108, %109 : vector<512x128xf32>
    %cst_31 = arith.constant 0.000000e+00 : f32
    %111 = vector.broadcast %cst_31 : f32 to vector<512x128xf32>
    %112 = arith.maximumf %110, %111 : vector<512x128xf32>
    %113 = arith.truncf %112 : vector<512x128xf32> to vector<512x128xbf16>
    %c1_32 = arith.constant 1 : index
    %c0_33 = arith.constant 0 : index
    %c0_34 = arith.constant 0 : index
    %114 = vector.load %arg3[%c1_32, %c0_33, %c0_34] : memref<2x128x128xbf16, #tpu.memory_space<vmem>>, vector<1x128x128xbf16>
    %115 = vector.shape_cast %114 : vector<1x128x128xbf16> to vector<128x128xbf16>
    %cst_35 = arith.constant dense<0.000000e+00> : vector<512x128xf32>
    %116 = tpu.matmul %113, %115, %cst_35 {dimension_numbers = #tpu.dot_dimension_numbers<[1], [0], [0], [1], [0, 0, 1, 1], [], []>} : vector<512x128xbf16>, vector<128x128xbf16>, vector<512x128xf32> -> vector<512x128xf32>
    %c6 = arith.constant 6 : index
    %c0_36 = arith.constant 0 : index
    %117 = vector.load %arg5[%c6, %c0_36] : memref<9x128xf32, #tpu.memory_space<vmem>>, vector<1x128xf32>
    %118 = vector.broadcast %117 : vector<1x128xf32> to vector<512x128xf32>
    %119 = arith.addf %116, %118 : vector<512x128xf32>
    %c7 = arith.constant 7 : index
    %c0_37 = arith.constant 0 : index
    %120 = vector.load %arg5[%c7, %c0_37] : memref<9x128xf32, #tpu.memory_space<vmem>>, vector<1x128xf32>
    %c8 = arith.constant 8 : index
    %c0_38 = arith.constant 0 : index
    %121 = vector.load %arg5[%c8, %c0_38] : memref<9x128xf32, #tpu.memory_space<vmem>>, vector<1x128xf32>
    %cst_39 = arith.constant 0.000000e+00 : f32
    %122 = vector.shape_cast %2 : vector<1x128xi1> to vector<1x128xi1>
    %123 = vector.broadcast %122 : vector<1x128xi1> to vector<512x128xi1>
    %124 = vector.broadcast %cst_39 : f32 to vector<512x128xf32>
    %125 = arith.select %123, %119, %124 : vector<512x128xi1>, vector<512x128xf32>
    %126 = arith.subf %119, %125 : vector<512x128xf32>
    %cst_40 = arith.constant dense<0.000000e+00> : vector<512xf32>
    %127 = vector.multi_reduction <add>, %125, %cst_40 [1] : vector<512x128xf32> to vector<512xf32>
    %128 = vector.shape_cast %127 : vector<512xf32> to vector<512x1xf32>
    %cst_41 = arith.constant dense<0.000000e+00> : vector<512xf32>
    %129 = vector.multi_reduction <add>, %126, %cst_41 [1] : vector<512x128xf32> to vector<512xf32>
    %130 = vector.shape_cast %129 : vector<512xf32> to vector<512x1xf32>
    %131 = arith.mulf %125, %125 : vector<512x128xf32>
    %cst_42 = arith.constant dense<0.000000e+00> : vector<512xf32>
    %132 = vector.multi_reduction <add>, %131, %cst_42 [1] : vector<512x128xf32> to vector<512xf32>
    %133 = vector.shape_cast %132 : vector<512xf32> to vector<512x1xf32>
    %134 = arith.mulf %126, %126 : vector<512x128xf32>
    %cst_43 = arith.constant dense<0.000000e+00> : vector<512xf32>
    %135 = vector.multi_reduction <add>, %134, %cst_43 [1] : vector<512x128xf32> to vector<512xf32>
    %136 = vector.shape_cast %135 : vector<512xf32> to vector<512x1xf32>
    %137 = vector.shape_cast %2 : vector<1x128xi1> to vector<1x128xi1>
    %138 = vector.broadcast %137 : vector<1x128xi1> to vector<512x128xi1>
    %139 = vector.shape_cast %128 : vector<512x1xf32> to vector<512x1xf32>
    %140 = vector.broadcast %139 : vector<512x1xf32> to vector<512x128xf32>
    %141 = vector.shape_cast %130 : vector<512x1xf32> to vector<512x1xf32>
    %142 = vector.broadcast %141 : vector<512x1xf32> to vector<512x128xf32>
    %143 = arith.select %138, %140, %142 : vector<512x128xi1>, vector<512x128xf32>
    %cst_44 = arith.constant 1.562500e-02 : f32
    %144 = vector.broadcast %cst_44 : f32 to vector<512x128xf32>
    %145 = arith.mulf %143, %144 : vector<512x128xf32>
    %146 = vector.shape_cast %2 : vector<1x128xi1> to vector<1x128xi1>
    %147 = vector.broadcast %146 : vector<1x128xi1> to vector<512x128xi1>
    %148 = vector.shape_cast %133 : vector<512x1xf32> to vector<512x1xf32>
    %149 = vector.broadcast %148 : vector<512x1xf32> to vector<512x128xf32>
    %150 = vector.shape_cast %136 : vector<512x1xf32> to vector<512x1xf32>
    %151 = vector.broadcast %150 : vector<512x1xf32> to vector<512x128xf32>
    %152 = arith.select %147, %149, %151 : vector<512x128xi1>, vector<512x128xf32>
    %cst_45 = arith.constant 1.562500e-02 : f32
    %153 = vector.broadcast %cst_45 : f32 to vector<512x128xf32>
    %154 = arith.mulf %152, %153 : vector<512x128xf32>
    %155 = arith.mulf %145, %145 : vector<512x128xf32>
    %156 = arith.subf %154, %155 : vector<512x128xf32>
    %157 = arith.subf %119, %145 : vector<512x128xf32>
    %cst_46 = arith.constant 9.99999974E-6 : f32
    %158 = vector.broadcast %cst_46 : f32 to vector<512x128xf32>
    %159 = arith.addf %156, %158 : vector<512x128xf32>
    %160 = math.rsqrt %159 : vector<512x128xf32>
    %161 = arith.mulf %157, %160 : vector<512x128xf32>
    %162 = vector.broadcast %120 : vector<1x128xf32> to vector<512x128xf32>
    %163 = arith.mulf %161, %162 : vector<512x128xf32>
    %164 = vector.broadcast %121 : vector<1x128xf32> to vector<512x128xf32>
    %165 = arith.addf %163, %164 : vector<512x128xf32>
    %cst_47 = arith.constant 0.000000e+00 : f32
    %166 = vector.broadcast %cst_47 : f32 to vector<512x128xf32>
    %167 = arith.maximumf %165, %166 : vector<512x128xf32>
    %168 = arith.truncf %167 : vector<512x128xf32> to vector<512x128xbf16>
    %c0_48 = arith.constant 0 : index
    %c0_49 = arith.constant 0 : index
    %169 = vector.load %arg4[%c0_48, %c0_49] : memref<128x2xbf16, #tpu.memory_space<vmem>>, vector<128x2xbf16>
    %cst_50 = arith.constant dense<0.000000e+00> : vector<512x2xf32>
    %170 = tpu.matmul %168, %169, %cst_50 {dimension_numbers = #tpu.dot_dimension_numbers<[1], [0], [0], [1], [0, 0, 1, 1], [], []>} : vector<512x128xbf16>, vector<128x2xbf16>, vector<512x2xf32> -> vector<512x2xf32>
    %c0_51 = arith.constant 0 : index
    %c0_52 = arith.constant 0 : index
    %171 = vector.load %arg6[%c0_51, %c0_52] : memref<1x2xf32, #tpu.memory_space<vmem>>, vector<1x2xf32>
    %172 = vector.broadcast %171 : vector<1x2xf32> to vector<512x2xf32>
    %173 = arith.addf %170, %172 : vector<512x2xf32>
    %174 = math.tanh %173 : vector<512x2xf32>
    %c0_53 = arith.constant 0 : index
    %c0_54 = arith.constant 0 : index
    %175 = vector.load %arg7[%c0_53, %c0_54] : memref<512x2xf32, #tpu.memory_space<vmem>>, vector<512x2xf32>
    tpu.vector_store %arg7[%c0_53, %c0_54], %174 {strides = array<i32>} : memref<512x2xf32, #tpu.memory_space<vmem>>, vector<512x2xf32>,
    return
  }
  func.func @transform_0(%arg0: i32) -> (i32, i32) {
    %c0_i32 = arith.constant 0 : i32
    %c0_i32_0 = arith.constant 0 : i32
    return %arg0, %c0_i32 : i32, i32
  }
  func.func @transform_1(%arg0: i32) -> (i32, i32) {
    %c0_i32 = arith.constant 0 : i32
    %c0_i32_0 = arith.constant 0 : i32
    %c0_i32_1 = arith.constant 0 : i32
    return %c0_i32, %c0_i32_0 : i32, i32
  }
  func.func @transform_2(%arg0: i32) -> (i32, i32, i32) {
    %c0_i32 = arith.constant 0 : i32
    %c0_i32_0 = arith.constant 0 : i32
    %c0_i32_1 = arith.constant 0 : i32
    %c0_i32_2 = arith.constant 0 : i32
    return %c0_i32, %c0_i32_0, %c0_i32_1 : i32, i32, i32
  }
  func.func @transform_3(%arg0: i32) -> (i32, i32) {
    %c0_i32 = arith.constant 0 : i32
    %c0_i32_0 = arith.constant 0 : i32
    %c0_i32_1 = arith.constant 0 : i32
    return %c0_i32, %c0_i32_0 : i32, i32
  }
  func.func @transform_4(%arg0: i32) -> (i32, i32) {
    %c0_i32 = arith.constant 0 : i32
    %c0_i32_0 = arith.constant 0 : i32
    %c0_i32_1 = arith.constant 0 : i32
    return %c0_i32, %c0_i32_0 : i32, i32
  }
  func.func @transform_5(%arg0: i32) -> (i32, i32) {
    %c0_i32 = arith.constant 0 : i32
    %c0_i32_0 = arith.constant 0 : i32
    %c0_i32_1 = arith.constant 0 : i32
    return %c0_i32, %c0_i32_0 : i32, i32
  }
  func.func @transform_6(%arg0: i32) -> (i32, i32) {
    %c0_i32 = arith.constant 0 : i32
    %c0_i32_0 = arith.constant 0 : i32
    return %arg0, %c0_i32 : i32, i32
  }
}

</mosaic_0001>

<bundles_post_ra>
// kernel: tpu_custom_call.1
= control target key start
LH: loop header
LB: loop body
LE: loop exit
PB: predicated region body
PF: predicated region fallthrough
CT: control target
= control target key end

     0   :  { %s8142_s21 = smov 0   ;;  %s15408_s0 = inlined_call_operand.vmem [shape: f32[2048,38], index: 0, kind: input, shape index: {}]   ;;  %s15409_s1 = inlined_call_operand.vmem [shape: bf16[38,128], index: 1, kind: input, shape index: {}]   ;;  %s15410_s2 = inlined_call_operand.vmem [shape: bf16[2,128,128], index: 2, kind: input, shape index: {}]   ;;  %s15411_s3 = inlined_call_operand.vmem [shape: bf16[128,2], index: 3, kind: input, shape index: {}]   ;;  %s15412_s4 = inlined_call_operand.vmem [shape: f32[9,128], index: 4, kind: input, shape index: {}]   ;;  %s15413_s5 = inlined_call_operand.vmem [shape: f32[1,2], index: 5, kind: input, shape index: {}]   ;;  %s15414_s6 = inlined_call_operand.vmem [shape: f32[2048,2], index: 6, kind: output, shape index: {}]  }
   0x1 LB: > { %s6960_s22 = sadd.s32 4294967295, %s8105_s21   ;;  %p6964_p0 = scmp.ge.s32.totalorder %s8105_s21, 1  ;;  %s8105_s21 = sphi %s8142_s21, %s16_s21  }
   0x2   : > { %p213_p1 = scmp.lt.s32.totalorder %s8105_s21, 5 }
   0x4   : > { %p214_p2 = pnand %p6964_p0, %p213_p1 }
   0x6   : > { %217 = sbr.rel (%p214_p2) target bundleno = 2645 (0xa55), region = 44 }
   0xd   : > { %v7546_v0 = vld [vmem:[%s15409_s1] sm:$0xff]   ;;  %v7547_v1 = vld [vmem:[%s15409_s1 + $0x8] sm:$0xff]   ;;  %s6965_s27 = sshll.u32 %s6960_s22, 6  ;;  %v7548_v2 = vld [vmem:[%s15409_s1 + $0x10] ss:$0 sps:$4 sm:$0x77]  }
   0xe   : > { %7211 = vmatprep.subr.bf16.mxu0 %v7546_v0  ;;  %p244_p3 = scmp.lt.s32.totalorder %s6965_s27, 255  ;;  %vm477_vm0 = vcmask 1042432   ;;  %vm380_vm1 = vcmask 310272   ;;  %vm6839_vm3 = vcmask 15360  }
   0xf   : > { %7212 = vmatpush3.bf16.msra.mxu0 %v7546_v0  ;;  %v479_v3 = vsel %vm477_vm0, %v7548_v2, 0 }
  0x10   : > { %7213 = vmatprep.subr.bf16.mxu0 %v7547_v1  ;;  %s17065_s27 = smov (!%p244_p3, %s6965_s27), 255 }
  0x11   : > { %s6966_s30 = sshll.u32 %s17065_s27, 3 }
  0x12   : > { %s8167_s9 = scalar_lea.vmem %s15408_s0, %s6966_s30  ;;  %s14855_s18 = scalar_lea.vmem %s15414_s6, %s6966_s30 }
  0x13   : > { %7214 = vmatpush3.bf16.msra.mxu0 %v7547_v1  ;;  %v259_v4 = vld [vmem:[%s8167_s9] sm:$0xff]  ;;  %v260_v5 = vld [vmem:[%s8167_s9 + $0x8] sm:$0xff]  ;;  %v261_v6 = vld [vmem:[%s8167_s9 + $0x10] sm:$0xff] }
  0x14   : > { %7537 = vmatprep.subr.msk.bf16.mxu0 %vm477_vm0, %v7548_v2  ;;  %v323_v7 = vpack.c.bf16 %v260_v5, %v259_v4  ;;  %v262_v8 = vld [vmem:[%s8167_s9 + $0x18] sm:$0xff]  ;;  %v263_v9 = vld [vmem:[%s8167_s9 + $0x20] sm:$0xff]  ;;  %v264_v10 = vld [vmem:[%s8167_s9 + $0x28] sm:$0xff] }
  0x15   : > { %v324_v11 = vpack.c.bf16 %v262_v8, %v261_v6  ;;  %v325_v12 = vpack.c.bf16 %v264_v10, %v263_v9  ;;  %v265_v13 = vld [vmem:[%s8167_s9 + $0x30] sm:$0xff]  ;;  %v266_v14 = vld [vmem:[%s8167_s9 + $0x38] sm:$0xff]  ;;  %v267_v15 = vld [vmem:[%s8167_s9 + $0x40] sm:$0xff] }
  0x16   : > { %7217 = vmatprep.mubr.msk.bf16.mxu0 %vm380_vm1, %v323_v7  ;;  %v268_v16 = vld [vmem:[%s8167_s9 + $0x48] sm:$0xff]  ;;  %v326_v17 = vpack.c.bf16 %v266_v14, %v265_v13  ;;  %v269_v19 = vld [vmem:[%s8167_s9 + $0x50] sm:$0xff]  ;;  %v270_v20 = vld [vmem:[%s8167_s9 + $0x58] sm:$0xff] }
  0x17   : > { %7216 = vmatpush3.bf16.msra.mxu0 %v479_v3  ;;  %v327_v18 = vpack.c.bf16 %v268_v16, %v267_v15  ;;  %v271_v21 = vld [vmem:[%s8167_s9 + $0x60] sm:$0xff]  ;;  %v272_v22 = vld [vmem:[%s8167_s9 + $0x68] sm:$0xff]  ;;  %v328_v23 = vpack.c.bf16 %v270_v20, %v269_v19  ;;  %v273_v25 = vld [vmem:[%s8167_s9 + $0x70] sm:$0xff] }
  0x18   : > { %v329_v24 = vpack.c.bf16 %v272_v22, %v271_v21  ;;  %v274_v26 = vld [vmem:[%s8167_s9 + $0x78] sm:$0xff]  ;;  %v275_v27 = vld [vmem:[%s8167_s9 + $0x80] sm:$0xff]  ;;  %v276_v28 = vld [vmem:[%s8167_s9 + $0x88] sm:$0xff] }
  0x19   : > { %v330_v29 = vpack.c.bf16 %v274_v26, %v273_v25  ;;  %v331_v30 = vpack.c.bf16 %v276_v28, %v275_v27  ;;  %v277_v31 = vld [vmem:[%s8167_s9 + $0x90] sm:$0xff]  ;;  %v278_v32 = vld [vmem:[%s8167_s9 + $0x98] sm:$0xff]  ;;  %v279_v33 = vld [vmem:[%s8167_s9 + $0xa0] sm:$0xff] }
  0x1a   : > { %7218 = vmatmul.mubr.msk.bf16.vlgmr.msra.gmra.mrb[0].mxu0 %vm380_vm1, %v324_v11  ;;  %v280_v34 = vld [vmem:[%s8167_s9 + $0xa8] sm:$0xff]  ;;  %v332_v35 = vpack.c.bf16 %v278_v32, %v277_v31  ;;  %v281_v37 = vld [vmem:[%s8167_s9 + $0xb0] sm:$0xff]  ;;  %v282_v38 = vld [vmem:[%s8167_s9 + $0xb8] sm:$0xff] }
  0x1b   : > { %7221 = vmatprep.mubr.msk.bf16.mxu0 %vm380_vm1, %v325_v12  ;;  %v333_v36 = vpack.c.bf16 %v280_v34, %v279_v33  ;;  %v283_v39 = vld [vmem:[%s8167_s9 + $0xc0] sm:$0xff]  ;;  %v284_v40 = vld [vmem:[%s8167_s9 + $0xc8] sm:$0xff]  ;;  %v334_v41 = vpack.c.bf16 %v282_v38, %v281_v37  ;;  %v285_v43 = vld [vmem:[%s8167_s9 + $0xd0] sm:$0xff] }
  0x1c   : > { %v335_v42 = vpack.c.bf16 %v284_v40, %v283_v39  ;;  %v286_v44 = vld [vmem:[%s8167_s9 + $0xd8] sm:$0xff]  ;;  %v287_v45 = vld [vmem:[%s8167_s9 + $0xe0] sm:$0xff]  ;;  %v288_v46 = vld [vmem:[%s8167_s9 + $0xe8] sm:$0xff] }
  0x1d   : > { %v336_v47 = vpack.c.bf16 %v286_v44, %v285_v43  ;;  %v337_v48 = vpack.c.bf16 %v288_v46, %v287_v45  ;;  %v289_v49 = vld [vmem:[%s8167_s9 + $0xf0] sm:$0xff]  ;;  %v290_v50 = vld [vmem:[%s8167_s9 + $0xf8] sm:$0xff]  ;;  %v291_v51 = vld [vmem:[%s8167_s9 + $0x100] sm:$0xff] }
  0x1e   : > { %v292_v52 = vld [vmem:[%s8167_s9 + $0x108] sm:$0xff]  ;;  %v338_v53 = vpack.c.bf16 %v290_v50, %v289_v49  ;;  %v293_v55 = vld [vmem:[%s8167_s9 + $0x110] sm:$0xff]  ;;  %v294_v56 = vld [vmem:[%s8167_s9 + $0x118] sm:$0xff] }
  0x1f   : > { %v339_v54 = vpack.c.bf16 %v292_v52, %v291_v51  ;;  %v295_v57 = vld [vmem:[%s8167_s9 + $0x120] sm:$0xff]  ;;  %v296_v58 = vld [vmem:[%s8167_s9 + $0x128] sm:$0xff]  ;;  %v340_v59 = vpack.c.bf16 %v294_v56, %v293_v55  ;;  %v297_v61 = vld [vmem:[%s8167_s9 + $0x130] sm:$0xff] }
  0x20   : > { %v341_v60 = vpack.c.bf16 %v296_v58, %v295_v57  ;;  %v298_v62 = vld [vmem:[%s8167_s9 + $0x138] sm:$0xff]  ;;  %v299_v0 = vld [vmem:[%s8167_s9 + $0x140] sm:$0xff]  ;;  %v300_v1 = vld [vmem:[%s8167_s9 + $0x148] sm:$0xff] }
  0x21   : > { %v342_v63 = vpack.c.bf16 %v298_v62, %v297_v61  ;;  %v343_v2 = vpack.c.bf16 %v300_v1, %v299_v0  ;;  %v301_v3 = vld [vmem:[%s8167_s9 + $0x150] sm:$0xff]  ;;  %v302_v4 = vld [vmem:[%s8167_s9 + $0x158] sm:$0xff]  ;;  %v303_v6 = vld [vmem:[%s8167_s9 + $0x160] sm:$0xff] }
  0x22   : > { %7222 = vmatmul.mubr.msk.bf16.gmra.mrb[4].mxu0 %vm380_vm1, %v326_v17  ;;  %v344_v5 = vpack.c.bf16 %v302_v4, %v301_v3  ;;  %v304_v7 = vld [vmem:[%s8167_s9 + $0x168] sm:$0xff]  ;;  %v305_v9 = vld [vmem:[%s8167_s9 + $0x170] sm:$0xff]  ;;  %v306_v10 = vld [vmem:[%s8167_s9 + $0x178] sm:$0xff] }
  0x23   : > { %7225 = vmatprep.mubr.msk.bf16.mxu0 %vm380_vm1, %v327_v18  ;;  %v345_v8 = vpack.c.bf16 %v304_v7, %v303_v6  ;;  %v346_v11 = vpack.c.bf16 %v306_v10, %v305_v9  ;;  %v307_v12 = vld [vmem:[%s8167_s9 + $0x180] sm:$0xff]  ;;  %v308_v13 = vld [vmem:[%s8167_s9 + $0x188] sm:$0xff]  ;;  %v309_v15 = vld [vmem:[%s8167_s9 + $0x190] sm:$0xff] }
  0x24   : > { %v347_v14 = vpack.c.bf16 %v308_v13, %v307_v12  ;;  %v310_v16 = vld [vmem:[%s8167_s9 + $0x198] sm:$0xff]  ;;  %v311_v18 = vld [vmem:[%s8167_s9 + $0x1a0] sm:$0xff]  ;;  %v312_v19 = vld [vmem:[%s8167_s9 + $0x1a8] sm:$0xff] }
  0x25   : > { %v348_v17 = vpack.c.bf16 %v310_v16, %v309_v15  ;;  %v349_v20 = vpack.c.bf16 %v312_v19, %v311_v18  ;;  %v313_v21 = vld [vmem:[%s8167_s9 + $0x1b0] sm:$0xff]  ;;  %v314_v22 = vld [vmem:[%s8167_s9 + $0x1b8] sm:$0xff]  ;;  %v316_v25 = vld [vmem:[%s8167_s9 + $0x1c8] sm:$0xff] }
  0x26   : > { %v317_v27 = vld [vmem:[%s8167_s9 + $0x1d0] sm:$0xff]  ;;  %v318_v28 = vld [vmem:[%s8167_s9 + $0x1d8] sm:$0xff]  ;;  %v319_v31 = vld [vmem:[%s8167_s9 + $0x1e0] sm:$0xff] }
  0x27   : > { %v320_v32 = vld [vmem:[%s8167_s9 + $0x1e8] sm:$0xff]  ;;  %v321_v34 = vld [vmem:[%s8167_s9 + $0x1f0] sm:$0xff]  ;;  %v8270_v38 = vld [vmem:[%s15412_s4] ss:$0 sm:$0xff] }
  0x28   : > { %v353_v33 = vpack.c.bf16 %v320_v32, %v319_v31 }
  0x2a   : > { %7226 = vmatmul.mubr.msk.bf16.gmra.mrb[8].mxu0 %vm380_vm1, %v328_v23  ;;  %v350_v23 = vpack.c.bf16 %v314_v22, %v313_v21 }
  0x2b   : > { %7229 = vmatprep.mubr.msk.bf16.mxu0 %vm380_vm1, %v329_v24  ;;  %v315_v24 = vld [vmem:[%s8167_s9 + $0x1c0] sm:$0xff] }
  0x2c   : > { %v351_v26 = vpack.c.bf16 %v316_v25, %v315_v24 }
  0x32   : > { %7230 = vmatmul.mubr.msk.bf16.gmra.mrb[12].mxu0 %vm380_vm1, %v330_v29  ;;  %v352_v29 = vpack.c.bf16 %v318_v28, %v317_v27 }
  0x33   : > { %7233 = vmatprep.mubr.msk.bf16.mxu0 %vm380_vm1, %v331_v30  ;;  %v256_v30 = vlaneseq }
  0x35   : > { %v8264_v37 = vand.u32 127, %v256_v30 }
  0x37   : > { %vm258_vm2 = vcmp.lt.s32.totalorder %v8264_v37, 64 }
  0x3a   : > { %7234 = vmatmul.mubr.msk.bf16.gmra.mrb[16].mxu0 %vm380_vm1, %v332_v35  ;;  %v322_v35 = vld [vmem:[%s8167_s9 + $0x1f8] sm:$0xff] }
  0x3b   : > { %7237 = vmatprep.mubr.msk.bf16.mxu0 %vm380_vm1, %v333_v36  ;;  %v354_v36 = vpack.c.bf16 %v322_v35, %v321_v34 }
  0x42   : > { %7238 = vmatmul.mubr.msk.bf16.gmra.mrb[20].mxu0 %vm380_vm1, %v334_v41 }
  0x43   : > { %7241 = vmatprep.mubr.msk.bf16.mxu0 %vm380_vm1, %v335_v42 }
  0x4a   : > { %7242 = vmatmul.mubr.msk.bf16.gmra.mrb[24].mxu0 %vm380_vm1, %v336_v47 }
  0x4b   : > { %7245 = vmatprep.mubr.msk.bf16.mxu0 %vm380_vm1, %v337_v48 }
  0x52   : > { %7246 = vmatmul.mubr.msk.bf16.gmra.mrb[28].mxu0 %vm380_vm1, %v338_v53 }
  0x53   : > { %7249 = vmatprep.mubr.msk.bf16.mxu0 %vm380_vm1, %v339_v54 }
  0x5a   : > { %7250 = vmatmul.mubr.msk.bf16.gmra.mrb[32].mxu0 %vm380_vm1, %v340_v59 }
  0x5b   : > { %7253 = vmatprep.mubr.msk.bf16.mxu0 %vm380_vm1, %v341_v60 }
  0x62   : > { %7254 = vmatmul.mubr.msk.bf16.gmra.mrb[36].mxu0 %vm380_vm1, %v342_v63 }
  0x63   : > { %7257 = vmatprep.mubr.msk.bf16.mxu0 %vm380_vm1, %v343_v2 }
  0x6a   : > { %7258 = vmatmul.mubr.msk.bf16.gmra.mrb[40].mxu0 %vm380_vm1, %v344_v5 }
  0x6b   : > { %7261 = vmatprep.mubr.msk.bf16.mxu0 %vm380_vm1, %v345_v8 }
  0x72   : > { %7262 = vmatmul.mubr.msk.bf16.gmra.mrb[44].mxu0 %vm380_vm1, %v346_v11 }
  0x73   : > { %7265 = vmatprep.mubr.msk.bf16.mxu0 %vm380_vm1, %v347_v14 }
  0x7a   : > { %7266 = vmatmul.mubr.msk.bf16.gmra.mrb[48].mxu0 %vm380_vm1, %v348_v17 }
  0x7b   : > { %7269 = vmatprep.mubr.msk.bf16.mxu0 %vm380_vm1, %v349_v20 }
  0x82   : > { %7270 = vmatmul.mubr.msk.bf16.gmra.mrb[52].mxu0 %vm380_vm1, %v350_v23 }
  0x83   : > { %7273 = vmatprep.mubr.msk.bf16.mxu0 %vm380_vm1, %v351_v26 }
  0x8a   : > { %7274 = vmatmul.mubr.msk.bf16.gmra.mrb[56].mxu0 %vm380_vm1, %v352_v29 }
  0x8b   : > { %7277 = vmatprep.mubr.msk.bf16.mxu0 %vm380_vm1, %v353_v33 }
  0x92   : > { %7278 = vmatmul.mubr.msk.bf16.gmra.mrb[60].mxu0 %vm380_vm1, %v354_v36 }
  0xed   : > { %v7219_v39 = vpop.f32.mrb[0].mxu0 }
  0xee   : > { %v8274_v40 = vadd.f32 %v7219_v39, %v8270_v38  ;;  %v515_v41 = vpop.f32.mrb[1].mxu0 }
  0xef   : > { %v8277_v42 = vadd.f32 %v8270_v38, %v515_v41  ;;  %v7220_v43 = vpop.f32.mrb[2].mxu0 }
  0xf0   : > { %15829 = vst [vmem:[#allocation2_spill] sm:$0xff] %v8274_v40  ;;  %v8280_v44 = vadd.f32 %v7220_v43, %v8270_v38  ;;  %v518_v45 = vpop.f32.mrb[3].mxu0  ;;  %v776_v46 = vsel %vm258_vm2, %v8274_v40, 0.0 }
  0xf1   : > { %15830 = vst [vmem:[#allocation3_spill] sm:$0xff] %v8277_v42  ;;  %906 = vadd.xlane.f32.xlu1 %v776_v46  ;;  %v774_v47 = vsel %vm258_vm2, %v8277_v42, 0.0  ;;  %v8292_v49 = vsub.f32 %v8274_v40, %v776_v46  ;;  %v8299_v54 = vadd.f32 %v8270_v38, %v518_v45  ;;  %v1160_v55 = vmul.f32 %v776_v46, %v776_v46 }
  0xf2   : > { %15831 = vst [vmem:[#allocation4_spill] sm:$0xff] %v8280_v44  ;;  %902 = vadd.xlane.f32.xlu0 %v774_v47  ;;  %v777_v48 = vsel %vm258_vm2, %v8280_v44, 0.0  ;;  %v8309_v63 = vsub.f32 %v8277_v42, %v774_v47  ;;  %v1158_v3 = vmul.f32 %v774_v47, %v774_v47 }
  0xf3   : > { %v8296_v52 = vsub.f32 %v8280_v44, %v777_v48  ;;  %15832 = vst [vmem:[#allocation5_spill] sm:$0xff] %v8299_v54  ;;  %v1161_v57 = vmul.f32 %v777_v48, %v777_v48  ;;  %v775_v58 = vsel %vm258_vm2, %v8299_v54, 0.0 }
  0xf4   : > { %v8306_v61 = vsub.f32 %v8299_v54, %v775_v58  ;;  %v1159_v1 = vmul.f32 %v775_v58, %v775_v58 }
  0xf5   : > { %908 = vadd.xlane.f32.xlu1 %v777_v48  ;;  %v7223_v50 = vpop.f32.mrb[4].mxu0 }
  0xf6   : > { %1034 = vadd.xlane.f32.xlu0 %v8292_v49  ;;  %v531_v51 = vpop.f32.mrb[5].mxu0  ;;  %v8317_v4 = vadd.f32 %v7223_v50, %v8270_v38 }
  0xf7   : > { %v7224_v53 = vpop.f32.mrb[6].mxu0  ;;  %v8334_v11 = vadd.f32 %v8270_v38, %v531_v51 }
  0xf8   : > { %v534_v56 = vpop.f32.mrb[7].mxu0  ;;  %v8314_v2 = vadd.f32 %v7224_v53, %v8270_v38  ;;  %15834 = vst [vmem:[#allocation7_spill] sm:$0xff] %v8317_v4  ;;  %v780_v12 = vsel %vm258_vm2, %v8317_v4, 0.0 }
  0xf9   : > { %1036 = vadd.xlane.f32.xlu1 %v8296_v52  ;;  %v8326_v8 = vadd.f32 %v8270_v38, %v534_v56  ;;  %15836 = vst [vmem:[#allocation9_spill] sm:$0xff] %v8334_v11  ;;  %v778_v14 = vsel %vm258_vm2, %v8334_v11, 0.0  ;;  %v8355_v19 = vsub.f32 %v8317_v4, %v780_v12  ;;  %v1164_v22 = vmul.f32 %v780_v12, %v780_v12 }
  0xfa   : > { %1226 = vadd.xlane.f32.xlu0 %v1160_v55  ;;  %15833 = vst [vmem:[#allocation6_spill] sm:$0xff] %v8314_v2  ;;  %v781_v9 = vsel %vm258_vm2, %v8314_v2, 0.0  ;;  %v8371_v27 = vsub.f32 %v8334_v11, %v778_v14  ;;  %v1162_v31 = vmul.f32 %v778_v14, %v778_v14 }
  0xfb   : > { %15835 = vst [vmem:[#allocation8_spill] sm:$0xff] %v8326_v8  ;;  %v779_v13 = vsel %vm258_vm2, %v8326_v8, 0.0  ;;  %v8350_v17 = vsub.f32 %v8314_v2, %v781_v9  ;;  %v1165_v21 = vmul.f32 %v781_v9, %v781_v9 }
  0xfc   : > { %v8366_v25 = vsub.f32 %v8326_v8, %v779_v13  ;;  %v1163_v29 = vmul.f32 %v779_v13, %v779_v13 }
  0xfd   : > { %1228 = vadd.xlane.f32.xlu1 %v1161_v57  ;;  %v7227_v59 = vpop.f32.mrb[8].mxu0 }
  0xfe   : > { %904 = vadd.xlane.f32.xlu0 %v775_v58  ;;  %v547_v60 = vpop.f32.mrb[9].mxu0  ;;  %v8381_v32 = vadd.f32 %v7227_v59, %v8270_v38 }
  0xff   : > { %v7228_v62 = vpop.f32.mrb[10].mxu0  ;;  %v8398_v43 = vadd.f32 %v8270_v38, %v547_v60 }
 0x100   : > { %v550_v0 = vpop.f32.mrb[11].mxu0  ;;  %v8378_v30 = vadd.f32 %v7228_v62, %v8270_v38  ;;  %15838 = vst [vmem:[#allocation11_spill] sm:$0xff] %v8381_v32  ;;  %v784_v45 = vsel %vm258_vm2, %v8381_v32, 0.0 }
 0x101   : > { %1032 = vadd.xlane.f32.xlu1 %v8306_v61  ;;  %v8390_v36 = vadd.f32 %v8270_v38, %v550_v0  ;;  %15840 = vst [vmem:[#allocation13_spill] sm:$0xff] %v8398_v43  ;;  %v782_v47 = vsel %vm258_vm2, %v8398_v43, 0.0  ;;  %v8419_v55 = vsub.f32 %v8381_v32, %v784_v45  ;;  %v1168_v58 = vmul.f32 %v784_v45, %v784_v45 }
 0x102   : > { %1030 = vadd.xlane.f32.xlu0 %v8309_v63  ;;  %15837 = vst [vmem:[#allocation10_spill] sm:$0xff] %v8378_v30  ;;  %v785_v39 = vsel %vm258_vm2, %v8378_v30, 0.0 }
 0x103   : > { %15839 = vst [vmem:[#allocation12_spill] sm:$0xff] %v8390_v36  ;;  %v783_v46 = vsel %vm258_vm2, %v8390_v36, 0.0  ;;  %v8414_v51 = vsub.f32 %v8378_v30, %v785_v39  ;;  %v1169_v57 = vmul.f32 %v785_v39, %v785_v39 }
 0x104   : > { %v8430_v62 = vsub.f32 %v8390_v36, %v783_v46 }
 0x105   : > { %1224 = vadd.xlane.f32.xlu1 %v1159_v1  ;;  %v8319_v5 = vpop.f32.mrb[12].mxu0  ;;  %v8435_v1 = vsub.f32 %v8398_v43, %v782_v47 }
 0x106   : > { %1222 = vadd.xlane.f32.xlu0 %v1158_v3  ;;  %v8321_v6 = vpop.f32.mrb[13].mxu0 }
 0x107   : > { %v8323_v7 = vpop.f32.mrb[14].mxu0 }
 0x108   : > { %v8331_v10 = vpop.f32.mrb[15].mxu0 }
 0x109   : > { %916 = vadd.xlane.f32.xlu1 %v781_v9  ;;  %v1167_v9 = vmul.f32 %v783_v46, %v783_v46 }
 0x10a   : > { %914 = vadd.xlane.f32.xlu0 %v780_v12  ;;  %v8443_v12 = vadd.f32 %v8323_v7, %v8270_v38 }
 0x10c   : > { %15841 = vst [vmem:[#allocation14_spill] sm:$0xff] %v8443_v12 }
 0x10d   : > { %912 = vadd.xlane.f32.xlu1 %v779_v13  ;;  %v8345_v15 = vpop.f32.mrb[16].mxu0  ;;  %v1166_v13 = vmul.f32 %v782_v47, %v782_v47 }
 0x10e   : > { %910 = vadd.xlane.f32.xlu0 %v778_v14  ;;  %v8347_v16 = vpop.f32.mrb[17].mxu0  ;;  %v8447_v14 = vadd.f32 %v8319_v5, %v8270_v38 }
 0x10f   : > { %v8352_v18 = vpop.f32.mrb[18].mxu0 }
 0x110   : > { %v8357_v20 = vpop.f32.mrb[19].mxu0  ;;  %15842 = vst [vmem:[#allocation15_spill] sm:$0xff] %v8447_v14  ;;  %v788_v5 = vsel %vm258_vm2, %v8447_v14, 0.0 }
 0x111   : > { %1044 = vadd.xlane.f32.xlu1 %v8350_v17 }
 0x112   : > { %1042 = vadd.xlane.f32.xlu0 %v8355_v19 }
 0x115   : > { %1236 = vadd.xlane.f32.xlu1 %v1165_v21  ;;  %v8361_v23 = vpop.f32.mrb[20].mxu0  ;;  %v8451_v21 = vadd.f32 %v8270_v38, %v8331_v10 }
 0x116   : > { %1234 = vadd.xlane.f32.xlu0 %v1164_v22  ;;  %v8363_v24 = vpop.f32.mrb[21].mxu0  ;;  %v789_v22 = vsel %vm258_vm2, %v8443_v12, 0.0 }
 0x117   : > { %v8368_v26 = vpop.f32.mrb[22].mxu0  ;;  %15843 = vst [vmem:[#allocation16_spill] sm:$0xff] %v8451_v21  ;;  %v787_v7 = vsel %vm258_vm2, %v8451_v21, 0.0 }
 0x118   : > { %v8373_v28 = vpop.f32.mrb[23].mxu0  ;;  %v8547_v30 = vadd.f32 %v8368_v26, %v8270_v38 }
 0x119   : > { %1040 = vadd.xlane.f32.xlu1 %v8366_v25 }
 0x11a   : > { %1038 = vadd.xlane.f32.xlu0 %v8371_v27  ;;  %15851 = vst [vmem:[#allocation24_spill] sm:$0xff] %v8547_v30 }
 0x11d   : > { %1232 = vadd.xlane.f32.xlu1 %v1163_v29  ;;  %v8383_v33 = vpop.f32.mrb[24].mxu0  ;;  %v8458_v29 = vadd.f32 %v8270_v38, %v8321_v6  ;;  %v8473_v6 = vsub.f32 %v8447_v14, %v788_v5  ;;  %v1171_v14 = vmul.f32 %v787_v7, %v787_v7 }
 0x11e   : > { %1230 = vadd.xlane.f32.xlu0 %v1162_v31  ;;  %v8385_v34 = vpop.f32.mrb[25].mxu0  ;;  %v8470_v31 = vsub.f32 %v8443_v12, %v789_v22  ;;  %v8495_v12 = vadd.f32 %v8352_v18, %v8270_v38 }
 0x11f   : > { %v8387_v35 = vpop.f32.mrb[26].mxu0  ;;  %15844 = vst [vmem:[#allocation17_spill] sm:$0xff] %v8458_v29  ;;  %v786_v10 = vsel %vm258_vm2, %v8458_v29, 0.0 }
 0x120   : > { %v8395_v41 = vpop.f32.mrb[27].mxu0  ;;  %15845 = vst [vmem:[#allocation18_spill] sm:$0xff] %v8495_v12  ;;  %v8599_v2 = vadd.f32 %v8387_v35, %v8270_v38  ;;  %v8614_v35 = vadd.f32 %v8270_v38, %v8385_v34 }
 0x121   : > { %924 = vadd.xlane.f32.xlu1 %v785_v39 }
 0x122   : > { %922 = vadd.xlane.f32.xlu0 %v784_v45  ;;  %15859 = vst [vmem:[#allocation32_spill] sm:$0xff] %v8599_v2  ;;  %15862 = vst [vmem:[#allocation35_spill] sm:$0xff] %v8614_v35  ;;  %v798_v34 = vsel %vm258_vm2, %v8614_v35, 0.0 }
 0x125   : > { %920 = vadd.xlane.f32.xlu1 %v783_v46  ;;  %v8409_v48 = vpop.f32.mrb[28].mxu0 }
 0x126   : > { %918 = vadd.xlane.f32.xlu0 %v782_v47  ;;  %v8411_v50 = vpop.f32.mrb[29].mxu0  ;;  %v1173_v47 = vmul.f32 %v789_v22, %v789_v22 }
 0x127   : > { %v8416_v53 = vpop.f32.mrb[30].mxu0 }
 0x128   : > { %v8421_v56 = vpop.f32.mrb[31].mxu0 }
 0x129   : > { %1052 = vadd.xlane.f32.xlu1 %v8414_v51 }
 0x12a   : > { %1050 = vadd.xlane.f32.xlu0 %v8419_v55 }
 0x12d   : > { %1244 = vadd.xlane.f32.xlu1 %v1169_v57  ;;  %v8425_v59 = vpop.f32.mrb[32].mxu0 }
 0x12e   : > { %1242 = vadd.xlane.f32.xlu0 %v1168_v58  ;;  %v8427_v60 = vpop.f32.mrb[33].mxu0  ;;  %v1172_v58 = vmul.f32 %v788_v5, %v788_v5 }
 0x12f   : > { %v8432_v0 = vpop.f32.mrb[34].mxu0 }
 0x130   : > { %v8437_v3 = vpop.f32.mrb[35].mxu0 }
 0x131   : > { %1048 = vadd.xlane.f32.xlu1 %v8430_v62 }
 0x132   : > { %1046 = vadd.xlane.f32.xlu0 %v8435_v1 }
 0x135   : > { %1240 = vadd.xlane.f32.xlu1 %v1167_v9  ;;  %v8475_v39 = vpop.f32.mrb[36].mxu0  ;;  %v8486_v9 = vsub.f32 %v8451_v21, %v787_v7 }
 0x136   : > { %1238 = vadd.xlane.f32.xlu0 %v1166_v13  ;;  %v8478_v45 = vpop.f32.mrb[37].mxu0  ;;  %v8489_v13 = vsub.f32 %v8458_v29, %v786_v10 }
 0x137   : > { %v8481_v46 = vpop.f32.mrb[38].mxu0 }
 0x138   : > { %v8483_v57 = vpop.f32.mrb[39].mxu0 }
 0x139   : > { %932 = vadd.xlane.f32.xlu1 %v789_v22  ;;  %v1170_v22 = vmul.f32 %v786_v10, %v786_v10 }
 0x13a   : > { %930 = vadd.xlane.f32.xlu0 %v788_v5  ;;  %v8499_v5 = vadd.f32 %v8345_v15, %v8270_v38 }
 0x13c   : > { %15846 = vst [vmem:[#allocation19_spill] sm:$0xff] %v8499_v5  ;;  %v792_v15 = vsel %vm258_vm2, %v8499_v5, 0.0 }
 0x13d   : > { %928 = vadd.xlane.f32.xlu1 %v787_v7  ;;  %v8510_v7 = vadd.f32 %v8270_v38, %v8347_v16  ;;  %v8525_v16 = vsub.f32 %v8499_v5, %v792_v15  ;;  %v1176_v36 = vmul.f32 %v792_v15, %v792_v15 }
 0x13e   : > { %926 = vadd.xlane.f32.xlu0 %v786_v10  ;;  %v8527_v10 = vpop.f32.mrb[40].mxu0 }
 0x13f   : > { %15848 = vst [vmem:[#allocation21_spill] sm:$0xff] %v8510_v7  ;;  %15850 = vst [vmem:[#allocation23_spill] sm:$0xff] %v8525_v16 }
 0x141   : > { %1060 = vadd.xlane.f32.xlu1 %v8470_v31 }
 0x142   : > { %1058 = vadd.xlane.f32.xlu0 %v8473_v6 }
 0x145   : > { %1252 = vadd.xlane.f32.xlu1 %v1173_v47  ;;  %v8503_v47 = vadd.f32 %v8270_v38, %v8357_v20  ;;  %v790_v20 = vsel %vm258_vm2, %v8510_v7, 0.0 }
 0x146   : > { %1250 = vadd.xlane.f32.xlu0 %v1172_v58  ;;  %v793_v58 = vsel %vm258_vm2, %v8495_v12, 0.0  ;;  %v8541_v5 = vsub.f32 %v8510_v7, %v790_v20 }
 0x147   : > { %15847 = vst [vmem:[#allocation20_spill] sm:$0xff] %v8503_v47  ;;  %v791_v18 = vsel %vm258_vm2, %v8503_v47, 0.0  ;;  %v1177_v21 = vmul.f32 %v793_v58, %v793_v58 }
 0x148   : > { %v1175_v32 = vmul.f32 %v791_v18, %v791_v18 }
 0x149   : > { %1056 = vadd.xlane.f32.xlu1 %v8486_v9 }
 0x14a   : > { %1054 = vadd.xlane.f32.xlu0 %v8489_v13 }
 0x14d   : > { %1248 = vadd.xlane.f32.xlu1 %v1171_v14  ;;  %v8522_v14 = vsub.f32 %v8495_v12, %v793_v58  ;;  %v8538_v12 = vsub.f32 %v8503_v47, %v791_v18 }
 0x14e   : > { %1246 = vadd.xlane.f32.xlu0 %v1170_v22  ;;  %v8530_v22 = vpop.f32.mrb[41].mxu0 }
 0x14f   : > { %15849 = vst [vmem:[#allocation22_spill] sm:$0xff] %v8522_v14  ;;  %v8533_v29 = vpop.f32.mrb[42].mxu0 }
 0x150   : > { %v8535_v43 = vpop.f32.mrb[43].mxu0 }
 0x151   : > { %940 = vadd.xlane.f32.xlu1 %v793_v58  ;;  %v1174_v58 = vmul.f32 %v790_v20, %v790_v20 }
 0x152   : > { %938 = vadd.xlane.f32.xlu0 %v792_v15  ;;  %v797_v15 = vsel %vm258_vm2, %v8547_v30, 0.0 }
 0x153   : > { %v1181_v47 = vmul.f32 %v797_v15, %v797_v15 }
 0x155   : > { %936 = vadd.xlane.f32.xlu1 %v791_v18  ;;  %v8562_v18 = vadd.f32 %v8270_v38, %v8363_v24 }
 0x156   : > { %934 = vadd.xlane.f32.xlu0 %v790_v20  ;;  %v8579_v20 = vpop.f32.mrb[44].mxu0 }
 0x157   : > { %15854 = vst [vmem:[#allocation27_spill] sm:$0xff] %v8562_v18 }
 0x159   : > { %1068 = vadd.xlane.f32.xlu1 %v8522_v14 }
 0x15a   : > { %1066 = vadd.xlane.f32.xlu0 %v8525_v16 }
 0x15d   : > { %1260 = vadd.xlane.f32.xlu1 %v1177_v21  ;;  %v8551_v21 = vadd.f32 %v8361_v23, %v8270_v38 }
 0x15e   : > { %1258 = vadd.xlane.f32.xlu0 %v1176_v36  ;;  %v8555_v36 = vadd.f32 %v8270_v38, %v8373_v28  ;;  %v794_v28 = vsel %vm258_vm2, %v8562_v18, 0.0 }
 0x15f   : > { %15852 = vst [vmem:[#allocation25_spill] sm:$0xff] %v8551_v21  ;;  %v796_v23 = vsel %vm258_vm2, %v8551_v21, 0.0 }
 0x160   : > { %15853 = vst [vmem:[#allocation26_spill] sm:$0xff] %v8555_v36  ;;  %v795_v26 = vsel %vm258_vm2, %v8555_v36, 0.0  ;;  %v8577_v24 = vsub.f32 %v8551_v21, %v796_v23  ;;  %v1180_v8 = vmul.f32 %v796_v23, %v796_v23  ;;  %v8593_v21 = vsub.f32 %v8562_v18, %v794_v28 }
 0x161   : > { %1064 = vadd.xlane.f32.xlu1 %v8538_v12  ;;  %v1179_v4 = vmul.f32 %v795_v26, %v795_v26  ;;  %v8607_v18 = vadd.f32 %v8270_v38, %v8395_v41 }
 0x162   : > { %1062 = vadd.xlane.f32.xlu0 %v8541_v5  ;;  %15856 = vst [vmem:[#allocation29_spill] sm:$0xff] %v8577_v24  ;;  %15858 = vst [vmem:[#allocation31_spill] sm:$0xff] %v8593_v21 }
 0x163   : > { %15861 = vst [vmem:[#allocation34_spill] sm:$0xff] %v8607_v18 }
 0x165   : > { %1256 = vadd.xlane.f32.xlu1 %v1175_v32  ;;  %v8574_v32 = vsub.f32 %v8547_v30, %v797_v15  ;;  %v8590_v30 = vsub.f32 %v8555_v36, %v795_v26 }
 0x166   : > { %1254 = vadd.xlane.f32.xlu0 %v1174_v58  ;;  %v8582_v58 = vpop.f32.mrb[45].mxu0 }
 0x167   : > { %15855 = vst [vmem:[#allocation28_spill] sm:$0xff] %v8574_v32  ;;  %v8585_v7 = vpop.f32.mrb[46].mxu0  ;;  %15857 = vst [vmem:[#allocation30_spill] sm:$0xff] %v8590_v30 }
 0x168   : > { %v8587_v11 = vpop.f32.mrb[47].mxu0 }
 0x169   : > { %948 = vadd.xlane.f32.xlu1 %v797_v15  ;;  %v1178_v15 = vmul.f32 %v794_v28, %v794_v28  ;;  %v8641_v44 = vpop.f32.mrb[48].mxu0 }
 0x16a   : > { %946 = vadd.xlane.f32.xlu0 %v796_v23  ;;  %v8644_v40 = vpop.f32.mrb[49].mxu0 }
 0x16d   : > { %944 = vadd.xlane.f32.xlu1 %v795_v26  ;;  %v801_v26 = vsel %vm258_vm2, %v8599_v2, 0.0 }
 0x16e   : > { %942 = vadd.xlane.f32.xlu0 %v794_v28 }
 0x171   : > { %1076 = vadd.xlane.f32.xlu1 %v8574_v32 }
 0x172   : > { %1074 = vadd.xlane.f32.xlu0 %v8577_v24 }
 0x175   : > { %1268 = vadd.xlane.f32.xlu1 %v1181_v47  ;;  %v8603_v47 = vadd.f32 %v8383_v33, %v8270_v38 }
 0x176   : > { %1266 = vadd.xlane.f32.xlu0 %v1180_v8 }
 0x177   : > { %15860 = vst [vmem:[#allocation33_spill] sm:$0xff] %v8603_v47 }
 0x179   : > { %1072 = vadd.xlane.f32.xlu1 %v8590_v30 }
 0x17a   : > { %1070 = vadd.xlane.f32.xlu0 %v8593_v21 }
 0x17d   : > { %1264 = vadd.xlane.f32.xlu1 %v1179_v4  ;;  %v800_v4 = vsel %vm258_vm2, %v8603_v47, 0.0 }
 0x17e   : > { %v907_v8 = vpop.xlane.xlu1 %906  ;;  %1262 = vadd.xlane.f32.xlu0 %v1178_v15  ;;  %v799_v15 = vsel %vm258_vm2, %v8607_v18, 0.0 }
 0x17f   : > { %v903_v23 = vpop.xlane.xlu0 %902  ;;  %v8658_v32 = vsub.f32 %v8607_v18, %v799_v15 }
 0x181   : > { %956 = vadd.xlane.f32.xlu1 %v801_v26  ;;  %15870 = vst [vmem:[#allocation43_spill] sm:$0xff] %v8658_v32 }
 0x182   : > { %v909_v33 = vpop.xlane.xlu1 %908  ;;  %954 = vadd.xlane.f32.xlu0 %v800_v4 }
 0x183   : > { %v1035_v28 = vpop.xlane.xlu0 %1034 }
 0x184   : > { %v8621_v41 = vsel %vm258_vm2, %v907_v8, %v1035_v28  ;;  %v8636_v8 = vsub.f32 %v8599_v2, %v801_v26  ;;  %v8639_v28 = vsub.f32 %v8603_v47, %v800_v4  ;;  %v1184_v2 = vmul.f32 %v800_v4, %v800_v4 }
 0x185   : > { %15863 = vst [vmem:[#allocation36_spill] sm:$0xff] %v8621_v41  ;;  %952 = vadd.xlane.f32.xlu1 %v799_v15  ;;  %v8675_v4 = vadd.f32 %v8416_v53, %v8270_v38  ;;  %v8690_v53 = vadd.f32 %v8270_v38, %v8411_v50 }
 0x186   : > { %v1037_v36 = vpop.xlane.xlu1 %1036  ;;  %950 = vadd.xlane.f32.xlu0 %v798_v34  ;;  %15866 = vst [vmem:[#allocation39_spill] sm:$0xff] %v8636_v8  ;;  %15867 = vst [vmem:[#allocation40_spill] sm:$0xff] %v8639_v28 }
 0x187   : > { %v8631_v42 = vsel %vm258_vm2, %v909_v33, %v1037_v36  ;;  %v8633_v54 = vpop.xlane.xlu0 %1226  ;;  %v8649_v36 = vpop.f32.mrb[50].mxu0  ;;  %15875 = vst [vmem:[#allocation48_spill] sm:$0xff] %v8675_v4  ;;  %15878 = vst [vmem:[#allocation51_spill] sm:$0xff] %v8690_v53  ;;  %v802_v50 = vsel %vm258_vm2, %v8690_v53, 0.0 }
 0x188   : > { %15864 = vst [vmem:[#allocation37_spill] sm:$0xff] %v8631_v42  ;;  %15865 = vst [vmem:[#allocation38_spill] sm:$0xff] %v8633_v54  ;;  %v1185_v54 = vmul.f32 %v801_v26, %v801_v26  ;;  %v8651_v42 = vpop.f32.mrb[51].mxu0  ;;  %v8665_v26 = vsub.f32 %v8614_v35, %v798_v34 }
 0x189   : > { %1084 = vadd.xlane.f32.xlu1 %v8636_v8 }
 0x18a   : > { %v8646_v41 = vpop.xlane.xlu1 %1228  ;;  %1082 = vadd.xlane.f32.xlu0 %v8639_v28  ;;  %15872 = vst [vmem:[#allocation45_spill] sm:$0xff] %v8665_v26 }
 0x18b   : > { %15868 = vst [vmem:[#allocation41_spill] sm:$0xff] %v8646_v41  ;;  %v905_v33 = vpop.xlane.xlu0 %904 }
 0x18d   : > { %1276 = vadd.xlane.f32.xlu1 %v1185_v54 }
 0x18e   : > { %v1033_v47 = vpop.xlane.xlu1 %1032  ;;  %1274 = vadd.xlane.f32.xlu0 %v1184_v2 }
 0x18f   : > { %v8655_v24 = vsel %vm258_vm2, %v905_v33, %v1033_v47  ;;  %v1031_v8 = vpop.xlane.xlu0 %1030  ;;  %v1183_v47 = vmul.f32 %v799_v15, %v799_v15  ;;  %v1182_v33 = vmul.f32 %v798_v34, %v798_v34  ;;  %v805_v15 = vsel %vm258_vm2, %v8675_v4, 0.0 }
 0x190   : > { %15869 = vst [vmem:[#allocation42_spill] sm:$0xff] %v8655_v24  ;;  %v8662_v41 = vsel %vm258_vm2, %v903_v23, %v1031_v8  ;;  %v8679_v23 = vadd.f32 %v8409_v48, %v8270_v38 }
 0x191   : > { %15871 = vst [vmem:[#allocation44_spill] sm:$0xff] %v8662_v41  ;;  %1080 = vadd.xlane.f32.xlu1 %v8658_v32 }
 0x192   : > { %v8668_v54 = vpop.xlane.xlu1 %1224  ;;  %1078 = vadd.xlane.f32.xlu0 %v8665_v26  ;;  %15876 = vst [vmem:[#allocation49_spill] sm:$0xff] %v8679_v23  ;;  %v804_v48 = vsel %vm258_vm2, %v8679_v23, 0.0  ;;  %v8712_v26 = vsub.f32 %v8675_v4, %v805_v15 }
 0x193   : > { %15873 = vst [vmem:[#allocation46_spill] sm:$0xff] %v8668_v54  ;;  %v8671_v2 = vpop.xlane.xlu0 %1222  ;;  %v8683_v54 = vadd.f32 %v8270_v38, %v8421_v56  ;;  %v8721_v30 = vsub.f32 %v8679_v23, %v804_v48  ;;  %v1188_v4 = vmul.f32 %v804_v48, %v804_v48 }
 0x194   : > { %15874 = vst [vmem:[#allocation47_spill] sm:$0xff] %v8671_v2  ;;  %15880 = vst [vmem:[#allocation53_spill] sm:$0xff] %v8712_v26 }
 0x195   : > { %1272 = vadd.xlane.f32.xlu1 %v1183_v47  ;;  %15877 = vst [vmem:[#allocation50_spill] sm:$0xff] %v8683_v54  ;;  %v803_v56 = vsel %vm258_vm2, %v8683_v54, 0.0  ;;  %15882 = vst [vmem:[#allocation55_spill] sm:$0xff] %v8721_v30 }
 0x196   : > { %v917_v8 = vpop.xlane.xlu1 %916  ;;  %1270 = vadd.xlane.f32.xlu0 %v1182_v33  ;;  %v8698_v33 = vpop.f32.mrb[52].mxu0  ;;  %v8734_v23 = vsub.f32 %v8683_v54, %v803_v56 }
 0x197   : > { %v915_v35 = vpop.xlane.xlu0 %914  ;;  %v8703_v2 = vpop.f32.mrb[53].mxu0 }
 0x198   : > { %v8705_v41 = vpop.f32.mrb[54].mxu0  ;;  %15886 = vst [vmem:[#allocation59_spill] sm:$0xff] %v8734_v23 }
 0x199   : > { %964 = vadd.xlane.f32.xlu1 %v805_v15  ;;  %v8714_v32 = vpop.f32.mrb[55].mxu0 }
 0x19a   : > { %v913_v34 = vpop.xlane.xlu1 %912  ;;  %962 = vadd.xlane.f32.xlu0 %v804_v48  ;;  %v8751_v48 = vadd.f32 %v8432_v0, %v8270_v38  ;;  %v8767_v0 = vadd.f32 %v8270_v38, %v8437_v3 }
 0x19b   : > { %v911_v47 = vpop.xlane.xlu0 %910 }
 0x19c   : > { %15891 = vst [vmem:[#allocation64_spill] sm:$0xff] %v8751_v48  ;;  %15893 = vst [vmem:[#allocation66_spill] sm:$0xff] %v8767_v0  ;;  %v807_v3 = vsel %vm258_vm2, %v8767_v0, 0.0 }
 0x19d   : > { %960 = vadd.xlane.f32.xlu1 %v803_v56 }
 0x19e   : > { %v1045_v18 = vpop.xlane.xlu1 %1044  ;;  %958 = vadd.xlane.f32.xlu0 %v802_v50 }
 0x19f   : > { %v8709_v24 = vsel %vm258_vm2, %v917_v8, %v1045_v18  ;;  %v1043_v28 = vpop.xlane.xlu0 %1042  ;;  %v1189_v8 = vmul.f32 %v805_v15, %v805_v15 }
 0x1a0   : > { %15879 = vst [vmem:[#allocation52_spill] sm:$0xff] %v8709_v24  ;;  %v8718_v21 = vsel %vm258_vm2, %v915_v35, %v1043_v28 }
 0x1a1   : > { %15881 = vst [vmem:[#allocation54_spill] sm:$0xff] %v8718_v21  ;;  %1092 = vadd.xlane.f32.xlu1 %v8712_v26  ;;  %v8741_v21 = vsub.f32 %v8690_v53, %v802_v50 }
 0x1a2   : > { %v8724_v16 = vpop.xlane.xlu1 %1236  ;;  %1090 = vadd.xlane.f32.xlu0 %v8721_v30 }
 0x1a3   : > { %15883 = vst [vmem:[#allocation56_spill] sm:$0xff] %v8724_v16  ;;  %v8727_v18 = vpop.xlane.xlu0 %1234  ;;  %15888 = vst [vmem:[#allocation61_spill] sm:$0xff] %v8741_v21 }
 0x1a4   : > { %15884 = vst [vmem:[#allocation57_spill] sm:$0xff] %v8727_v18 }
 0x1a5   : > { %1284 = vadd.xlane.f32.xlu1 %v1189_v8  ;;  %v8753_v8 = vpop.f32.mrb[56].mxu0 }
 0x1a6   : > { %v1041_v24 = vpop.xlane.xlu1 %1040  ;;  %1282 = vadd.xlane.f32.xlu0 %v1188_v4 }
 0x1a7   : > { %v8731_v35 = vsel %vm258_vm2, %v913_v34, %v1041_v24  ;;  %v1039_v28 = vpop.xlane.xlu0 %1038  ;;  %v1187_v24 = vmul.f32 %v803_v56, %v803_v56  ;;  %v1186_v34 = vmul.f32 %v802_v50, %v802_v50  ;;  %v809_v50 = vsel %vm258_vm2, %v8751_v48, 0.0 }
 0x1a8   : > { %15885 = vst [vmem:[#allocation58_spill] sm:$0xff] %v8731_v35  ;;  %v8738_v16 = vsel %vm258_vm2, %v911_v47, %v1039_v28  ;;  %v8757_v47 = vadd.f32 %v8425_v59, %v8270_v38  ;;  %v8759_v28 = vpop.f32.mrb[57].mxu0  ;;  %v8774_v59 = vadd.f32 %v8270_v38, %v8427_v60  ;;  %v8790_v30 = vsub.f32 %v8751_v48, %v809_v50 }
 0x1a9   : > { %15887 = vst [vmem:[#allocation60_spill] sm:$0xff] %v8738_v16  ;;  %1088 = vadd.xlane.f32.xlu1 %v8734_v23 }
 0x1aa   : > { %v8744_v15 = vpop.xlane.xlu1 %1232  ;;  %1086 = vadd.xlane.f32.xlu0 %v8741_v21  ;;  %15892 = vst [vmem:[#allocation65_spill] sm:$0xff] %v8757_v47  ;;  %15894 = vst [vmem:[#allocation67_spill] sm:$0xff] %v8774_v59  ;;  %v806_v54 = vsel %vm258_vm2, %v8774_v59, 0.0 }
 0x1ab   : > { %15889 = vst [vmem:[#allocation62_spill] sm:$0xff] %v8744_v15  ;;  %v8747_v4 = vpop.xlane.xlu0 %1230  ;;  %v8761_v15 = vpop.f32.mrb[58].mxu0  ;;  %15896 = vst [vmem:[#allocation69_spill] sm:$0xff] %v8790_v30 }
 0x1ac   : > { %15890 = vst [vmem:[#allocation63_spill] sm:$0xff] %v8747_v4  ;;  %v8763_v56 = vpop.f32.mrb[59].mxu0 }
 0x1ad   : > { %1280 = vadd.xlane.f32.xlu1 %v1187_v24  ;;  %v808_v24 = vsel %vm258_vm2, %v8757_v47, 0.0 }
 0x1ae   : > { %v925_v18 = vpop.xlane.xlu1 %924  ;;  %1278 = vadd.xlane.f32.xlu0 %v1186_v34  ;;  %v8797_v21 = vsub.f32 %v8757_v47, %v808_v24 }
 0x1af   : > { %v923_v4 = vpop.xlane.xlu0 %922 }
 0x1b0   : > { %15898 = vst [vmem:[#allocation71_spill] sm:$0xff] %v8797_v21 }
 0x1b1   : > { %972 = vadd.xlane.f32.xlu1 %v809_v50 }
 0x1b2   : > { %v921_v34 = vpop.xlane.xlu1 %920  ;;  %970 = vadd.xlane.f32.xlu0 %v808_v24 }
 0x1b3   : > { %v919_v53 = vpop.xlane.xlu0 %918 }
 0x1b5   : > { %968 = vadd.xlane.f32.xlu1 %v807_v3 }
 0x1b6   : > { %v1053_v16 = vpop.xlane.xlu1 %1052  ;;  %966 = vadd.xlane.f32.xlu0 %v806_v54 }
 0x1b7   : > { %v8787_v60 = vsel %vm258_vm2, %v925_v18, %v1053_v16  ;;  %v1051_v35 = vpop.xlane.xlu0 %1050  ;;  %v1193_v16 = vmul.f32 %v809_v50, %v809_v50  ;;  %v1192_v18 = vmul.f32 %v808_v24, %v808_v24  ;;  %v8825_v24 = vsub.f32 %v8774_v59, %v806_v54 }
 0x1b8   : > { %15895 = vst [vmem:[#allocation68_spill] sm:$0xff] %v8787_v60  ;;  %v8794_v26 = vsel %vm258_vm2, %v923_v4, %v1051_v35  ;;  %v8805_v60 = vpop.f32.mrb[60].mxu0 }
 0x1b9   : > { %15897 = vst [vmem:[#allocation70_spill] sm:$0xff] %v8794_v26  ;;  %1100 = vadd.xlane.f32.xlu1 %v8790_v30  ;;  %v8807_v48 = vpop.f32.mrb[61].mxu0  ;;  %v8816_v26 = vsub.f32 %v8767_v0, %v807_v3  ;;  %15904 = vst [vmem:[#allocation77_spill] sm:$0xff] %v8825_v24  ;;  %v1190_v0 = vmul.f32 %v806_v54, %v806_v54 }
 0x1ba   : > { %v8800_v23 = vpop.xlane.xlu1 %1244  ;;  %1098 = vadd.xlane.f32.xlu0 %v8797_v21  ;;  %v8809_v4 = vpop.f32.mrb[62].mxu0 }
 0x1bb   : > { %15899 = vst [vmem:[#allocation72_spill] sm:$0xff] %v8800_v23  ;;  %v8803_v14 = vpop.xlane.xlu0 %1242  ;;  %15902 = vst [vmem:[#allocation75_spill] sm:$0xff] %v8816_v26 }
 0x1bc   : > { %15900 = vst [vmem:[#allocation73_spill] sm:$0xff] %v8803_v14  ;;  %v8818_v14 = vpop.f32.mrb[63].mxu0 }
 0x1bd   : > { %1292 = vadd.xlane.f32.xlu1 %v1193_v16 }
 0x1be   : > { %v1049_v35 = vpop.xlane.xlu1 %1048  ;;  %1290 = vadd.xlane.f32.xlu0 %v1192_v18  ;;  %v1191_v18 = vmul.f32 %v807_v3, %v807_v3 }
 0x1bf   : > { %v8813_v47 = vsel %vm258_vm2, %v921_v34, %v1049_v35  ;;  %v1047_v23 = vpop.xlane.xlu0 %1046  ;;  %v8835_v35 = vadd.f32 %v8481_v46, %v8270_v38  ;;  %v8850_v46 = vadd.f32 %v8270_v38, %v8478_v45 }
 0x1c0   : > { %15901 = vst [vmem:[#allocation74_spill] sm:$0xff] %v8813_v47  ;;  %v8822_v50 = vsel %vm258_vm2, %v919_v53, %v1047_v23  ;;  %v8839_v23 = vadd.f32 %v8475_v39, %v8270_v38 }
 0x1c1   : > { %15903 = vst [vmem:[#allocation76_spill] sm:$0xff] %v8822_v50  ;;  %1096 = vadd.xlane.f32.xlu1 %v8816_v26  ;;  %15907 = vst [vmem:[#allocation80_spill] sm:$0xff] %v8835_v35  ;;  %v813_v3 = vsel %vm258_vm2, %v8835_v35, 0.0 }
 0x1c2   : > { %v8828_v16 = vpop.xlane.xlu1 %1240  ;;  %1094 = vadd.xlane.f32.xlu0 %v8825_v24  ;;  %15908 = vst [vmem:[#allocation81_spill] sm:$0xff] %v8839_v23  ;;  %15910 = vst [vmem:[#allocation83_spill] sm:$0xff] %v8850_v46  ;;  %v812_v39 = vsel %vm258_vm2, %v8839_v23, 0.0  ;;  %v8866_v47 = vsub.f32 %v8835_v35, %v813_v3 }
 0x1c3   : > { %15905 = vst [vmem:[#allocation78_spill] sm:$0xff] %v8828_v16  ;;  %v8831_v34 = vpop.xlane.xlu0 %1238  ;;  %v8843_v16 = vadd.f32 %v8270_v38, %v8483_v57  ;;  %v8873_v30 = vsub.f32 %v8839_v23, %v812_v39 }
 0x1c4   : > { %15906 = vst [vmem:[#allocation79_spill] sm:$0xff] %v8831_v34 }
 0x1c5   : > { %1288 = vadd.xlane.f32.xlu1 %v1191_v18  ;;  %15909 = vst [vmem:[#allocation82_spill] sm:$0xff] %v8843_v16  ;;  %v811_v57 = vsel %vm258_vm2, %v8843_v16, 0.0  ;;  %v810_v18 = vsel %vm258_vm2, %v8850_v46, 0.0 }
 0x1c6   : > { %v933_v53 = vpop.xlane.xlu1 %932  ;;  %1286 = vadd.xlane.f32.xlu0 %v1190_v0  ;;  %v8886_v23 = vsub.f32 %v8843_v16, %v811_v57 }
 0x1c7   : > { %v931_v59 = vpop.xlane.xlu0 %930 }
 0x1c9   : > { %980 = vadd.xlane.f32.xlu1 %v813_v3 }
 0x1ca   : > { %v929_v54 = vpop.xlane.xlu1 %928  ;;  %978 = vadd.xlane.f32.xlu0 %v812_v39 }
 0x1cb   : > { %v927_v0 = vpop.xlane.xlu0 %926 }
 0x1cd   : > { %976 = vadd.xlane.f32.xlu1 %v811_v57 }
 0x1ce   : > { %v1061_v34 = vpop.xlane.xlu1 %1060  ;;  %974 = vadd.xlane.f32.xlu0 %v810_v18 }
 0x1cf   : > { %v8863_v45 = vsel %vm258_vm2, %v933_v53, %v1061_v34  ;;  %v1059_v50 = vpop.xlane.xlu0 %1058  ;;  %v1197_v34 = vmul.f32 %v813_v3, %v813_v3  ;;  %v1196_v53 = vmul.f32 %v812_v39, %v812_v39 }
 0x1d0   : > { %15911 = vst [vmem:[#allocation84_spill] sm:$0xff] %v8863_v45  ;;  %v8870_v21 = vsel %vm258_vm2, %v931_v59, %v1059_v50 }
 0x1d1   : > { %15912 = vst [vmem:[#allocation85_spill] sm:$0xff] %v8870_v21  ;;  %1108 = vadd.xlane.f32.xlu1 %v8866_v47  ;;  %v8893_v21 = vsub.f32 %v8850_v46, %v810_v18 }
 0x1d2   : > { %v8876_v24 = vpop.xlane.xlu1 %1252  ;;  %1106 = vadd.xlane.f32.xlu0 %v8873_v30 }
 0x1d3   : > { %15913 = vst [vmem:[#allocation86_spill] sm:$0xff] %v8876_v24  ;;  %v8879_v26 = vpop.xlane.xlu0 %1250 }
 0x1d4   : > { %15914 = vst [vmem:[#allocation87_spill] sm:$0xff] %v8879_v26  ;;  %v8911_v26 = vadd.f32 %v8270_v38, %v8535_v43 }
 0x1d5   : > { %1300 = vadd.xlane.f32.xlu1 %v1197_v34  ;;  %v1194_v34 = vmul.f32 %v810_v18, %v810_v18 }
 0x1d6   : > { %v1057_v35 = vpop.xlane.xlu1 %1056  ;;  %1298 = vadd.xlane.f32.xlu0 %v1196_v53  ;;  %15921 = vst [vmem:[#allocation94_spill] sm:$0xff] %v8911_v26  ;;  %v815_v43 = vsel %vm258_vm2, %v8911_v26, 0.0 }
 0x1d7   : > { %v8883_v59 = vsel %vm258_vm2, %v929_v54, %v1057_v35  ;;  %v1055_v50 = vpop.xlane.xlu0 %1054  ;;  %v1195_v35 = vmul.f32 %v811_v57, %v811_v57  ;;  %v8903_v54 = vadd.f32 %v8533_v29, %v8270_v38  ;;  %v8918_v29 = vadd.f32 %v8270_v38, %v8530_v22 }
 0x1d8   : > { %15915 = vst [vmem:[#allocation88_spill] sm:$0xff] %v8883_v59  ;;  %v8890_v24 = vsel %vm258_vm2, %v927_v0, %v1055_v50  ;;  %v8907_v0 = vadd.f32 %v8527_v10, %v8270_v38 }
 0x1d9   : > { %15916 = vst [vmem:[#allocation89_spill] sm:$0xff] %v8890_v24  ;;  %1104 = vadd.xlane.f32.xlu1 %v8886_v23  ;;  %15919 = vst [vmem:[#allocation92_spill] sm:$0xff] %v8903_v54  ;;  %v817_v57 = vsel %vm258_vm2, %v8903_v54, 0.0 }
 0x1da   : > { %v8896_v3 = vpop.xlane.xlu1 %1248  ;;  %1102 = vadd.xlane.f32.xlu0 %v8893_v21  ;;  %15920 = vst [vmem:[#allocation93_spill] sm:$0xff] %v8907_v0  ;;  %15922 = vst [vmem:[#allocation95_spill] sm:$0xff] %v8918_v29  ;;  %v816_v10 = vsel %vm258_vm2, %v8907_v0, 0.0  ;;  %v8934_v46 = vsub.f32 %v8903_v54, %v817_v57 }
 0x1db   : > { %15917 = vst [vmem:[#allocation90_spill] sm:$0xff] %v8896_v3  ;;  %v8899_v39 = vpop.xlane.xlu0 %1246  ;;  %v8941_v24 = vsub.f32 %v8907_v0, %v816_v10  ;;  %v8954_v0 = vsub.f32 %v8911_v26, %v815_v43 }
 0x1dc   : > { %15918 = vst [vmem:[#allocation91_spill] sm:$0xff] %v8899_v39 }
 0x1dd   : > { %1296 = vadd.xlane.f32.xlu1 %v1195_v35 }
 0x1de   : > { %v941_v53 = vpop.xlane.xlu1 %940  ;;  %1294 = vadd.xlane.f32.xlu0 %v1194_v34  ;;  %v814_v34 = vsel %vm258_vm2, %v8918_v29, 0.0 }
 0x1df   : > { %v939_v50 = vpop.xlane.xlu0 %938 }
 0x1e1   : > { %988 = vadd.xlane.f32.xlu1 %v817_v57 }
 0x1e2   : > { %v937_v18 = vpop.xlane.xlu1 %936  ;;  %986 = vadd.xlane.f32.xlu0 %v816_v10 }
 0x1e3   : > { %v935_v35 = vpop.xlane.xlu0 %934 }
 0x1e5   : > { %984 = vadd.xlane.f32.xlu1 %v815_v43 }
 0x1e6   : > { %v1069_v39 = vpop.xlane.xlu1 %1068  ;;  %982 = vadd.xlane.f32.xlu0 %v814_v34 }
 0x1e7   : > { %v8931_v22 = vsel %vm258_vm2, %v941_v53, %v1069_v39  ;;  %v1067_v3 = vpop.xlane.xlu0 %1066  ;;  %v1201_v39 = vmul.f32 %v817_v57, %v817_v57  ;;  %v1200_v53 = vmul.f32 %v816_v10, %v816_v10 }
 0x1e8   : > { %15923 = vst [vmem:[#allocation96_spill] sm:$0xff] %v8931_v22  ;;  %v8938_v16 = vsel %vm258_vm2, %v939_v50, %v1067_v3 }
 0x1e9   : > { %15924 = vst [vmem:[#allocation97_spill] sm:$0xff] %v8938_v16  ;;  %1116 = vadd.xlane.f32.xlu1 %v8934_v46  ;;  %v8961_v16 = vsub.f32 %v8918_v29, %v814_v34 }
 0x1ea   : > { %v8944_v59 = vpop.xlane.xlu1 %1260  ;;  %1114 = vadd.xlane.f32.xlu0 %v8941_v24 }
 0x1eb   : > { %15925 = vst [vmem:[#allocation98_spill] sm:$0xff] %v8944_v59  ;;  %v8947_v45 = vpop.xlane.xlu0 %1258 }
 0x1ec   : > { %15926 = vst [vmem:[#allocation99_spill] sm:$0xff] %v8947_v45  ;;  %v8979_v45 = vadd.f32 %v8270_v38, %v8587_v11 }
 0x1ed   : > { %1308 = vadd.xlane.f32.xlu1 %v1201_v39  ;;  %v1198_v39 = vmul.f32 %v814_v34, %v814_v34 }
 0x1ee   : > { %v1065_v54 = vpop.xlane.xlu1 %1064  ;;  %1306 = vadd.xlane.f32.xlu0 %v1200_v53  ;;  %15933 = vst [vmem:[#allocation106_spill] sm:$0xff] %v8979_v45  ;;  %v819_v11 = vsel %vm258_vm2, %v8979_v45, 0.0 }
 0x1ef   : > { %v8951_v3 = vsel %vm258_vm2, %v937_v18, %v1065_v54  ;;  %v1063_v50 = vpop.xlane.xlu0 %1062  ;;  %v1199_v54 = vmul.f32 %v815_v43, %v815_v43  ;;  %v8971_v18 = vadd.f32 %v8585_v7, %v8270_v38  ;;  %v8986_v7 = vadd.f32 %v8270_v38, %v8582_v58 }
 0x1f0   : > { %15927 = vst [vmem:[#allocation100_spill] sm:$0xff] %v8951_v3  ;;  %v8958_v59 = vsel %vm258_vm2, %v935_v35, %v1063_v50  ;;  %v8975_v35 = vadd.f32 %v8579_v20, %v8270_v38 }
 0x1f1   : > { %15928 = vst [vmem:[#allocation101_spill] sm:$0xff] %v8958_v59  ;;  %1112 = vadd.xlane.f32.xlu1 %v8954_v0  ;;  %15931 = vst [vmem:[#allocation104_spill] sm:$0xff] %v8971_v18  ;;  %v821_v43 = vsel %vm258_vm2, %v8971_v18, 0.0 }
 0x1f2   : > { %v8964_v57 = vpop.xlane.xlu1 %1256  ;;  %1110 = vadd.xlane.f32.xlu0 %v8961_v16  ;;  %15932 = vst [vmem:[#allocation105_spill] sm:$0xff] %v8975_v35  ;;  %15934 = vst [vmem:[#allocation107_spill] sm:$0xff] %v8986_v7  ;;  %v820_v20 = vsel %vm258_vm2, %v8975_v35, 0.0  ;;  %v9002_v29 = vsub.f32 %v8971_v18, %v821_v43 }
 0x1f3   : > { %15929 = vst [vmem:[#allocation102_spill] sm:$0xff] %v8964_v57  ;;  %v8967_v10 = vpop.xlane.xlu0 %1254  ;;  %v9009_v59 = vsub.f32 %v8975_v35, %v820_v20  ;;  %v9022_v35 = vsub.f32 %v8979_v45, %v819_v11 }
 0x1f4   : > { %15930 = vst [vmem:[#allocation103_spill] sm:$0xff] %v8967_v10 }
 0x1f5   : > { %1304 = vadd.xlane.f32.xlu1 %v1199_v54 }
 0x1f6   : > { %v949_v53 = vpop.xlane.xlu1 %948  ;;  %1302 = vadd.xlane.f32.xlu0 %v1198_v39  ;;  %v818_v39 = vsel %vm258_vm2, %v8986_v7, 0.0 }
 0x1f7   : > { %v947_v50 = vpop.xlane.xlu0 %946 }
 0x1f9   : > { %996 = vadd.xlane.f32.xlu1 %v821_v43 }
 0x1fa   : > { %v945_v34 = vpop.xlane.xlu1 %944  ;;  %994 = vadd.xlane.f32.xlu0 %v820_v20 }
 0x1fb   : > { %v943_v54 = vpop.xlane.xlu0 %942 }
 0x1fd   : > { %992 = vadd.xlane.f32.xlu1 %v819_v11 }
 0x1fe   : > { %v1077_v10 = vpop.xlane.xlu1 %1076  ;;  %990 = vadd.xlane.f32.xlu0 %v818_v39 }
 0x1ff   : > { %v8999_v58 = vsel %vm258_vm2, %v949_v53, %v1077_v10  ;;  %v1075_v57 = vpop.xlane.xlu0 %1074  ;;  %v1205_v10 = vmul.f32 %v821_v43, %v821_v43  ;;  %v1204_v53 = vmul.f32 %v820_v20, %v820_v20 }
 0x200   : > { %15935 = vst [vmem:[#allocation108_spill] sm:$0xff] %v8999_v58  ;;  %v9006_v26 = vsel %vm258_vm2, %v947_v50, %v1075_v57 }
 0x201   : > { %15936 = vst [vmem:[#allocation109_spill] sm:$0xff] %v9006_v26  ;;  %1124 = vadd.xlane.f32.xlu1 %v9002_v29  ;;  %v9029_v26 = vsub.f32 %v8986_v7, %v818_v39 }
 0x202   : > { %v9012_v3 = vpop.xlane.xlu1 %1268  ;;  %1122 = vadd.xlane.f32.xlu0 %v9009_v59 }
 0x203   : > { %15937 = vst [vmem:[#allocation110_spill] sm:$0xff] %v9012_v3  ;;  %v9015_v22 = vpop.xlane.xlu0 %1266 }
 0x204   : > { %15938 = vst [vmem:[#allocation111_spill] sm:$0xff] %v9015_v22  ;;  %v9047_v22 = vadd.f32 %v8270_v38, %v8651_v42 }
 0x205   : > { %1316 = vadd.xlane.f32.xlu1 %v1205_v10  ;;  %v1202_v10 = vmul.f32 %v818_v39, %v818_v39 }
 0x206   : > { %v1073_v18 = vpop.xlane.xlu1 %1072  ;;  %1314 = vadd.xlane.f32.xlu0 %v1204_v53  ;;  %15945 = vst [vmem:[#allocation118_spill] sm:$0xff] %v9047_v22 }
 0x207   : > { %v9019_v57 = vsel %vm258_vm2, %v945_v34, %v1073_v18  ;;  %v1071_v50 = vpop.xlane.xlu0 %1070  ;;  %v1203_v18 = vmul.f32 %v819_v11, %v819_v11  ;;  %v9039_v34 = vadd.f32 %v8649_v36, %v8270_v38  ;;  %v9056_v36 = vadd.f32 %v8270_v38, %v8644_v40 }
 0x208   : > { %15939 = vst [vmem:[#allocation112_spill] sm:$0xff] %v9019_v57  ;;  %v9026_v3 = vsel %vm258_vm2, %v943_v54, %v1071_v50  ;;  %v9043_v54 = vadd.f32 %v8641_v44, %v8270_v38 }
 0x209   : > { %15940 = vst [vmem:[#allocation113_spill] sm:$0xff] %v9026_v3  ;;  %1120 = vadd.xlane.f32.xlu1 %v9022_v35  ;;  %15943 = vst [vmem:[#allocation116_spill] sm:$0xff] %v9039_v34  ;;  %v9052_v11 = vsel %vm258_vm2, %v9039_v34, 0.0  ;;  %v822_v38 = vsel %vm258_vm2, %v9056_v36, 0.0 }
 0x20a   : > { %v9032_v43 = vpop.xlane.xlu1 %1264  ;;  %1118 = vadd.xlane.f32.xlu0 %v9029_v26  ;;  %15944 = vst [vmem:[#allocation117_spill] sm:$0xff] %v9043_v54  ;;  %15946 = vst [vmem:[#allocation119_spill] sm:$0xff] %v9056_v36  ;;  %v9062_v44 = vsel %vm258_vm2, %v9043_v54, 0.0 }
 0x20b   : > { %15941 = vst [vmem:[#allocation114_spill] sm:$0xff] %v9032_v43  ;;  %v9035_v20 = vpop.xlane.xlu0 %1262  ;;  %v9077_v43 = vsub.f32 %v9039_v34, %v9052_v11  ;;  %v9085_v45 = vsub.f32 %v9043_v54, %v9062_v44  ;;  %v9097_v34 = vsub.f32 %v9056_v36, %v822_v38 }
 0x20c   : > { %15942 = vst [vmem:[#allocation115_spill] sm:$0xff] %v9035_v20 }
 0x20d   : > { %1312 = vadd.xlane.f32.xlu1 %v1203_v18  ;;  %v823_v18 = vsel %vm258_vm2, %v9047_v22, 0.0 }
 0x20e   : > { %v957_v53 = vpop.xlane.xlu1 %956  ;;  %1310 = vadd.xlane.f32.xlu0 %v1202_v10  ;;  %v1207_v54 = vmul.f32 %v823_v18, %v823_v18 }
 0x20f   : > { %v955_v50 = vpop.xlane.xlu0 %954 }
 0x211   : > { %1004 = vadd.xlane.f32.xlu1 %v9052_v11 }
 0x212   : > { %v953_v39 = vpop.xlane.xlu1 %952  ;;  %1002 = vadd.xlane.f32.xlu0 %v9062_v44 }
 0x213   : > { %v951_v42 = vpop.xlane.xlu0 %950 }
 0x215   : > { %1000 = vadd.xlane.f32.xlu1 %v823_v18 }
 0x216   : > { %v1085_v40 = vpop.xlane.xlu1 %1084  ;;  %998 = vadd.xlane.f32.xlu0 %v822_v38 }
 0x217   : > { %v9073_v10 = vsel %vm258_vm2, %v957_v53, %v1085_v40  ;;  %v1083_v20 = vpop.xlane.xlu0 %1082  ;;  %v9094_v40 = vsub.f32 %v9047_v22, %v823_v18 }
 0x218   : > { %15947 = vst [vmem:[#allocation120_spill] sm:$0xff] %v9073_v10  ;;  %v9081_v7 = vsel %vm258_vm2, %v955_v50, %v1083_v20 }
 0x219   : > { %15948 = vst [vmem:[#allocation121_spill] sm:$0xff] %v9081_v7  ;;  %1132 = vadd.xlane.f32.xlu1 %v9077_v43  ;;  %v1206_v7 = vmul.f32 %v822_v38, %v822_v38 }
 0x21a   : > { %v9088_v3 = vpop.xlane.xlu1 %1276  ;;  %1130 = vadd.xlane.f32.xlu0 %v9085_v45 }
 0x21b   : > { %15949 = vst [vmem:[#allocation122_spill] sm:$0xff] %v9088_v3  ;;  %v9091_v53 = vpop.xlane.xlu0 %1274 }
 0x21c   : > { %15950 = vst [vmem:[#allocation123_spill] sm:$0xff] %v9091_v53  ;;  %v9108_v53 = vld [vmem:[%s15412_s4] ss:$0 sm:$0xff] }
 0x21d   : > { %1128 = vadd.xlane.f32.xlu1 %v9094_v40  ;;  %v9112_v36 = vadd.f32 %v9108_v53, %v8705_v41 }
 0x21e   : > { %v1081_v20 = vpop.xlane.xlu1 %1080  ;;  %1126 = vadd.xlane.f32.xlu0 %v9097_v34 }
 0x21f   : > { %v9103_v50 = vsel %vm258_vm2, %v953_v39, %v1081_v20  ;;  %v1079_v3 = vpop.xlane.xlu0 %1078  ;;  %15952 = vst [vmem:[#allocation125_spill] sm:$0xff] %v9112_v36  ;;  %v9120_v39 = vadd.f32 %v9108_v53, %v8698_v33  ;;  %v9133_v41 = vsel %vm258_vm2, %v9112_v36, 0.0 }
 0x220   : > { %15951 = vst [vmem:[#allocation124_spill] sm:$0xff] %v9103_v50  ;;  %v9116_v22 = vsel %vm258_vm2, %v951_v42, %v1079_v3  ;;  %v9128_v50 = vadd.f32 %v9108_v53, %v8714_v32  ;;  %v9137_v3 = vadd.f32 %v9108_v53, %v8703_v2 }
 0x221   : > { %15953 = vst [vmem:[#allocation126_spill] sm:$0xff] %v9116_v22  ;;  %15954 = vst [vmem:[#allocation127_spill] sm:$0xff] %v9120_v39  ;;  %1320 = vadd.xlane.f32.xlu1 %v1207_v54  ;;  %v9143_v33 = vsel %vm258_vm2, %v9120_v39, 0.0 }
 0x222   : > { %v9122_v18 = vpop.xlane.xlu1 %1272  ;;  %1318 = vadd.xlane.f32.xlu0 %v1206_v7  ;;  %15957 = vst [vmem:[#allocation130_spill] sm:$0xff] %v9128_v50  ;;  %15958 = vst [vmem:[#allocation131_spill] sm:$0xff] %v9137_v3  ;;  %v9149_v54 = vsel %vm258_vm2, %v9128_v50, 0.0  ;;  %v9155_v2 = vsel %vm258_vm2, %v9137_v3, 0.0 }
 0x223   : > { %15955 = vst [vmem:[#allocation128_spill] sm:$0xff] %v9122_v18  ;;  %v9124_v20 = vpop.xlane.xlu0 %1270  ;;  %v9164_v18 = vsub.f32 %v9120_v39, %v9143_v33  ;;  %v9174_v58 = vsub.f32 %v9128_v50, %v9149_v54 }
 0x224   : > { %15956 = vst [vmem:[#allocation129_spill] sm:$0xff] %v9124_v20  ;;  %v9160_v20 = vsub.f32 %v9112_v36, %v9133_v41  ;;  %v9178_v36 = vadd.f32 %v9108_v53, %v8761_v15 }
 0x225   : > { %1012 = vadd.xlane.f32.xlu1 %v9133_v41  ;;  %15960 = vst [vmem:[#allocation133_spill] sm:$0xff] %v9164_v18 }
 0x226   : > { %v965_v7 = vpop.xlane.xlu1 %964  ;;  %1010 = vadd.xlane.f32.xlu0 %v9143_v33  ;;  %15959 = vst [vmem:[#allocation132_spill] sm:$0xff] %v9160_v20  ;;  %15962 = vst [vmem:[#allocation135_spill] sm:$0xff] %v9178_v36 }
 0x227   : > { %v963_v32 = vpop.xlane.xlu0 %962 }
 0x229   : > { %1008 = vadd.xlane.f32.xlu1 %v9149_v54 }
 0x22a   : > { %v961_v42 = vpop.xlane.xlu1 %960  ;;  %1006 = vadd.xlane.f32.xlu0 %v9155_v2 }
 0x22b   : > { %v959_v38 = vpop.xlane.xlu0 %958 }
 0x22d   : > { %1140 = vadd.xlane.f32.xlu1 %v9160_v20 }
 0x22e   : > { %v1093_v22 = vpop.xlane.xlu1 %1092  ;;  %1138 = vadd.xlane.f32.xlu0 %v9164_v18  ;;  %v9186_v18 = vsub.f32 %v9137_v3, %v9155_v2 }
 0x22f   : > { %v9170_v10 = vsel %vm258_vm2, %v965_v7, %v1093_v22  ;;  %v1091_v57 = vpop.xlane.xlu0 %1090  ;;  %v9190_v22 = vadd.f32 %v9108_v53, %v8753_v8  ;;  %v9209_v8 = vadd.f32 %v9108_v53, %v8759_v28 }
 0x230   : > { %15961 = vst [vmem:[#allocation134_spill] sm:$0xff] %v9170_v10  ;;  %v9182_v39 = vsel %vm258_vm2, %v963_v32, %v1091_v57  ;;  %15964 = vst [vmem:[#allocation137_spill] sm:$0xff] %v9186_v18  ;;  %v9200_v57 = vadd.f32 %v9108_v53, %v8763_v56  ;;  %v9205_v32 = vsel %vm258_vm2, %v9178_v36, 0.0 }
 0x231   : > { %15963 = vst [vmem:[#allocation136_spill] sm:$0xff] %v9182_v39  ;;  %15965 = vst [vmem:[#allocation138_spill] sm:$0xff] %v9190_v22  ;;  %1136 = vadd.xlane.f32.xlu1 %v9174_v58  ;;  %v9235_v39 = vsel %vm258_vm2, %v9209_v8, 0.0 }
 0x232   : > { %v9193_v7 = vpop.xlane.xlu1 %1284  ;;  %1134 = vadd.xlane.f32.xlu0 %v9186_v18  ;;  %15968 = vst [vmem:[#allocation141_spill] sm:$0xff] %v9200_v57  ;;  %15969 = vst [vmem:[#allocation142_spill] sm:$0xff] %v9209_v8  ;;  %v9229_v28 = vsel %vm258_vm2, %v9200_v57, 0.0 }
 0x233   : > { %15966 = vst [vmem:[#allocation139_spill] sm:$0xff] %v9193_v7  ;;  %v9196_v15 = vpop.xlane.xlu0 %1282  ;;  %v9215_v7 = vsel %vm258_vm2, %v9190_v22, 0.0 }
 0x234   : > { %15967 = vst [vmem:[#allocation140_spill] sm:$0xff] %v9196_v15 }
 0x235   : > { %1020 = vadd.xlane.f32.xlu1 %v9205_v32 }
 0x236   : > { %v1089_v15 = vpop.xlane.xlu1 %1088  ;;  %1018 = vadd.xlane.f32.xlu0 %v9215_v7 }
 0x237   : > { %v9220_v56 = vsel %vm258_vm2, %v961_v42, %v1089_v15  ;;  %v1087_v3 = vpop.xlane.xlu0 %1086 }
 0x238   : > { %15970 = vst [vmem:[#allocation143_spill] sm:$0xff] %v9220_v56  ;;  %v9224_v50 = vsel %vm258_vm2, %v959_v38, %v1087_v3  ;;  %v9244_v3 = vsub.f32 %v9178_v36, %v9205_v32  ;;  %v9248_v38 = vsub.f32 %v9190_v22, %v9215_v7  ;;  %v9262_v36 = vsub.f32 %v9209_v8, %v9235_v39 }
 0x239   : > { %15971 = vst [vmem:[#allocation144_spill] sm:$0xff] %v9224_v50  ;;  %1016 = vadd.xlane.f32.xlu1 %v9229_v28  ;;  %v9266_v22 = vadd.f32 %v9108_v53, %v8805_v60  ;;  %v9281_v8 = vadd.f32 %v9108_v53, %v8807_v48 }
 0x23a   : > { %v9237_v10 = vpop.xlane.xlu1 %1280  ;;  %1014 = vadd.xlane.f32.xlu0 %v9235_v39  ;;  %15974 = vst [vmem:[#allocation147_spill] sm:$0xff] %v9244_v3  ;;  %15975 = vst [vmem:[#allocation148_spill] sm:$0xff] %v9248_v38 }
 0x23b   : > { %15972 = vst [vmem:[#allocation145_spill] sm:$0xff] %v9237_v10  ;;  %v9240_v42 = vpop.xlane.xlu0 %1278  ;;  %v9254_v10 = vsub.f32 %v9200_v57, %v9229_v28  ;;  %15978 = vst [vmem:[#allocation151_spill] sm:$0xff] %v9262_v36  ;;  %v9272_v57 = vadd.f32 %v9108_v53, %v8818_v14  ;;  %v9287_v60 = vsel %vm258_vm2, %v9266_v22, 0.0 }
 0x23c   : > { %15973 = vst [vmem:[#allocation146_spill] sm:$0xff] %v9240_v42  ;;  %v9258_v42 = vadd.f32 %v9108_v53, %v8809_v4  ;;  %15979 = vst [vmem:[#allocation152_spill] sm:$0xff] %v9266_v22  ;;  %v834_v53 = vsel %vm258_vm2, %v9281_v8, 0.0 }
 0x23d   : > { %1148 = vadd.xlane.f32.xlu1 %v9244_v3  ;;  %15976 = vst [vmem:[#allocation149_spill] sm:$0xff] %v9254_v10  ;;  %15980 = vst [vmem:[#allocation153_spill] sm:$0xff] %v9272_v57  ;;  %v835_v48 = vsel %vm258_vm2, %v9272_v57, 0.0 }
 0x23e   : > { %v973_v15 = vpop.xlane.xlu1 %972  ;;  %1146 = vadd.xlane.f32.xlu0 %v9248_v38  ;;  %15977 = vst [vmem:[#allocation150_spill] sm:$0xff] %v9258_v42  ;;  %v9277_v4 = vsel %vm258_vm2, %v9258_v42, 0.0  ;;  %15981 = vst [vmem:[#allocation154_spill] sm:$0xff] %v9281_v8 }
 0x23f   : > { %v971_v50 = vpop.xlane.xlu0 %970 }
 0x241   : > { %1144 = vadd.xlane.f32.xlu1 %v9254_v10 }
 0x242   : > { %v969_v56 = vpop.xlane.xlu1 %968  ;;  %1142 = vadd.xlane.f32.xlu0 %v9262_v36 }
 0x243   : > { %v967_v38 = vpop.xlane.xlu0 %966 }
 0x245   : > { %1028 = vadd.xlane.f32.xlu1 %v9277_v4 }
 0x246   : > { %v1101_v3 = vpop.xlane.xlu1 %1100  ;;  %1026 = vadd.xlane.f32.xlu0 %v9287_v60 }
 0x247   : > { %v9292_v14 = vsel %vm258_vm2, %v973_v15, %v1101_v3  ;;  %v1099_v36 = vpop.xlane.xlu0 %1098  ;;  %v9310_v3 = vsub.f32 %v9258_v42, %v9277_v4 }
 0x248   : > { %15982 = vst [vmem:[#allocation155_spill] sm:$0xff] %v9292_v14  ;;  %v9296_v10 = vsel %vm258_vm2, %v971_v50, %v1099_v36  ;;  %v9314_v36 = vsub.f32 %v9266_v22, %v9287_v60  ;;  %v9330_v22 = vsub.f32 %v9281_v8, %v834_v53 }
 0x249   : > { %15983 = vst [vmem:[#allocation156_spill] sm:$0xff] %v9296_v10  ;;  %1024 = vadd.xlane.f32.xlu1 %v835_v48 }
 0x24a   : > { %v9304_v20 = vpop.xlane.xlu1 %1292  ;;  %1022 = vadd.xlane.f32.xlu0 %v834_v53 }
 0x24b   : > { %15984 = vst [vmem:[#allocation157_spill] sm:$0xff] %v9304_v20  ;;  %v9306_v18 = vpop.xlane.xlu0 %1290 }
 0x24c   : > { %15985 = vst [vmem:[#allocation158_spill] sm:$0xff] %v9306_v18  ;;  %v9323_v18 = vsub.f32 %v9272_v57, %v835_v48  ;;  %v1211_v57 = vmul.f32 %v9149_v54, %v9149_v54 }
 0x24d   : > { %1156 = vadd.xlane.f32.xlu1 %v9310_v3 }
 0x24e   : > { %v1097_v50 = vpop.xlane.xlu1 %1096  ;;  %1154 = vadd.xlane.f32.xlu0 %v9314_v36 }
 0x24f   : > { %v9320_v15 = vsel %vm258_vm2, %v969_v56, %v1097_v50  ;;  %v1095_v20 = vpop.xlane.xlu0 %1094  ;;  %v1209_v56 = vmul.f32 %v9052_v11, %v9052_v11  ;;  %v1208_v50 = vmul.f32 %v9062_v44, %v9062_v44  ;;  %v1213_v11 = vmul.f32 %v9133_v41, %v9133_v41 }
 0x250   : > { %v9327_v42 = vsel %vm258_vm2, %v967_v38, %v1095_v20  ;;  %v1212_v44 = vmul.f32 %v9143_v33, %v9143_v33  ;;  %v1214_v41 = vmul.f32 %v9235_v39, %v9235_v39 }
 0x251   : > { %1152 = vadd.xlane.f32.xlu1 %v9323_v18 }
 0x252   : > { %v9333_v10 = vpop.xlane.xlu1 %1288  ;;  %1150 = vadd.xlane.f32.xlu0 %v9330_v22 }
 0x253   : > { %15986 = vst [vmem:[#allocation159_spill] sm:$0xff] %v9333_v10  ;;  %v9336_v14 = vpop.xlane.xlu0 %1286  ;;  %v1210_v10 = vmul.f32 %v9155_v2, %v9155_v2  ;;  %v1215_v2 = vmul.f32 %v9229_v28, %v9229_v28 }
 0x254   : > { %15987 = vst [vmem:[#allocation160_spill] sm:$0xff] %v9336_v14 }
 0x255   : > { %1324 = vadd.xlane.f32.xlu1 %v1209_v56 }
 0x256   : > { %v981_v20 = vpop.xlane.xlu1 %980  ;;  %1322 = vadd.xlane.f32.xlu0 %v1208_v50 }
 0x257   : > { %v979_v38 = vpop.xlane.xlu0 %978 }
 0x259   : > { %1328 = vadd.xlane.f32.xlu1 %v1211_v57 }
 0x25a   : > { %v977_v8 = vpop.xlane.xlu1 %976  ;;  %1326 = vadd.xlane.f32.xlu0 %v1210_v10 }
 0x25b   : > { %v975_v14 = vpop.xlane.xlu0 %974 }
 0x25d   : > { %1332 = vadd.xlane.f32.xlu1 %v1213_v11  ;;  %v1216_v11 = vmul.f32 %v9215_v7, %v9215_v7  ;;  %v1221_v7 = vmul.f32 %v9277_v4, %v9277_v4 }
 0x25e   : > { %v1109_v56 = vpop.xlane.xlu1 %1108  ;;  %1330 = vadd.xlane.f32.xlu0 %v1212_v44  ;;  %v1219_v44 = vmul.f32 %v835_v48, %v835_v48 }
 0x25f   : > { %v9352_v50 = vsel %vm258_vm2, %v981_v20, %v1109_v56  ;;  %v1107_v54 = vpop.xlane.xlu0 %1106  ;;  %v1217_v20 = vmul.f32 %v9205_v32, %v9205_v32 }
 0x260   : > { %v9358_v10 = vsel %vm258_vm2, %v979_v38, %v1107_v54  ;;  %v1218_v54 = vmul.f32 %v834_v53, %v834_v53  ;;  %v1350_v53 = vmul.f32 %v8309_v63, %v8309_v63 }
 0x261   : > { %1336 = vadd.xlane.f32.xlu1 %v1215_v2 }
 0x262   : > { %v9362_v33 = vpop.xlane.xlu1 %1300  ;;  %1334 = vadd.xlane.f32.xlu0 %v1214_v41 }
 0x263   : > { %15988 = vst [vmem:[#allocation161_spill] sm:$0xff] %v9362_v33  ;;  %v9364_v57 = vpop.xlane.xlu0 %1298 }
 0x264   : > { %15989 = vst [vmem:[#allocation162_spill] sm:$0xff] %v9364_v57  ;;  %v16039_v57 = vld [vmem:[#allocation58_spill] sm:$0xff] }
 0x265   : > { %1340 = vadd.xlane.f32.xlu1 %v1217_v20  ;;  %v9659_v33 = vmul.f32 0.015625, %v16039_v57 }
 0x266   : > { %v1105_v28 = vpop.xlane.xlu1 %1104  ;;  %1338 = vadd.xlane.f32.xlu0 %v1216_v11  ;;  %v1353_v11 = vmul.f32 %v8296_v52, %v8296_v52 }
 0x267   : > { %v9372_v38 = vsel %vm258_vm2, %v977_v8, %v1105_v28  ;;  %v1103_v39 = vpop.xlane.xlu0 %1102  ;;  %v1220_v8 = vmul.f32 %v9287_v60, %v9287_v60  ;;  %v1352_v60 = vmul.f32 %v8292_v49, %v8292_v49 }
 0x268   : > { %v9376_v56 = vsel %vm258_vm2, %v975_v14, %v1103_v39  ;;  %v1351_v14 = vmul.f32 %v8306_v61, %v8306_v61  ;;  %v1355_v61 = vmul.f32 %v8366_v25, %v8366_v25 }
 0x269   : > { %1344 = vadd.xlane.f32.xlu1 %v1219_v44  ;;  %v1354_v44 = vmul.f32 %v8371_v27, %v8371_v27  ;;  %v7549_v27 = vld [vmem:[%s15410_s2] sm:$0xff]  }
 0x26a   : > { %v9378_v2 = vpop.xlane.xlu1 %1296  ;;  %1342 = vadd.xlane.f32.xlu0 %v1218_v54  ;;  %v1357_v54 = vmul.f32 %v8350_v17, %v8350_v17  ;;  %7281 = vmatprep.subr.bf16.mxu1 %v7549_v27 }
 0x26b   : > { %15990 = vst [vmem:[#allocation163_spill] sm:$0xff] %v9378_v2  ;;  %v9380_v32 = vpop.xlane.xlu0 %1294  ;;  %7282 = vmatpush3.bf16.msra.mxu1 %v7549_v27 }
 0x26c   : > { %15991 = vst [vmem:[#allocation164_spill] sm:$0xff] %v9380_v32  ;;  %v16041_v32 = vld [vmem:[#allocation60_spill] sm:$0xff] }
 0x26d   : > { %1348 = vadd.xlane.f32.xlu1 %v1221_v7  ;;  %v1356_v7 = vmul.f32 %v8355_v19, %v8355_v19  ;;  %v9662_v2 = vmul.f32 0.015625, %v16041_v32  ;;  %v9701_v32 = vmul.f32 %v9659_v33, %v9659_v33 }
 0x26e   : > { %v989_v41 = vpop.xlane.xlu1 %988  ;;  %1346 = vadd.xlane.f32.xlu0 %v1220_v8 }
 0x26f   : > { %v987_v48 = vpop.xlane.xlu0 %986  ;;  %16059 = vst [vmem:[#allocation58_spill] sm:$0xff] %v9701_v32 }
 0x271   : > { %1416 = vadd.xlane.f32.xlu1 %v1351_v14 }
 0x272   : > { %v985_v20 = vpop.xlane.xlu1 %984  ;;  %1414 = vadd.xlane.f32.xlu0 %v1350_v53 }
 0x273   : > { %v983_v4 = vpop.xlane.xlu0 %982 }
 0x275   : > { %1420 = vadd.xlane.f32.xlu1 %v1353_v11 }
 0x276   : > { %v1117_v28 = vpop.xlane.xlu1 %1116  ;;  %1418 = vadd.xlane.f32.xlu0 %v1352_v60  ;;  %v7551_v60 = vld [vmem:[%s15410_s2 + $0x10] sm:$0xff]  }
 0x277   : > { %v9398_v39 = vsel %vm258_vm2, %v989_v41, %v1117_v28  ;;  %v1115_v63 = vpop.xlane.xlu0 %1114  ;;  %v1359_v41 = vmul.f32 %v8430_v62, %v8430_v62  ;;  %v7550_v62 = vld [vmem:[%s15410_s2 + $0x8] sm:$0xff]   ;;  %v1363_v28 = vmul.f32 %v8486_v9, %v8486_v9  ;;  %v1364_v9 = vmul.f32 %v8473_v6, %v8473_v6 }
 0x278   : > { %v9404_v52 = vsel %vm258_vm2, %v987_v48, %v1115_v63  ;;  %v1358_v48 = vmul.f32 %v8435_v1, %v8435_v1  ;;  %v1360_v1 = vmul.f32 %v8419_v55, %v8419_v55  ;;  %7283 = vmatprep.subr.bf16.mxu1 %v7550_v62  ;;  %v7552_v63 = vld [vmem:[%s15410_s2 + $0x18] sm:$0xff]   ;;  %v1366_v6 = vmul.f32 %v8541_v5, %v8541_v5  ;;  %v15999_v5 = vld [vmem:[#allocation23_spill] sm:$0xff] }
 0x279   : > { %1424 = vadd.xlane.f32.xlu1 %v1355_v61  ;;  %7284 = vmatpush3.bf16.msra.mxu1 %v7550_v62 }
 0x27a   : > { %v9406_v49 = vpop.xlane.xlu1 %1308  ;;  %1422 = vadd.xlane.f32.xlu0 %v1354_v44  ;;  %7285 = vmatprep.subr.bf16.mxu1 %v7551_v60  ;;  %v1365_v44 = vmul.f32 %v8470_v31, %v8470_v31 }
 0x27b   : > { %15992 = vst [vmem:[#allocation165_spill] sm:$0xff] %v9406_v49  ;;  %v9410_v25 = vpop.xlane.xlu0 %1306 }
 0x27c   : > { %15993 = vst [vmem:[#allocation166_spill] sm:$0xff] %v9410_v25 }
 0x27d   : > { %1428 = vadd.xlane.f32.xlu1 %v1357_v54  ;;  %7286 = vmatpush3.bf16.msra.mxu1 %v7551_v60  ;;  %v7555_v60 = vld [vmem:[%s15410_s2 + $0x30] sm:$0xff]  }
 0x27e   : > { %v1113_v8 = vpop.xlane.xlu1 %1112  ;;  %1426 = vadd.xlane.f32.xlu0 %v1356_v7  ;;  %7287 = vmatprep.subr.bf16.mxu1 %v7552_v63  ;;  %v7553_v7 = vld [vmem:[%s15410_s2 + $0x20] sm:$0xff]  }
 0x27f   : > { %v9421_v14 = vsel %vm258_vm2, %v985_v20, %v1113_v8  ;;  %v1111_v17 = vpop.xlane.xlu0 %1110  ;;  %v1361_v20 = vmul.f32 %v8414_v51, %v8414_v51  ;;  %v1362_v51 = vmul.f32 %v8489_v13, %v8489_v13  ;;  %v1367_v8 = vmul.f32 %v8538_v12, %v8538_v12  ;;  %v7554_v12 = vld [vmem:[%s15410_s2 + $0x28] sm:$0xff]  }
 0x280   : > { %v9427_v19 = vsel %vm258_vm2, %v983_v4, %v1111_v17 }
 0x281   : > { %1432 = vadd.xlane.f32.xlu1 %v1359_v41  ;;  %7288 = vmatpush3.bf16.msra.mxu1 %v7552_v63 }
 0x282   : > { %v9429_v53 = vpop.xlane.xlu1 %1304  ;;  %1430 = vadd.xlane.f32.xlu0 %v1358_v48  ;;  %7289 = vmatprep.subr.bf16.mxu1 %v7553_v7  ;;  %v15997_v48 = vld [vmem:[#allocation22_spill] sm:$0xff] }
 0x283   : > { %15994 = vst [vmem:[#allocation167_spill] sm:$0xff] %v9429_v53  ;;  %v9436_v11 = vpop.xlane.xlu0 %1302  ;;  %v1369_v62 = vmul.f32 %v15997_v48, %v15997_v48 }
 0x284   : > { %15995 = vst [vmem:[#allocation168_spill] sm:$0xff] %v9436_v11  ;;  %v1400_v11 = vmul.f32 %v9085_v45, %v9085_v45 }
 0x285   : > { %1436 = vadd.xlane.f32.xlu1 %v1361_v20  ;;  %7290 = vmatpush3.bf16.msra.mxu1 %v7553_v7 }
 0x286   : > { %v997_v4 = vpop.xlane.xlu1 %996  ;;  %1434 = vadd.xlane.f32.xlu0 %v1360_v1  ;;  %v1368_v1 = vmul.f32 %v15999_v5, %v15999_v5  ;;  %7291 = vmatprep.subr.bf16.mxu1 %v7554_v12 }
 0x287   : > { %v995_v61 = vpop.xlane.xlu0 %994 }
 0x289   : > { %1440 = vadd.xlane.f32.xlu1 %v1363_v28  ;;  %7292 = vmatpush3.bf16.msra.mxu1 %v7554_v12  ;;  %v16000_v28 = vld [vmem:[#allocation30_spill] sm:$0xff]  ;;  %v16005_v12 = vld [vmem:[#allocation29_spill] sm:$0xff] }
 0x28a   : > { %v993_v55 = vpop.xlane.xlu1 %992  ;;  %1438 = vadd.xlane.f32.xlu0 %v1362_v51  ;;  %7293 = vmatprep.subr.bf16.mxu1 %v7555_v60  ;;  %v1372_v48 = vmul.f32 %v16005_v12, %v16005_v12 }
 0x28b   : > { %v991_v54 = vpop.xlane.xlu0 %990 }
 0x28d   : > { %1444 = vadd.xlane.f32.xlu1 %v1365_v44  ;;  %v16001_v44 = vld [vmem:[#allocation31_spill] sm:$0xff]  ;;  %7294 = vmatpush3.bf16.msra.mxu1 %v7555_v60 }
 0x28e   : > { %v1125_v13 = vpop.xlane.xlu1 %1124  ;;  %1442 = vadd.xlane.f32.xlu0 %v1364_v9  ;;  %v1370_v9 = vmul.f32 %v16001_v44, %v16001_v44 }
 0x28f   : > { %v9461_v27 = vsel %vm258_vm2, %v997_v4, %v1125_v13  ;;  %v1123_v31 = vpop.xlane.xlu0 %1122 }
 0x290   : > { %v9467_v41 = vsel %vm258_vm2, %v995_v61, %v1123_v31  ;;  %v1371_v61 = vmul.f32 %v16000_v28, %v16000_v28 }
 0x291   : > { %1448 = vadd.xlane.f32.xlu1 %v1367_v8  ;;  %v7556_v8 = vld [vmem:[%s15410_s2 + $0x38] sm:$0xff]  }
 0x292   : > { %v9469_v17 = vpop.xlane.xlu1 %1316  ;;  %1446 = vadd.xlane.f32.xlu0 %v1366_v6  ;;  %7295 = vmatprep.subr.bf16.mxu1 %v7556_v8 }
 0x293   : > { %15996 = vst [vmem:[#allocation169_spill] sm:$0xff] %v9469_v17  ;;  %v9476_v20 = vpop.xlane.xlu0 %1314  ;;  %7296 = vmatpush3.bf16.msra.mxu1 %v7556_v8  ;;  %v16024_v17 = vld [vmem:[#allocation42_spill] sm:$0xff] }
 0x294   : > { %15998 = vst [vmem:[#allocation22_spill] sm:$0xff] %v9476_v20 }
 0x295   : > { %1452 = vadd.xlane.f32.xlu1 %v1369_v62  ;;  %v16006_v62 = vld [vmem:[#allocation43_spill] sm:$0xff] }
 0x296   : > { %v1121_v4 = vpop.xlane.xlu1 %1120  ;;  %1450 = vadd.xlane.f32.xlu0 %v1368_v1  ;;  %v1375_v5 = vmul.f32 %v16006_v62, %v16006_v62 }
 0x297   : > { %v9487_v51 = vsel %vm258_vm2, %v993_v55, %v1121_v4  ;;  %v1119_v63 = vpop.xlane.xlu0 %1118  ;;  %v16003_v55 = vld [vmem:[#allocation28_spill] sm:$0xff]  ;;  %v16007_v4 = vld [vmem:[#allocation45_spill] sm:$0xff] }
 0x298   : > { %v9493_v13 = vsel %vm258_vm2, %v991_v54, %v1119_v63  ;;  %v1373_v31 = vmul.f32 %v16003_v55, %v16003_v55  ;;  %v1374_v60 = vmul.f32 %v16007_v4, %v16007_v4 }
 0x299   : > { %1456 = vadd.xlane.f32.xlu1 %v1371_v61  ;;  %v16008_v61 = vld [vmem:[#allocation39_spill] sm:$0xff] }
 0x29a   : > { %v9495_v7 = vpop.xlane.xlu1 %1312  ;;  %1454 = vadd.xlane.f32.xlu0 %v1370_v9  ;;  %v1377_v63 = vmul.f32 %v16008_v61, %v16008_v61  ;;  %v16009_v9 = vld [vmem:[#allocation40_spill] sm:$0xff] }
 0x29b   : > { %16002 = vst [vmem:[#allocation23_spill] sm:$0xff] %v9495_v7  ;;  %v9502_v6 = vpop.xlane.xlu0 %1310  ;;  %v1376_v55 = vmul.f32 %v16009_v9, %v16009_v9  ;;  %v16030_v7 = vld [vmem:[#allocation54_spill] sm:$0xff] }
 0x29c   : > { %16004 = vst [vmem:[#allocation30_spill] sm:$0xff] %v9502_v6  ;;  %v9626_v25 = vmul.f32 0.015625, %v16030_v7  ;;  %v16049_v7 = vld [vmem:[#allocation68_spill] sm:$0xff] }
 0x29d   : > { %1460 = vadd.xlane.f32.xlu1 %v1373_v31  ;;  %v16010_v31 = vld [vmem:[#allocation59_spill] sm:$0xff] }
 0x29e   : > { %v1005_v54 = vpop.xlane.xlu1 %1004  ;;  %1458 = vadd.xlane.f32.xlu0 %v1372_v48  ;;  %v1379_v12 = vmul.f32 %v16010_v31, %v16010_v31  ;;  %16031 = vst [vmem:[#allocation59_spill] sm:$0xff] %v9626_v25 }
 0x29f   : > { %v1003_v1 = vpop.xlane.xlu0 %1002 }
 0x2a1   : > { %1464 = vadd.xlane.f32.xlu1 %v1375_v5  ;;  %v16011_v5 = vld [vmem:[#allocation61_spill] sm:$0xff] }
 0x2a2   : > { %v1001_v28 = vpop.xlane.xlu1 %1000  ;;  %1462 = vadd.xlane.f32.xlu0 %v1374_v60  ;;  %v1378_v4 = vmul.f32 %v16011_v5, %v16011_v5 }
 0x2a3   : > { %v999_v44 = vpop.xlane.xlu0 %998 }
 0x2a5   : > { %1468 = vadd.xlane.f32.xlu1 %v1377_v63  ;;  %v16012_v63 = vld [vmem:[#allocation53_spill] sm:$0xff] }
 0x2a6   : > { %v1133_v8 = vpop.xlane.xlu1 %1132  ;;  %1466 = vadd.xlane.f32.xlu0 %v1376_v55  ;;  %v1381_v9 = vmul.f32 %v16012_v63, %v16012_v63  ;;  %v16017_v63 = vld [vmem:[#allocation77_spill] sm:$0xff] }
 0x2a7   : > { %v9518_v48 = vsel %vm258_vm2, %v1005_v54, %v1133_v8  ;;  %v1131_v62 = vpop.xlane.xlu0 %1130  ;;  %v16013_v8 = vld [vmem:[#allocation55_spill] sm:$0xff]  ;;  %16040 = vst [vmem:[#allocation77_spill] sm:$0xff] %v9659_v33 }
 0x2a8   : > { %v9524_v60 = vsel %vm258_vm2, %v1003_v1, %v1131_v62  ;;  %v1380_v31 = vmul.f32 %v16013_v8, %v16013_v8  ;;  %v16016_v62 = vld [vmem:[#allocation75_spill] sm:$0xff] }
 0x2a9   : > { %1472 = vadd.xlane.f32.xlu1 %v1379_v12  ;;  %v16067_v33 = vld [vmem:[#allocation147_spill] sm:$0xff] }
 0x2aa   : > { %v1129_v61 = vpop.xlane.xlu1 %1128  ;;  %1470 = vadd.xlane.f32.xlu0 %v1378_v4  ;;  %v1383_v4 = vmul.f32 %v16016_v62, %v16016_v62 }
 0x2ab   : > { %v9530_v55 = vsel %vm258_vm2, %v1001_v28, %v1129_v61  ;;  %v1127_v54 = vpop.xlane.xlu0 %1126  ;;  %v1382_v28 = vmul.f32 %v16017_v63, %v16017_v63  ;;  %v1386_v63 = vmul.f32 %v8893_v21, %v8893_v21  ;;  %v1391_v21 = vmul.f32 %v8954_v0, %v8954_v0 }
 0x2ac   : > { %v9536_v5 = vsel %vm258_vm2, %v999_v44, %v1127_v54  ;;  %v16018_v44 = vld [vmem:[#allocation69_spill] sm:$0xff]  ;;  %v16019_v54 = vld [vmem:[#allocation71_spill] sm:$0xff] }
 0x2ad   : > { %1476 = vadd.xlane.f32.xlu1 %v1381_v9  ;;  %v1385_v9 = vmul.f32 %v16018_v44, %v16018_v44  ;;  %16042 = vst [vmem:[#allocation69_spill] sm:$0xff] %v9662_v2 }
 0x2ae   : > { %v9538_v1 = vpop.xlane.xlu1 %1320  ;;  %1474 = vadd.xlane.f32.xlu0 %v1380_v31  ;;  %v1384_v31 = vmul.f32 %v16019_v54, %v16019_v54  ;;  %v1388_v54 = vmul.f32 %v8873_v30, %v8873_v30  ;;  %v1393_v30 = vmul.f32 %v8934_v46, %v8934_v46 }
 0x2af   : > { %16014 = vst [vmem:[#allocation31_spill] sm:$0xff] %v9538_v1  ;;  %v9540_v12 = vpop.xlane.xlu0 %1318 }
 0x2b0   : > { %16015 = vst [vmem:[#allocation28_spill] sm:$0xff] %v9540_v12 }
 0x2b1   : > { %1480 = vadd.xlane.f32.xlu1 %v1383_v4  ;;  %v1387_v4 = vmul.f32 %v8886_v23, %v8886_v23 }
 0x2b2   : > { %v9546_v61 = vpop.xlane.xlu1 %1012  ;;  %1478 = vadd.xlane.f32.xlu0 %v1382_v28 }
 0x2b3   : > { %v9548_v8 = vpop.xlane.xlu0 %1010 }
 0x2b5   : > { %1484 = vadd.xlane.f32.xlu1 %v1385_v9  ;;  %v1389_v9 = vmul.f32 %v8866_v47, %v8866_v47 }
 0x2b6   : > { %v9554_v12 = vpop.xlane.xlu1 %1008  ;;  %1482 = vadd.xlane.f32.xlu0 %v1384_v31 }
 0x2b7   : > { %v9556_v62 = vpop.xlane.xlu0 %1006 }
 0x2b9   : > { %1488 = vadd.xlane.f32.xlu1 %v1387_v4  ;;  %v1390_v4 = vmul.f32 %v8961_v16, %v8961_v16  ;;  %v1395_v16 = vmul.f32 %v9022_v35, %v9022_v35  ;;  %v16020_v35 = vld [vmem:[#allocation36_spill] sm:$0xff] }
 0x2ba   : > { %v9562_v28 = vpop.xlane.xlu1 %1140  ;;  %1486 = vadd.xlane.f32.xlu0 %v1386_v63  ;;  %v9605_v1 = vmul.f32 0.015625, %v16020_v35 }
 0x2bb   : > { %v9564_v44 = vpop.xlane.xlu0 %1138 }
 0x2bc   : > { %16021 = vst [vmem:[#allocation29_spill] sm:$0xff] %v9605_v1 }
 0x2bd   : > { %1492 = vadd.xlane.f32.xlu1 %v1389_v9  ;;  %v1392_v9 = vmul.f32 %v8941_v24, %v8941_v24  ;;  %v1397_v24 = vmul.f32 %v9002_v29, %v9002_v29  ;;  %v9615_v29 = vmul.f32 0.015625, %v16024_v17  ;;  %v9632_v17 = vmul.f32 %v9605_v1, %v9605_v1 }
 0x2be   : > { %v9570_v31 = vpop.xlane.xlu1 %1136  ;;  %1490 = vadd.xlane.f32.xlu0 %v1388_v54 }
 0x2bf   : > { %v9572_v23 = vpop.xlane.xlu0 %1134  ;;  %16025 = vst [vmem:[#allocation45_spill] sm:$0xff] %v9615_v29  ;;  %16033 = vst [vmem:[#allocation53_spill] sm:$0xff] %v9632_v17  ;;  %v16066_v17 = vld [vmem:[#allocation151_spill] sm:$0xff] }
 0x2c1   : > { %1496 = vadd.xlane.f32.xlu1 %v1391_v21  ;;  %v1394_v21 = vmul.f32 %v9029_v26, %v9029_v26 }
 0x2c2   : > { %v9578_v63 = vpop.xlane.xlu1 %1020  ;;  %1494 = vadd.xlane.f32.xlu0 %v1390_v4 }
 0x2c3   : > { %v9580_v47 = vpop.xlane.xlu0 %1018 }
 0x2c5   : > { %1500 = vadd.xlane.f32.xlu1 %v1393_v30  ;;  %v1396_v30 = vmul.f32 %v9009_v59, %v9009_v59  ;;  %v1398_v59 = vmul.f32 %v9097_v34, %v9097_v34  ;;  %v16055_v34 = vld [vmem:[#allocation74_spill] sm:$0xff] }
 0x2c6   : > { %v9586_v54 = vpop.xlane.xlu1 %1016  ;;  %1498 = vadd.xlane.f32.xlu0 %v1392_v9 }
 0x2c7   : > { %v9588_v0 = vpop.xlane.xlu0 %1014 }
 0x2c9   : > { %1504 = vadd.xlane.f32.xlu1 %v1395_v16  ;;  %v1399_v16 = vmul.f32 %v9094_v40, %v9094_v40 }
 0x2ca   : > { %v9594_v4 = vpop.xlane.xlu1 %1148  ;;  %1502 = vadd.xlane.f32.xlu0 %v1394_v21  ;;  %v16022_v21 = vld [vmem:[#allocation37_spill] sm:$0xff] }
 0x2cb   : > { %v9596_v46 = vpop.xlane.xlu0 %1146  ;;  %v9612_v20 = vmul.f32 0.015625, %v16022_v21 }
 0x2cd   : > { %1508 = vadd.xlane.f32.xlu1 %v1397_v24  ;;  %16023 = vst [vmem:[#allocation43_spill] sm:$0xff] %v9612_v20  ;;  %v16026_v24 = vld [vmem:[#allocation44_spill] sm:$0xff] }
 0x2ce   : > { %v9602_v9 = vpop.xlane.xlu1 %1144  ;;  %1506 = vadd.xlane.f32.xlu0 %v1396_v30  ;;  %v9620_v6 = vmul.f32 0.015625, %v16026_v24  ;;  %v16028_v30 = vld [vmem:[#allocation52_spill] sm:$0xff]  ;;  %v9642_v24 = vmul.f32 %v9612_v20, %v9612_v20  ;;  %v9674_v20 = vmul.f32 %v9626_v25, %v9626_v25  ;;  %v16058_v25 = vld [vmem:[#allocation133_spill] sm:$0xff] }
 0x2cf   : > { %v9607_v26 = vpop.xlane.xlu0 %1142  ;;  %v9623_v35 = vmul.f32 0.015625, %v16028_v30  ;;  %v16052_v30 = vld [vmem:[#allocation137_spill] sm:$0xff] }
 0x2d0   : > { %16027 = vst [vmem:[#allocation39_spill] sm:$0xff] %v9620_v6  ;;  %16036 = vst [vmem:[#allocation75_spill] sm:$0xff] %v9642_v24  ;;  %v1402_v21 = vmul.f32 %v16052_v30, %v16052_v30  ;;  %v16062_v30 = vld [vmem:[#allocation76_spill] sm:$0xff] }
 0x2d1   : > { %1512 = vadd.xlane.f32.xlu1 %v1399_v16  ;;  %16029 = vst [vmem:[#allocation40_spill] sm:$0xff] %v9623_v35  ;;  %v1401_v16 = vmul.f32 %v9077_v43, %v9077_v43  ;;  %v9656_v43 = vmul.f32 %v9620_v6, %v9620_v6  ;;  %v9668_v45 = vmul.f32 %v9623_v35, %v9623_v35  ;;  %16046 = vst [vmem:[#allocation36_spill] sm:$0xff] %v9674_v20  ;;  %v16053_v35 = vld [vmem:[#allocation70_spill] sm:$0xff]  ;;  %v16082_v24 = vld [vmem:[#allocation88_spill] sm:$0xff] }
 0x2d2   : > { %v9628_v40 = vpop.xlane.xlu1 %1028  ;;  %1510 = vadd.xlane.f32.xlu0 %v1398_v59  ;;  %v9648_v59 = vmul.f32 %v9615_v29, %v9615_v29  ;;  %v9681_v29 = vmul.f32 0.015625, %v16049_v7  ;;  %v1403_v6 = vmul.f32 %v9174_v58, %v9174_v58  ;;  %v9690_v53 = vmul.f32 0.015625, %v16053_v35 }
 0x2d3   : > { %16032 = vst [vmem:[#allocation61_spill] sm:$0xff] %v9628_v40  ;;  %v9636_v49 = vpop.xlane.xlu0 %1026  ;;  %16044 = vst [vmem:[#allocation71_spill] sm:$0xff] %v9668_v45  ;;  %v9693_v20 = vmul.f32 0.015625, %v16055_v34  ;;  %v1404_v7 = vmul.f32 %v16058_v25, %v16058_v25  ;;  %v9707_v35 = vmul.f32 %v9662_v2, %v9662_v2  ;;  %v9710_v34 = vmul.f32 0.015625, %v16062_v30  ;;  %v16065_v25 = vld [vmem:[#allocation149_spill] sm:$0xff] }
 0x2d4   : > { %16035 = vst [vmem:[#allocation55_spill] sm:$0xff] %v9636_v49  ;;  %16050 = vst [vmem:[#allocation42_spill] sm:$0xff] %v9681_v29  ;;  %v1407_v32 = vmul.f32 %v16065_v25, %v16065_v25  ;;  %v1406_v45 = vmul.f32 %v16066_v17, %v16066_v17  ;;  %v1409_v58 = vmul.f32 %v16067_v33, %v16067_v33  ;;  %v9757_v40 = vmul.f32 0.015625, %v16082_v24  ;;  %v16084_v49 = vld [vmem:[#allocation89_spill] sm:$0xff]  ;;  %v16086_v33 = vld [vmem:[#allocation96_spill] sm:$0xff] }
 0x2d5   : > { %1516 = vadd.xlane.f32.xlu1 %v1401_v16  ;;  %16054 = vst [vmem:[#allocation52_spill] sm:$0xff] %v9690_v53  ;;  %16056 = vst [vmem:[#allocation54_spill] sm:$0xff] %v9693_v20  ;;  %v9724_v30 = vmul.f32 %v9681_v29, %v9681_v29  ;;  %v9737_v17 = vmul.f32 %v9690_v53, %v9690_v53  ;;  %v9760_v53 = vmul.f32 0.015625, %v16084_v49 }
 0x2d6   : > { %v9676_v57 = vpop.xlane.xlu1 %1024  ;;  %1514 = vadd.xlane.f32.xlu0 %v1400_v11  ;;  %v16057_v11 = vld [vmem:[#allocation132_spill] sm:$0xff]  ;;  %16061 = vst [vmem:[#allocation60_spill] sm:$0xff] %v9707_v35  ;;  %16063 = vst [vmem:[#allocation68_spill] sm:$0xff] %v9710_v34  ;;  %v16077_v35 = vld [vmem:[#allocation85_spill] sm:$0xff] }
 0x2d7   : > { %16047 = vst [vmem:[#allocation37_spill] sm:$0xff] %v9676_v57  ;;  %v9683_v1 = vpop.xlane.xlu0 %1022  ;;  %v1405_v16 = vmul.f32 %v16057_v11, %v16057_v11  ;;  %16068 = vst [vmem:[#allocation137_spill] sm:$0xff] %v9724_v30  ;;  %v16073_v11 = vld [vmem:[#allocation148_spill] sm:$0xff]  ;;  %v9743_v30 = vmul.f32 %v9693_v20, %v9693_v20  ;;  %v9746_v29 = vmul.f32 0.015625, %v16077_v35  ;;  %v9763_v35 = vmul.f32 0.015625, %v16086_v33 }
 0x2d8   : > { %16051 = vst [vmem:[#allocation44_spill] sm:$0xff] %v9683_v1  ;;  %v16070_v1 = vld [vmem:[#allocation84_spill] sm:$0xff]  ;;  %v1408_v25 = vmul.f32 %v16073_v11, %v16073_v11  ;;  %16074 = vst [vmem:[#allocation132_spill] sm:$0xff] %v9737_v17  ;;  %v9752_v11 = vmul.f32 %v9710_v34, %v9710_v34  ;;  %v1410_v20 = vmul.f32 %v9330_v22, %v9330_v22 }
 0x2d9   : > { %1520 = vadd.xlane.f32.xlu1 %v1403_v6  ;;  %v9729_v2 = vmul.f32 0.015625, %v16070_v1  ;;  %16076 = vst [vmem:[#allocation133_spill] sm:$0xff] %v9743_v30  ;;  %16078 = vst [vmem:[#allocation76_spill] sm:$0xff] %v9746_v29  ;;  %v1411_v6 = vmul.f32 %v9323_v18, %v9323_v18  ;;  %v9782_v33 = vmul.f32 %v9310_v3, %v9310_v3  ;;  %v16100_v22 = vld [vmem:[#allocation108_spill] sm:$0xff] }
 0x2da   : > { %v9714_v57 = vpop.xlane.xlu1 %1156  ;;  %1518 = vadd.xlane.f32.xlu0 %v1402_v21  ;;  %16080 = vst [vmem:[#allocation149_spill] sm:$0xff] %v9752_v11  ;;  %16083 = vst [vmem:[#allocation151_spill] sm:$0xff] %v9757_v40  ;;  %v9792_v1 = vmul.f32 %v9746_v29, %v9746_v29  ;;  %v9801_v3 = vmul.f32 %v9757_v40, %v9757_v40  ;;  %v9813_v34 = vmul.f32 %v9760_v53, %v9760_v53 }
 0x2db   : > { %16071 = vst [vmem:[#allocation70_spill] sm:$0xff] %v9729_v2  ;;  %v9731_v21 = vpop.xlane.xlu0 %1154  ;;  %16085 = vst [vmem:[#allocation147_spill] sm:$0xff] %v9760_v53  ;;  %v9773_v24 = vmul.f32 %v9729_v2, %v9729_v2  ;;  %v9809_v2 = vmul.f32 0.015625, %v16100_v22  ;;  %v9819_v29 = vmul.f32 %v9763_v35, %v9763_v35  ;;  %v16110_v53 = vld [vmem:[#allocation112_spill] sm:$0xff] }
 0x2dc   : > { %16072 = vst [vmem:[#allocation74_spill] sm:$0xff] %v9731_v21  ;;  %16087 = vst [vmem:[#allocation84_spill] sm:$0xff] %v9763_v35  ;;  %v16095_v21 = vld [vmem:[#allocation100_spill] sm:$0xff] }
 0x2dd   : > { %1524 = vadd.xlane.f32.xlu1 %v1405_v16  ;;  %16089 = vst [vmem:[#allocation85_spill] sm:$0xff] %v9773_v24  ;;  %v16090_v16 = vld [vmem:[#allocation97_spill] sm:$0xff]  ;;  %v9797_v24 = vmul.f32 0.015625, %v16095_v21  ;;  %16101 = vst [vmem:[#allocation100_spill] sm:$0xff] %v9809_v2  ;;  %v9835_v21 = vmul.f32 0.015625, %v16110_v53  ;;  %v16117_v22 = vld [vmem:[#allocation120_spill] sm:$0xff] }
 0x2de   : > { %v9765_v30 = vpop.xlane.xlu1 %1152  ;;  %1522 = vadd.xlane.f32.xlu0 %v1404_v7  ;;  %v9776_v17 = vmul.f32 0.015625, %v16090_v16  ;;  %v9786_v7 = vmul.f32 %v9314_v36, %v9314_v36  ;;  %v16104_v16 = vld [vmem:[#allocation109_spill] sm:$0xff]  ;;  %v16133_v53 = vld [vmem:[#allocation134_spill] sm:$0xff] }
 0x2df   : > { %16088 = vst [vmem:[#allocation148_spill] sm:$0xff] %v9765_v30  ;;  %v9778_v49 = vpop.xlane.xlu0 %1150  ;;  %16096 = vst [vmem:[#allocation96_spill] sm:$0xff] %v9797_v24  ;;  %v9822_v11 = vmul.f32 0.015625, %v16104_v16  ;;  %v9841_v16 = vmul.f32 %v9797_v24, %v9797_v24  ;;  %v16122_v36 = vld [vmem:[#allocation121_spill] sm:$0xff] }
 0x2e0   : > { %16091 = vst [vmem:[#allocation88_spill] sm:$0xff] %v9776_v17  ;;  %16092 = vst [vmem:[#allocation89_spill] sm:$0xff] %v9778_v49  ;;  %v16098_v49 = vld [vmem:[#allocation101_spill] sm:$0xff]  ;;  %v9830_v40 = vmul.f32 %v9776_v17, %v9776_v17  ;;  %v9859_v17 = vmul.f32 %v9809_v2, %v9809_v2  ;;  %v16131_v2 = vld [vmem:[#allocation126_spill] sm:$0xff] }
 0x2e1   : > { %v9806_v30 = vmul.f32 0.015625, %v16098_v49  ;;  %1528 = vadd.xlane.f32.xlu1 %v1407_v32  ;;  %16103 = vst [vmem:[#allocation101_spill] sm:$0xff] %v9819_v29  ;;  %16105 = vst [vmem:[#allocation108_spill] sm:$0xff] %v9822_v11  ;;  %v16115_v32 = vld [vmem:[#allocation113_spill] sm:$0xff] }
 0x2e2   : > { %v9824_v49 = vpop.xlane.xlu1 %1324  ;;  %1526 = vadd.xlane.f32.xlu0 %v1406_v45  ;;  %16108 = vst [vmem:[#allocation170_spill] sm:$0xff] %v9830_v40  ;;  %16111 = vst [vmem:[#allocation112_spill] sm:$0xff] %v9835_v21  ;;  %v9846_v35 = vmul.f32 0.015625, %v16115_v32  ;;  %v9849_v40 = vmul.f32 0.015625, %v16117_v22  ;;  %v9868_v22 = vmul.f32 %v9822_v11, %v9822_v11  ;;  %v9884_v32 = vmul.f32 0.015625, %v16131_v2 }
 0x2e3   : > { %16099 = vst [vmem:[#allocation97_spill] sm:$0xff] %v9806_v30  ;;  %16106 = vst [vmem:[#allocation109_spill] sm:$0xff] %v9824_v49  ;;  %v9837_v29 = vpop.xlane.xlu0 %1322  ;;  %v9853_v18 = vmul.f32 %v9806_v30, %v9806_v30  ;;  %v16138_v49 = vld [vmem:[#allocation136_spill] sm:$0xff] }
 0x2e4   : > { %16112 = vst [vmem:[#allocation171_spill] sm:$0xff] %v9837_v29  ;;  %16113 = vst [vmem:[#allocation172_spill] sm:$0xff] %v9841_v16  ;;  %v9862_v16 = vmul.f32 0.015625, %v16122_v36  ;;  %v9879_v36 = vmul.f32 %v9835_v21, %v9835_v21  ;;  %v9899_v11 = vmul.f32 %v9849_v40, %v9849_v40  ;;  %v9902_v24 = vmul.f32 0.015625, %v16138_v49 }
 0x2e5   : > { %16116 = vst [vmem:[#allocation113_spill] sm:$0xff] %v9846_v35  ;;  %16118 = vst [vmem:[#allocation120_spill] sm:$0xff] %v9849_v40  ;;  %1532 = vadd.xlane.f32.xlu1 %v1409_v58  ;;  %v16147_v40 = vld [vmem:[#allocation155_spill] sm:$0xff]  ;;  %v9953_v58 = vmul.f32 0.015625, %v9320_v15 }
 0x2e6   : > { %16119 = vst [vmem:[#allocation173_spill] sm:$0xff] %v9853_v18  ;;  %16121 = vst [vmem:[#allocation174_spill] sm:$0xff] %v9859_v17  ;;  %v16127_v18 = vld [vmem:[#allocation124_spill] sm:$0xff]  ;;  %v9875_v30 = vpop.xlane.xlu1 %1328  ;;  %1530 = vadd.xlane.f32.xlu0 %v1408_v25  ;;  %v16143_v17 = vld [vmem:[#allocation143_spill] sm:$0xff]  ;;  %v9925_v2 = vmul.f32 0.015625, %v16147_v40 }
 0x2e7   : > { %16123 = vst [vmem:[#allocation121_spill] sm:$0xff] %v9862_v16  ;;  %16125 = vst [vmem:[#allocation175_spill] sm:$0xff] %v9868_v22  ;;  %v9873_v29 = vmul.f32 0.015625, %v16127_v18  ;;  %v9887_v22 = vmul.f32 0.015625, %v16133_v53  ;;  %v9889_v45 = vpop.xlane.xlu0 %1326  ;;  %v9893_v18 = vmul.f32 %v9846_v35, %v9846_v35  ;;  %v16146_v25 = vld [vmem:[#allocation144_spill] sm:$0xff]  ;;  %v16160_v15 = vld [vmem:[#allocation51_spill] sm:$0xff] }
 0x2e8   : > { %16129 = vst [vmem:[#allocation176_spill] sm:$0xff] %v9875_v30  ;;  %16132 = vst [vmem:[#allocation126_spill] sm:$0xff] %v9884_v32  ;;  %v9922_v53 = vmul.f32 0.015625, %v16146_v25  ;;  %v16151_v35 = vld [vmem:[#allocation156_spill] sm:$0xff]  ;;  %v9976_v40 = vmul.f32 %v9925_v2, %v9925_v2 }
 0x2e9   : > { %16128 = vst [vmem:[#allocation124_spill] sm:$0xff] %v9873_v29  ;;  %16134 = vst [vmem:[#allocation134_spill] sm:$0xff] %v9887_v22  ;;  %1536 = vadd.xlane.f32.xlu1 %v1411_v6  ;;  %v9917_v30 = vmul.f32 %v9873_v29, %v9873_v29  ;;  %v9940_v25 = vmul.f32 0.015625, %v16151_v35  ;;  %v9962_v6 = vmul.f32 0.015625, %v9327_v42 }
 0x2ea   : > { %16135 = vst [vmem:[#allocation177_spill] sm:$0xff] %v9889_v45  ;;  %16136 = vst [vmem:[#allocation178_spill] sm:$0xff] %v9893_v18  ;;  %v9908_v45 = vmul.f32 %v9862_v16, %v9862_v16  ;;  %v9913_v18 = vmul.f32 0.015625, %v16143_v17  ;;  %1534 = vadd.xlane.f32.xlu0 %v1410_v20  ;;  %v9931_v17 = vmul.f32 %v9884_v32, %v9884_v32 }
 0x2eb   : > { %16139 = vst [vmem:[#allocation136_spill] sm:$0xff] %v9902_v24  ;;  %16148 = vst [vmem:[#allocation144_spill] sm:$0xff] %v9925_v2  ;;  %v9937_v16 = vmul.f32 %v9887_v22, %v9887_v22  ;;  %v9942_v21 = vpop.xlane.xlu0 %1330  ;;  %v9948_v20 = vmul.f32 %v9902_v24, %v9902_v24  ;;  %v9970_v49 = vmul.f32 %v9922_v53, %v9922_v53  ;;  %v10007_v2 = vmul.f32 0.015625, %v9398_v39 }
 0x2ec   : > { %16141 = vst [vmem:[#allocation179_spill] sm:$0xff] %v9908_v45  ;;  %16144 = vst [vmem:[#allocation143_spill] sm:$0xff] %v9913_v18  ;;  %v9927_v45 = vpop.xlane.xlu1 %1332  ;;  %v9957_v32 = vmul.f32 %v9913_v18, %v9913_v18  ;;  %v9988_v24 = vmul.f32 %v9940_v25, %v9940_v25  ;;  %v9993_v18 = vmul.f32 0.015625, %v9372_v38  ;;  %v10011_v29 = vmul.f32 %v9962_v6, %v9962_v6 }
 0x2ed   : > { %16149 = vst [vmem:[#allocation155_spill] sm:$0xff] %v9927_v45  ;;  %16152 = vst [vmem:[#allocation156_spill] sm:$0xff] %v9940_v25  ;;  %v9965_v45 = vmul.f32 0.015625, %v9352_v50  ;;  %1540 = vadd.xlane.f32.xlu1 %v9782_v33  ;;  %v10004_v33 = vmul.f32 0.015625, %v9376_v56  ;;  %v10020_v25 = vmul.f32 0.015625, %v9404_v52  ;;  %v10029_v22 = vmul.f32 0.015625, %v9421_v14 }
 0x2ee   : > { %16153 = vst [vmem:[#allocation180_spill] sm:$0xff] %v9942_v21  ;;  %16156 = vst [vmem:[#allocation181_spill] sm:$0xff] %v9953_v58  ;;  %v9979_v21 = vmul.f32 0.015625, %v9358_v10  ;;  %1538 = vadd.xlane.f32.xlu0 %v9786_v7  ;;  %v9999_v10 = vmul.f32 %v9953_v58, %v9953_v58  ;;  %v10032_v58 = vmul.f32 0.015625, %v9427_v19  ;;  %v10040_v52 = vmul.f32 %v9993_v18, %v9993_v18 }
 0x2ef   : > { %16158 = vst [vmem:[#allocation182_spill] sm:$0xff] %v9962_v6  ;;  %16159 = vst [vmem:[#allocation183_spill] sm:$0xff] %v9965_v45  ;;  %v9995_v35 = vpop.xlane.xlu0 %1334  ;;  %v10017_v50 = vmul.f32 %v9965_v45, %v9965_v45  ;;  %v10046_v45 = vmul.f32 0.015625, %v9467_v41  ;;  %v10060_v7 = vmul.f32 %v10007_v2, %v10007_v2  ;;  %v10071_v19 = vmul.f32 0.015625, %v9487_v51 }
 0x2f0   : > { %16161 = vst [vmem:[#allocation51_spill] sm:$0xff] %v9979_v21  ;;  %v9981_v42 = vpop.xlane.xlu1 %1336  ;;  %16165 = vst [vmem:[#allocation185_spill] sm:$0xff] %v9993_v18  ;;  %v10026_v39 = vmul.f32 %v9979_v21, %v9979_v21  ;;  %v10075_v21 = vmul.f32 %v10029_v22, %v10029_v22  ;;  %v10081_v41 = vmul.f32 %v10032_v58, %v10032_v58 }
 0x2f1   : > { %16162 = vst [vmem:[#allocation184_spill] sm:$0xff] %v9981_v42  ;;  %16166 = vst [vmem:[#allocation186_spill] sm:$0xff] %v9995_v35  ;;  %v10043_v42 = vmul.f32 0.015625, %v9461_v27  ;;  %v10098_v6 = vmul.f32 %v10046_v45, %v10046_v45  ;;  %v1597_v51 = vsel %vm258_vm2, %v9546_v61, %v9562_v28  ;;  %v1596_v38 = vsel %vm258_vm2, %v9548_v8, %v9564_v44 }
 0x2f2   : > { %16168 = vst [vmem:[#allocation187_spill] sm:$0xff] %v10004_v33  ;;  %16169 = vst [vmem:[#allocation188_spill] sm:$0xff] %v10007_v2  ;;  %v10084_v2 = vmul.f32 0.015625, %v9493_v13  ;;  %v10103_v13 = vmul.f32 0.015625, %v9518_v48  ;;  %v10120_v48 = vmul.f32 %v10071_v19, %v10071_v19  ;;  %v10132_v28 = vmul.f32 0.015625, %v9536_v5 }
 0x2f3   : > { %16171 = vst [vmem:[#allocation189_spill] sm:$0xff] %v10020_v25  ;;  %16173 = vst [vmem:[#allocation190_spill] sm:$0xff] %v10029_v22  ;;  %v10048_v14 = vpop.xlane.xlu0 %1338  ;;  %v1595_v8 = vsel %vm258_vm2, %v9554_v12, %v9570_v31  ;;  %v1594_v44 = vsel %vm258_vm2, %v9556_v62, %v9572_v23  ;;  %v1601_v5 = vsel %vm258_vm2, %v9578_v63, %v9594_v4  ;;  %v16212_v62 = vld [vmem:[#allocation46_spill] sm:$0xff] }
 0x2f4   : > { %16174 = vst [vmem:[#allocation191_spill] sm:$0xff] %v10032_v58  ;;  %v10034_v35 = vpop.xlane.xlu1 %1340  ;;  %16177 = vst [vmem:[#allocation193_spill] sm:$0xff] %v10043_v42  ;;  %v10129_v61 = vmul.f32 %v10084_v2, %v10084_v2  ;;  %v10158_v31 = vmul.f32 %v10103_v13, %v10103_v13  ;;  %v10172_v63 = vmul.f32 0.015625, %v1595_v8  ;;  %v10174_v4 = vmul.f32 0.015625, %v1594_v44  ;;  %v16273_v58 = vld [vmem:[#allocation29_spill] sm:$0xff] }
 0x2f5   : > { %16175 = vst [vmem:[#allocation192_spill] sm:$0xff] %v10034_v35  ;;  %16178 = vst [vmem:[#allocation194_spill] sm:$0xff] %v10046_v45  ;;  %v10054_v35 = vmul.f32 %v10004_v33, %v10004_v33  ;;  %v10125_v33 = vmul.f32 0.015625, %v9530_v55  ;;  %v10146_v45 = vmul.f32 0.015625, %v1597_v51  ;;  %v1600_v23 = vsel %vm258_vm2, %v9580_v47, %v9596_v46 }
 0x2f6   : > { %16179 = vst [vmem:[#allocation195_spill] sm:$0xff] %v10048_v14  ;;  %v10066_v14 = vmul.f32 %v10020_v25, %v10020_v25  ;;  %16184 = vst [vmem:[#allocation196_spill] sm:$0xff] %v10071_v19  ;;  %v10092_v25 = vmul.f32 %v10043_v42, %v10043_v42  ;;  %v10148_v42 = vmul.f32 0.015625, %v1596_v38  ;;  %v10188_v38 = vmul.f32 0.015625, %v1601_v5 }
 0x2f7   : > { %16186 = vst [vmem:[#allocation197_spill] sm:$0xff] %v10084_v2  ;;  %v10100_v22 = vpop.xlane.xlu0 %1342  ;;  %16191 = vst [vmem:[#allocation200_spill] sm:$0xff] %v10103_v13  ;;  %v10192_v44 = vmul.f32 %v10146_v45, %v10146_v45  ;;  %v10212_v47 = vmul.f32 %v10172_v63, %v10172_v63 }
 0x2f8   : > { %v10086_v27 = vpop.xlane.xlu1 %1344  ;;  %16190 = vst [vmem:[#allocation199_spill] sm:$0xff] %v10100_v22  ;;  %16195 = vst [vmem:[#allocation202_spill] sm:$0xff] %v10125_v33  ;;  %v10198_v46 = vmul.f32 %v10148_v42, %v10148_v42 }
 0x2f9   : > { %16187 = vst [vmem:[#allocation198_spill] sm:$0xff] %v10086_v27  ;;  %v10106_v27 = vmul.f32 0.015625, %v9524_v60  ;;  %16196 = vst [vmem:[#allocation203_spill] sm:$0xff] %v10132_v28  ;;  %v16215_v60 = vld [vmem:[#allocation47_spill] sm:$0xff] }
 0x2fa   : > { %16199 = vst [vmem:[#allocation205_spill] sm:$0xff] %v10146_v45  ;;  %16200 = vst [vmem:[#allocation206_spill] sm:$0xff] %v10148_v42 }
 0x2fb   : > { %16192 = vst [vmem:[#allocation201_spill] sm:$0xff] %v10106_v27  ;;  %v10154_v12 = vpop.xlane.xlu0 %1346  ;;  %v10164_v51 = vmul.f32 %v10106_v27, %v10106_v27  ;;  %16204 = vst [vmem:[#allocation208_spill] sm:$0xff] %v10172_v63  ;;  %v16220_v63 = vld [vmem:[#allocation41_spill] sm:$0xff] }
 0x2fc   : > { %v10142_v56 = vpop.xlane.xlu1 %1348  ;;  %16201 = vst [vmem:[#allocation207_spill] sm:$0xff] %v10154_v12  ;;  %16205 = vst [vmem:[#allocation209_spill] sm:$0xff] %v10174_v4  ;;  %v10184_v12 = vmul.f32 %v10132_v28, %v10132_v28  ;;  %v10205_v28 = vmul.f32 0.015625, %v1600_v23 }
 0x2fd   : > { %16197 = vst [vmem:[#allocation204_spill] sm:$0xff] %v10142_v56  ;;  %v10170_v56 = vmul.f32 %v10125_v33, %v10125_v33  ;;  %16208 = vst [vmem:[#allocation210_spill] sm:$0xff] %v10188_v38 }
 0x2fe   : > { %16209 = vst [vmem:[#allocation211_spill] sm:$0xff] %v10192_v44  ;;  %16211 = vst [vmem:[#allocation212_spill] sm:$0xff] %v10198_v46 }
 0x2ff   : > { %v1415_v13 = vpop.xlane.xlu0 %1414  ;;  %16214 = vst [vmem:[#allocation46_spill] sm:$0xff] %v10205_v28 }
 0x300   : > { %v1417_v8 = vpop.xlane.xlu1 %1416  ;;  %v1670_v2 = vsel %vm258_vm2, %v16215_v60, %v1415_v13  ;;  %v1599_v13 = vsel %vm258_vm2, %v9586_v54, %v9602_v9  ;;  %v10243_v54 = vmul.f32 %v10205_v28, %v10205_v28  ;;  %v16232_v28 = vld [vmem:[#allocation148_spill] sm:$0xff] }
 0x301   : > { %v1671_v33 = vsel %vm258_vm2, %v16212_v62, %v1417_v8  ;;  %v10218_v62 = vmul.f32 %v10174_v4, %v10174_v4  ;;  %v1734_v8 = vmul.f32 0.015625, %v1670_v2  ;;  %v1598_v2 = vsel %vm258_vm2, %v9588_v0, %v9607_v26 }
 0x302   : > { %v1735_v22 = vmul.f32 0.015625, %v1671_v33  ;;  %v10224_v33 = vmul.f32 %v10188_v38, %v10188_v38  ;;  %16221 = vst [vmem:[#allocation41_spill] sm:$0xff] %v10243_v54  ;;  %v10250_v26 = vmul.f32 0.015625, %v1599_v13  ;;  %v10252_v42 = vmul.f32 0.015625, %v1598_v2  ;;  %v16228_v54 = vld [vmem:[#allocation74_spill] sm:$0xff]  ;;  %v16230_v13 = vld [vmem:[#allocation53_spill] sm:$0xff] }
 0x303   : > { %v1862_v27 = vsub.f32 %v1734_v8, %v9656_v43  ;;  %v1419_v4 = vpop.xlane.xlu0 %1418  ;;  %v16233_v38 = vld [vmem:[#allocation37_spill] sm:$0xff] }
 0x304   : > { %16218 = vst [vmem:[#allocation47_spill] sm:$0xff] %v10224_v33  ;;  %v1863_v60 = vsub.f32 %v1735_v22, %v9648_v59  ;;  %v1421_v19 = vpop.xlane.xlu1 %1420  ;;  %v16222_v22 = vld [vmem:[#allocation38_spill] sm:$0xff]  ;;  %16225 = vst [vmem:[#allocation213_spill] sm:$0xff] %v10252_v42 }
 0x305   : > { %v1673_v45 = vsel %vm258_vm2, %v16220_v63, %v1421_v19  ;;  %v1672_v5 = vsel %vm258_vm2, %v16222_v22, %v1419_v4  ;;  %16224 = vst [vmem:[#allocation38_spill] sm:$0xff] %v10250_v26  ;;  %v1990_v43 = vadd.f32 1e-05, %v1862_v27  ;;  %v16226_v19 = vld [vmem:[#allocation61_spill] sm:$0xff]  ;;  %v16229_v4 = vld [vmem:[#allocation55_spill] sm:$0xff] }
 0x306   : > { %v1991_v9 = vadd.f32 1e-05, %v1863_v60  ;;  %v1737_v59 = vmul.f32 0.015625, %v1673_v45  ;;  %v1736_v8 = vmul.f32 0.015625, %v1672_v5  ;;  %v1605_v63 = vsel %vm258_vm2, %v16226_v19, %v9714_v57  ;;  %v16227_v45 = vld [vmem:[#allocation75_spill] sm:$0xff]  ;;  %v16231_v5 = vld [vmem:[#allocation62_spill] sm:$0xff] }
 0x307   : > { %v1604_v22 = vsel %vm258_vm2, %v16229_v4, %v16228_v54  ;;  %v1423_v0 = vpop.xlane.xlu0 %1422  ;;  %v1603_v57 = vsel %vm258_vm2, %v16233_v38, %v16232_v28  ;;  %v16234_v19 = vld [vmem:[#allocation63_spill] sm:$0xff]  ;;  %v10276_v54 = vmul.f32 %v10250_v26, %v10250_v26  ;;  %v16240_v38 = vld [vmem:[#allocation58_spill] sm:$0xff] }
 0x308   : > { %7573 = vrsqrt.f32 %v1991_v9  ;;  %v1865_v60 = vsub.f32 %v1737_v59, %v16227_v45  ;;  %v1425_v23 = vpop.xlane.xlu1 %1424  ;;  %v1864_v27 = vsub.f32 %v1736_v8, %v16230_v13  ;;  %v1674_v45 = vsel %vm258_vm2, %v16234_v19, %v1423_v0  ;;  %v16238_v13 = vld [vmem:[#allocation89_spill] sm:$0xff]  ;;  %v16242_v19 = vld [vmem:[#allocation60_spill] sm:$0xff]  ;;  %v16255_v26 = vld [vmem:[#allocation79_spill] sm:$0xff] }
 0x309   : > { %7575 = vrsqrt.f32 %v1990_v43  ;;  %v1675_v2 = vsel %vm258_vm2, %v16231_v5, %v1425_v23  ;;  %16235 = vst [vmem:[#allocation61_spill] sm:$0xff] %v10276_v54  ;;  %v10278_v43 = vmul.f32 0.015625, %v1605_v63  ;;  %v1738_v23 = vmul.f32 0.015625, %v1674_v45  ;;  %v16239_v5 = vld [vmem:[#allocation44_spill] sm:$0xff] }
 0x30a   : > { %v1993_v9 = vadd.f32 1e-05, %v1865_v60  ;;  %v1739_v59 = vmul.f32 0.015625, %v1675_v2  ;;  %v1992_v8 = vadd.f32 1e-05, %v1864_v27  ;;  %v10280_v4 = vmul.f32 0.015625, %v1604_v22 }
 0x30b   : > { %16236 = vst [vmem:[#allocation75_spill] sm:$0xff] %v10278_v43  ;;  %v1602_v28 = vsel %vm258_vm2, %v16239_v5, %v16238_v13  ;;  %v10287_v0 = vmul.f32 0.015625, %v1603_v57  ;;  %v1866_v33 = vsub.f32 %v1738_v23, %v16242_v19  ;;  %v16243_v63 = vld [vmem:[#allocation56_spill] sm:$0xff]  ;;  %v1427_v22 = vpop.xlane.xlu0 %1426  ;;  %v16245_v13 = vld [vmem:[#allocation57_spill] sm:$0xff]  ;;  %v10300_v57 = vmul.f32 %v10252_v42, %v10252_v42  ;;  %v16251_v19 = vld [vmem:[#allocation71_spill] sm:$0xff] }
 0x30c   : > { %16237 = vst [vmem:[#allocation74_spill] sm:$0xff] %v10280_v4  ;;  %7577 = vrsqrt.f32 %v1993_v9  ;;  %v1867_v60 = vsub.f32 %v1739_v59, %v16240_v38  ;;  %v1429_v2 = vpop.xlane.xlu1 %1428  ;;  %v1676_v9 = vsel %vm258_vm2, %v16245_v13, %v1427_v22  ;;  %v10302_v59 = vmul.f32 0.015625, %v1602_v28  ;;  %v16254_v13 = vld [vmem:[#allocation78_spill] sm:$0xff] }
 0x30d   : > { %16241 = vst [vmem:[#allocation55_spill] sm:$0xff] %v10287_v0  ;;  %7579 = vrsqrt.f32 %v1992_v8  ;;  %v1677_v27 = vsel %vm258_vm2, %v16243_v63, %v1429_v2  ;;  %16246 = vst [vmem:[#allocation53_spill] sm:$0xff] %v10300_v57  ;;  %v1994_v8 = vadd.f32 1e-05, %v1866_v33  ;;  %v1740_v23 = vmul.f32 0.015625, %v1676_v9  ;;  %v16253_v33 = vld [vmem:[#allocation36_spill] sm:$0xff] }
 0x30e   : > { %v1995_v54 = vadd.f32 1e-05, %v1867_v60  ;;  %v1741_v46 = vmul.f32 0.015625, %v1677_v27  ;;  %16247 = vst [vmem:[#allocation62_spill] sm:$0xff] %v10302_v59  ;;  %v10308_v2 = vmul.f32 %v10278_v43, %v10278_v43  ;;  %v10312_v60 = vmul.f32 %v10280_v4, %v10280_v4  ;;  %v10344_v5 = vld [vmem:[%s15412_s4 + $0x2] ss:$0 sm:$0xff] }
 0x30f   : > { %v10317_v28 = vmul.f32 %v10287_v0, %v10287_v0  ;;  %7581 = vrsqrt.f32 %v1994_v8  ;;  %v1868_v22 = vsub.f32 %v1740_v23, %v16253_v33  ;;  %v1431_v55 = vpop.xlane.xlu0 %1430  ;;  %v10333_v23 = vmul.f32 %v10302_v59, %v10302_v59  ;;  %v16267_v59 = vld [vmem:[#allocation73_spill] sm:$0xff]  ;;  %v16272_v57 = vld [vmem:[#allocation2_spill] sm:$0xff] }
 0x310   : > { %16249 = vst [vmem:[#allocation148_spill] sm:$0xff] %v10308_v2  ;;  %16250 = vst [vmem:[#allocation37_spill] sm:$0xff] %v10312_v60  ;;  %v1869_v63 = vsub.f32 %v1741_v46, %v16251_v19  ;;  %v1433_v27 = vpop.xlane.xlu1 %1432  ;;  %7583 = vrsqrt.f32 %v1995_v54  ;;  %v1678_v46 = vsel %vm258_vm2, %v16255_v26, %v1431_v55  ;;  %v10329_v19 = vld [vmem:[%s15412_s4 + $0x1] ss:$0 sm:$0xff]  ;;  %v16258_v54 = vld [vmem:[#allocation45_spill] sm:$0xff] }
 0x311   : > { %16252 = vst [vmem:[#allocation63_spill] sm:$0xff] %v10317_v28  ;;  %v1679_v9 = vsel %vm258_vm2, %v16254_v13, %v1433_v27  ;;  %16256 = vst [vmem:[#allocation89_spill] sm:$0xff] %v10333_v23  ;;  %v1996_v27 = vadd.f32 1e-05, %v1868_v22  ;;  %v1742_v33 = vmul.f32 0.015625, %v1678_v46  ;;  %v16257_v13 = vld [vmem:[#allocation5_spill] sm:$0xff] }
 0x312   : > { %v7574_v38 = vpop.eup %7573  ;;  %v1997_v43 = vadd.f32 1e-05, %v1869_v63  ;;  %v1743_v4 = vmul.f32 0.015625, %v1679_v9  ;;  %v16259_v63 = vsub.f32 %v16257_v13, %v16258_v54  ;;  %v16261_v55 = vld [vmem:[#allocation133_spill] sm:$0xff]  ;;  %v16262_v60 = vld [vmem:[#allocation3_spill] sm:$0xff] }
 0x313   : > { %v7576_v8 = vpop.eup %7575  ;;  %v16263_v2 = vld [vmem:[#allocation39_spill] sm:$0xff]  ;;  %v16265_v23 = vld [vmem:[#allocation149_spill] sm:$0xff] }
 0x314   : > { %v2119_v9 = vmul.f32 %v7574_v38, %v16259_v63  ;;  %7585 = vrsqrt.f32 %v1997_v43  ;;  %v1871_v26 = vsub.f32 %v1743_v4, %v16261_v55  ;;  %v1437_v42 = vpop.xlane.xlu1 %1436  ;;  %v16264_v22 = vsub.f32 %v16262_v60, %v16263_v2  ;;  %v16266_v38 = vld [vmem:[#allocation72_spill] sm:$0xff]  ;;  %v1435_v43 = vpop.xlane.xlu0 %1434 }
 0x315   : > { %7587 = vrsqrt.f32 %v1996_v27  ;;  %v1870_v13 = vsub.f32 %v1742_v33, %v16265_v23  ;;  %v1681_v54 = vsel %vm258_vm2, %v16266_v38, %v1437_v42  ;;  %v1680_v0 = vsel %vm258_vm2, %v16267_v59, %v1435_v43  ;;  %v16268_v33 = vld [vmem:[#allocation4_spill] sm:$0xff] }
 0x316   : > { %v2118_v46 = vmul.f32 %v7576_v8, %v16264_v22  ;;  %v2187_v4 = vmul.f32 %v10329_v19, %v2119_v9  ;;  %v7578_v63 = vpop.eup %7577  ;;  %v1999_v55 = vadd.f32 1e-05, %v1871_v26  ;;  %v1745_v45 = vmul.f32 0.015625, %v1681_v54  ;;  %v16269_v22 = vld [vmem:[#allocation43_spill] sm:$0xff]  ;;  %v16271_v9 = vld [vmem:[#allocation137_spill] sm:$0xff] }
 0x317   : > { %v7580_v60 = vpop.eup %7579  ;;  %v1998_v8 = vadd.f32 1e-05, %v1870_v13  ;;  %v1744_v27 = vmul.f32 0.015625, %v1680_v0  ;;  %v16270_v42 = vsub.f32 %v16268_v33, %v16269_v22  ;;  %v16274_v59 = vsub.f32 %v16272_v57, %v16273_v58  ;;  %v16276_v0 = vld [vmem:[#allocation90_spill] sm:$0xff]  ;;  %v16277_v22 = vld [vmem:[#allocation91_spill] sm:$0xff] }
 0x318   : > { %v2186_v2 = vmul.f32 %v10329_v19, %v2118_v46  ;;  %v2255_v23 = vadd.f32 %v10344_v5, %v2187_v4  ;;  %7589 = vrsqrt.f32 %v1999_v55  ;;  %v1873_v28 = vsub.f32 %v1745_v45, %v16271_v9  ;;  %v1441_v26 = vpop.xlane.xlu1 %1440  ;;  %v16275_v46 = vld [vmem:[#allocation132_spill] sm:$0xff]  ;;  %v1439_v18 = vpop.xlane.xlu0 %1438 }
 0x319   : > { %v2121_v38 = vmul.f32 %v7578_v63, %v16270_v42  ;;  %v2120_v43 = vmul.f32 %v7580_v60, %v16274_v59  ;;  %7591 = vrsqrt.f32 %v1998_v8  ;;  %v1872_v13 = vsub.f32 %v1744_v27, %v16275_v46  ;;  %v7582_v42 = vpop.eup %7581  ;;  %v16279_v59 = vld [vmem:[#allocation69_spill] sm:$0xff] }
 0x31a   : > { %v2254_v54 = vadd.f32 %v10344_v5, %v2186_v2  ;;  %v1683_v4 = vsel %vm258_vm2, %v16276_v0, %v1441_v26  ;;  %v2319_v33 = vmax.f32 %v2255_v23, 0.0  ;;  %v2001_v63 = vadd.f32 1e-05, %v1873_v28  ;;  %v7584_v8 = vpop.eup %7583  ;;  %v16278_v28 = vld [vmem:[#allocation9_spill] sm:$0xff] }
 0x31b   : > { %v1747_v55 = vmul.f32 0.015625, %v1683_v4  ;;  %v1682_v45 = vsel %vm258_vm2, %v16277_v22, %v1439_v18  ;;  %v2000_v9 = vadd.f32 1e-05, %v1872_v13  ;;  %v2188_v57 = vmul.f32 %v10329_v19, %v2120_v43 }
 0x31c   : > { %v2318_v2 = vmax.f32 %v2254_v54, 0.0  ;;  %v1746_v58 = vmul.f32 0.015625, %v1682_v45  ;;  %v2189_v60 = vmul.f32 %v10329_v19, %v2121_v38  ;;  %7593 = vrsqrt.f32 %v2001_v63  ;;  %v1445_v26 = vpop.xlane.xlu1 %1444  ;;  %v16281_v54 = vld [vmem:[#allocation86_spill] sm:$0xff]  ;;  %v1443_v43 = vpop.xlane.xlu0 %1442 }
 0x31d   : > { %v1875_v27 = vsub.f32 %v1747_v55, %v9801_v3  ;;  %v16280_v46 = vsub.f32 %v16278_v28, %v16279_v59  ;;  %7595 = vrsqrt.f32 %v2000_v9  ;;  %v1685_v13 = vsel %vm258_vm2, %v16281_v54, %v1445_v26  ;;  %v16282_v3 = vld [vmem:[#allocation87_spill] sm:$0xff]  ;;  %v16283_v9 = vld [vmem:[#allocation8_spill] sm:$0xff] }
 0x31e   : > { %v2382_v23 = vpack.c.bf16 %v2319_v33, %v2318_v2  ;;  %v1874_v18 = vsub.f32 %v1746_v58, %v9813_v34  ;;  %v2256_v38 = vadd.f32 %v10344_v5, %v2188_v57  ;;  %v7586_v4 = vpop.eup %7585  ;;  %v1749_v22 = vmul.f32 0.015625, %v1685_v13  ;;  %v16284_v58 = vld [vmem:[#allocation77_spill] sm:$0xff]  ;;  %v16287_v13 = vld [vmem:[#allocation102_spill] sm:$0xff] }
 0x31f   : > { %v2122_v0 = vmul.f32 %v7582_v42, %v16280_v46  ;;  %v2003_v63 = vadd.f32 1e-05, %v1875_v27  ;;  %v1684_v33 = vsel %vm258_vm2, %v16282_v3, %v1443_v43  ;;  %v2257_v55 = vadd.f32 %v10344_v5, %v2189_v60  ;;  %v7588_v45 = vpop.eup %7587  ;;  %v16286_v57 = vld [vmem:[#allocation85_spill] sm:$0xff] }
 0x320   : > { %7297 = vmatprep.mubr.bf16.mxu1 %v2382_v23  ;;  %v2002_v2 = vadd.f32 1e-05, %v1874_v18  ;;  %v1748_v34 = vmul.f32 0.015625, %v1684_v33  ;;  %v2320_v42 = vmax.f32 %v2256_v38, 0.0  ;;  %v16285_v26 = vsub.f32 %v16283_v9, %v16284_v58  ;;  %v1449_v27 = vpop.xlane.xlu1 %1448  ;;  %v1447_v18 = vpop.xlane.xlu0 %1446  ;;  %v16289_v9 = vld [vmem:[#allocation172_spill] sm:$0xff] }
 0x321   : > { %7597 = vrsqrt.f32 %v2003_v63  ;;  %v1877_v59 = vsub.f32 %v1749_v22, %v16286_v57  ;;  %v2321_v46 = vmax.f32 %v2257_v55, 0.0  ;;  %v2190_v54 = vmul.f32 %v10329_v19, %v2122_v0  ;;  %v16288_v63 = vld [vmem:[#allocation103_spill] sm:$0xff] }
 0x322   : > { %v2123_v28 = vmul.f32 %v7584_v8, %v16285_v26  ;;  %7599 = vrsqrt.f32 %v2002_v2  ;;  %v1876_v23 = vsub.f32 %v1748_v34, %v9792_v1  ;;  %v1687_v60 = vsel %vm258_vm2, %v16287_v13, %v1449_v27  ;;  %v7590_v38 = vpop.eup %7589  ;;  %v16291_v57 = vld [vmem:[#allocation59_spill] sm:$0xff]  ;;  %v16293_v13 = vld [vmem:[#allocation6_spill] sm:$0xff] }
 0x323   : > { %v2005_v3 = vadd.f32 1e-05, %v1877_v59  ;;  %v1751_v8 = vmul.f32 0.015625, %v1687_v60  ;;  %v1686_v22 = vsel %vm258_vm2, %v16288_v63, %v1447_v18  ;;  %v2383_v33 = vpack.c.bf16 %v2321_v46, %v2320_v42  ;;  %v7592_v55 = vpop.eup %7591  ;;  %v16294_v60 = vld [vmem:[#allocation40_spill] sm:$0xff]  ;;  %v16296_v46 = vld [vmem:[#allocation173_spill] sm:$0xff]  ;;  %v16297_v63 = vld [vmem:[#allocation98_spill] sm:$0xff] }
 0x324   : > { %v2191_v43 = vmul.f32 %v10329_v19, %v2123_v28  ;;  %v2004_v0 = vadd.f32 1e-05, %v1876_v23  ;;  %v1750_v2 = vmul.f32 0.015625, %v1686_v22  ;;  %v2258_v1 = vadd.f32 %v10344_v5, %v2190_v54  ;;  %v1453_v26 = vpop.xlane.xlu1 %1452  ;;  %v16290_v28 = vld [vmem:[#allocation7_spill] sm:$0xff] }
 0x325   : > { %7601 = vrsqrt.f32 %v2005_v3  ;;  %v1879_v58 = vsub.f32 %v1751_v8, %v16289_v9  ;;  %7298 = vmatmul.mubr.bf16.vlgmr.msra.gmra.mrb[0].mxu1 %v2383_v33  ;;  %v16292_v59 = vsub.f32 %v16290_v28, %v16291_v57  ;;  %v16295_v18 = vsub.f32 %v16293_v13, %v16294_v60  ;;  %v16298_v9 = vld [vmem:[#allocation99_spill] sm:$0xff]  ;;  %v16299_v13 = vld [vmem:[#allocation101_spill] sm:$0xff] }
 0x326   : > { %v2259_v34 = vadd.f32 %v10344_v5, %v2191_v43  ;;  %7603 = vrsqrt.f32 %v2004_v0  ;;  %v1878_v23 = vsub.f32 %v1750_v2, %v16296_v46  ;;  %v1689_v54 = vsel %vm258_vm2, %v16297_v63, %v1453_v26  ;;  %v1451_v43 = vpop.xlane.xlu0 %1450  ;;  %v7594_v8 = vpop.eup %7593 }
 0x327   : > { %v2124_v27 = vmul.f32 %v7588_v45, %v16292_v59  ;;  %v2125_v42 = vmul.f32 %v7586_v4, %v16295_v18  ;;  %v2322_v3 = vmax.f32 %v2258_v1, 0.0  ;;  %v2007_v22 = vadd.f32 1e-05, %v1879_v58  ;;  %v7596_v57 = vpop.eup %7595  ;;  %v16300_v18 = vld [vmem:[#allocation13_spill] sm:$0xff]  ;;  %v16301_v58 = vld [vmem:[#allocation68_spill] sm:$0xff] }
 0x328   : > { %v1753_v33 = vmul.f32 0.015625, %v1689_v54  ;;  %v1688_v45 = vsel %vm258_vm2, %v16298_v9, %v1451_v43  ;;  %v2323_v28 = vmax.f32 %v2259_v34, 0.0  ;;  %v2006_v59 = vadd.f32 1e-05, %v1878_v23  ;;  %v1457_v1 = vpop.xlane.xlu1 %1456  ;;  %v16303_v54 = vld [vmem:[#allocation170_spill] sm:$0xff] }
 0x329   : > { %v1752_v4 = vmul.f32 0.015625, %v1688_v45  ;;  %v2192_v0 = vmul.f32 %v10329_v19, %v2124_v27  ;;  %v2193_v2 = vmul.f32 %v10329_v19, %v2125_v42  ;;  %7605 = vrsqrt.f32 %v2007_v22  ;;  %v16304_v34 = vld [vmem:[#allocation114_spill] sm:$0xff] }
 0x32a   : > { %v1881_v26 = vsub.f32 %v1753_v33, %v16299_v13  ;;  %v2384_v60 = vpack.c.bf16 %v2323_v28, %v2322_v3  ;;  %v16302_v46 = vsub.f32 %v16300_v18, %v16301_v58  ;;  %7607 = vrsqrt.f32 %v2006_v59  ;;  %v1455_v9 = vpop.xlane.xlu0 %1454  ;;  %v16305_v33 = vld [vmem:[#allocation115_spill] sm:$0xff]  ;;  %v16306_v18 = vld [vmem:[#allocation12_spill] sm:$0xff] }
 0x32b   : > { %v1880_v43 = vsub.f32 %v1752_v4, %v16303_v54  ;;  %v1691_v23 = vsel %vm258_vm2, %v16304_v34, %v1457_v1  ;;  %v2260_v27 = vadd.f32 %v10344_v5, %v2192_v0  ;;  %v10429_v42 = vpop.eup %7597  ;;  %v1690_v45 = vsel %vm258_vm2, %v16305_v33, %v1455_v9  ;;  %v16307_v1 = vld [vmem:[#allocation54_spill] sm:$0xff] }
 0x32c   : > { %v2126_v63 = vmul.f32 %v7592_v55, %v16302_v46  ;;  %v2009_v22 = vadd.f32 1e-05, %v1881_v26  ;;  %7301 = vmatprep.mubr.bf16.mxu1 %v2384_v60  ;;  %v1755_v3 = vmul.f32 0.015625, %v1691_v23  ;;  %v2261_v55 = vadd.f32 %v10344_v5, %v2193_v2  ;;  %v7600_v28 = vpop.eup %7599  ;;  %v1461_v60 = vpop.xlane.xlu1 %1460  ;;  %v16309_v34 = vld [vmem:[#allocation178_spill] sm:$0xff] }
 0x32d   : > { %v2008_v59 = vadd.f32 1e-05, %v1880_v43  ;;  %v1754_v4 = vmul.f32 0.015625, %v1690_v45  ;;  %v2324_v13 = vmax.f32 %v2260_v27, 0.0  ;;  %v16308_v58 = vsub.f32 %v16306_v18, %v16307_v1  ;;  %v16310_v9 = vld [vmem:[#allocation110_spill] sm:$0xff] }
 0x32e   : > { %7609 = vrsqrt.f32 %v2009_v22  ;;  %v1883_v0 = vsub.f32 %v1755_v3, %v9879_v36  ;;  %v2325_v26 = vmax.f32 %v2261_v55, 0.0  ;;  %v2194_v54 = vmul.f32 %v10329_v19, %v2126_v63  ;;  %v1459_v43 = vpop.xlane.xlu0 %1458  ;;  %v16311_v36 = vld [vmem:[#allocation111_spill] sm:$0xff]  ;;  %v16312_v1 = vld [vmem:[#allocation174_spill] sm:$0xff] }
 0x32f   : > { %v2127_v46 = vmul.f32 %v7590_v38, %v16308_v58  ;;  %7611 = vrsqrt.f32 %v2008_v59  ;;  %v1882_v23 = vsub.f32 %v1754_v4, %v16309_v34  ;;  %v1693_v2 = vsel %vm258_vm2, %v16310_v9, %v1461_v60  ;;  %v10445_v33 = vpop.eup %7601  ;;  %v16313_v60 = vld [vmem:[#allocation11_spill] sm:$0xff]  ;;  %v16316_v34 = vld [vmem:[#allocation10_spill] sm:$0xff] }
 0x330   : > { %v2011_v38 = vadd.f32 1e-05, %v1883_v0  ;;  %v2385_v22 = vpack.c.bf16 %v2325_v26, %v2324_v13  ;;  %v1757_v45 = vmul.f32 0.015625, %v1693_v2  ;;  %v1692_v3 = vsel %vm258_vm2, %v16311_v36, %v1459_v43  ;;  %v7604_v63 = vpop.eup %7603  ;;  %v16314_v0 = vld [vmem:[#allocation52_spill] sm:$0xff]  ;;  %v16317_v9 = vld [vmem:[#allocation42_spill] sm:$0xff] }
 0x331   : > { %v2195_v27 = vmul.f32 %v10329_v19, %v2127_v46  ;;  %v2010_v55 = vadd.f32 1e-05, %v1882_v23  ;;  %v1756_v59 = vmul.f32 0.015625, %v1692_v3  ;;  %v2262_v4 = vadd.f32 %v10344_v5, %v2194_v54  ;;  %v1465_v46 = vpop.xlane.xlu1 %1464  ;;  %v16319_v23 = vld [vmem:[#allocation175_spill] sm:$0xff] }
 0x332   : > { %7613 = vrsqrt.f32 %v2011_v38  ;;  %7302 = vmatmul.mubr.bf16.gmra.mrb[4].mxu1 %v2385_v22  ;;  %v1885_v58 = vsub.f32 %v1757_v45, %v16312_v1  ;;  %v16315_v13 = vsub.f32 %v16313_v60, %v16314_v0  ;;  %v16318_v2 = vsub.f32 %v16316_v34, %v16317_v9  ;;  %v1463_v44 = vpop.xlane.xlu0 %1462  ;;  %v16320_v22 = vld [vmem:[#allocation128_spill] sm:$0xff]  ;;  %v16321_v1 = vld [vmem:[#allocation129_spill] sm:$0xff] }
 0x333   : > { %v2263_v18 = vadd.f32 %v10344_v5, %v2195_v27  ;;  %7615 = vrsqrt.f32 %v2010_v55  ;;  %v1884_v36 = vsub.f32 %v1756_v59, %v16319_v23  ;;  %v2326_v3 = vmax.f32 %v2262_v4, 0.0  ;;  %v10460_v27 = vpop.eup %7605  ;;  %v16322_v34 = vld [vmem:[#allocation17_spill] sm:$0xff]  ;;  %v16325_v23 = vld [vmem:[#allocation122_spill] sm:$0xff] }
 0x334   : > { %v2128_v26 = vmul.f32 %v7596_v57, %v16315_v13  ;;  %v2129_v43 = vmul.f32 %v7594_v8, %v16318_v2  ;;  %v2013_v38 = vadd.f32 1e-05, %v1885_v58  ;;  %v1695_v45 = vsel %vm258_vm2, %v16320_v22, %v1465_v46  ;;  %v10469_v8 = vpop.eup %7607  ;;  %v16323_v46 = vld [vmem:[#allocation147_spill] sm:$0xff] }
 0x335   : > { %v2327_v54 = vmax.f32 %v2263_v18, 0.0  ;;  %v1694_v57 = vsel %vm258_vm2, %v16321_v1, %v1463_v44  ;;  %v2012_v55 = vadd.f32 1e-05, %v1884_v36  ;;  %v1759_v4 = vmul.f32 0.015625, %v1695_v45  ;;  %v1469_v13 = vpop.xlane.xlu1 %1468  ;;  %v16326_v45 = vld [vmem:[#allocation123_spill] sm:$0xff] }
 0x336   : > { %v2196_v60 = vmul.f32 %v10329_v19, %v2128_v26  ;;  %v1758_v18 = vmul.f32 0.015625, %v1694_v57  ;;  %7617 = vrsqrt.f32 %v2013_v38  ;;  %v2197_v0 = vmul.f32 %v10329_v19, %v2129_v43 }
 0x337   : > { %v2386_v59 = vpack.c.bf16 %v2327_v54, %v2326_v3  ;;  %v16324_v9 = vsub.f32 %v16322_v34, %v16323_v46  ;;  %7619 = vrsqrt.f32 %v2012_v55  ;;  %v1887_v44 = vsub.f32 %v1759_v4, %v9917_v30  ;;  %v1467_v3 = vpop.xlane.xlu0 %1466  ;;  %v16328_v55 = vld [vmem:[#allocation151_spill] sm:$0xff]  ;;  %v16331_v46 = vld [vmem:[#allocation76_spill] sm:$0xff] }
 0x338   : > { %v2264_v58 = vadd.f32 %v10344_v5, %v2196_v60  ;;  %v1886_v26 = vsub.f32 %v1758_v18, %v9931_v17  ;;  %v1697_v36 = vsel %vm258_vm2, %v16325_v23, %v1469_v13  ;;  %v10481_v54 = vpop.eup %7609  ;;  %v2265_v43 = vadd.f32 %v10344_v5, %v2197_v0  ;;  %v16327_v60 = vld [vmem:[#allocation16_spill] sm:$0xff]  ;;  %v16330_v34 = vld [vmem:[#allocation15_spill] sm:$0xff] }
 0x339   : > { %v2130_v2 = vmul.f32 %v7600_v28, %v16324_v9  ;;  %7305 = vmatprep.mubr.bf16.mxu1 %v2386_v59  ;;  %v1761_v22 = vmul.f32 0.015625, %v1697_v36  ;;  %v1696_v28 = vsel %vm258_vm2, %v16326_v45, %v1467_v3  ;;  %v10487_v1 = vpop.eup %7611  ;;  %v2015_v30 = vadd.f32 1e-05, %v1887_v44  ;;  %v16333_v36 = vld [vmem:[#allocation179_spill] sm:$0xff]  ;;  %v16334_v3 = vld [vmem:[#allocation145_spill] sm:$0xff] }
 0x33a   : > { %v2328_v38 = vmax.f32 %v2264_v58, 0.0  ;;  %v2014_v57 = vadd.f32 1e-05, %v1886_v26  ;;  %v1760_v17 = vmul.f32 0.015625, %v1696_v28  ;;  %v16329_v59 = vsub.f32 %v16327_v60, %v16328_v55  ;;  %v1473_v58 = vpop.xlane.xlu1 %1472  ;;  %v16335_v60 = vld [vmem:[#allocation146_spill] sm:$0xff] }
 0x33b   : > { %v2329_v18 = vmax.f32 %v2265_v43, 0.0  ;;  %v1889_v13 = vsub.f32 %v1761_v22, %v9899_v11  ;;  %v2198_v0 = vmul.f32 %v10329_v19, %v2130_v2  ;;  %v16332_v9 = vsub.f32 %v16330_v34, %v16331_v46 }
 0x33c   : > { %v2131_v4 = vmul.f32 %v10429_v42, %v16329_v59  ;;  %7621 = vrsqrt.f32 %v2015_v30  ;;  %v1888_v44 = vsub.f32 %v1760_v17, %v16333_v36  ;;  %v1699_v45 = vsel %vm258_vm2, %v16334_v3, %v1473_v58  ;;  %v1471_v42 = vpop.xlane.xlu0 %1470  ;;  %v10503_v43 = vpop.eup %7613  ;;  %v16336_v58 = vld [vmem:[#allocation14_spill] sm:$0xff]  ;;  %v16339_v3 = vld [vmem:[#allocation139_spill] sm:$0xff] }
 0x33d   : > { %v2132_v23 = vmul.f32 %v7604_v63, %v16332_v9  ;;  %7623 = vrsqrt.f32 %v2014_v57  ;;  %v2387_v11 = vpack.c.bf16 %v2329_v18, %v2328_v38  ;;  %v2017_v2 = vadd.f32 1e-05, %v1889_v13  ;;  %v10506_v28 = vpop.eup %7615  ;;  %v16337_v57 = vld [vmem:[#allocation70_spill] sm:$0xff] }
 0x33e   : > { %v2199_v26 = vmul.f32 %v10329_v19, %v2131_v4  ;;  %v2266_v22 = vadd.f32 %v10344_v5, %v2198_v0  ;;  %v2016_v63 = vadd.f32 1e-05, %v1888_v44  ;;  %v1763_v17 = vmul.f32 0.015625, %v1699_v45  ;;  %v1477_v13 = vpop.xlane.xlu1 %1476 }
 0x33f   : > { %v1698_v55 = vsel %vm258_vm2, %v16335_v60, %v1471_v42  ;;  %7306 = vmatmul.mubr.bf16.gmra.mrb[8].mxu1 %v2387_v11  ;;  %7625 = vrsqrt.f32 %v2017_v2  ;;  %v16338_v38 = vsub.f32 %v16336_v58, %v16337_v57  ;;  %v2200_v46 = vmul.f32 %v10329_v19, %v2132_v23  ;;  %v16340_v42 = vld [vmem:[#allocation140_spill] sm:$0xff]  ;;  %v16342_v60 = vld [vmem:[#allocation97_spill] sm:$0xff] }
 0x340   : > { %v2267_v30 = vadd.f32 %v10344_v5, %v2199_v26  ;;  %v2330_v59 = vmax.f32 %v2266_v22, 0.0  ;;  %v1762_v4 = vmul.f32 0.015625, %v1698_v55  ;;  %7627 = vrsqrt.f32 %v2016_v63  ;;  %v1475_v9 = vpop.xlane.xlu0 %1474  ;;  %v10518_v36 = vpop.eup %7617 }
 0x341   : > { %v2133_v18 = vmul.f32 %v10445_v33, %v16338_v38  ;;  %v1891_v34 = vsub.f32 %v1763_v17, %v9957_v32  ;;  %v1701_v45 = vsel %vm258_vm2, %v16339_v3, %v1477_v13  ;;  %v1700_v33 = vsel %vm258_vm2, %v16340_v42, %v1475_v9  ;;  %v10528_v11 = vpop.eup %7619  ;;  %v16341_v17 = vld [vmem:[#allocation21_spill] sm:$0xff]  ;;  %v16348_v42 = vld [vmem:[#allocation160_spill] sm:$0xff] }
 0x342   : > { %v2331_v0 = vmax.f32 %v2267_v30, 0.0  ;;  %v1890_v44 = vsub.f32 %v1762_v4, %v9970_v49  ;;  %v2268_v23 = vadd.f32 %v10344_v5, %v2200_v46  ;;  %v1765_v22 = vmul.f32 0.015625, %v1701_v45  ;;  %v1481_v58 = vpop.xlane.xlu1 %1480  ;;  %v16347_v45 = vld [vmem:[#allocation159_spill] sm:$0xff] }
 0x343   : > { %v2201_v26 = vmul.f32 %v10329_v19, %v2133_v18  ;;  %v2019_v2 = vadd.f32 1e-05, %v1891_v34  ;;  %v1764_v30 = vmul.f32 0.015625, %v1700_v33  ;;  %v16343_v55 = vsub.f32 %v16341_v17, %v16342_v60  ;;  %v16345_v18 = vld [vmem:[#allocation96_spill] sm:$0xff] }
 0x344   : > { %v2388_v32 = vpack.c.bf16 %v2331_v0, %v2330_v59  ;;  %v2018_v63 = vadd.f32 1e-05, %v1890_v44  ;;  %v2332_v57 = vmax.f32 %v2268_v23, 0.0  ;;  %v1893_v38 = vsub.f32 %v1765_v22, %v9937_v16  ;;  %v16344_v59 = vld [vmem:[#allocation20_spill] sm:$0xff]  ;;  %v1479_v34 = vpop.xlane.xlu0 %1478 }
 0x345   : > { %v2269_v49 = vadd.f32 %v10344_v5, %v2201_v26  ;;  %v2134_v4 = vmul.f32 %v10469_v8, %v16343_v55  ;;  %7629 = vrsqrt.f32 %v2019_v2  ;;  %v16346_v13 = vsub.f32 %v16344_v59, %v16345_v18  ;;  %v16350_v17 = vld [vmem:[#allocation88_spill] sm:$0xff]  ;;  %v16352_v59 = vld [vmem:[#allocation18_spill] sm:$0xff] }
 0x346   : > { %7309 = vmatprep.mubr.bf16.mxu1 %v2388_v32  ;;  %7631 = vrsqrt.f32 %v2018_v63  ;;  %v1892_v9 = vsub.f32 %v1764_v30, %v9948_v20  ;;  %v10543_v26 = vpop.eup %7621  ;;  %v2021_v8 = vadd.f32 1e-05, %v1893_v38  ;;  %v1703_v16 = vsel %vm258_vm2, %v16347_v45, %v1481_v58  ;;  %v1485_v22 = vpop.xlane.xlu1 %1484  ;;  %v16349_v30 = vld [vmem:[#allocation19_spill] sm:$0xff]  ;;  %v16353_v18 = vld [vmem:[#allocation84_spill] sm:$0xff] }
 0x347   : > { %v2135_v0 = vmul.f32 %v10460_v27, %v16346_v13  ;;  %v2333_v46 = vmax.f32 %v2269_v49, 0.0  ;;  %v2202_v44 = vmul.f32 %v10329_v19, %v2134_v4  ;;  %v1702_v27 = vsel %vm258_vm2, %v16348_v42, %v1479_v34  ;;  %v10552_v33 = vpop.eup %7623 }
 0x348   : > { %v2020_v2 = vadd.f32 1e-05, %v1892_v9  ;;  %v1767_v23 = vmul.f32 0.015625, %v1703_v16  ;;  %7633 = vrsqrt.f32 %v2021_v8  ;;  %v1766_v49 = vmul.f32 0.015625, %v1702_v27  ;;  %v1483_v4 = vpop.xlane.xlu0 %1482  ;;  %v16356_v16 = vld [vmem:[#allocation158_spill] sm:$0xff] }
 0x349   : > { %v2203_v3 = vmul.f32 %v10329_v19, %v2135_v0  ;;  %v2389_v32 = vpack.c.bf16 %v2333_v46, %v2332_v57  ;;  %v2270_v20 = vadd.f32 %v10344_v5, %v2202_v44  ;;  %v16351_v60 = vsub.f32 %v16349_v30, %v16350_v17  ;;  %v10560_v58 = vpop.eup %7625  ;;  %v16355_v44 = vld [vmem:[#allocation157_spill] sm:$0xff] }
 0x34a   : > { %7635 = vrsqrt.f32 %v2020_v2  ;;  %v1895_v38 = vsub.f32 %v1767_v23, %v9999_v10  ;;  %v16354_v13 = vsub.f32 %v16352_v59, %v16353_v18  ;;  %v10567_v34 = vpop.eup %7627  ;;  %v1894_v9 = vsub.f32 %v1766_v49, %v10011_v29  ;;  %v16358_v49 = vld [vmem:[#allocation113_spill] sm:$0xff] }
 0x34b   : > { %v2271_v63 = vadd.f32 %v10344_v5, %v2203_v3  ;;  %v2136_v55 = vmul.f32 %v10487_v1, %v16351_v60  ;;  %7310 = vmatmul.mubr.bf16.gmra.mrb[12].mxu1 %v2389_v32  ;;  %v2334_v57 = vmax.f32 %v2270_v20, 0.0  ;;  %v1705_v8 = vsel %vm258_vm2, %v16355_v44, %v1485_v22 }
 0x34c   : > { %v2137_v0 = vmul.f32 %v10481_v54, %v16354_v13  ;;  %v2023_v3 = vadd.f32 1e-05, %v1895_v38  ;;  %v1769_v10 = vmul.f32 0.015625, %v1705_v8  ;;  %v1704_v42 = vsel %vm258_vm2, %v16356_v16, %v1483_v4  ;;  %v1489_v54 = vpop.xlane.xlu1 %1488  ;;  %v1487_v20 = vpop.xlane.xlu0 %1486  ;;  %v16361_v38 = vld [vmem:[#allocation112_spill] sm:$0xff] }
 0x34d   : > { %v2335_v46 = vmax.f32 %v2271_v63, 0.0  ;;  %v2204_v1 = vmul.f32 %v10329_v19, %v2136_v55  ;;  %v2022_v32 = vadd.f32 1e-05, %v1894_v9  ;;  %v1768_v29 = vmul.f32 0.015625, %v1704_v42  ;;  %v16357_v63 = vld [vmem:[#allocation27_spill] sm:$0xff] }
 0x34e   : > { %v2205_v45 = vmul.f32 %v10329_v19, %v2137_v0  ;;  %7637 = vrsqrt.f32 %v2023_v3  ;;  %v1897_v22 = vsub.f32 %v1769_v10, %v9976_v40  ;;  %v16359_v30 = vsub.f32 %v16357_v63, %v16358_v49  ;;  %v16363_v9 = vld [vmem:[#allocation163_spill] sm:$0xff]  ;;  %v16364_v3 = vld [vmem:[#allocation164_spill] sm:$0xff] }
 0x34f   : > { %v2390_v27 = vpack.c.bf16 %v2335_v46, %v2334_v57  ;;  %v2272_v2 = vadd.f32 %v10344_v5, %v2204_v1  ;;  %v10585_v60 = vpop.eup %7629  ;;  %7639 = vrsqrt.f32 %v2022_v32  ;;  %v1896_v4 = vsub.f32 %v1768_v29, %v9988_v24  ;;  %v16360_v57 = vld [vmem:[#allocation26_spill] sm:$0xff]  ;;  %v16366_v29 = vld [vmem:[#allocation108_spill] sm:$0xff] }
 0x350   : > { %v2273_v23 = vadd.f32 %v10344_v5, %v2205_v45  ;;  %v2138_v17 = vmul.f32 %v10506_v28, %v16359_v30  ;;  %v16362_v59 = vsub.f32 %v16360_v57, %v16361_v38  ;;  %v10592_v13 = vpop.eup %7631  ;;  %v2025_v0 = vadd.f32 1e-05, %v1897_v22  ;;  %v1493_v1 = vpop.xlane.xlu1 %1492  ;;  %v16368_v30 = vld [vmem:[#allocation24_spill] sm:$0xff]  ;;  %v16371_v57 = vld [vmem:[#allocation161_spill] sm:$0xff] }
 0x351   : > { %7313 = vmatprep.mubr.bf16.mxu1 %v2390_v27  ;;  %v2336_v55 = vmax.f32 %v2272_v2, 0.0  ;;  %v1707_v28 = vsel %vm258_vm2, %v16363_v9, %v1489_v54  ;;  %v2024_v44 = vadd.f32 1e-05, %v1896_v4  ;;  %v1706_v45 = vsel %vm258_vm2, %v16364_v3, %v1487_v20  ;;  %v16365_v2 = vld [vmem:[#allocation25_spill] sm:$0xff] }
 0x352   : > { %v2139_v18 = vmul.f32 %v10503_v43, %v16362_v59  ;;  %v2337_v40 = vmax.f32 %v2273_v23, 0.0  ;;  %v2206_v46 = vmul.f32 %v10329_v19, %v2138_v17  ;;  %v1771_v24 = vmul.f32 0.015625, %v1707_v28  ;;  %v1491_v43 = vpop.xlane.xlu0 %1490  ;;  %v10603_v27 = vpop.eup %7633  ;;  %v16369_v17 = vld [vmem:[#allocation100_spill] sm:$0xff] }
 0x353   : > { %7641 = vrsqrt.f32 %v2025_v0  ;;  %v1770_v42 = vmul.f32 0.015625, %v1706_v45  ;;  %v16367_v23 = vsub.f32 %v16365_v2, %v16366_v29 }
 0x354   : > { %v2207_v8 = vmul.f32 %v10329_v19, %v2139_v18  ;;  %v2391_v10 = vpack.c.bf16 %v2337_v40, %v2336_v55  ;;  %v2274_v16 = vadd.f32 %v10344_v5, %v2206_v46  ;;  %7643 = vrsqrt.f32 %v2024_v44  ;;  %v10611_v63 = vpop.eup %7635  ;;  %v1497_v38 = vpop.xlane.xlu1 %1496  ;;  %v16373_v44 = vld [vmem:[#allocation35_spill] sm:$0xff] }
 0x355   : > { %v1899_v32 = vsub.f32 %v1771_v24, %v10040_v52  ;;  %v2140_v22 = vmul.f32 %v10528_v11, %v16367_v23  ;;  %v1898_v49 = vsub.f32 %v1770_v42, %v10054_v35  ;;  %v16370_v55 = vsub.f32 %v16368_v30, %v16369_v17  ;;  %v16372_v35 = vld [vmem:[#allocation162_spill] sm:$0xff] }
 0x356   : > { %v2275_v54 = vadd.f32 %v10344_v5, %v2207_v8  ;;  %7314 = vmatmul.mubr.bf16.gmra.mrb[16].mxu1 %v2391_v10  ;;  %v2338_v20 = vmax.f32 %v2274_v16, 0.0  ;;  %v1709_v52 = vsel %vm258_vm2, %v16371_v57, %v1493_v1  ;;  %v1495_v0 = vpop.xlane.xlu0 %1494  ;;  %v1708_v28 = vsel %vm258_vm2, %v16372_v35, %v1491_v43 }
 0x357   : > { %v2141_v4 = vmul.f32 %v10518_v36, %v16370_v55  ;;  %v2027_v18 = vadd.f32 1e-05, %v1899_v32  ;;  %v2208_v11 = vmul.f32 %v10329_v19, %v2140_v22  ;;  %v1773_v40 = vmul.f32 0.015625, %v1709_v52  ;;  %v16374_v36 = vld [vmem:[#allocation126_spill] sm:$0xff]  ;;  %v16377_v32 = vld [vmem:[#allocation124_spill] sm:$0xff] }
 0x358   : > { %v2339_v59 = vmax.f32 %v2275_v54, 0.0  ;;  %v2026_v46 = vadd.f32 1e-05, %v1898_v49  ;;  %v16375_v8 = vsub.f32 %v16373_v44, %v16374_v36  ;;  %v10632_v10 = vpop.eup %7637  ;;  %v1772_v42 = vmul.f32 0.015625, %v1708_v28  ;;  %v16376_v54 = vld [vmem:[#allocation34_spill] sm:$0xff]  ;;  %v1501_v29 = vpop.xlane.xlu1 %1500  ;;  %v16380_v52 = vld [vmem:[#allocation168_spill] sm:$0xff] }
 0x359   : > { %v2209_v9 = vmul.f32 %v10329_v19, %v2141_v4  ;;  %7645 = vrsqrt.f32 %v2027_v18  ;;  %v2276_v3 = vadd.f32 %v10344_v5, %v2208_v11  ;;  %v1901_v45 = vsub.f32 %v1773_v40, %v10017_v50  ;;  %v10639_v23 = vpop.eup %7639  ;;  %v16379_v50 = vld [vmem:[#allocation167_spill] sm:$0xff]  ;;  %v16381_v18 = vld [vmem:[#allocation33_spill] sm:$0xff] }
 0x35a   : > { %v2142_v24 = vmul.f32 %v10552_v33, %v16375_v8  ;;  %v2392_v1 = vpack.c.bf16 %v2339_v59, %v2338_v20  ;;  %7647 = vrsqrt.f32 %v2026_v46  ;;  %v16378_v43 = vsub.f32 %v16376_v54, %v16377_v32  ;;  %v1499_v30 = vpop.xlane.xlu0 %1498  ;;  %v16382_v11 = vld [vmem:[#allocation121_spill] sm:$0xff] }
 0x35b   : > { %v2277_v16 = vadd.f32 %v10344_v5, %v2209_v9  ;;  %v2340_v33 = vmax.f32 %v2276_v3, 0.0  ;;  %v2029_v22 = vadd.f32 1e-05, %v1901_v45  ;;  %v1711_v49 = vsel %vm258_vm2, %v16379_v50, %v1497_v38  ;;  %v16387_v32 = vld [vmem:[#allocation165_spill] sm:$0xff] }
 0x35c   : > { %v2143_v2 = vmul.f32 %v10543_v26, %v16378_v43  ;;  %7317 = vmatprep.mubr.bf16.mxu1 %v2392_v1  ;;  %v2210_v20 = vmul.f32 %v10329_v19, %v2142_v24  ;;  %v1900_v55 = vsub.f32 %v1772_v42, %v10026_v39  ;;  %v1775_v57 = vmul.f32 0.015625, %v1711_v49  ;;  %v1505_v44 = vpop.xlane.xlu1 %1504  ;;  %v16384_v1 = vld [vmem:[#allocation32_spill] sm:$0xff] }
 0x35d   : > { %v2341_v17 = vmax.f32 %v2277_v16, 0.0  ;;  %7649 = vrsqrt.f32 %v2029_v22  ;;  %v1710_v59 = vsel %vm258_vm2, %v16380_v52, %v1495_v0  ;;  %v16383_v40 = vsub.f32 %v16381_v18, %v16382_v11  ;;  %v10655_v38 = vpop.eup %7641  ;;  %v16385_v0 = vld [vmem:[#allocation120_spill] sm:$0xff]  ;;  %v16391_v11 = vld [vmem:[#allocation143_spill] sm:$0xff] }
 0x35e   : > { %v2211_v4 = vmul.f32 %v10329_v19, %v2143_v2  ;;  %v2278_v26 = vadd.f32 %v10344_v5, %v2210_v20  ;;  %v2028_v35 = vadd.f32 1e-05, %v1900_v55  ;;  %v1903_v28 = vsub.f32 %v1775_v57, %v10075_v21  ;;  %v10659_v36 = vpop.eup %7643  ;;  %v1503_v16 = vpop.xlane.xlu0 %1502 }
 0x35f   : > { %v2144_v46 = vmul.f32 %v10567_v34, %v16383_v40  ;;  %v2393_v9 = vpack.c.bf16 %v2341_v17, %v2340_v33  ;;  %v1774_v24 = vmul.f32 0.015625, %v1710_v59  ;;  %v16386_v3 = vsub.f32 %v16384_v1, %v16385_v0 }
 0x360   : > { %v2279_v39 = vadd.f32 %v10344_v5, %v2211_v4  ;;  %v2342_v8 = vmax.f32 %v2278_v26, 0.0  ;;  %7651 = vrsqrt.f32 %v2028_v35  ;;  %v2031_v54 = vadd.f32 1e-05, %v1903_v28  ;;  %v1509_v55 = vpop.xlane.xlu1 %1508 }
 0x361   : > { %v2145_v45 = vmul.f32 %v10560_v58, %v16386_v3  ;;  %v2212_v34 = vmul.f32 %v10329_v19, %v2144_v46  ;;  %7318 = vmatmul.mubr.bf16.gmra.mrb[20].mxu1 %v2393_v9  ;;  %v1713_v21 = vsel %vm258_vm2, %v16387_v32, %v1501_v29  ;;  %v1902_v43 = vsub.f32 %v1774_v24, %v10081_v41  ;;  %v16388_v58 = vld [vmem:[#allocation166_spill] sm:$0xff]  ;;  %v16395_v32 = vld [vmem:[#allocation49_spill] sm:$0xff] }
 0x362   : > { %v2343_v42 = vmax.f32 %v2279_v39, 0.0  ;;  %v1777_v22 = vmul.f32 0.015625, %v1713_v21  ;;  %7653 = vrsqrt.f32 %v2031_v54  ;;  %v1712_v50 = vsel %vm258_vm2, %v16388_v58, %v1499_v30  ;;  %v1507_v52 = vpop.xlane.xlu0 %1506  ;;  %v16390_v30 = vld [vmem:[#allocation50_spill] sm:$0xff]  ;;  %v16396_v21 = vld [vmem:[#allocation136_spill] sm:$0xff] }
 0x363   : > { %v2213_v2 = vmul.f32 %v10329_v19, %v2145_v45  ;;  %v2280_v33 = vadd.f32 %v10344_v5, %v2212_v34  ;;  %v16389_v49 = vsub.f32 %v16160_v15, %v9922_v53  ;;  %v10679_v29 = vpop.eup %7645  ;;  %v2030_v41 = vadd.f32 1e-05, %v1902_v43  ;;  %v16394_v24 = vld [vmem:[#allocation30_spill] sm:$0xff] }
 0x364   : > { %v2394_v20 = vpack.c.bf16 %v2343_v42, %v2342_v8  ;;  %v1905_v26 = vsub.f32 %v1777_v22, %v10060_v7  ;;  %v10683_v59 = vpop.eup %7647  ;;  %v1776_v18 = vmul.f32 0.015625, %v1712_v50  ;;  %v16392_v40 = vsub.f32 %v16390_v30, %v16391_v11  ;;  %v1513_v1 = vpop.xlane.xlu1 %1512  ;;  %v16398_v22 = vld [vmem:[#allocation48_spill] sm:$0xff]  ;;  %v16401_v50 = vld [vmem:[#allocation169_spill] sm:$0xff] }
 0x365   : > { %v2146_v17 = vmul.f32 %v10592_v13, %v16389_v49  ;;  %v2281_v4 = vadd.f32 %v10344_v5, %v2213_v2  ;;  %v2344_v57 = vmax.f32 %v2280_v33, 0.0  ;;  %v16393_v13 = vld [vmem:[#allocation23_spill] sm:$0xff]  ;;  %7655 = vrsqrt.f32 %v2030_v41 }
 0x366   : > { %7321 = vmatprep.mubr.bf16.mxu1 %v2394_v20  ;;  %v2147_v53 = vmul.f32 %v10585_v60, %v16392_v40  ;;  %v1715_v46 = vsel %vm258_vm2, %v16393_v13, %v1505_v44  ;;  %v2033_v35 = vadd.f32 1e-05, %v1905_v26  ;;  %v1904_v39 = vsub.f32 %v1776_v18, %v10066_v14  ;;  %v1511_v34 = vpop.xlane.xlu0 %1510  ;;  %v16399_v20 = vld [vmem:[#allocation134_spill] sm:$0xff] }
 0x367   : > { %v2214_v15 = vmul.f32 %v10329_v19, %v2146_v17  ;;  %v2345_v9 = vmax.f32 %v2281_v4, 0.0  ;;  %v1779_v7 = vmul.f32 0.015625, %v1715_v46  ;;  %v1714_v60 = vsel %vm258_vm2, %v16394_v24, %v1503_v16  ;;  %v10699_v0 = vpop.eup %7649  ;;  %v16402_v18 = vld [vmem:[#allocation22_spill] sm:$0xff]  ;;  %v16403_v46 = vld [vmem:[#allocation67_spill] sm:$0xff] }
 0x368   : > { %v2215_v28 = vmul.f32 %v10329_v19, %v2147_v53  ;;  %7657 = vrsqrt.f32 %v2033_v35  ;;  %v1778_v45 = vmul.f32 0.015625, %v1714_v60  ;;  %v2032_v42 = vadd.f32 1e-05, %v1904_v39  ;;  %v16406_v39 = vld [vmem:[#allocation66_spill] sm:$0xff] }
 0x369   : > { %v2282_v8 = vadd.f32 %v10344_v5, %v2214_v15  ;;  %v2395_v3 = vpack.c.bf16 %v2345_v9, %v2344_v57  ;;  %v1907_v44 = vsub.f32 %v1779_v7, %v10120_v48  ;;  %v16397_v43 = vsub.f32 %v16395_v32, %v16396_v21  ;;  %v1517_v57 = vpop.xlane.xlu1 %1516  ;;  %v16404_v9 = vld [vmem:[#allocation182_spill] sm:$0xff]  ;;  %v16410_v21 = vld [vmem:[#allocation28_spill] sm:$0xff] }
 0x36a   : > { %v2283_v14 = vadd.f32 %v10344_v5, %v2215_v28  ;;  %v1906_v33 = vsub.f32 %v1778_v45, %v10129_v61  ;;  %v16400_v58 = vsub.f32 %v16398_v22, %v16399_v20  ;;  %v1717_v49 = vsel %vm258_vm2, %v16401_v50, %v1509_v55  ;;  %v10715_v17 = vpop.eup %7651  ;;  %v1515_v30 = vpop.xlane.xlu0 %1514  ;;  %v16407_v28 = vld [vmem:[#allocation181_spill] sm:$0xff] }
 0x36b   : > { %v2346_v54 = vmax.f32 %v2282_v8, 0.0  ;;  %v2148_v2 = vmul.f32 %v10611_v63, %v16397_v43  ;;  %7322 = vmatmul.mubr.bf16.gmra.mrb[24].mxu1 %v2395_v3  ;;  %v2035_v16 = vadd.f32 1e-05, %v1907_v44  ;;  %7659 = vrsqrt.f32 %v2032_v42 }
 0x36c   : > { %v2149_v48 = vmul.f32 %v10603_v27, %v16400_v58  ;;  %v2347_v41 = vmax.f32 %v2283_v14, 0.0  ;;  %v1781_v63 = vmul.f32 0.015625, %v1717_v49  ;;  %v2034_v26 = vadd.f32 1e-05, %v1906_v33  ;;  %v10722_v11 = vpop.eup %7653 }
 0x36d   : > { %v2216_v4 = vmul.f32 %v10329_v19, %v2148_v2  ;;  %7661 = vrsqrt.f32 %v2035_v16  ;;  %v1716_v27 = vsel %vm258_vm2, %v16402_v18, %v1507_v52  ;;  %v16405_v35 = vsub.f32 %v16403_v46, %v16404_v9  ;;  %v1521_v45 = vpop.xlane.xlu1 %1520  ;;  %v16412_v2 = vld [vmem:[#allocation156_spill] sm:$0xff] }
 0x36e   : > { %v2217_v61 = vmul.f32 %v10329_v19, %v2149_v48  ;;  %v2396_v55 = vpack.c.bf16 %v2347_v41, %v2346_v54  ;;  %v1909_v53 = vsub.f32 %v1781_v63, %v10092_v25  ;;  %v1780_v15 = vmul.f32 0.015625, %v1716_v27  ;;  %v16409_v25 = vld [vmem:[#allocation31_spill] sm:$0xff]  ;;  %v1519_v33 = vpop.xlane.xlu0 %1518  ;;  %v16414_v41 = vld [vmem:[#allocation64_spill] sm:$0xff]  ;;  %v16417_v27 = vld [vmem:[#allocation109_spill] sm:$0xff] }
 0x36f   : > { %v2284_v40 = vadd.f32 %v10344_v5, %v2216_v4  ;;  %7663 = vrsqrt.f32 %v2034_v26  ;;  %v2150_v7 = vmul.f32 %v10639_v23, %v16405_v35  ;;  %v16408_v52 = vsub.f32 %v16406_v39, %v16407_v28  ;;  %v10739_v42 = vpop.eup %7655  ;;  %v16415_v4 = vld [vmem:[#allocation144_spill] sm:$0xff]  ;;  %v16418_v35 = vld [vmem:[#allocation171_spill] sm:$0xff] }
 0x370   : > { %v2285_v13 = vadd.f32 %v10344_v5, %v2217_v61  ;;  %7325 = vmatprep.mubr.bf16.mxu1 %v2396_v55  ;;  %v2037_v60 = vadd.f32 1e-05, %v1909_v53  ;;  %v1908_v3 = vsub.f32 %v1780_v15, %v10098_v6  ;;  %v1719_v44 = vsel %vm258_vm2, %v16409_v25, %v1513_v1  ;;  %v16411_v6 = vld [vmem:[#allocation65_spill] sm:$0xff]  ;;  %v16419_v39 = vld [vmem:[#allocation83_spill] sm:$0xff] }
 0x371   : > { %v2151_v8 = vmul.f32 %v10632_v10, %v16408_v52  ;;  %v2348_v24 = vmax.f32 %v2284_v40, 0.0  ;;  %v2218_v23 = vmul.f32 %v10329_v19, %v2150_v7  ;;  %v1783_v32 = vmul.f32 0.015625, %v1719_v44 }
 0x372   : > { %v2349_v14 = vmax.f32 %v2285_v13, 0.0  ;;  %7665 = vrsqrt.f32 %v2037_v60  ;;  %v2036_v10 = vadd.f32 1e-05, %v1908_v3  ;;  %v1718_v43 = vsel %vm258_vm2, %v16410_v21, %v1511_v34  ;;  %v10750_v22 = vpop.eup %7657  ;;  %v1523_v3 = vpop.xlane.xlu0 %1522 }
 0x373   : > { %v2219_v54 = vmul.f32 %v10329_v19, %v2151_v8  ;;  %v16413_v16 = vsub.f32 %v16411_v6, %v16412_v2  ;;  %v2286_v58 = vadd.f32 %v10344_v5, %v2218_v23  ;;  %v1911_v50 = vsub.f32 %v1783_v32, %v10170_v56  ;;  %v16423_v23 = vld [vmem:[#allocation185_spill] sm:$0xff] }
 0x374   : > { %v2397_v20 = vpack.c.bf16 %v2349_v14, %v2348_v24  ;;  %7667 = vrsqrt.f32 %v2036_v10  ;;  %v1782_v49 = vmul.f32 0.015625, %v1718_v43  ;;  %v16416_v34 = vsub.f32 %v16414_v41, %v16415_v4  ;;  %v16422_v14 = vld [vmem:[#allocation82_spill] sm:$0xff]  ;;  %v16425_v10 = vld [vmem:[#allocation176_spill] sm:$0xff]  ;;  %v16427_v4 = vld [vmem:[#allocation81_spill] sm:$0xff] }
 0x375   : > { %v2152_v1 = vmul.f32 %v10659_v36, %v16413_v16  ;;  %v2287_v48 = vadd.f32 %v10344_v5, %v2219_v54  ;;  %v2350_v36 = vmax.f32 %v2286_v58, 0.0  ;;  %v2039_v18 = vadd.f32 1e-05, %v1911_v50  ;;  %v10763_v40 = vpop.eup %7659 }
 0x376   : > { %v2153_v63 = vmul.f32 %v10655_v38, %v16416_v34  ;;  %7326 = vmatmul.mubr.bf16.gmra.mrb[28].mxu1 %v2397_v20  ;;  %v1721_v55 = vsel %vm258_vm2, %v16417_v27, %v1517_v57  ;;  %v1910_v56 = vsub.f32 %v1782_v49, %v10184_v12  ;;  %v1525_v38 = vpop.xlane.xlu1 %1524  ;;  %v1720_v7 = vsel %vm258_vm2, %v16418_v35, %v1515_v30  ;;  %v16420_v57 = vld [vmem:[#allocation187_spill] sm:$0xff] }
 0x377   : > { %v2220_v26 = vmul.f32 %v10329_v19, %v2152_v1  ;;  %v2351_v61 = vmax.f32 %v2287_v48, 0.0  ;;  %v1785_v13 = vmul.f32 0.015625, %v1721_v55  ;;  %v10768_v46 = vpop.eup %7661  ;;  %7669 = vrsqrt.f32 %v2039_v18  ;;  %v16426_v1 = vld [vmem:[#allocation177_spill] sm:$0xff]  ;;  %v16431_v18 = vld [vmem:[#allocation183_spill] sm:$0xff] }
 0x378   : > { %v2221_v53 = vmul.f32 %v10329_v19, %v2153_v63  ;;  %v16421_v28 = vsub.f32 %v16419_v39, %v16420_v57  ;;  %v2038_v12 = vadd.f32 1e-05, %v1910_v56  ;;  %v1784_v44 = vmul.f32 0.015625, %v1720_v7  ;;  %v16433_v55 = vld [vmem:[#allocation155_spill] sm:$0xff]  ;;  %v1527_v56 = vpop.xlane.xlu0 %1526  ;;  %v10828_v39 = vld [vmem:[%s15412_s4 + $0x2] ss:$0 sm:$0xff] }
 0x379   : > { %v2288_v15 = vadd.f32 %v10344_v5, %v2220_v26  ;;  %v2398_v9 = vpack.c.bf16 %v2351_v61, %v2350_v36  ;;  %v1913_v60 = vsub.f32 %v1785_v13, %v10158_v31  ;;  %v10779_v25 = vpop.eup %7663  ;;  %v16424_v54 = vsub.f32 %v16422_v14, %v16423_v23  ;;  %v16430_v61 = vld [vmem:[#allocation80_spill] sm:$0xff]  ;;  %v16439_v14 = vld [vmem:[#allocation94_spill] sm:$0xff] }
 0x37a   : > { %v2154_v52 = vmul.f32 %v10683_v59, %v16421_v28  ;;  %v2289_v8 = vadd.f32 %v10344_v5, %v2221_v53  ;;  %v1723_v59 = vsel %vm258_vm2, %v16425_v10, %v1521_v45  ;;  %7671 = vrsqrt.f32 %v2038_v12  ;;  %v1529_v50 = vpop.xlane.xlu1 %1528  ;;  %v16435_v28 = vld [vmem:[#allocation211_spill] sm:$0xff]  ;;  %v16440_v23 = vld [vmem:[#allocation190_spill] sm:$0xff] }
 0x37b   : > { %v2352_v24 = vmax.f32 %v2288_v15, 0.0  ;;  %7329 = vmatprep.mubr.bf16.mxu1 %v2398_v9  ;;  %v2155_v30 = vmul.f32 %v10679_v29, %v16424_v54  ;;  %v2041_v43 = vadd.f32 1e-05, %v1913_v60  ;;  %v1787_v31 = vmul.f32 0.015625, %v1723_v59  ;;  %v16437_v60 = vld [vmem:[#allocation191_spill] sm:$0xff] }
 0x37c   : > { %v2222_v32 = vmul.f32 %v10329_v19, %v2154_v52  ;;  %v2353_v21 = vmax.f32 %v2289_v8, 0.0  ;;  %v1912_v6 = vsub.f32 %v1784_v44, %v10164_v51  ;;  %v1722_v29 = vsel %vm258_vm2, %v16426_v1, %v1519_v33  ;;  %v10795_v20 = vpop.eup %7665 }
 0x37d   : > { %v2223_v2 = vmul.f32 %v10329_v19, %v2155_v30  ;;  %7673 = vrsqrt.f32 %v2041_v43  ;;  %v1915_v45 = vsub.f32 %v1787_v31, %v10212_v47  ;;  %v1786_v48 = vmul.f32 0.015625, %v1722_v29  ;;  %v16428_v19 = vld [vmem:[#allocation51_spill] sm:$0xff]  ;;  %v16443_v31 = vld [vmem:[#allocation184_spill] sm:$0xff] }
 0x37e   : > { %v2290_v16 = vadd.f32 %v10344_v5, %v2222_v32  ;;  %v2399_v58 = vpack.c.bf16 %v2353_v21, %v2352_v24  ;;  %v2040_v49 = vadd.f32 1e-05, %v1912_v6  ;;  %v16429_v34 = vsub.f32 %v16427_v4, %v16428_v19  ;;  %v10803_v26 = vpop.eup %7667  ;;  %v16436_v24 = vld [vmem:[#allocation95_spill] sm:$0xff]  ;;  %v1533_v32 = vpop.xlane.xlu1 %1532  ;;  %v16442_v21 = vld [vmem:[#allocation212_spill] sm:$0xff] }
 0x37f   : > { %v2291_v41 = vadd.f32 %v10344_v5, %v2223_v2  ;;  %v2043_v33 = vadd.f32 1e-05, %v1915_v45  ;;  %v1914_v36 = vsub.f32 %v1786_v48, %v10218_v62  ;;  %v16432_v47 = vsub.f32 %v16430_v61, %v16431_v18  ;;  %v16444_v45 = vld [vmem:[#allocation186_spill] sm:$0xff]  ;;  %v16449_v18 = vld [vmem:[#allocation92_spill] sm:$0xff] }
 0x380   : > { %v2354_v51 = vmax.f32 %v2290_v16, 0.0  ;;  %v2156_v63 = vmul.f32 %v10715_v17, %v16429_v34  ;;  %7330 = vmatmul.mubr.bf16.gmra.mrb[32].mxu1 %v2399_v58  ;;  %v1725_v5 = vsel %vm258_vm2, %v16433_v55, %v1525_v38  ;;  %7675 = vrsqrt.f32 %v2040_v49  ;;  %v10816_v17 = vld [vmem:[%s15412_s4 + $0x1] ss:$0 sm:$0xff]  ;;  %v1531_v58 = vpop.xlane.xlu0 %1530  ;;  %v16445_v49 = vld [vmem:[#allocation93_spill] sm:$0xff] }
 0x381   : > { %v2157_v27 = vmul.f32 %v10699_v0, %v16432_v47  ;;  %v2355_v53 = vmax.f32 %v2291_v41, 0.0  ;;  %v1789_v62 = vmul.f32 0.015625, %v1725_v5  ;;  %7677 = vrsqrt.f32 %v2043_v33  ;;  %v16434_v0 = vld [vmem:[#allocation180_spill] sm:$0xff]  ;;  %v10823_v38 = vpop.eup %7669  ;;  %v16446_v41 = vld [vmem:[#allocation189_spill] sm:$0xff] }
 0x382   : > { %v2224_v15 = vmul.f32 %v10816_v17, %v2156_v63  ;;  %v2042_v13 = vadd.f32 1e-05, %v1914_v36  ;;  %v1724_v35 = vsel %vm258_vm2, %v16434_v0, %v1523_v3  ;;  %v16438_v44 = vsub.f32 %v16436_v24, %v16437_v60  ;;  %v16448_v33 = vld [vmem:[#allocation61_spill] sm:$0xff]  ;;  %v16450_v47 = vld [vmem:[#allocation188_spill] sm:$0xff]  ;;  %v16455_v24 = vld [vmem:[#allocation107_spill] sm:$0xff] }
 0x383   : > { %v2225_v9 = vmul.f32 %v10816_v17, %v2157_v27  ;;  %v2400_v7 = vpack.c.bf16 %v2355_v53, %v2354_v51  ;;  %v1917_v52 = vsub.f32 %v1789_v62, %v16435_v28  ;;  %v1788_v12 = vmul.f32 0.015625, %v1724_v35  ;;  %v16453_v0 = vld [vmem:[#allocation53_spill] sm:$0xff] }
 0x384   : > { %v2292_v57 = vadd.f32 %v10828_v39, %v2224_v15  ;;  %7679 = vrsqrt.f32 %v2042_v13  ;;  %v2158_v3 = vmul.f32 %v10739_v42, %v16438_v44  ;;  %v16441_v54 = vsub.f32 %v16439_v14, %v16440_v23  ;;  %v10845_v2 = vpop.eup %7671  ;;  %v16452_v15 = vld [vmem:[#allocation192_spill] sm:$0xff]  ;;  %v1537_v13 = vpop.xlane.xlu1 %1536  ;;  %v16456_v60 = vld [vmem:[#allocation197_spill] sm:$0xff] }
 0x385   : > { %v2293_v8 = vadd.f32 %v10828_v39, %v2225_v9  ;;  %7333 = vmatprep.mubr.bf16.mxu1 %v2400_v7  ;;  %v2045_v59 = vadd.f32 1e-05, %v1917_v52  ;;  %v1916_v43 = vsub.f32 %v1788_v12, %v16442_v21  ;;  %v1727_v6 = vsel %vm258_vm2, %v16443_v31, %v1529_v50  ;;  %v16454_v12 = vld [vmem:[#allocation195_spill] sm:$0xff]  ;;  %v1535_v14 = vpop.xlane.xlu0 %1534  ;;  %v16460_v31 = vld [vmem:[#allocation196_spill] sm:$0xff] }
 0x386   : > { %v2159_v30 = vmul.f32 %v10722_v11, %v16441_v54  ;;  %v2356_v10 = vmax.f32 %v2292_v57, 0.0  ;;  %v2226_v42 = vmul.f32 %v10816_v17, %v2158_v3  ;;  %v1791_v29 = vmul.f32 0.015625, %v1727_v6 }
 0x387   : > { %v2357_v16 = vmax.f32 %v2293_v8, 0.0  ;;  %7681 = vrsqrt.f32 %v2045_v59  ;;  %v2044_v11 = vadd.f32 1e-05, %v1916_v43  ;;  %v1726_v48 = vsel %vm258_vm2, %v16444_v45, %v1527_v56  ;;  %v10856_v4 = vpop.eup %7673  ;;  %v16459_v43 = vld [vmem:[#allocation106_spill] sm:$0xff]  ;;  %v16463_v45 = vld [vmem:[#allocation41_spill] sm:$0xff] }
 0x388   : > { %v2227_v1 = vmul.f32 %v10816_v17, %v2159_v30  ;;  %v16447_v51 = vsub.f32 %v16445_v49, %v16446_v41  ;;  %v2294_v34 = vadd.f32 %v10828_v39, %v2226_v42  ;;  %v1919_v36 = vsub.f32 %v1791_v29, %v16448_v33 }
 0x389   : > { %v2401_v19 = vpack.c.bf16 %v2357_v16, %v2356_v10  ;;  %7683 = vrsqrt.f32 %v2044_v11  ;;  %v1790_v61 = vmul.f32 0.015625, %v1726_v48  ;;  %v16451_v27 = vsub.f32 %v16449_v18, %v16450_v47 }
 0x38a   : > { %v2160_v50 = vmul.f32 %v10763_v40, %v16447_v51  ;;  %v2295_v63 = vadd.f32 %v10828_v39, %v2227_v1  ;;  %v2358_v40 = vmax.f32 %v2294_v34, 0.0  ;;  %v2047_v53 = vadd.f32 1e-05, %v1919_v36  ;;  %v10869_v9 = vpop.eup %7675  ;;  %v16462_v1 = vld [vmem:[#allocation198_spill] sm:$0xff]  ;;  %v16464_v51 = vld [vmem:[#allocation199_spill] sm:$0xff] }
 0x38b   : > { %v2161_v55 = vmul.f32 %v10750_v22, %v16451_v27  ;;  %7334 = vmatmul.mubr.bf16.gmra.mrb[36].mxu1 %v2401_v19  ;;  %v1729_v62 = vsel %vm258_vm2, %v16452_v15, %v1533_v32  ;;  %v1918_v35 = vsub.f32 %v1790_v61, %v16453_v0  ;;  %v10874_v28 = vpop.eup %7677  ;;  %v1728_v8 = vsel %vm258_vm2, %v16454_v12, %v1531_v58  ;;  %v16458_v32 = vld [vmem:[#allocation47_spill] sm:$0xff]  ;;  %v16466_v27 = vld [vmem:[#allocation105_spill] sm:$0xff]  ;;  %v16470_v0 = vld [vmem:[#allocation104_spill] sm:$0xff] }
 0x38c   : > { %v2228_v5 = vmul.f32 %v10816_v17, %v2160_v50  ;;  %v2359_v56 = vmax.f32 %v2295_v63, 0.0  ;;  %v1793_v22 = vmul.f32 0.015625, %v1729_v62  ;;  %7685 = vrsqrt.f32 %v2047_v53  ;;  %v1541_v50 = vpop.xlane.xlu1 %1540  ;;  %v16465_v63 = vld [vmem:[#allocation63_spill] sm:$0xff]  ;;  %v16469_v62 = vld [vmem:[#allocation89_spill] sm:$0xff] }
 0x38d   : > { %v2229_v7 = vmul.f32 %v10816_v17, %v2161_v55  ;;  %v16457_v44 = vsub.f32 %v16455_v24, %v16456_v60  ;;  %v2046_v23 = vadd.f32 1e-05, %v1918_v35  ;;  %v1792_v21 = vmul.f32 0.015625, %v1728_v8  ;;  %v16467_v55 = vld [vmem:[#allocation194_spill] sm:$0xff]  ;;  %v16471_v35 = vld [vmem:[#allocation193_spill] sm:$0xff] }
 0x38e   : > { %v2296_v57 = vadd.f32 %v10828_v39, %v2228_v5  ;;  %v2402_v52 = vpack.c.bf16 %v2359_v56, %v2358_v40  ;;  %v1921_v10 = vsub.f32 %v1793_v22, %v16458_v32  ;;  %v7680_v59 = vpop.eup %7679  ;;  %v16461_v6 = vsub.f32 %v16459_v43, %v16460_v31  ;;  %v1539_v56 = vpop.xlane.xlu0 %1538  ;;  %v16473_v22 = vld [vmem:[#allocation204_spill] sm:$0xff]  ;;  %v16477_v43 = vld [vmem:[#allocation203_spill] sm:$0xff] }
 0x38f   : > { %v2162_v3 = vmul.f32 %v10779_v25, %v16457_v44  ;;  %v2297_v54 = vadd.f32 %v10828_v39, %v2229_v7  ;;  %v1731_v25 = vsel %vm258_vm2, %v16462_v1, %v1537_v13  ;;  %7687 = vrsqrt.f32 %v2046_v23  ;;  %v16474_v44 = vld [vmem:[#allocation207_spill] sm:$0xff] }
 0x390   : > { %v2360_v30 = vmax.f32 %v2296_v57, 0.0  ;;  %7337 = vmatprep.mubr.bf16.mxu1 %v2402_v52  ;;  %v2163_v16 = vmul.f32 %v10768_v46, %v16461_v6  ;;  %v2049_v58 = vadd.f32 1e-05, %v1921_v10  ;;  %v1795_v11 = vmul.f32 0.015625, %v1731_v25 }
 0x391   : > { %v2230_v42 = vmul.f32 %v10816_v17, %v2162_v3  ;;  %v2361_v29 = vmax.f32 %v2297_v54, 0.0  ;;  %v1920_v48 = vsub.f32 %v1792_v21, %v16463_v45  ;;  %v1730_v46 = vsel %vm258_vm2, %v16464_v51, %v1535_v14  ;;  %v10899_v19 = vpop.eup %7681  ;;  %v16475_v54 = vld [vmem:[#allocation148_spill] sm:$0xff]  ;;  %v16476_v21 = vld [vmem:[#allocation119_spill] sm:$0xff] }
 0x392   : > { %v2231_v49 = vmul.f32 %v10816_v17, %v2163_v16  ;;  %7689 = vrsqrt.f32 %v2049_v58  ;;  %v1923_v33 = vsub.f32 %v1795_v11, %v16465_v63  ;;  %v1794_v36 = vmul.f32 0.015625, %v1730_v46  ;;  %v16479_v16 = vld [vmem:[#allocation118_spill] sm:$0xff]  ;;  %v16482_v11 = vld [vmem:[#allocation37_spill] sm:$0xff]  ;;  %v16486_v63 = vld [vmem:[#allocation116_spill] sm:$0xff] }
 0x393   : > { %v2298_v41 = vadd.f32 %v10828_v39, %v2230_v42  ;;  %v2403_v34 = vpack.c.bf16 %v2361_v29, %v2360_v30  ;;  %v2048_v61 = vadd.f32 1e-05, %v1920_v48  ;;  %v16468_v5 = vsub.f32 %v16466_v27, %v16467_v55  ;;  %v7684_v53 = vpop.eup %7683  ;;  %v16480_v42 = vld [vmem:[#allocation202_spill] sm:$0xff]  ;;  %v16483_v48 = vld [vmem:[#allocation117_spill] sm:$0xff] }
 0x394   : > { %v2299_v18 = vadd.f32 %v10828_v39, %v2231_v49  ;;  %v2051_v15 = vadd.f32 1e-05, %v1923_v33  ;;  %v1922_v13 = vsub.f32 %v1794_v36, %v16469_v62  ;;  %v16472_v7 = vsub.f32 %v16470_v0, %v16471_v35  ;;  %v16484_v49 = vld [vmem:[#allocation201_spill] sm:$0xff]  ;;  %v16487_v33 = vld [vmem:[#allocation200_spill] sm:$0xff] }
 0x395   : > { %v2362_v47 = vmax.f32 %v2298_v41, 0.0  ;;  %v2164_v40 = vmul.f32 %v10803_v26, %v16468_v5  ;;  %7338 = vmatmul.mubr.bf16.gmra.mrb[40].mxu1 %v2403_v34  ;;  %v1733_v52 = vsel %vm258_vm2, %v16473_v22, %v1541_v50  ;;  %7691 = vrsqrt.f32 %v2048_v61  ;;  %v16490_v27 = vld [vmem:[#allocation209_spill] sm:$0xff]  ;;  %v16493_v0 = vld [vmem:[#allocation208_spill] sm:$0xff] }
 0x396   : > { %v2165_v57 = vmul.f32 %v10795_v20, %v16472_v7  ;;  %v2363_v12 = vmax.f32 %v2299_v18, 0.0  ;;  %v1797_v26 = vmul.f32 0.015625, %v1733_v52  ;;  %7693 = vrsqrt.f32 %v2051_v15  ;;  %v7686_v14 = vpop.eup %7685 }
 0x397   : > { %v2232_v8 = vmul.f32 %v10816_v17, %v2164_v40  ;;  %v2050_v24 = vadd.f32 1e-05, %v1922_v13  ;;  %v1732_v3 = vsel %vm258_vm2, %v16474_v44, %v1539_v56  ;;  %v16478_v31 = vsub.f32 %v16476_v21, %v16477_v43 }
 0x398   : > { %v2233_v60 = vmul.f32 %v10816_v17, %v2165_v57  ;;  %v2404_v23 = vpack.c.bf16 %v2363_v12, %v2362_v47  ;;  %v1925_v30 = vsub.f32 %v1797_v26, %v16475_v54  ;;  %v1796_v32 = vmul.f32 0.015625, %v1732_v3  ;;  %v16489_v47 = vld [vmem:[#allocation131_spill] sm:$0xff]  ;;  %v16499_v54 = vld [vmem:[#allocation205_spill] sm:$0xff] }
 0x399   : > { %v2300_v20 = vadd.f32 %v10828_v39, %v2232_v8  ;;  %7695 = vrsqrt.f32 %v2050_v24  ;;  %v2166_v6 = vmul.f32 %v10845_v2, %v16478_v31  ;;  %v16481_v1 = vsub.f32 %v16479_v16, %v16480_v42  ;;  %v7688_v46 = vpop.eup %7687  ;;  %v16495_v12 = vld [vmem:[#allocation127_spill] sm:$0xff]  ;;  %v16496_v8 = vld [vmem:[#allocation206_spill] sm:$0xff] }
 0x39a   : > { %v2301_v10 = vadd.f32 %v10828_v39, %v2233_v60  ;;  %7341 = vmatprep.mubr.bf16.mxu1 %v2404_v23  ;;  %v2053_v58 = vadd.f32 1e-05, %v1925_v30  ;;  %v1924_v45 = vsub.f32 %v1796_v32, %v16482_v11  ;;  %v16485_v41 = vsub.f32 %v16483_v48, %v16484_v49  ;;  %v16501_v31 = vld [vmem:[#allocation142_spill] sm:$0xff] }
 0x39b   : > { %v2167_v25 = vmul.f32 %v10823_v38, %v16481_v1  ;;  %v2364_v29 = vmax.f32 %v2300_v20, 0.0  ;;  %v2234_v34 = vmul.f32 %v10816_v17, %v2166_v6  ;;  %v16488_v36 = vsub.f32 %v16486_v63, %v16487_v33  ;;  %v16498_v20 = vld [vmem:[#allocation125_spill] sm:$0xff] }
 0x39c   : > { %v2168_v51 = vmul.f32 %v10869_v9, %v16485_v41  ;;  %v2365_v50 = vmax.f32 %v2301_v10, 0.0  ;;  %7697 = vrsqrt.f32 %v2053_v58  ;;  %v2052_v61 = vadd.f32 1e-05, %v1924_v45  ;;  %v7690_v9 = vpop.eup %7689  ;;  %v16502_v6 = vld [vmem:[#allocation213_spill] sm:$0xff]  ;;  %v16505_v58 = vld [vmem:[#allocation38_spill] sm:$0xff] }
 0x39d   : > { %v2235_v2 = vmul.f32 %v10816_v17, %v2167_v25  ;;  %v2169_v38 = vmul.f32 %v10856_v4, %v16488_v36  ;;  %v16491_v55 = vsub.f32 %v16489_v47, %v16490_v27  ;;  %v2302_v56 = vadd.f32 %v10828_v39, %v2234_v34  ;;  %v16492_v4 = vld [vmem:[#allocation130_spill] sm:$0xff]  ;;  %v16510_v36 = vld [vmem:[#allocation135_spill] sm:$0xff]  ;;  %v16514_v47 = vld [vmem:[#allocation153_spill] sm:$0xff] }
 0x39e   : > { %v2236_v18 = vmul.f32 %v10816_v17, %v2168_v51  ;;  %v2405_v40 = vpack.c.bf16 %v2365_v50, %v2364_v29  ;;  %7699 = vrsqrt.f32 %v2052_v61  ;;  %v16494_v35 = vsub.f32 %v16492_v4, %v16493_v0  ;;  %v16504_v29 = vld [vmem:[#allocation141_spill] sm:$0xff]  ;;  %v16507_v51 = vld [vmem:[#allocation138_spill] sm:$0xff] }
 0x39f   : > { %v2170_v5 = vmul.f32 %v7680_v59, %v16491_v55  ;;  %v2303_v15 = vadd.f32 %v10828_v39, %v2235_v2  ;;  %v2237_v62 = vmul.f32 %v10816_v17, %v2169_v38  ;;  %v2366_v59 = vmax.f32 %v2302_v56, 0.0  ;;  %v7692_v60 = vpop.eup %7691  ;;  %v16508_v50 = vld [vmem:[#allocation46_spill] sm:$0xff] }
 0x3a0   : > { %v2304_v13 = vadd.f32 %v10828_v39, %v2236_v18  ;;  %v2171_v7 = vmul.f32 %v10874_v28, %v16494_v35  ;;  %7342 = vmatmul.mubr.bf16.gmra.mrb[44].mxu1 %v2405_v40  ;;  %v16497_v26 = vsub.f32 %v16495_v12, %v16496_v8  ;;  %v16500_v28 = vsub.f32 %v16498_v20, %v16499_v54  ;;  %v7694_v32 = vpop.eup %7693  ;;  %v16511_v38 = vld [vmem:[#allocation210_spill] sm:$0xff]  ;;  %v16513_v18 = vld [vmem:[#allocation55_spill] sm:$0xff] }
 0x3a1   : > { %v2238_v57 = vmul.f32 %v10816_v17, %v2170_v5  ;;  %v2367_v22 = vmax.f32 %v2303_v15, 0.0  ;;  %v2305_v52 = vadd.f32 %v10828_v39, %v2237_v62  ;;  %v16503_v16 = vsub.f32 %v16501_v31, %v16502_v6  ;;  %v16515_v40 = vld [vmem:[#allocation154_spill] sm:$0xff] }
 0x3a2   : > { %v2172_v24 = vmul.f32 %v7684_v53, %v16497_v26  ;;  %v2368_v44 = vmax.f32 %v2304_v13, 0.0  ;;  %v2239_v3 = vmul.f32 %v10816_v17, %v2171_v7  ;;  %v2173_v30 = vmul.f32 %v10899_v19, %v16500_v28  ;;  %v16516_v56 = vld [vmem:[#allocation62_spill] sm:$0xff]  ;;  %v16518_v26 = vld [vmem:[#allocation75_spill] sm:$0xff] }
 0x3a3   : > { %v2306_v23 = vadd.f32 %v10828_v39, %v2238_v57  ;;  %v2406_v10 = vpack.c.bf16 %v2367_v22, %v2366_v59  ;;  %v2369_v21 = vmax.f32 %v2305_v52, 0.0  ;;  %v2174_v53 = vmul.f32 %v7688_v46, %v16503_v16  ;;  %v7696_v48 = vpop.eup %7695 }
 0x3a4   : > { %v2240_v43 = vmul.f32 %v10816_v17, %v2172_v24  ;;  %v2307_v42 = vadd.f32 %v10828_v39, %v2239_v3  ;;  %v2241_v25 = vmul.f32 %v10816_v17, %v2173_v30  ;;  %v16506_v11 = vsub.f32 %v16504_v29, %v16505_v58  ;;  %v16519_v24 = vld [vmem:[#allocation150_spill] sm:$0xff]  ;;  %v16521_v3 = vld [vmem:[#allocation152_spill] sm:$0xff] }
 0x3a5   : > { %v2370_v1 = vmax.f32 %v2306_v23, 0.0  ;;  %7345 = vmatprep.mubr.bf16.mxu1 %v2406_v10  ;;  %v2407_v19 = vpack.c.bf16 %v2369_v21, %v2368_v44  ;;  %v2242_v41 = vmul.f32 %v10816_v17, %v2174_v53  ;;  %v16509_v34 = vsub.f32 %v16507_v51, %v16508_v50  ;;  %v16520_v44 = vld [vmem:[#allocation74_spill] sm:$0xff] }
 0x3a6   : > { %v2175_v45 = vmul.f32 %v7686_v14, %v16506_v11  ;;  %v2308_v49 = vadd.f32 %v10828_v39, %v2240_v43  ;;  %v2371_v2 = vmax.f32 %v2307_v42, 0.0  ;;  %v2309_v63 = vadd.f32 %v10828_v39, %v2241_v25  ;;  %v7698_v13 = vpop.eup %7697 }
 0x3a7   : > { %v2176_v46 = vmul.f32 %v7692_v60, %v16509_v34  ;;  %v16512_v61 = vsub.f32 %v16510_v36, %v16511_v38  ;;  %v1987_v27 = vsub.f32 %v16514_v47, %v16513_v18  ;;  %v2310_v5 = vadd.f32 %v10828_v39, %v2242_v41 }
 0x3a8   : > { %v2243_v33 = vmul.f32 %v10816_v17, %v2175_v45  ;;  %v2372_v55 = vmax.f32 %v2308_v49, 0.0  ;;  %v16517_v15 = vsub.f32 %v16515_v40, %v16516_v56  ;;  %v2408_v4 = vpack.c.bf16 %v2371_v2, %v2370_v1  ;;  %7346 = vmatmul.mubr.bf16.gmra.mrb[48].mxu1 %v2407_v19  ;;  %v7700_v59 = vpop.eup %7699  ;;  %v11010_v49 = vld [vmem:[%s15412_s4 + $0x3] ss:$0 sm:$0xff] }
 0x3a9   : > { %v2177_v14 = vmul.f32 %v7690_v9, %v16512_v61  ;;  %v2373_v0 = vmax.f32 %v2309_v63, 0.0  ;;  %v2244_v7 = vmul.f32 %v10816_v17, %v2176_v46  ;;  %v2179_v57 = vmul.f32 %v7694_v32, %v1987_v27 }
 0x3aa   : > { %v2178_v62 = vmul.f32 %v7696_v48, %v16517_v15  ;;  %v2311_v35 = vadd.f32 %v10828_v39, %v2243_v33  ;;  %7349 = vmatprep.mubr.bf16.mxu1 %v2408_v4  ;;  %v2374_v52 = vmax.f32 %v2310_v5, 0.0  ;;  %v1989_v60 = vsub.f32 %v16519_v24, %v16518_v26 }
 0x3ab   : > { %v2245_v9 = vmul.f32 %v10816_v17, %v2177_v14  ;;  %v2409_v22 = vpack.c.bf16 %v2373_v0, %v2372_v55  ;;  %v1988_v23 = vsub.f32 %v16521_v3, %v16520_v44  ;;  %v2247_v20 = vmul.f32 %v10816_v17, %v2179_v57 }
 0x3ac   : > { %v2375_v12 = vmax.f32 %v2311_v35, 0.0  ;;  %v2246_v8 = vmul.f32 %v10816_v17, %v2178_v62  ;;  %v2312_v54 = vadd.f32 %v10828_v39, %v2244_v7  ;;  %v2181_v32 = vmul.f32 %v7698_v13, %v1989_v60 }
 0x3ad   : > { %v2313_v28 = vadd.f32 %v10828_v39, %v2245_v9  ;;  %v2180_v30 = vmul.f32 %v7700_v59, %v1988_v23  ;;  %v2315_v43 = vadd.f32 %v10828_v39, %v2247_v20 }
 0x3ae   : > { %v2410_v10 = vpack.c.bf16 %v2375_v12, %v2374_v52  ;;  %v2314_v21 = vadd.f32 %v10828_v39, %v2246_v8  ;;  %v2376_v31 = vmax.f32 %v2312_v54, 0.0  ;;  %v2249_v53 = vmul.f32 %v10816_v17, %v2181_v32 }
 0x3af   : > { %v2377_v6 = vmax.f32 %v2313_v28, 0.0  ;;  %v2248_v16 = vmul.f32 %v10816_v17, %v2180_v30  ;;  %v2379_v1 = vmax.f32 %v2315_v43, 0.0 }
 0x3b0   : > { %7350 = vmatmul.mubr.bf16.gmra.mrb[52].mxu1 %v2409_v22  ;;  %v2378_v42 = vmax.f32 %v2314_v21, 0.0  ;;  %v2317_v58 = vadd.f32 %v10828_v39, %v2249_v53 }
 0x3b1   : > { %7353 = vmatprep.mubr.bf16.mxu1 %v2410_v10  ;;  %v2411_v25 = vpack.c.bf16 %v2377_v6, %v2376_v31  ;;  %v2316_v29 = vadd.f32 %v10828_v39, %v2248_v16 }
 0x3b2   : > { %v2412_v11 = vpack.c.bf16 %v2379_v1, %v2378_v42  ;;  %v2381_v48 = vmax.f32 %v2317_v58, 0.0 }
 0x3b3   : > { %v2380_v45 = vmax.f32 %v2316_v29, 0.0 }
 0x3b5   : > { %v2413_v19 = vpack.c.bf16 %v2381_v48, %v2380_v45 }
 0x3b8   : > { %7354 = vmatmul.mubr.bf16.gmra.mrb[56].mxu1 %v2411_v25 }
 0x3b9   : > { %7357 = vmatprep.mubr.bf16.mxu1 %v2412_v11 }
 0x3c0   : > { %7358 = vmatmul.mubr.bf16.gmra.mrb[60].mxu1 %v2413_v19 }
 0x3f8   : > { %v7299_v17 = vpop.f32.mrb[0].mxu1 }
 0x3f9   : > { %v11013_v41 = vadd.f32 %v7299_v17, %v11010_v49  ;;  %v2517_v51 = vpop.f32.mrb[1].mxu1 }
 0x3fa   : > { %v7300_v50 = vpop.f32.mrb[2].mxu1  ;;  %v11016_v39 = vadd.f32 %v11010_v49, %v2517_v51 }
 0x3fb   : > { %16522 = vst [vmem:[#allocation44_spill] sm:$0xff] %v11013_v41  ;;  %v11019_v34 = vadd.f32 %v7300_v50, %v11010_v49  ;;  %v2520_v46 = vpop.f32.mrb[3].mxu1  ;;  %v11024_v2 = vsel %vm258_vm2, %v11013_v41, 0.0 }
 0x3fc   : > { %16523 = vst [vmem:[#allocation58_spill] sm:$0xff] %v11016_v39  ;;  %2906 = vadd.xlane.f32.xlu0 %v11024_v2  ;;  %v11028_v63 = vadd.f32 %v11010_v49, %v2520_v46  ;;  %v11039_v36 = vsel %vm258_vm2, %v11016_v39, 0.0  ;;  %v11050_v61 = vsub.f32 %v11013_v41, %v11024_v2 }
 0x3fd   : > { %16524 = vst [vmem:[#allocation60_spill] sm:$0xff] %v11019_v34  ;;  %v11033_v33 = vsel %vm258_vm2, %v11019_v34, 0.0  ;;  %v11060_v55 = vsub.f32 %v11016_v39, %v11039_v36 }
 0x3fe   : > { %16525 = vst [vmem:[#allocation56_spill] sm:$0xff] %v11028_v63  ;;  %2908 = vadd.xlane.f32.xlu1 %v11033_v33  ;;  %v11045_v38 = vsel %vm258_vm2, %v11028_v63, 0.0  ;;  %v11055_v18 = vsub.f32 %v11019_v34, %v11033_v33 }
 0x3ff   : > { %v11068_v56 = vsub.f32 %v11028_v63, %v11045_v38 }
 0x400   : > { %2902 = vadd.xlane.f32.xlu0 %v11039_v36 }
 0x402   : > { %2904 = vadd.xlane.f32.xlu1 %v11045_v38 }
 0x404   : > { %3034 = vadd.xlane.f32.xlu0 %v11050_v61 }
 0x405   : > { %v7303_v14 = vpop.f32.mrb[4].mxu1 }
 0x406   : > { %v2533_v47 = vpop.f32.mrb[5].mxu1  ;;  %3036 = vadd.xlane.f32.xlu1 %v11055_v18  ;;  %v11063_v5 = vadd.f32 %v7303_v14, %v11010_v49 }
 0x407   : > { %v7304_v27 = vpop.f32.mrb[6].mxu1  ;;  %v11075_v62 = vadd.f32 %v11010_v49, %v2533_v47 }
 0x408   : > { %16526 = vst [vmem:[#allocation57_spill] sm:$0xff] %v11063_v5  ;;  %v2536_v40 = vpop.f32.mrb[7].mxu1  ;;  %3030 = vadd.xlane.f32.xlu0 %v11060_v55  ;;  %v11071_v15 = vadd.f32 %v7304_v27, %v11010_v49  ;;  %v11080_v13 = vsel %vm258_vm2, %v11063_v5, 0.0 }
 0x409   : > { %16528 = vst [vmem:[#allocation36_spill] sm:$0xff] %v11075_v62  ;;  %v11084_v4 = vadd.f32 %v11010_v49, %v2536_v40  ;;  %v11095_v35 = vsel %vm258_vm2, %v11075_v62, 0.0  ;;  %v11106_v22 = vsub.f32 %v11063_v5, %v11080_v13 }
 0x40a   : > { %16527 = vst [vmem:[#allocation71_spill] sm:$0xff] %v11071_v15  ;;  %3032 = vadd.xlane.f32.xlu1 %v11068_v56  ;;  %v11089_v0 = vsel %vm258_vm2, %v11071_v15, 0.0  ;;  %v11116_v8 = vsub.f32 %v11075_v62, %v11095_v35 }
 0x40b   : > { %16529 = vst [vmem:[#allocation78_spill] sm:$0xff] %v11084_v4  ;;  %v11101_v57 = vsel %vm258_vm2, %v11084_v4, 0.0  ;;  %v11111_v12 = vsub.f32 %v11071_v15, %v11089_v0 }
 0x40c   : > { %2914 = vadd.xlane.f32.xlu0 %v11080_v13  ;;  %v11124_v24 = vsub.f32 %v11084_v4, %v11101_v57 }
 0x40e   : > { %2916 = vadd.xlane.f32.xlu1 %v11089_v0 }
 0x410   : > { %2910 = vadd.xlane.f32.xlu0 %v11095_v35 }
 0x412   : > { %v7307_v7 = vpop.f32.mrb[8].mxu1  ;;  %2912 = vadd.xlane.f32.xlu1 %v11101_v57 }
 0x413   : > { %v2549_v9 = vpop.f32.mrb[9].mxu1  ;;  %v11119_v26 = vadd.f32 %v7307_v7, %v11010_v49 }
 0x414   : > { %v7308_v59 = vpop.f32.mrb[10].mxu1  ;;  %3042 = vadd.xlane.f32.xlu0 %v11106_v22  ;;  %v11131_v3 = vadd.f32 %v11010_v49, %v2549_v9 }
 0x415   : > { %v2552_v52 = vpop.f32.mrb[11].mxu1  ;;  %16530 = vst [vmem:[#allocation79_spill] sm:$0xff] %v11119_v26  ;;  %v11127_v60 = vadd.f32 %v7308_v59, %v11010_v49  ;;  %v11136_v20 = vsel %vm258_vm2, %v11119_v26, 0.0 }
 0x416   : > { %3044 = vadd.xlane.f32.xlu1 %v11111_v12  ;;  %16532 = vst [vmem:[#allocation45_spill] sm:$0xff] %v11131_v3  ;;  %16533 = vst [vmem:[#allocation133_spill] sm:$0xff] %v11136_v20  ;;  %v11140_v28 = vadd.f32 %v11010_v49, %v2552_v52  ;;  %v11151_v10 = vsel %vm258_vm2, %v11131_v3, 0.0  ;;  %v11162_v43 = vsub.f32 %v11119_v26, %v11136_v20 }
 0x417   : > { %16531 = vst [vmem:[#allocation5_spill] sm:$0xff] %v11127_v60  ;;  %v11145_v32 = vsel %vm258_vm2, %v11127_v60, 0.0  ;;  %v11172_v42 = vsub.f32 %v11131_v3, %v11151_v10 }
 0x418   : > { %3038 = vadd.xlane.f32.xlu0 %v11116_v8  ;;  %16534 = vst [vmem:[#allocation3_spill] sm:$0xff] %v11140_v28  ;;  %16535 = vst [vmem:[#allocation39_spill] sm:$0xff] %v11145_v32  ;;  %v11157_v21 = vsel %vm258_vm2, %v11140_v28, 0.0  ;;  %v11167_v6 = vsub.f32 %v11127_v60, %v11145_v32 }
 0x419   : > { %16536 = vst [vmem:[#allocation149_spill] sm:$0xff] %v11162_v43  ;;  %v11180_v29 = vsub.f32 %v11140_v28, %v11157_v21 }
 0x41a   : > { %3040 = vadd.xlane.f32.xlu1 %v11124_v24  ;;  %16537 = vst [vmem:[#allocation72_spill] sm:$0xff] %v11167_v6 }
 0x41b   : > { %16539 = vst [vmem:[#allocation4_spill] sm:$0xff] %v11180_v29 }
 0x41c   : > { %2922 = vadd.xlane.f32.xlu0 %v11136_v20 }
 0x41e   : > { %v7311_v44 = vpop.f32.mrb[12].mxu1  ;;  %2924 = vadd.xlane.f32.xlu1 %v11145_v32 }
 0x41f   : > { %v2565_v23 = vpop.f32.mrb[13].mxu1  ;;  %v11175_v1 = vadd.f32 %v7311_v44, %v11010_v49 }
 0x420   : > { %v7312_v54 = vpop.f32.mrb[14].mxu1  ;;  %2918 = vadd.xlane.f32.xlu0 %v11151_v10  ;;  %v11187_v11 = vadd.f32 %v11010_v49, %v2565_v23 }
 0x421   : > { %v2568_v30 = vpop.f32.mrb[15].mxu1  ;;  %16538 = vst [vmem:[#allocation73_spill] sm:$0xff] %v11175_v1  ;;  %v11183_v58 = vadd.f32 %v7312_v54, %v11010_v49  ;;  %v11192_v45 = vsel %vm258_vm2, %v11175_v1, 0.0 }
 0x422   : > { %2920 = vadd.xlane.f32.xlu1 %v11157_v21  ;;  %16541 = vst [vmem:[#allocation137_spill] sm:$0xff] %v11187_v11  ;;  %16542 = vst [vmem:[#allocation2_spill] sm:$0xff] %v11192_v45  ;;  %v11196_v48 = vadd.f32 %v11010_v49, %v2568_v30  ;;  %v11207_v50 = vsel %vm258_vm2, %v11187_v11, 0.0  ;;  %v11218_v27 = vsub.f32 %v11175_v1, %v11192_v45 }
 0x423   : > { %16540 = vst [vmem:[#allocation43_spill] sm:$0xff] %v11183_v58  ;;  %v11201_v19 = vsel %vm258_vm2, %v11183_v58, 0.0  ;;  %16545 = vst [vmem:[#allocation90_spill] sm:$0xff] %v11207_v50  ;;  %v11228_v7 = vsub.f32 %v11187_v11, %v11207_v50 }
 0x424   : > { %3050 = vadd.xlane.f32.xlu0 %v11162_v43  ;;  %16543 = vst [vmem:[#allocation29_spill] sm:$0xff] %v11196_v48  ;;  %16544 = vst [vmem:[#allocation132_spill] sm:$0xff] %v11201_v19  ;;  %v11213_v47 = vsel %vm258_vm2, %v11196_v48, 0.0  ;;  %v11223_v40 = vsub.f32 %v11183_v58, %v11201_v19 }
 0x425   : > { %16546 = vst [vmem:[#allocation91_spill] sm:$0xff] %v11213_v47  ;;  %16547 = vst [vmem:[#allocation9_spill] sm:$0xff] %v11218_v27  ;;  %v11236_v44 = vsub.f32 %v11196_v48, %v11213_v47 }
 0x426   : > { %3052 = vadd.xlane.f32.xlu1 %v11167_v6  ;;  %16548 = vst [vmem:[#allocation69_spill] sm:$0xff] %v11223_v40  ;;  %16549 = vst [vmem:[#allocation86_spill] sm:$0xff] %v11228_v7 }
 0x427   : > { %16551 = vst [vmem:[#allocation8_spill] sm:$0xff] %v11236_v44 }
 0x428   : > { %3046 = vadd.xlane.f32.xlu0 %v11172_v42 }
 0x429   : > { %v7315_v31 = vpop.f32.mrb[16].mxu1 }
 0x42a   : > { %v2581_v16 = vpop.f32.mrb[17].mxu1  ;;  %3048 = vadd.xlane.f32.xlu1 %v11180_v29  ;;  %v11231_v9 = vadd.f32 %v7315_v31, %v11010_v49 }
 0x42b   : > { %v7316_v53 = vpop.f32.mrb[18].mxu1  ;;  %v11243_v58 = vadd.f32 %v11010_v49, %v2581_v16 }
 0x42c   : > { %v2584_v25 = vpop.f32.mrb[19].mxu1  ;;  %2930 = vadd.xlane.f32.xlu0 %v11192_v45  ;;  %16550 = vst [vmem:[#allocation87_spill] sm:$0xff] %v11231_v9  ;;  %v11239_v23 = vadd.f32 %v7316_v53, %v11010_v49  ;;  %v11248_v31 = vsel %vm258_vm2, %v11231_v9, 0.0 }
 0x42d   : > { %16553 = vst [vmem:[#allocation85_spill] sm:$0xff] %v11243_v58  ;;  %16554 = vst [vmem:[#allocation102_spill] sm:$0xff] %v11248_v31  ;;  %v11252_v1 = vadd.f32 %v11010_v49, %v2584_v25  ;;  %v11263_v16 = vsel %vm258_vm2, %v11243_v58, 0.0  ;;  %v11278_v60 = vsub.f32 %v11231_v9, %v11248_v31 }
 0x42e   : > { %2932 = vadd.xlane.f32.xlu1 %v11201_v19  ;;  %16552 = vst [vmem:[#allocation77_spill] sm:$0xff] %v11239_v23  ;;  %v11257_v53 = vsel %vm258_vm2, %v11239_v23, 0.0  ;;  %16557 = vst [vmem:[#allocation7_spill] sm:$0xff] %v11263_v16  ;;  %v11292_v15 = vsub.f32 %v11243_v58, %v11263_v16 }
 0x42f   : > { %16555 = vst [vmem:[#allocation103_spill] sm:$0xff] %v11252_v1  ;;  %16556 = vst [vmem:[#allocation172_spill] sm:$0xff] %v11257_v53  ;;  %v11271_v25 = vsel %vm258_vm2, %v11252_v1, 0.0  ;;  %v11287_v3 = vsub.f32 %v11239_v23, %v11257_v53 }
 0x430   : > { %2926 = vadd.xlane.f32.xlu0 %v11207_v50  ;;  %16558 = vst [vmem:[#allocation59_spill] sm:$0xff] %v11271_v25  ;;  %16559 = vst [vmem:[#allocation6_spill] sm:$0xff] %v11278_v60  ;;  %v11300_v9 = vsub.f32 %v11252_v1, %v11271_v25 }
 0x431   : > { %16560 = vst [vmem:[#allocation40_spill] sm:$0xff] %v11287_v3  ;;  %16561 = vst [vmem:[#allocation173_spill] sm:$0xff] %v11292_v15 }
 0x432   : > { %2928 = vadd.xlane.f32.xlu1 %v11213_v47  ;;  %16563 = vst [vmem:[#allocation99_spill] sm:$0xff] %v11300_v9 }
 0x434   : > { %v7319_v17 = vpop.f32.mrb[20].mxu1  ;;  %3058 = vadd.xlane.f32.xlu0 %v11218_v27 }
 0x435   : > { %v2597_v51 = vpop.f32.mrb[21].mxu1  ;;  %v11295_v5 = vadd.f32 %v7319_v17, %v11010_v49 }
 0x436   : > { %v7320_v46 = vpop.f32.mrb[22].mxu1  ;;  %3060 = vadd.xlane.f32.xlu1 %v11223_v40  ;;  %v11309_v62 = vadd.f32 %v11010_v49, %v2597_v51 }
 0x437   : > { %v2600_v14 = vpop.f32.mrb[23].mxu1  ;;  %16562 = vst [vmem:[#allocation98_spill] sm:$0xff] %v11295_v5  ;;  %v11303_v4 = vadd.f32 %v7320_v46, %v11010_v49  ;;  %v11316_v17 = vsel %vm258_vm2, %v11295_v5, 0.0 }
 0x438   : > { %3054 = vadd.xlane.f32.xlu0 %v11228_v7  ;;  %16565 = vst [vmem:[#allocation13_spill] sm:$0xff] %v11309_v62  ;;  %16566 = vst [vmem:[#allocation68_spill] sm:$0xff] %v11316_v17  ;;  %v11322_v46 = vadd.f32 %v11010_v49, %v2600_v14  ;;  %v11335_v41 = vsel %vm258_vm2, %v11309_v62, 0.0  ;;  %v11346_v63 = vsub.f32 %v11295_v5, %v11316_v17 }
 0x439   : > { %16564 = vst [vmem:[#allocation101_spill] sm:$0xff] %v11303_v4  ;;  %v11329_v51 = vsel %vm258_vm2, %v11303_v4, 0.0  ;;  %16569 = vst [vmem:[#allocation115_spill] sm:$0xff] %v11335_v41 }
 0x43a   : > { %3056 = vadd.xlane.f32.xlu1 %v11236_v44  ;;  %16567 = vst [vmem:[#allocation170_spill] sm:$0xff] %v11322_v46  ;;  %16568 = vst [vmem:[#allocation114_spill] sm:$0xff] %v11329_v51  ;;  %v11341_v14 = vsel %vm258_vm2, %v11322_v46, 0.0 }
 0x43b   : > { %16570 = vst [vmem:[#allocation12_spill] sm:$0xff] %v11341_v14  ;;  %16571 = vst [vmem:[#allocation54_spill] sm:$0xff] %v11346_v63 }
 0x43c   : > { %2938 = vadd.xlane.f32.xlu0 %v11248_v31  ;;  %v11362_v31 = vsub.f32 %v11309_v62, %v11335_v41 }
 0x43e   : > { %v7323_v59 = vpop.f32.mrb[24].mxu1  ;;  %2940 = vadd.xlane.f32.xlu1 %v11257_v53  ;;  %16573 = vst [vmem:[#allocation110_spill] sm:$0xff] %v11362_v31 }
 0x43f   : > { %v2613_v52 = vpop.f32.mrb[25].mxu1  ;;  %v11365_v5 = vadd.f32 %v7323_v59, %v11010_v49 }
 0x440   : > { %v7324_v54 = vpop.f32.mrb[26].mxu1  ;;  %2934 = vadd.xlane.f32.xlu0 %v11263_v16 }
 0x441   : > { %v2616_v30 = vpop.f32.mrb[27].mxu1  ;;  %16574 = vst [vmem:[#allocation111_spill] sm:$0xff] %v11365_v5  ;;  %v11384_v59 = vsel %vm258_vm2, %v11365_v5, 0.0 }
 0x442   : > { %2936 = vadd.xlane.f32.xlu1 %v11271_v25  ;;  %16578 = vst [vmem:[#allocation10_spill] sm:$0xff] %v11384_v59  ;;  %v11388_v62 = vadd.f32 %v11010_v49, %v2616_v30 }
 0x444   : > { %3066 = vadd.xlane.f32.xlu0 %v11278_v60  ;;  %16579 = vst [vmem:[#allocation42_spill] sm:$0xff] %v11388_v62 }
 0x446   : > { %3068 = vadd.xlane.f32.xlu1 %v11287_v3  ;;  %v11353_v3 = vsub.f32 %v11303_v4, %v11329_v51  ;;  %v11372_v4 = vsub.f32 %v11322_v46, %v11341_v14 }
 0x448   : > { %3062 = vadd.xlane.f32.xlu0 %v11292_v15  ;;  %16572 = vst [vmem:[#allocation178_spill] sm:$0xff] %v11353_v3  ;;  %16575 = vst [vmem:[#allocation174_spill] sm:$0xff] %v11372_v4 }
 0x449   : > { %v11266_v48 = vpop.f32.mrb[28].mxu1 }
 0x44a   : > { %v11273_v11 = vpop.f32.mrb[29].mxu1  ;;  %3064 = vadd.xlane.f32.xlu1 %v11300_v9  ;;  %v11432_v15 = vadd.f32 %v11266_v48, %v11010_v49 }
 0x44b   : > { %v11280_v26 = vpop.f32.mrb[30].mxu1  ;;  %v11454_v48 = vadd.f32 %v11010_v49, %v11273_v11 }
 0x44c   : > { %v11282_v28 = vpop.f32.mrb[31].mxu1  ;;  %2946 = vadd.xlane.f32.xlu0 %v11316_v17  ;;  %16586 = vst [vmem:[#allocation123_spill] sm:$0xff] %v11432_v15 }
 0x44d   : > { %16589 = vst [vmem:[#allocation15_spill] sm:$0xff] %v11454_v48 }
 0x44e   : > { %2948 = vadd.xlane.f32.xlu1 %v11329_v51 }
 0x450   : > { %2942 = vadd.xlane.f32.xlu0 %v11335_v41 }
 0x452   : > { %2944 = vadd.xlane.f32.xlu1 %v11341_v14  ;;  %v11418_v14 = vsub.f32 %v11365_v5, %v11384_v59 }
 0x453   : > { %v11305_v23 = vpop.f32.mrb[32].mxu1 }
 0x454   : > { %v11311_v58 = vpop.f32.mrb[33].mxu1  ;;  %3074 = vadd.xlane.f32.xlu0 %v11346_v63  ;;  %v11375_v63 = vadd.f32 %v7324_v54, %v11010_v49  ;;  %16583 = vst [vmem:[#allocation17_spill] sm:$0xff] %v11418_v14  ;;  %v11508_v27 = vadd.f32 %v11305_v23, %v11010_v49 }
 0x455   : > { %v11318_v34 = vpop.f32.mrb[34].mxu1  ;;  %v11530_v23 = vadd.f32 %v11010_v49, %v11311_v58 }
 0x456   : > { %v11324_v1 = vpop.f32.mrb[35].mxu1  ;;  %3076 = vadd.xlane.f32.xlu1 %v11353_v3  ;;  %16576 = vst [vmem:[#allocation11_spill] sm:$0xff] %v11375_v63  ;;  %v11379_v3 = vadd.f32 %v11010_v49, %v2613_v52  ;;  %v11395_v54 = vsel %vm258_vm2, %v11375_v63, 0.0  ;;  %16598 = vst [vmem:[#allocation21_spill] sm:$0xff] %v11508_v27 }
 0x457   : > { %16580 = vst [vmem:[#allocation175_spill] sm:$0xff] %v11395_v54  ;;  %v11423_v41 = vsub.f32 %v11375_v63, %v11395_v54  ;;  %16601 = vst [vmem:[#allocation96_spill] sm:$0xff] %v11530_v23 }
 0x458   : > { %3070 = vadd.xlane.f32.xlu0 %v11362_v31  ;;  %16577 = vst [vmem:[#allocation52_spill] sm:$0xff] %v11379_v3  ;;  %v11413_v31 = vsel %vm258_vm2, %v11388_v62, 0.0 }
 0x459   : > { %16582 = vst [vmem:[#allocation129_spill] sm:$0xff] %v11413_v31  ;;  %16584 = vst [vmem:[#allocation147_spill] sm:$0xff] %v11423_v41  ;;  %v11441_v63 = vsub.f32 %v11388_v62, %v11413_v31 }
 0x45a   : > { %3072 = vadd.xlane.f32.xlu1 %v11372_v4  ;;  %v11405_v4 = vsel %vm258_vm2, %v11379_v3, 0.0 }
 0x45b   : > { %16581 = vst [vmem:[#allocation128_spill] sm:$0xff] %v11405_v4  ;;  %v11428_v9 = vsub.f32 %v11379_v3, %v11405_v4  ;;  %16587 = vst [vmem:[#allocation16_spill] sm:$0xff] %v11441_v63 }
 0x45c   : > { %2954 = vadd.xlane.f32.xlu0 %v11384_v59  ;;  %v11477_v59 = vsel %vm258_vm2, %v11454_v48, 0.0 }
 0x45d   : > { %16585 = vst [vmem:[#allocation122_spill] sm:$0xff] %v11428_v9  ;;  %16593 = vst [vmem:[#allocation146_spill] sm:$0xff] %v11477_v59  ;;  %v11504_v40 = vsub.f32 %v11454_v48, %v11477_v59 }
 0x45e   : > { %v11348_v39 = vpop.f32.mrb[36].mxu1  ;;  %2956 = vadd.xlane.f32.xlu1 %v11395_v54  ;;  %v11459_v54 = vsel %vm258_vm2, %v11432_v15, 0.0 }
 0x45f   : > { %v11355_v60 = vpop.f32.mrb[37].mxu1  ;;  %16590 = vst [vmem:[#allocation76_spill] sm:$0xff] %v11459_v54  ;;  %16597 = vst [vmem:[#allocation140_spill] sm:$0xff] %v11504_v40  ;;  %v11584_v7 = vadd.f32 %v11348_v39, %v11010_v49 }
 0x460   : > { %v11357_v53 = vpop.f32.mrb[38].mxu1  ;;  %2950 = vadd.xlane.f32.xlu0 %v11405_v4  ;;  %v11494_v4 = vsub.f32 %v11432_v15, %v11459_v54  ;;  %v11606_v39 = vadd.f32 %v11010_v49, %v11355_v60 }
 0x461   : > { %v11367_v17 = vpop.f32.mrb[39].mxu1  ;;  %16610 = vst [vmem:[#allocation27_spill] sm:$0xff] %v11584_v7 }
 0x462   : > { %2952 = vadd.xlane.f32.xlu1 %v11413_v31  ;;  %16595 = vst [vmem:[#allocation70_spill] sm:$0xff] %v11494_v4  ;;  %16613 = vst [vmem:[#allocation112_spill] sm:$0xff] %v11606_v39 }
 0x464   : > { %3082 = vadd.xlane.f32.xlu0 %v11418_v14 }
 0x466   : > { %3084 = vadd.xlane.f32.xlu1 %v11423_v41  ;;  %v11445_v41 = vadd.f32 %v11280_v26, %v11010_v49  ;;  %v11464_v26 = vadd.f32 %v11010_v49, %v11282_v28 }
 0x468   : > { %v11390_v46 = vpop.f32.mrb[40].mxu1  ;;  %3078 = vadd.xlane.f32.xlu0 %v11428_v9  ;;  %16588 = vst [vmem:[#allocation151_spill] sm:$0xff] %v11445_v41  ;;  %16591 = vst [vmem:[#allocation179_spill] sm:$0xff] %v11464_v26  ;;  %v11469_v62 = vsel %vm258_vm2, %v11445_v41, 0.0  ;;  %v11487_v9 = vsel %vm258_vm2, %v11464_v26, 0.0 }
 0x469   : > { %v11397_v51 = vpop.f32.mrb[41].mxu1  ;;  %16592 = vst [vmem:[#allocation145_spill] sm:$0xff] %v11469_v62  ;;  %16594 = vst [vmem:[#allocation14_spill] sm:$0xff] %v11487_v9  ;;  %v11499_v16 = vsub.f32 %v11445_v41, %v11469_v62  ;;  %v11517_v41 = vsub.f32 %v11464_v26, %v11487_v9 }
 0x46a   : > { %v11400_v52 = vpop.f32.mrb[42].mxu1  ;;  %3080 = vadd.xlane.f32.xlu1 %v11441_v63 }
 0x46b   : > { %v11407_v30 = vpop.f32.mrb[43].mxu1  ;;  %16596 = vst [vmem:[#allocation139_spill] sm:$0xff] %v11499_v16  ;;  %16599 = vst [vmem:[#allocation97_spill] sm:$0xff] %v11517_v41 }
 0x46c   : > { %2962 = vadd.xlane.f32.xlu0 %v11459_v54  ;;  %v11553_v54 = vsel %vm258_vm2, %v11530_v23, 0.0 }
 0x46d   : > { %16605 = vst [vmem:[#allocation88_spill] sm:$0xff] %v11553_v54  ;;  %v11580_v44 = vsub.f32 %v11530_v23, %v11553_v54 }
 0x46e   : > { %2964 = vadd.xlane.f32.xlu1 %v11469_v62  ;;  %v11535_v62 = vsel %vm258_vm2, %v11508_v27, 0.0 }
 0x46f   : > { %16602 = vst [vmem:[#allocation159_spill] sm:$0xff] %v11535_v62  ;;  %16609 = vst [vmem:[#allocation158_spill] sm:$0xff] %v11580_v44 }
 0x470   : > { %2958 = vadd.xlane.f32.xlu0 %v11477_v59  ;;  %v11570_v59 = vsub.f32 %v11508_v27, %v11535_v62 }
 0x472   : > { %2960 = vadd.xlane.f32.xlu1 %v11487_v9  ;;  %16607 = vst [vmem:[#allocation84_spill] sm:$0xff] %v11570_v59 }
 0x473   : > { %v11434_v25 = vpop.f32.mrb[44].mxu1 }
 0x474   : > { %v11436_v5 = vpop.f32.mrb[45].mxu1  ;;  %3090 = vadd.xlane.f32.xlu0 %v11494_v4 }
 0x475   : > { %v11447_v3 = vpop.f32.mrb[46].mxu1 }
 0x476   : > { %v11449_v14 = vpop.f32.mrb[47].mxu1  ;;  %3092 = vadd.xlane.f32.xlu1 %v11499_v16  ;;  %v11521_v16 = vadd.f32 %v11318_v34, %v11010_v49  ;;  %v11540_v34 = vadd.f32 %v11010_v49, %v11324_v1 }
 0x478   : > { %3086 = vadd.xlane.f32.xlu0 %v11504_v40  ;;  %16600 = vst [vmem:[#allocation20_spill] sm:$0xff] %v11521_v16  ;;  %16603 = vst [vmem:[#allocation160_spill] sm:$0xff] %v11540_v34  ;;  %v11545_v26 = vsel %vm258_vm2, %v11521_v16, 0.0  ;;  %v11563_v40 = vsel %vm258_vm2, %v11540_v34, 0.0 }
 0x479   : > { %16604 = vst [vmem:[#allocation19_spill] sm:$0xff] %v11545_v26  ;;  %16606 = vst [vmem:[#allocation18_spill] sm:$0xff] %v11563_v40  ;;  %v11575_v45 = vsub.f32 %v11521_v16, %v11545_v26  ;;  %v11593_v16 = vsub.f32 %v11540_v34, %v11563_v40  ;;  %v11611_v34 = vsel %vm258_vm2, %v11584_v7, 0.0 }
 0x47a   : > { %3088 = vadd.xlane.f32.xlu1 %v11517_v41  ;;  %16614 = vst [vmem:[#allocation163_spill] sm:$0xff] %v11611_v34  ;;  %v11642_v6 = vsub.f32 %v11584_v7, %v11611_v34 }
 0x47b   : > { %v11472_v11 = vpop.f32.mrb[48].mxu1  ;;  %16608 = vst [vmem:[#allocation157_spill] sm:$0xff] %v11575_v45  ;;  %16611 = vst [vmem:[#allocation113_spill] sm:$0xff] %v11593_v16 }
 0x47c   : > { %v11479_v63 = vpop.f32.mrb[49].mxu1  ;;  %2970 = vadd.xlane.f32.xlu0 %v11535_v62  ;;  %16618 = vst [vmem:[#allocation24_spill] sm:$0xff] %v11642_v6 }
 0x47d   : > { %v11482_v28 = vpop.f32.mrb[50].mxu1 }
 0x47e   : > { %v11489_v31 = vpop.f32.mrb[51].mxu1  ;;  %2972 = vadd.xlane.f32.xlu1 %v11545_v26 }
 0x480   : > { %2966 = vadd.xlane.f32.xlu0 %v11553_v54 }
 0x482   : > { %2968 = vadd.xlane.f32.xlu1 %v11563_v40  ;;  %v11627_v40 = vsel %vm258_vm2, %v11606_v39, 0.0 }
 0x483   : > { %v11510_v19 = vpop.f32.mrb[52].mxu1 }
 0x484   : > { %v11512_v15 = vpop.f32.mrb[53].mxu1  ;;  %3098 = vadd.xlane.f32.xlu0 %v11570_v59 }
 0x485   : > { %v11523_v48 = vpop.f32.mrb[54].mxu1 }
 0x486   : > { %v11525_v4 = vpop.f32.mrb[55].mxu1  ;;  %3100 = vadd.xlane.f32.xlu1 %v11575_v45  ;;  %v11597_v45 = vadd.f32 %v11357_v53, %v11010_v49  ;;  %v11616_v53 = vadd.f32 %v11010_v49, %v11367_v17 }
 0x488   : > { %3094 = vadd.xlane.f32.xlu0 %v11580_v44  ;;  %16612 = vst [vmem:[#allocation26_spill] sm:$0xff] %v11597_v45  ;;  %16615 = vst [vmem:[#allocation164_spill] sm:$0xff] %v11616_v53  ;;  %v11633_v17 = vsel %vm258_vm2, %v11616_v53, 0.0 }
 0x489   : > { %v2907_v59 = vpop.xlane.xlu0 %2906 }
 0x48a   : > { %3096 = vadd.xlane.f32.xlu1 %v11593_v16  ;;  %v11621_v16 = vsel %vm258_vm2, %v11597_v45, 0.0 }
 0x48b   : > { %v11548_v58 = vpop.f32.mrb[56].mxu1  ;;  %v2909_v62 = vpop.xlane.xlu1 %2908  ;;  %16616 = vst [vmem:[#allocation25_spill] sm:$0xff] %v11621_v16  ;;  %v11651_v20 = vsub.f32 %v11597_v45, %v11621_v16 }
 0x48c   : > { %v11555_v41 = vpop.f32.mrb[57].mxu1  ;;  %2978 = vadd.xlane.f32.xlu0 %v11611_v34 }
 0x48d   : > { %v11558_v1 = vpop.f32.mrb[58].mxu1  ;;  %v2903_v44 = vpop.xlane.xlu0 %2902  ;;  %16620 = vst [vmem:[#allocation161_spill] sm:$0xff] %v11651_v20 }
 0x48e   : > { %v11565_v9 = vpop.f32.mrb[59].mxu1  ;;  %2980 = vadd.xlane.f32.xlu1 %v11621_v16 }
 0x48f   : > { %v2905_v60 = vpop.xlane.xlu1 %2904 }
 0x490   : > { %2974 = vadd.xlane.f32.xlu0 %v11627_v40 }
 0x491   : > { %v3035_v54 = vpop.xlane.xlu0 %3034 }
 0x492   : > { %v11637_v50 = vsel %vm258_vm2, %v2907_v59, %v3035_v54  ;;  %2976 = vadd.xlane.f32.xlu1 %v11633_v17  ;;  %v11660_v54 = vsub.f32 %v11606_v39, %v11627_v40 }
 0x493   : > { %v11586_v47 = vpop.f32.mrb[60].mxu1  ;;  %16617 = vst [vmem:[#allocation108_spill] sm:$0xff] %v11637_v50  ;;  %v3037_v43 = vpop.xlane.xlu1 %3036 }
 0x494   : > { %v11588_v27 = vpop.f32.mrb[61].mxu1  ;;  %v11646_v32 = vsel %vm258_vm2, %v2909_v62, %v3037_v43  ;;  %3106 = vadd.xlane.f32.xlu0 %v11642_v6  ;;  %16621 = vst [vmem:[#allocation162_spill] sm:$0xff] %v11660_v54  ;;  %v11664_v62 = vadd.f32 %v11390_v46, %v11010_v49  ;;  %v11682_v46 = vadd.f32 %v11010_v49, %v11397_v51 }
 0x495   : > { %v11599_v23 = vpop.f32.mrb[62].mxu1  ;;  %16619 = vst [vmem:[#allocation100_spill] sm:$0xff] %v11646_v32  ;;  %v3031_v29 = vpop.xlane.xlu0 %3030 }
 0x496   : > { %v11601_v26 = vpop.f32.mrb[63].mxu1  ;;  %v11655_v59 = vsel %vm258_vm2, %v2903_v44, %v3031_v29  ;;  %3108 = vadd.xlane.f32.xlu1 %v11651_v20  ;;  %16622 = vst [vmem:[#allocation35_spill] sm:$0xff] %v11664_v62  ;;  %v11673_v29 = vsub.f32 %v11616_v53, %v11633_v17  ;;  %v11677_v44 = vadd.f32 %v11400_v52, %v11010_v49  ;;  %16625 = vst [vmem:[#allocation124_spill] sm:$0xff] %v11682_v46 }
 0x497   : > { %v3033_v43 = vpop.xlane.xlu1 %3032  ;;  %v11703_v20 = vsel %vm258_vm2, %v11682_v46, 0.0 }
 0x498   : > { %v11668_v45 = vsel %vm258_vm2, %v2905_v60, %v3033_v43  ;;  %3102 = vadd.xlane.f32.xlu0 %v11660_v54  ;;  %16623 = vst [vmem:[#allocation126_spill] sm:$0xff] %v11673_v29  ;;  %16624 = vst [vmem:[#allocation34_spill] sm:$0xff] %v11677_v44  ;;  %v11687_v60 = vsel %vm258_vm2, %v11664_v62, 0.0  ;;  %v11692_v43 = vadd.f32 %v11010_v49, %v11407_v30  ;;  %v11697_v53 = vsel %vm258_vm2, %v11677_v44, 0.0 }
 0x499   : > { %v2915_v7 = vpop.xlane.xlu0 %2914  ;;  %16626 = vst [vmem:[#allocation167_spill] sm:$0xff] %v11687_v60  ;;  %16628 = vst [vmem:[#allocation33_spill] sm:$0xff] %v11697_v53  ;;  %v11718_v16 = vsub.f32 %v11664_v62, %v11687_v60 }
 0x49a   : > { %3104 = vadd.xlane.f32.xlu1 %v11673_v29  ;;  %16627 = vst [vmem:[#allocation168_spill] sm:$0xff] %v11692_v43  ;;  %v11709_v30 = vsel %vm258_vm2, %v11692_v43, 0.0  ;;  %v11727_v29 = vsub.f32 %v11677_v44, %v11697_v53 }
 0x49b   : > { %v2917_v39 = vpop.xlane.xlu1 %2916  ;;  %16630 = vst [vmem:[#allocation32_spill] sm:$0xff] %v11718_v16 }
 0x49c   : > { %2986 = vadd.xlane.f32.xlu0 %v11687_v60  ;;  %16632 = vst [vmem:[#allocation165_spill] sm:$0xff] %v11727_v29 }
 0x49d   : > { %v2911_v52 = vpop.xlane.xlu0 %2910 }
 0x49e   : > { %2988 = vadd.xlane.f32.xlu1 %v11697_v53 }
 0x49f   : > { %v2913_v51 = vpop.xlane.xlu1 %2912 }
 0x4a0   : > { %2982 = vadd.xlane.f32.xlu0 %v11703_v20 }
 0x4a1   : > { %v3043_v6 = vpop.xlane.xlu0 %3042 }
 0x4a2   : > { %v11713_v32 = vsel %vm258_vm2, %v2915_v7, %v3043_v6  ;;  %2984 = vadd.xlane.f32.xlu1 %v11709_v30  ;;  %v11736_v7 = vsub.f32 %v11682_v46, %v11703_v20 }
 0x4a3   : > { %16629 = vst [vmem:[#allocation121_spill] sm:$0xff] %v11713_v32  ;;  %v3045_v50 = vpop.xlane.xlu1 %3044 }
 0x4a4   : > { %v11722_v34 = vsel %vm258_vm2, %v2917_v39, %v3045_v50  ;;  %3114 = vadd.xlane.f32.xlu0 %v11718_v16  ;;  %16633 = vst [vmem:[#allocation166_spill] sm:$0xff] %v11736_v7  ;;  %v11740_v50 = vadd.f32 %v11434_v25, %v11010_v49  ;;  %v11758_v25 = vadd.f32 %v11010_v49, %v11436_v5 }
 0x4a5   : > { %16631 = vst [vmem:[#allocation120_spill] sm:$0xff] %v11722_v34  ;;  %v3039_v54 = vpop.xlane.xlu0 %3038 }
 0x4a6   : > { %v11731_v6 = vsel %vm258_vm2, %v2911_v52, %v3039_v54  ;;  %3116 = vadd.xlane.f32.xlu1 %v11727_v29  ;;  %16634 = vst [vmem:[#allocation50_spill] sm:$0xff] %v11740_v50  ;;  %v11749_v54 = vsub.f32 %v11692_v43, %v11709_v30  ;;  %v11753_v52 = vadd.f32 %v11447_v3, %v11010_v49  ;;  %16637 = vst [vmem:[#allocation30_spill] sm:$0xff] %v11758_v25 }
 0x4a7   : > { %v3041_v39 = vpop.xlane.xlu1 %3040  ;;  %v11779_v29 = vsel %vm258_vm2, %v11758_v25, 0.0 }
 0x4a8   : > { %v11744_v44 = vsel %vm258_vm2, %v2913_v51, %v3041_v39  ;;  %3110 = vadd.xlane.f32.xlu0 %v11736_v7  ;;  %16635 = vst [vmem:[#allocation143_spill] sm:$0xff] %v11749_v54  ;;  %16636 = vst [vmem:[#allocation23_spill] sm:$0xff] %v11753_v52  ;;  %v11763_v51 = vsel %vm258_vm2, %v11740_v50, 0.0  ;;  %v11768_v39 = vadd.f32 %v11010_v49, %v11449_v14  ;;  %v11773_v43 = vsel %vm258_vm2, %v11753_v52, 0.0 }
 0x4a9   : > { %v2923_v62 = vpop.xlane.xlu0 %2922  ;;  %16638 = vst [vmem:[#allocation49_spill] sm:$0xff] %v11763_v51  ;;  %16640 = vst [vmem:[#allocation48_spill] sm:$0xff] %v11773_v43  ;;  %v11794_v53 = vsub.f32 %v11740_v50, %v11763_v51 }
 0x4aa   : > { %3112 = vadd.xlane.f32.xlu1 %v11749_v54  ;;  %16639 = vst [vmem:[#allocation136_spill] sm:$0xff] %v11768_v39  ;;  %v11785_v14 = vsel %vm258_vm2, %v11768_v39, 0.0  ;;  %v11803_v54 = vsub.f32 %v11753_v52, %v11773_v43 }
 0x4ab   : > { %v2925_v46 = vpop.xlane.xlu1 %2924  ;;  %16642 = vst [vmem:[#allocation169_spill] sm:$0xff] %v11794_v53 }
 0x4ac   : > { %2994 = vadd.xlane.f32.xlu0 %v11763_v51  ;;  %16644 = vst [vmem:[#allocation67_spill] sm:$0xff] %v11803_v54 }
 0x4ad   : > { %v2919_v3 = vpop.xlane.xlu0 %2918 }
 0x4ae   : > { %2996 = vadd.xlane.f32.xlu1 %v11773_v43 }
 0x4af   : > { %v2921_v5 = vpop.xlane.xlu1 %2920 }
 0x4b0   : > { %2990 = vadd.xlane.f32.xlu0 %v11779_v29 }
 0x4b1   : > { %v3051_v16 = vpop.xlane.xlu0 %3050 }
 0x4b2   : > { %v11789_v34 = vsel %vm258_vm2, %v2923_v62, %v3051_v16  ;;  %2992 = vadd.xlane.f32.xlu1 %v11785_v14  ;;  %v11812_v62 = vsub.f32 %v11758_v25, %v11779_v29 }
 0x4b3   : > { %16641 = vst [vmem:[#allocation134_spill] sm:$0xff] %v11789_v34  ;;  %v3053_v32 = vpop.xlane.xlu1 %3052 }
 0x4b4   : > { %v11798_v60 = vsel %vm258_vm2, %v2925_v46, %v3053_v32  ;;  %3122 = vadd.xlane.f32.xlu0 %v11794_v53  ;;  %16645 = vst [vmem:[#allocation182_spill] sm:$0xff] %v11812_v62  ;;  %v11816_v32 = vadd.f32 %v11472_v11, %v11010_v49  ;;  %v11834_v11 = vadd.f32 %v11010_v49, %v11479_v63 }
 0x4b5   : > { %16643 = vst [vmem:[#allocation22_spill] sm:$0xff] %v11798_v60  ;;  %v3047_v7 = vpop.xlane.xlu0 %3046 }
 0x4b6   : > { %v11807_v16 = vsel %vm258_vm2, %v2919_v3, %v3047_v7  ;;  %3124 = vadd.xlane.f32.xlu1 %v11803_v54  ;;  %16646 = vst [vmem:[#allocation66_spill] sm:$0xff] %v11816_v32  ;;  %v11825_v7 = vsub.f32 %v11768_v39, %v11785_v14  ;;  %v11829_v3 = vadd.f32 %v11482_v28, %v11010_v49  ;;  %16649 = vst [vmem:[#allocation28_spill] sm:$0xff] %v11834_v11 }
 0x4b7   : > { %v3049_v46 = vpop.xlane.xlu1 %3048  ;;  %v11855_v54 = vsel %vm258_vm2, %v11834_v11, 0.0 }
 0x4b8   : > { %v11820_v52 = vsel %vm258_vm2, %v2921_v5, %v3049_v46  ;;  %3118 = vadd.xlane.f32.xlu0 %v11812_v62  ;;  %16647 = vst [vmem:[#allocation181_spill] sm:$0xff] %v11825_v7  ;;  %16648 = vst [vmem:[#allocation31_spill] sm:$0xff] %v11829_v3  ;;  %v11839_v5 = vsel %vm258_vm2, %v11816_v32, 0.0  ;;  %v11844_v46 = vadd.f32 %v11010_v49, %v11489_v31  ;;  %v11849_v39 = vsel %vm258_vm2, %v11829_v3, 0.0 }
 0x4b9   : > { %v2931_v50 = vpop.xlane.xlu0 %2930  ;;  %16650 = vst [vmem:[#allocation65_spill] sm:$0xff] %v11839_v5  ;;  %16652 = vst [vmem:[#allocation64_spill] sm:$0xff] %v11849_v39  ;;  %v11870_v43 = vsub.f32 %v11816_v32, %v11839_v5 }
 0x4ba   : > { %3120 = vadd.xlane.f32.xlu1 %v11825_v7  ;;  %16651 = vst [vmem:[#allocation156_spill] sm:$0xff] %v11844_v46  ;;  %v11861_v31 = vsel %vm258_vm2, %v11844_v46, 0.0  ;;  %v11879_v7 = vsub.f32 %v11829_v3, %v11849_v39 }
 0x4bb   : > { %v2933_v25 = vpop.xlane.xlu1 %2932  ;;  %16654 = vst [vmem:[#allocation109_spill] sm:$0xff] %v11870_v43 }
 0x4bc   : > { %3002 = vadd.xlane.f32.xlu0 %v11839_v5  ;;  %16656 = vst [vmem:[#allocation83_spill] sm:$0xff] %v11879_v7 }
 0x4bd   : > { %v2927_v28 = vpop.xlane.xlu0 %2926 }
 0x4be   : > { %3004 = vadd.xlane.f32.xlu1 %v11849_v39 }
 0x4bf   : > { %v2929_v63 = vpop.xlane.xlu1 %2928 }
 0x4c0   : > { %2998 = vadd.xlane.f32.xlu0 %v11855_v54 }
 0x4c1   : > { %v3059_v53 = vpop.xlane.xlu0 %3058 }
 0x4c2   : > { %v11865_v60 = vsel %vm258_vm2, %v2931_v50, %v3059_v53  ;;  %3000 = vadd.xlane.f32.xlu1 %v11861_v31  ;;  %v11888_v50 = vsub.f32 %v11834_v11, %v11855_v54 }
 0x4c3   : > { %16653 = vst [vmem:[#allocation144_spill] sm:$0xff] %v11865_v60  ;;  %v3061_v34 = vpop.xlane.xlu1 %3060  ;;  %v11950_v60 = vadd.f32 %v11548_v58, %v11010_v49 }
 0x4c4   : > { %v11874_v51 = vsel %vm258_vm2, %v2933_v25, %v3061_v34  ;;  %3130 = vadd.xlane.f32.xlu0 %v11870_v43  ;;  %v11892_v34 = vadd.f32 %v11510_v19, %v11010_v49  ;;  %v11910_v19 = vadd.f32 %v11010_v49, %v11512_v15 }
 0x4c5   : > { %16655 = vst [vmem:[#allocation171_spill] sm:$0xff] %v11874_v51  ;;  %v3055_v62 = vpop.xlane.xlu0 %3054  ;;  %16665 = vst [vmem:[#allocation183_spill] sm:$0xff] %v11950_v60 }
 0x4c6   : > { %v11883_v53 = vsel %vm258_vm2, %v2927_v28, %v3055_v62  ;;  %3132 = vadd.xlane.f32.xlu1 %v11879_v7  ;;  %16657 = vst [vmem:[#allocation187_spill] sm:$0xff] %v11892_v34  ;;  %v11901_v62 = vsub.f32 %v11844_v46, %v11861_v31  ;;  %v11905_v28 = vadd.f32 %v11523_v48, %v11010_v49  ;;  %16660 = vst [vmem:[#allocation176_spill] sm:$0xff] %v11910_v19 }
 0x4c7   : > { %v3057_v25 = vpop.xlane.xlu1 %3056  ;;  %v11931_v7 = vsel %vm258_vm2, %v11910_v19, 0.0 }
 0x4c8   : > { %v11896_v3 = vsel %vm258_vm2, %v2929_v63, %v3057_v25  ;;  %3126 = vadd.xlane.f32.xlu0 %v11888_v50  ;;  %16658 = vst [vmem:[#allocation82_spill] sm:$0xff] %v11901_v62  ;;  %16659 = vst [vmem:[#allocation185_spill] sm:$0xff] %v11905_v28  ;;  %v11915_v63 = vsel %vm258_vm2, %v11892_v34, 0.0  ;;  %v11920_v25 = vadd.f32 %v11010_v49, %v11525_v4  ;;  %v11925_v46 = vsel %vm258_vm2, %v11905_v28, 0.0 }
 0x4c9   : > { %v2939_v32 = vpop.xlane.xlu0 %2938  ;;  %v11946_v39 = vsub.f32 %v11910_v19, %v11931_v7 }
 0x4ca   : > { %3128 = vadd.xlane.f32.xlu1 %v11901_v62  ;;  %16661 = vst [vmem:[#allocation177_spill] sm:$0xff] %v11920_v25  ;;  %v11937_v4 = vsel %vm258_vm2, %v11920_v25, 0.0 }
 0x4cb   : > { %v2941_v11 = vpop.xlane.xlu1 %2940  ;;  %16662 = vst [vmem:[#allocation81_spill] sm:$0xff] %v11937_v4  ;;  %16664 = vst [vmem:[#allocation80_spill] sm:$0xff] %v11946_v39 }
 0x4cc   : > { %3010 = vadd.xlane.f32.xlu0 %v11915_v63 }
 0x4cd   : > { %v2935_v48 = vpop.xlane.xlu0 %2934 }
 0x4ce   : > { %3012 = vadd.xlane.f32.xlu1 %v11925_v46 }
 0x4cf   : > { %v2937_v15 = vpop.xlane.xlu1 %2936 }
 0x4d0   : > { %3006 = vadd.xlane.f32.xlu0 %v11931_v7 }
 0x4d1   : > { %v3067_v43 = vpop.xlane.xlu0 %3066 }
 0x4d2   : > { %v11941_v51 = vsel %vm258_vm2, %v2939_v32, %v3067_v43  ;;  %3008 = vadd.xlane.f32.xlu1 %v11937_v4  ;;  %v11959_v43 = vsub.f32 %v11920_v25, %v11937_v4  ;;  %v11963_v32 = vadd.f32 %v11558_v1, %v11010_v49  ;;  %v11977_v25 = vsel %vm258_vm2, %v11950_v60, 0.0 }
 0x4d3   : > { %16663 = vst [vmem:[#allocation51_spill] sm:$0xff] %v11941_v51  ;;  %v3069_v5 = vpop.xlane.xlu1 %3068  ;;  %16671 = vst [vmem:[#allocation94_spill] sm:$0xff] %v11977_v25 }
 0x4d4   : > { %v11954_v62 = vsel %vm258_vm2, %v2941_v11, %v3069_v5  ;;  %3134 = vadd.xlane.f32.xlu0 %v11946_v39  ;;  %16667 = vst [vmem:[#allocation180_spill] sm:$0xff] %v11959_v43  ;;  %16668 = vst [vmem:[#allocation211_spill] sm:$0xff] %v11963_v32  ;;  %v11972_v11 = vadd.f32 %v11010_v49, %v11555_v41  ;;  %v11991_v41 = vsel %vm258_vm2, %v11963_v32, 0.0 }
 0x4d5   : > { %16666 = vst [vmem:[#allocation155_spill] sm:$0xff] %v11954_v62  ;;  %v3063_v19 = vpop.xlane.xlu0 %3062  ;;  %v11996_v62 = vadd.f32 %v11586_v47, %v11010_v49  ;;  %v12016_v47 = vadd.f32 %v11010_v49, %v11588_v27 }
 0x4d6   : > { %v11967_v58 = vsel %vm258_vm2, %v2935_v48, %v3063_v19  ;;  %3136 = vadd.xlane.f32.xlu1 %v11959_v43  ;;  %16670 = vst [vmem:[#allocation191_spill] sm:$0xff] %v11972_v11  ;;  %v11986_v19 = vadd.f32 %v11010_v49, %v11565_v9  ;;  %v12006_v9 = vadd.f32 %v11599_v23, %v11010_v49 }
 0x4d7   : > { %16669 = vst [vmem:[#allocation95_spill] sm:$0xff] %v11967_v58  ;;  %v3065_v5 = vpop.xlane.xlu1 %3064  ;;  %16674 = vst [vmem:[#allocation184_spill] sm:$0xff] %v11996_v62  ;;  %v12026_v23 = vadd.f32 %v11010_v49, %v11601_v26 }
 0x4d8   : > { %v11981_v1 = vsel %vm258_vm2, %v2937_v15, %v3065_v5  ;;  %3018 = vadd.xlane.f32.xlu0 %v11977_v25  ;;  %16673 = vst [vmem:[#allocation212_spill] sm:$0xff] %v11986_v19  ;;  %v12001_v5 = vsel %vm258_vm2, %v11972_v11, 0.0  ;;  %16675 = vst [vmem:[#allocation186_spill] sm:$0xff] %v12006_v9  ;;  %v12011_v43 = vsel %vm258_vm2, %v11986_v19, 0.0  ;;  %v12031_v58 = vsel %vm258_vm2, %v12006_v9, 0.0 }
 0x4d9   : > { %16672 = vst [vmem:[#allocation190_spill] sm:$0xff] %v11981_v1  ;;  %v2947_v48 = vpop.xlane.xlu0 %2946  ;;  %16676 = vst [vmem:[#allocation93_spill] sm:$0xff] %v12016_v47  ;;  %v12021_v1 = vsel %vm258_vm2, %v11996_v62, 0.0  ;;  %v12060_v9 = vsub.f32 %v11892_v34, %v11915_v63  ;;  %v7557_v34 = vld [vmem:[%s15410_s2 + $0x40] sm:$0xff]  }
 0x4da   : > { %3020 = vadd.xlane.f32.xlu1 %v11991_v41  ;;  %16677 = vst [vmem:[#allocation189_spill] sm:$0xff] %v12021_v1  ;;  %16678 = vst [vmem:[#allocation61_spill] sm:$0xff] %v12026_v23  ;;  %7361 = vmatprep.subr.bf16.mxu0 %v7557_v34 }
 0x4db   : > { %v2949_v15 = vpop.xlane.xlu1 %2948  ;;  %16679 = vst [vmem:[#allocation92_spill] sm:$0xff] %v12031_v58  ;;  %7362 = vmatpush3.bf16.msra.mxu0 %v7557_v34 }
 0x4dc   : > { %3014 = vadd.xlane.f32.xlu0 %v12001_v5 }
 0x4dd   : > { %v2943_v51 = vpop.xlane.xlu0 %2942 }
 0x4de   : > { %3016 = vadd.xlane.f32.xlu1 %v12011_v43 }
 0x4df   : > { %v2945_v39 = vpop.xlane.xlu1 %2944 }
 0x4e0   : > { %3026 = vadd.xlane.f32.xlu0 %v12021_v1  ;;  %v12041_v1 = vsel %vm258_vm2, %v12016_v47, 0.0 }
 0x4e1   : > { %v3075_v4 = vpop.xlane.xlu0 %3074 }
 0x4e2   : > { %v12035_v27 = vsel %vm258_vm2, %v2947_v48, %v3075_v4  ;;  %3028 = vadd.xlane.f32.xlu1 %v12031_v58  ;;  %v12051_v4 = vsel %vm258_vm2, %v12026_v23, 0.0  ;;  %v12069_v58 = vsub.f32 %v11905_v28, %v11925_v46  ;;  %v12084_v28 = vsub.f32 %v11950_v60, %v11977_v25 }
 0x4e3   : > { %16680 = vst [vmem:[#allocation188_spill] sm:$0xff] %v12035_v27  ;;  %v3077_v62 = vpop.xlane.xlu1 %3076  ;;  %v12092_v27 = vsub.f32 %v11963_v32, %v11991_v41  ;;  %v12101_v60 = vsub.f32 %v12016_v47, %v12041_v1  ;;  %v12110_v34 = vsub.f32 %v12026_v23, %v12051_v4 }
 0x4e4   : > { %v12045_v49 = vsel %vm258_vm2, %v2949_v15, %v3077_v62  ;;  %3022 = vadd.xlane.f32.xlu0 %v12041_v1  ;;  %16683 = vst [vmem:[#allocation195_spill] sm:$0xff] %v12084_v28 }
 0x4e5   : > { %16681 = vst [vmem:[#allocation192_spill] sm:$0xff] %v12045_v49  ;;  %v3071_v26 = vpop.xlane.xlu0 %3070 }
 0x4e6   : > { %v12055_v48 = vsel %vm258_vm2, %v2943_v51, %v3071_v26  ;;  %3024 = vadd.xlane.f32.xlu1 %v12051_v4  ;;  %v12074_v51 = vsub.f32 %v11972_v11, %v12001_v5 }
 0x4e7   : > { %v3073_v62 = vpop.xlane.xlu1 %3072 }
 0x4e8   : > { %v12064_v15 = vsel %vm258_vm2, %v2945_v39, %v3073_v62  ;;  %3138 = vadd.xlane.f32.xlu0 %v12060_v9  ;;  %v12079_v39 = vsub.f32 %v11986_v19, %v12011_v43 }
 0x4e9   : > { %v2955_v49 = vpop.xlane.xlu0 %2954 }
 0x4ea   : > { %3140 = vadd.xlane.f32.xlu1 %v12069_v58  ;;  %16682 = vst [vmem:[#allocation53_spill] sm:$0xff] %v12079_v39 }
 0x4eb   : > { %v2957_v26 = vpop.xlane.xlu1 %2956 }
 0x4ec   : > { %3142 = vadd.xlane.f32.xlu0 %v12074_v51 }
 0x4ed   : > { %v2951_v62 = vpop.xlane.xlu0 %2950 }
 0x4ee   : > { %3144 = vadd.xlane.f32.xlu1 %v12079_v39 }
 0x4ef   : > { %v2953_v11 = vpop.xlane.xlu1 %2952 }
 0x4f0   : > { %3146 = vadd.xlane.f32.xlu0 %v12084_v28 }
 0x4f1   : > { %v3083_v19 = vpop.xlane.xlu0 %3082 }
 0x4f2   : > { %v12096_v39 = vsel %vm258_vm2, %v2955_v49, %v3083_v19  ;;  %3148 = vadd.xlane.f32.xlu1 %v12092_v27  ;;  %v3158_v49 = vmul.f32 %v11039_v36, %v11039_v36 }
 0x4f3   : > { %v3085_v25 = vpop.xlane.xlu1 %3084 }
 0x4f4   : > { %v12105_v28 = vsel %vm258_vm2, %v2957_v26, %v3085_v25  ;;  %3150 = vadd.xlane.f32.xlu0 %v12101_v60  ;;  %v3159_v26 = vmul.f32 %v11045_v38, %v11045_v38  ;;  %v3161_v38 = vmul.f32 %v11033_v33, %v11033_v33  ;;  %v3353_v33 = vmul.f32 %v11055_v18, %v11055_v18 }
 0x4f5   : > { %16684 = vst [vmem:[#allocation107_spill] sm:$0xff] %v12105_v28  ;;  %v3079_v32 = vpop.xlane.xlu0 %3078  ;;  %v3351_v28 = vmul.f32 %v11068_v56, %v11068_v56  ;;  %v3352_v56 = vmul.f32 %v11050_v61, %v11050_v61  ;;  %v3162_v61 = vmul.f32 %v11095_v35, %v11095_v35 }
 0x4f6   : > { %v12114_v19 = vsel %vm258_vm2, %v2951_v62, %v3079_v32  ;;  %3152 = vadd.xlane.f32.xlu1 %v12110_v34  ;;  %v3350_v32 = vmul.f32 %v11060_v55, %v11060_v55  ;;  %v7558_v55 = vld [vmem:[%s15410_s2 + $0x48] sm:$0xff]  }
 0x4f7   : > { %v3081_v47 = vpop.xlane.xlu1 %3080  ;;  %7363 = vmatprep.subr.bf16.mxu0 %v7558_v55 }
 0x4f8   : > { %v12121_v25 = vsel %vm258_vm2, %v2953_v11, %v3081_v47  ;;  %3222 = vadd.xlane.f32.xlu0 %v3158_v49  ;;  %v3160_v11 = vmul.f32 %v11024_v2, %v11024_v2  ;;  %7364 = vmatpush3.bf16.msra.mxu0 %v7558_v55  ;;  %v3355_v55 = vmul.f32 %v11124_v24, %v11124_v24 }
 0x4f9   : > { %v2963_v23 = vpop.xlane.xlu0 %2962 }
 0x4fa   : > { %3224 = vadd.xlane.f32.xlu1 %v3159_v26 }
 0x4fb   : > { %v2965_v62 = vpop.xlane.xlu1 %2964 }
 0x4fc   : > { %3414 = vadd.xlane.f32.xlu0 %v3350_v32 }
 0x4fd   : > { %v2959_v36 = vpop.xlane.xlu0 %2958 }
 0x4fe   : > { %3416 = vadd.xlane.f32.xlu1 %v3351_v28 }
 0x4ff   : > { %v2961_v47 = vpop.xlane.xlu1 %2960 }
 0x500   : > { %3226 = vadd.xlane.f32.xlu0 %v3160_v11 }
 0x501   : > { %v3091_v49 = vpop.xlane.xlu0 %3090 }
 0x502   : > { %v12138_v26 = vsel %vm258_vm2, %v2963_v23, %v3091_v49  ;;  %3228 = vadd.xlane.f32.xlu1 %v3161_v38  ;;  %v3354_v49 = vmul.f32 %v11116_v8, %v11116_v8  ;;  %v3356_v8 = vmul.f32 %v11106_v22, %v11106_v22  ;;  %v3166_v22 = vmul.f32 %v11151_v10, %v11151_v10 }
 0x503   : > { %v3093_v28 = vpop.xlane.xlu1 %3092 }
 0x504   : > { %v12144_v2 = vsel %vm258_vm2, %v2965_v62, %v3093_v28  ;;  %3418 = vadd.xlane.f32.xlu0 %v3352_v56  ;;  %v3163_v62 = vmul.f32 %v11101_v57, %v11101_v57  ;;  %v3165_v57 = vmul.f32 %v11089_v0, %v11089_v0  ;;  %v3357_v0 = vmul.f32 %v11111_v12, %v11111_v12 }
 0x505   : > { %v3087_v32 = vpop.xlane.xlu0 %3086  ;;  %v3167_v12 = vmul.f32 %v11157_v21, %v11157_v21 }
 0x506   : > { %v12150_v23 = vsel %vm258_vm2, %v2959_v36, %v3087_v32  ;;  %3420 = vadd.xlane.f32.xlu1 %v3353_v33  ;;  %v7559_v32 = vld [vmem:[%s15410_s2 + $0x50] sm:$0xff]  }
 0x507   : > { %v3089_v11 = vpop.xlane.xlu1 %3088  ;;  %7365 = vmatprep.subr.bf16.mxu0 %v7559_v32 }
 0x508   : > { %v12156_v38 = vsel %vm258_vm2, %v2961_v47, %v3089_v11  ;;  %3230 = vadd.xlane.f32.xlu0 %v3162_v61  ;;  %v3164_v47 = vmul.f32 %v11080_v13, %v11080_v13  ;;  %7366 = vmatpush3.bf16.msra.mxu0 %v7559_v32 }
 0x509   : > { %v2971_v18 = vpop.xlane.xlu0 %2970 }
 0x50a   : > { %3232 = vadd.xlane.f32.xlu1 %v3163_v62 }
 0x50b   : > { %v2973_v36 = vpop.xlane.xlu1 %2972 }
 0x50c   : > { %3422 = vadd.xlane.f32.xlu0 %v3354_v49 }
 0x50d   : > { %v2967_v35 = vpop.xlane.xlu0 %2966 }
 0x50e   : > { %3424 = vadd.xlane.f32.xlu1 %v3355_v55 }
 0x50f   : > { %v2969_v56 = vpop.xlane.xlu1 %2968 }
 0x510   : > { %3234 = vadd.xlane.f32.xlu0 %v3164_v47 }
 0x511   : > { %v3099_v28 = vpop.xlane.xlu0 %3098 }
 0x512   : > { %v12170_v33 = vsel %vm258_vm2, %v2971_v18, %v3099_v28  ;;  %3236 = vadd.xlane.f32.xlu1 %v3165_v57  ;;  %v16688_v57 = vld [vmem:[#allocation133_spill] sm:$0xff] }
 0x513   : > { %16685 = vst [vmem:[#allocation197_spill] sm:$0xff] %v12170_v33  ;;  %v3101_v24 = vpop.xlane.xlu1 %3100 }
 0x514   : > { %v12179_v13 = vsel %vm258_vm2, %v2973_v36, %v3101_v24  ;;  %3426 = vadd.xlane.f32.xlu0 %v3356_v8  ;;  %v3358_v36 = vmul.f32 %v11172_v42, %v11172_v42  ;;  %v16689_v8 = vld [vmem:[#allocation39_spill] sm:$0xff]  ;;  %v16691_v42 = vld [vmem:[#allocation149_spill] sm:$0xff] }
 0x515   : > { %16686 = vst [vmem:[#allocation47_spill] sm:$0xff] %v12179_v13  ;;  %v3095_v61 = vpop.xlane.xlu0 %3094  ;;  %v3169_v21 = vmul.f32 %v16689_v8, %v16689_v8 }
 0x516   : > { %v12185_v11 = vsel %vm258_vm2, %v2967_v35, %v3095_v61  ;;  %3428 = vadd.xlane.f32.xlu1 %v3357_v0  ;;  %v16687_v35 = vld [vmem:[#allocation4_spill] sm:$0xff]  ;;  %v3360_v0 = vmul.f32 %v16691_v42, %v16691_v42  ;;  %v16698_v42 = vld [vmem:[#allocation86_spill] sm:$0xff] }
 0x517   : > { %v3097_v62 = vpop.xlane.xlu1 %3096  ;;  %v3359_v10 = vmul.f32 %v16687_v35, %v16687_v35 }
 0x518   : > { %v12191_v18 = vsel %vm258_vm2, %v2969_v56, %v3097_v62  ;;  %3238 = vadd.xlane.f32.xlu0 %v3166_v22  ;;  %v3168_v56 = vmul.f32 %v16688_v57, %v16688_v57  ;;  %v16693_v62 = vld [vmem:[#allocation72_spill] sm:$0xff]  ;;  %v7560_v57 = vld [vmem:[%s15410_s2 + $0x58] sm:$0xff]  }
 0x519   : > { %v2979_v49 = vpop.xlane.xlu0 %2978  ;;  %7367 = vmatprep.subr.bf16.mxu0 %v7560_v57 }
 0x51a   : > { %3240 = vadd.xlane.f32.xlu1 %v3167_v12  ;;  %v3361_v12 = vmul.f32 %v16693_v62, %v16693_v62  ;;  %7368 = vmatpush3.bf16.msra.mxu0 %v7560_v57  ;;  %v7562_v62 = vld [vmem:[%s15410_s2 + $0x68] sm:$0xff]   ;;  %v7563_v57 = vld [vmem:[%s15410_s2 + $0x70] sm:$0xff]  }
 0x51b   : > { %v2981_v55 = vpop.xlane.xlu1 %2980 }
 0x51c   : > { %3430 = vadd.xlane.f32.xlu0 %v3358_v36 }
 0x51d   : > { %v2975_v47 = vpop.xlane.xlu0 %2974 }
 0x51e   : > { %3432 = vadd.xlane.f32.xlu1 %v3359_v10 }
 0x51f   : > { %v2977_v28 = vpop.xlane.xlu1 %2976 }
 0x520   : > { %3242 = vadd.xlane.f32.xlu0 %v3168_v56 }
 0x521   : > { %v3107_v24 = vpop.xlane.xlu0 %3106 }
 0x522   : > { %v12205_v32 = vsel %vm258_vm2, %v2979_v49, %v3107_v24  ;;  %3244 = vadd.xlane.f32.xlu1 %v3169_v21  ;;  %v16695_v49 = vld [vmem:[#allocation90_spill] sm:$0xff] }
 0x523   : > { %16690 = vst [vmem:[#allocation106_spill] sm:$0xff] %v12205_v32  ;;  %v3109_v61 = vpop.xlane.xlu1 %3108  ;;  %v3170_v10 = vmul.f32 %v16695_v49, %v16695_v49  ;;  %v16700_v49 = vld [vmem:[#allocation2_spill] sm:$0xff] }
 0x524   : > { %v12211_v22 = vsel %vm258_vm2, %v2981_v55, %v3109_v61  ;;  %3434 = vadd.xlane.f32.xlu0 %v3360_v0  ;;  %v7561_v55 = vld [vmem:[%s15410_s2 + $0x60] sm:$0xff]   ;;  %v3362_v0 = vmul.f32 %v16698_v42, %v16698_v42 }
 0x525   : > { %16692 = vst [vmem:[#allocation196_spill] sm:$0xff] %v12211_v22  ;;  %v3103_v36 = vpop.xlane.xlu0 %3102  ;;  %7369 = vmatprep.subr.bf16.mxu0 %v7561_v55 }
 0x526   : > { %v12217_v35 = vsel %vm258_vm2, %v2975_v47, %v3103_v36  ;;  %3436 = vadd.xlane.f32.xlu1 %v3361_v12  ;;  %v16697_v47 = vld [vmem:[#allocation91_spill] sm:$0xff]  ;;  %7370 = vmatpush3.bf16.msra.mxu0 %v7561_v55  ;;  %v16703_v55 = vld [vmem:[#allocation9_spill] sm:$0xff] }
 0x527   : > { %16694 = vst [vmem:[#allocation198_spill] sm:$0xff] %v12217_v35  ;;  %v3105_v56 = vpop.xlane.xlu1 %3104  ;;  %v3171_v21 = vmul.f32 %v16697_v47, %v16697_v47  ;;  %7371 = vmatprep.subr.bf16.mxu0 %v7562_v62  ;;  %v16701_v47 = vld [vmem:[#allocation132_spill] sm:$0xff] }
 0x528   : > { %v12229_v8 = vsel %vm258_vm2, %v2977_v28, %v3105_v56  ;;  %3246 = vadd.xlane.f32.xlu0 %v3170_v10  ;;  %v16699_v28 = vld [vmem:[#allocation8_spill] sm:$0xff]  ;;  %v3172_v10 = vmul.f32 %v16700_v49, %v16700_v49  ;;  %v7564_v49 = vld [vmem:[%s15410_s2 + $0x78] sm:$0xff]  }
 0x529   : > { %16696 = vst [vmem:[#allocation41_spill] sm:$0xff] %v12229_v8  ;;  %v2987_v24 = vpop.xlane.xlu0 %2986  ;;  %v3363_v12 = vmul.f32 %v16699_v28, %v16699_v28  ;;  %v3364_v28 = vmul.f32 %v16703_v55, %v16703_v55 }
 0x52a   : > { %3248 = vadd.xlane.f32.xlu1 %v3171_v21  ;;  %v3173_v21 = vmul.f32 %v16701_v47, %v16701_v47  ;;  %7372 = vmatpush3.bf16.msra.mxu0 %v7562_v62  ;;  %v16705_v62 = vld [vmem:[#allocation69_spill] sm:$0xff] }
 0x52b   : > { %v2989_v61 = vpop.xlane.xlu1 %2988  ;;  %7373 = vmatprep.subr.bf16.mxu0 %v7563_v57  ;;  %v3365_v47 = vmul.f32 %v16705_v62, %v16705_v62 }
 0x52c   : > { %3438 = vadd.xlane.f32.xlu0 %v3362_v0 }
 0x52d   : > { %v2983_v36 = vpop.xlane.xlu0 %2982 }
 0x52e   : > { %3440 = vadd.xlane.f32.xlu1 %v3363_v12  ;;  %7374 = vmatpush3.bf16.msra.mxu0 %v7563_v57  ;;  %v16710_v57 = vld [vmem:[#allocation173_spill] sm:$0xff] }
 0x52f   : > { %v2985_v56 = vpop.xlane.xlu1 %2984  ;;  %7375 = vmatprep.subr.bf16.mxu0 %v7564_v49 }
 0x530   : > { %3250 = vadd.xlane.f32.xlu0 %v3172_v10 }
 0x531   : > { %v3115_v42 = vpop.xlane.xlu0 %3114 }
 0x532   : > { %v12249_v0 = vsel %vm258_vm2, %v2987_v24, %v3115_v42  ;;  %3252 = vadd.xlane.f32.xlu1 %v3173_v21  ;;  %v16707_v42 = vld [vmem:[#allocation7_spill] sm:$0xff]  ;;  %7376 = vmatpush3.bf16.msra.mxu0 %v7564_v49 }
 0x533   : > { %16702 = vst [vmem:[#allocation199_spill] sm:$0xff] %v12249_v0  ;;  %v3117_v12 = vpop.xlane.xlu1 %3116  ;;  %v3174_v55 = vmul.f32 %v16707_v42, %v16707_v42 }
 0x534   : > { %v12258_v10 = vsel %vm258_vm2, %v2989_v61, %v3117_v12  ;;  %3442 = vadd.xlane.f32.xlu0 %v3364_v28  ;;  %v16709_v28 = vld [vmem:[#allocation59_spill] sm:$0xff] }
 0x535   : > { %16704 = vst [vmem:[#allocation63_spill] sm:$0xff] %v12258_v10  ;;  %v3111_v24 = vpop.xlane.xlu0 %3110  ;;  %v3175_v12 = vmul.f32 %v16709_v28, %v16709_v28 }
 0x536   : > { %v12264_v21 = vsel %vm258_vm2, %v2983_v36, %v3111_v24  ;;  %3444 = vadd.xlane.f32.xlu1 %v3365_v47  ;;  %v3366_v36 = vmul.f32 %v16710_v57, %v16710_v57  ;;  %v16711_v24 = vld [vmem:[#allocation99_spill] sm:$0xff]  ;;  %v16715_v57 = vld [vmem:[#allocation6_spill] sm:$0xff] }
 0x537   : > { %16706 = vst [vmem:[#allocation105_spill] sm:$0xff] %v12264_v21  ;;  %v3113_v0 = vpop.xlane.xlu1 %3112  ;;  %v3367_v42 = vmul.f32 %v16711_v24, %v16711_v24  ;;  %v16712_v21 = vld [vmem:[#allocation102_spill] sm:$0xff] }
 0x538   : > { %v12270_v61 = vsel %vm258_vm2, %v2985_v56, %v3113_v0  ;;  %3254 = vadd.xlane.f32.xlu0 %v3174_v55  ;;  %v3176_v56 = vmul.f32 %v16712_v21, %v16712_v21  ;;  %v16713_v55 = vld [vmem:[#allocation172_spill] sm:$0xff] }
 0x539   : > { %16708 = vst [vmem:[#allocation194_spill] sm:$0xff] %v12270_v61  ;;  %v2995_v62 = vpop.xlane.xlu0 %2994  ;;  %v3177_v28 = vmul.f32 %v16713_v55, %v16713_v55  ;;  %v16717_v21 = vld [vmem:[#allocation40_spill] sm:$0xff] }
 0x53a   : > { %3256 = vadd.xlane.f32.xlu1 %v3175_v12 }
 0x53b   : > { %v2997_v47 = vpop.xlane.xlu1 %2996 }
 0x53c   : > { %3446 = vadd.xlane.f32.xlu0 %v3366_v36  ;;  %v3368_v36 = vmul.f32 %v16715_v57, %v16715_v57 }
 0x53d   : > { %v2991_v10 = vpop.xlane.xlu0 %2990 }
 0x53e   : > { %3448 = vadd.xlane.f32.xlu1 %v3367_v42 }
 0x53f   : > { %v2993_v0 = vpop.xlane.xlu1 %2992 }
 0x540   : > { %3258 = vadd.xlane.f32.xlu0 %v3176_v56  ;;  %v3369_v56 = vmul.f32 %v16717_v21, %v16717_v21  ;;  %v16722_v21 = vld [vmem:[#allocation110_spill] sm:$0xff] }
 0x541   : > { %v3123_v49 = vpop.xlane.xlu0 %3122 }
 0x542   : > { %v12284_v12 = vsel %vm258_vm2, %v2995_v62, %v3123_v49  ;;  %3260 = vadd.xlane.f32.xlu1 %v3177_v28  ;;  %v16719_v62 = vld [vmem:[#allocation115_spill] sm:$0xff] }
 0x543   : > { %16714 = vst [vmem:[#allocation89_spill] sm:$0xff] %v12284_v12  ;;  %v3125_v24 = vpop.xlane.xlu1 %3124  ;;  %v3178_v28 = vmul.f32 %v16719_v62, %v16719_v62  ;;  %v16724_v12 = vld [vmem:[#allocation68_spill] sm:$0xff] }
 0x544   : > { %v12290_v42 = vsel %vm258_vm2, %v2997_v47, %v3125_v24  ;;  %3450 = vadd.xlane.f32.xlu0 %v3368_v36  ;;  %v16721_v47 = vld [vmem:[#allocation12_spill] sm:$0xff] }
 0x545   : > { %16716 = vst [vmem:[#allocation104_spill] sm:$0xff] %v12290_v42  ;;  %v3119_v61 = vpop.xlane.xlu0 %3118  ;;  %v3179_v36 = vmul.f32 %v16721_v47, %v16721_v47  ;;  %v3370_v42 = vmul.f32 %v16722_v21, %v16722_v21 }
 0x546   : > { %v12296_v55 = vsel %vm258_vm2, %v2991_v10, %v3119_v61  ;;  %3452 = vadd.xlane.f32.xlu1 %v3369_v56  ;;  %v16723_v61 = vld [vmem:[#allocation174_spill] sm:$0xff] }
 0x547   : > { %16718 = vst [vmem:[#allocation193_spill] sm:$0xff] %v12296_v55  ;;  %v3121_v49 = vpop.xlane.xlu1 %3120  ;;  %v3371_v56 = vmul.f32 %v16723_v61, %v16723_v61 }
 0x548   : > { %v12302_v57 = vsel %vm258_vm2, %v2993_v0, %v3121_v49  ;;  %3262 = vadd.xlane.f32.xlu0 %v3178_v28  ;;  %v3180_v0 = vmul.f32 %v16724_v12, %v16724_v12  ;;  %v16725_v28 = vld [vmem:[#allocation114_spill] sm:$0xff] }
 0x549   : > { %16720 = vst [vmem:[#allocation204_spill] sm:$0xff] %v12302_v57  ;;  %v3003_v24 = vpop.xlane.xlu0 %3002  ;;  %v3181_v47 = vmul.f32 %v16725_v28, %v16725_v28  ;;  %v16729_v12 = vld [vmem:[#allocation178_spill] sm:$0xff] }
 0x54a   : > { %3264 = vadd.xlane.f32.xlu1 %v3179_v36 }
 0x54b   : > { %v3005_v10 = vpop.xlane.xlu1 %3004 }
 0x54c   : > { %3454 = vadd.xlane.f32.xlu0 %v3370_v42  ;;  %v16727_v42 = vld [vmem:[#allocation54_spill] sm:$0xff] }
 0x54d   : > { %v2999_v62 = vpop.xlane.xlu0 %2998  ;;  %v3372_v21 = vmul.f32 %v16727_v42, %v16727_v42 }
 0x54e   : > { %3456 = vadd.xlane.f32.xlu1 %v3371_v56 }
 0x54f   : > { %v3001_v49 = vpop.xlane.xlu1 %3000 }
 0x550   : > { %3266 = vadd.xlane.f32.xlu0 %v3180_v0  ;;  %v3373_v0 = vmul.f32 %v16729_v12, %v16729_v12  ;;  %v16734_v12 = vld [vmem:[#allocation122_spill] sm:$0xff] }
 0x551   : > { %v3131_v57 = vpop.xlane.xlu0 %3130 }
 0x552   : > { %v12316_v36 = vsel %vm258_vm2, %v3003_v24, %v3131_v57  ;;  %3268 = vadd.xlane.f32.xlu1 %v3181_v47  ;;  %v16731_v57 = vld [vmem:[#allocation128_spill] sm:$0xff] }
 0x553   : > { %16726 = vst [vmem:[#allocation207_spill] sm:$0xff] %v12316_v36  ;;  %v3133_v61 = vpop.xlane.xlu1 %3132  ;;  %v3182_v24 = vmul.f32 %v16731_v57, %v16731_v57  ;;  %v16736_v36 = vld [vmem:[#allocation10_spill] sm:$0xff] }
 0x554   : > { %v12322_v56 = vsel %vm258_vm2, %v3005_v10, %v3133_v61  ;;  %3458 = vadd.xlane.f32.xlu0 %v3372_v21  ;;  %v16733_v10 = vld [vmem:[#allocation129_spill] sm:$0xff] }
 0x555   : > { %16728 = vst [vmem:[#allocation148_spill] sm:$0xff] %v12322_v56  ;;  %v3127_v55 = vpop.xlane.xlu0 %3126  ;;  %v3183_v21 = vmul.f32 %v16733_v10, %v16733_v10  ;;  %v3374_v56 = vmul.f32 %v16734_v12, %v16734_v12 }
 0x556   : > { %v12328_v28 = vsel %vm258_vm2, %v2999_v62, %v3127_v55  ;;  %3460 = vadd.xlane.f32.xlu1 %v3373_v0  ;;  %v16735_v62 = vld [vmem:[#allocation16_spill] sm:$0xff] }
 0x557   : > { %16730 = vst [vmem:[#allocation119_spill] sm:$0xff] %v12328_v28  ;;  %v3129_v47 = vpop.xlane.xlu1 %3128  ;;  %v3375_v0 = vmul.f32 %v16735_v62, %v16735_v62 }
 0x558   : > { %v12334_v42 = vsel %vm258_vm2, %v3001_v49, %v3129_v47  ;;  %3270 = vadd.xlane.f32.xlu0 %v3182_v24  ;;  %v3184_v49 = vmul.f32 %v16736_v36, %v16736_v36  ;;  %v16737_v24 = vld [vmem:[#allocation175_spill] sm:$0xff] }
 0x559   : > { %16732 = vst [vmem:[#allocation203_spill] sm:$0xff] %v12334_v42  ;;  %v3011_v61 = vpop.xlane.xlu0 %3010  ;;  %v3185_v10 = vmul.f32 %v16737_v24, %v16737_v24  ;;  %v16741_v36 = vld [vmem:[#allocation147_spill] sm:$0xff]  ;;  %v16742_v24 = vld [vmem:[#allocation146_spill] sm:$0xff] }
 0x55a   : > { %3272 = vadd.xlane.f32.xlu1 %v3183_v21  ;;  %v3186_v22 = vmul.f32 %v16742_v24, %v16742_v24 }
 0x55b   : > { %v3013_v55 = vpop.xlane.xlu1 %3012 }
 0x55c   : > { %3462 = vadd.xlane.f32.xlu0 %v3374_v56  ;;  %v16739_v56 = vld [vmem:[#allocation17_spill] sm:$0xff] }
 0x55d   : > { %v3007_v57 = vpop.xlane.xlu0 %3006  ;;  %v3376_v12 = vmul.f32 %v16739_v56, %v16739_v56 }
 0x55e   : > { %3464 = vadd.xlane.f32.xlu1 %v3375_v0 }
 0x55f   : > { %v3009_v47 = vpop.xlane.xlu1 %3008 }
 0x560   : > { %3274 = vadd.xlane.f32.xlu0 %v3184_v49  ;;  %v3377_v49 = vmul.f32 %v16741_v36, %v16741_v36 }
 0x561   : > { %v3135_v42 = vpop.xlane.xlu0 %3134 }
 0x562   : > { %v12348_v21 = vsel %vm258_vm2, %v3007_v57, %v3135_v42  ;;  %3276 = vadd.xlane.f32.xlu1 %v3185_v10  ;;  %v16743_v57 = vld [vmem:[#allocation14_spill] sm:$0xff] }
 0x563   : > { %16738 = vst [vmem:[#allocation118_spill] sm:$0xff] %v12348_v21  ;;  %v3137_v62 = vpop.xlane.xlu1 %3136  ;;  %v3187_v10 = vmul.f32 %v16743_v57, %v16743_v57  ;;  %v16744_v21 = vld [vmem:[#allocation140_spill] sm:$0xff]  ;;  %v16749_v57 = vld [vmem:[#allocation145_spill] sm:$0xff] }
 0x564   : > { %v12354_v0 = vsel %vm258_vm2, %v3009_v47, %v3137_v62  ;;  %3466 = vadd.xlane.f32.xlu0 %v3376_v12  ;;  %v3378_v47 = vmul.f32 %v16744_v21, %v16744_v21  ;;  %v16745_v12 = vld [vmem:[#allocation97_spill] sm:$0xff]  ;;  %v16750_v21 = vld [vmem:[#allocation70_spill] sm:$0xff] }
 0x565   : > { %16740 = vst [vmem:[#allocation202_spill] sm:$0xff] %v12354_v0  ;;  %v3019_v28 = vpop.xlane.xlu0 %3018  ;;  %v3379_v36 = vmul.f32 %v16745_v12, %v16745_v12  ;;  %v16751_v12 = vld [vmem:[#allocation139_spill] sm:$0xff] }
 0x566   : > { %3468 = vadd.xlane.f32.xlu1 %v3377_v49  ;;  %v16747_v49 = vld [vmem:[#allocation76_spill] sm:$0xff] }
 0x567   : > { %v3021_v42 = vpop.xlane.xlu1 %3020  ;;  %v3188_v24 = vmul.f32 %v16747_v49, %v16747_v49 }
 0x568   : > { %3278 = vadd.xlane.f32.xlu0 %v3186_v22 }
 0x569   : > { %v3015_v56 = vpop.xlane.xlu0 %3014 }
 0x56a   : > { %3280 = vadd.xlane.f32.xlu1 %v3187_v10  ;;  %v3189_v10 = vmul.f32 %v16749_v57, %v16749_v57 }
 0x56b   : > { %v3017_v62 = vpop.xlane.xlu1 %3016 }
 0x56c   : > { %3470 = vadd.xlane.f32.xlu0 %v3378_v47  ;;  %v3380_v47 = vmul.f32 %v16750_v21, %v16750_v21  ;;  %v16755_v21 = vld [vmem:[#allocation18_spill] sm:$0xff] }
 0x56d   : > { %v12366_v0 = vpop.xlane.xlu0 %3026 }
 0x56e   : > { %16746 = vst [vmem:[#allocation37_spill] sm:$0xff] %v12366_v0  ;;  %3472 = vadd.xlane.f32.xlu1 %v3379_v36  ;;  %v3381_v0 = vmul.f32 %v16751_v12, %v16751_v12 }
 0x56f   : > { %v12370_v22 = vpop.xlane.xlu1 %3028 }
 0x570   : > { %16748 = vst [vmem:[#allocation117_spill] sm:$0xff] %v12370_v22  ;;  %3282 = vadd.xlane.f32.xlu0 %v3188_v24  ;;  %v16753_v24 = vld [vmem:[#allocation88_spill] sm:$0xff] }
 0x571   : > { %v3023_v32 = vpop.xlane.xlu0 %3022  ;;  %v3190_v22 = vmul.f32 %v16753_v24, %v16753_v24 }
 0x572   : > { %3284 = vadd.xlane.f32.xlu1 %v3189_v10 }
 0x573   : > { %v3025_v8 = vpop.xlane.xlu1 %3024 }
 0x574   : > { %3474 = vadd.xlane.f32.xlu0 %v3380_v47  ;;  %v3191_v47 = vmul.f32 %v16755_v21, %v16755_v21 }
 0x575   : > { %v3139_v36 = vpop.xlane.xlu0 %3138 }
 0x576   : > { %v12380_v49 = vsel %vm258_vm2, %v3011_v61, %v3139_v36  ;;  %3476 = vadd.xlane.f32.xlu1 %v3381_v0  ;;  %v16757_v61 = vld [vmem:[#allocation158_spill] sm:$0xff] }
 0x577   : > { %16752 = vst [vmem:[#allocation201_spill] sm:$0xff] %v12380_v49  ;;  %v3141_v57 = vpop.xlane.xlu1 %3140  ;;  %v3382_v0 = vmul.f32 %v16757_v61, %v16757_v61  ;;  %v16783_v49 = vld [vmem:[#allocation120_spill] sm:$0xff] }
 0x578   : > { %v12386_v10 = vsel %vm258_vm2, %v3013_v55, %v3141_v57  ;;  %3286 = vadd.xlane.f32.xlu0 %v3190_v22  ;;  %v16759_v55 = vld [vmem:[#allocation113_spill] sm:$0xff]  ;;  %v12517_v13 = vmul.f32 0.015625, %v16783_v49 }
 0x579   : > { %16754 = vst [vmem:[#allocation116_spill] sm:$0xff] %v12386_v10  ;;  %v3143_v35 = vpop.xlane.xlu0 %3142  ;;  %v3383_v22 = vmul.f32 %v16759_v55, %v16759_v55 }
 0x57a   : > { %v12392_v12 = vsel %vm258_vm2, %v3015_v56, %v3143_v35  ;;  %3288 = vadd.xlane.f32.xlu1 %v3191_v47  ;;  %v16761_v35 = vld [vmem:[#allocation159_spill] sm:$0xff] }
 0x57b   : > { %16756 = vst [vmem:[#allocation200_spill] sm:$0xff] %v12392_v12  ;;  %v3145_v36 = vpop.xlane.xlu1 %3144  ;;  %v3192_v56 = vmul.f32 %v16761_v35, %v16761_v35 }
 0x57c   : > { %v12398_v24 = vsel %vm258_vm2, %v3017_v62, %v3145_v36  ;;  %3478 = vadd.xlane.f32.xlu0 %v3382_v0  ;;  %v16763_v62 = vld [vmem:[#allocation19_spill] sm:$0xff] }
 0x57d   : > { %16758 = vst [vmem:[#allocation131_spill] sm:$0xff] %v12398_v24  ;;  %v3147_v57 = vpop.xlane.xlu0 %3146  ;;  %v3193_v0 = vmul.f32 %v16763_v62, %v16763_v62  ;;  %v3194_v62 = vmul.f32 %v11627_v40, %v11627_v40 }
 0x57e   : > { %v12404_v21 = vsel %vm258_vm2, %v3019_v28, %v3147_v57  ;;  %3480 = vadd.xlane.f32.xlu1 %v3383_v22  ;;  %v16765_v28 = vld [vmem:[#allocation84_spill] sm:$0xff] }
 0x57f   : > { %16760 = vst [vmem:[#allocation209_spill] sm:$0xff] %v12404_v21  ;;  %v3149_v47 = vpop.xlane.xlu1 %3148  ;;  %v3384_v22 = vmul.f32 %v16765_v28, %v16765_v28 }
 0x580   : > { %v12410_v61 = vsel %vm258_vm2, %v3021_v42, %v3149_v47  ;;  %3290 = vadd.xlane.f32.xlu0 %v3192_v56  ;;  %v16767_v42 = vld [vmem:[#allocation157_spill] sm:$0xff] }
 0x581   : > { %16762 = vst [vmem:[#allocation130_spill] sm:$0xff] %v12410_v61  ;;  %v3151_v36 = vpop.xlane.xlu0 %3150  ;;  %v3385_v56 = vmul.f32 %v16767_v42, %v16767_v42  ;;  %v16771_v61 = vld [vmem:[#allocation108_spill] sm:$0xff] }
 0x582   : > { %v12416_v55 = vsel %vm258_vm2, %v3023_v32, %v3151_v36  ;;  %3292 = vadd.xlane.f32.xlu1 %v3193_v0  ;;  %v12429_v32 = vmul.f32 0.015625, %v11655_v59  ;;  %v3195_v36 = vmul.f32 %v11633_v17, %v11633_v17  ;;  %v16769_v17 = vld [vmem:[#allocation126_spill] sm:$0xff] }
 0x583   : > { %16764 = vst [vmem:[#allocation208_spill] sm:$0xff] %v12416_v55  ;;  %v3153_v57 = vpop.xlane.xlu1 %3152 }
 0x584   : > { %v12422_v35 = vsel %vm258_vm2, %v3025_v8, %v3153_v57  ;;  %3482 = vadd.xlane.f32.xlu0 %v3384_v22  ;;  %v12434_v8 = vmul.f32 0.015625, %v11668_v45  ;;  %v16768_v57 = vld [vmem:[#allocation162_spill] sm:$0xff]  ;;  %v3798_v40 = vmul.f32 %v12429_v32, %v12429_v32  ;;  %v3387_v45 = vmul.f32 %v16769_v17, %v16769_v17  ;;  %v16773_v17 = vld [vmem:[#allocation100_spill] sm:$0xff] }
 0x585   : > { %16766 = vst [vmem:[#allocation127_spill] sm:$0xff] %v12422_v35  ;;  %v3223_v47 = vpop.xlane.xlu0 %3222  ;;  %v3386_v42 = vmul.f32 %v16768_v57, %v16768_v57  ;;  %v16770_v57 = vld [vmem:[#allocation163_spill] sm:$0xff]  ;;  %v12456_v12 = vmul.f32 0.015625, %v16773_v17  ;;  %v3198_v17 = vmul.f32 %v11703_v20, %v11703_v20 }
 0x586   : > { %3484 = vadd.xlane.f32.xlu1 %v3385_v56  ;;  %v3799_v35 = vmul.f32 %v12434_v8, %v12434_v8  ;;  %v3196_v55 = vmul.f32 %v16770_v57, %v16770_v57 }
 0x587   : > { %v3225_v0 = vpop.xlane.xlu1 %3224 }
 0x588   : > { %3294 = vadd.xlane.f32.xlu0 %v3194_v62 }
 0x589   : > { %v3415_v28 = vpop.xlane.xlu0 %3414 }
 0x58a   : > { %v3670_v22 = vsel %vm258_vm2, %v3223_v47, %v3415_v28  ;;  %3296 = vadd.xlane.f32.xlu1 %v3195_v36 }
 0x58b   : > { %v3734_v59 = vmul.f32 0.015625, %v3670_v22  ;;  %v3417_v56 = vpop.xlane.xlu1 %3416  ;;  %v12451_v22 = vmul.f32 0.015625, %v16771_v61 }
 0x58c   : > { %v3671_v62 = vsel %vm258_vm2, %v3225_v0, %v3417_v56  ;;  %3486 = vadd.xlane.f32.xlu0 %v3386_v42  ;;  %v16772_v42 = vld [vmem:[#allocation25_spill] sm:$0xff] }
 0x58d   : > { %v3862_v47 = vsub.f32 %v3734_v59, %v3798_v40  ;;  %v3735_v36 = vmul.f32 0.015625, %v3671_v62  ;;  %v3227_v28 = vpop.xlane.xlu0 %3226  ;;  %v3197_v56 = vmul.f32 %v16772_v42, %v16772_v42 }
 0x58e   : > { %3488 = vadd.xlane.f32.xlu1 %v3387_v45  ;;  %v16774_v45 = vld [vmem:[#allocation24_spill] sm:$0xff] }
 0x58f   : > { %v3990_v21 = vadd.f32 1e-05, %v3862_v47  ;;  %v3863_v24 = vsub.f32 %v3735_v36, %v3799_v35  ;;  %v3229_v0 = vpop.xlane.xlu1 %3228  ;;  %v3388_v61 = vmul.f32 %v16774_v45, %v16774_v45  ;;  %v3800_v35 = vmul.f32 %v12451_v22, %v12451_v22 }
 0x590   : > { %3298 = vadd.xlane.f32.xlu0 %v3196_v55  ;;  %v3199_v45 = vmul.f32 %v11709_v30, %v11709_v30 }
 0x591   : > { %7701 = vrsqrt.f32 %v3990_v21  ;;  %v3991_v40 = vadd.f32 1e-05, %v3863_v24  ;;  %v3419_v59 = vpop.xlane.xlu0 %3418  ;;  %v16775_v21 = vld [vmem:[#allocation161_spill] sm:$0xff] }
 0x592   : > { %v3672_v62 = vsel %vm258_vm2, %v3227_v28, %v3419_v59  ;;  %3300 = vadd.xlane.f32.xlu1 %v3197_v56  ;;  %v3389_v24 = vmul.f32 %v16775_v21, %v16775_v21  ;;  %v3801_v28 = vmul.f32 %v12456_v12, %v12456_v12 }
 0x593   : > { %7703 = vrsqrt.f32 %v3991_v40  ;;  %v3736_v55 = vmul.f32 0.015625, %v3672_v62  ;;  %v3421_v47 = vpop.xlane.xlu1 %3420  ;;  %v12473_v40 = vmul.f32 0.015625, %v11731_v6  ;;  %v16777_v6 = vld [vmem:[#allocation166_spill] sm:$0xff] }
 0x594   : > { %v3673_v36 = vsel %vm258_vm2, %v3229_v0, %v3421_v47  ;;  %3490 = vadd.xlane.f32.xlu0 %v3388_v61  ;;  %v12478_v61 = vmul.f32 0.015625, %v11744_v44  ;;  %v16776_v47 = vld [vmem:[#allocation58_spill] sm:$0xff]  ;;  %v3390_v21 = vmul.f32 %v16777_v6, %v16777_v6 }
 0x595   : > { %v3864_v57 = vsub.f32 %v3736_v55, %v3800_v35  ;;  %v3737_v42 = vmul.f32 0.015625, %v3673_v36  ;;  %v3231_v56 = vpop.xlane.xlu0 %3230  ;;  %v3926_v36 = vsub.f32 %v16776_v47, %v12429_v32  ;;  %v3802_v30 = vmul.f32 %v12473_v40, %v12473_v40  ;;  %v16778_v32 = vld [vmem:[#allocation56_spill] sm:$0xff]  ;;  %v12504_v6 = vld [vmem:[%s15412_s4 + $0x5] ss:$0 sm:$0xff] }
 0x596   : > { %3492 = vadd.xlane.f32.xlu1 %v3389_v24 }
 0x597   : > { %v3992_v59 = vadd.f32 1e-05, %v3864_v57  ;;  %v3865_v62 = vsub.f32 %v3737_v42, %v3801_v28  ;;  %v3233_v0 = vpop.xlane.xlu1 %3232  ;;  %v12491_v57 = vld [vmem:[%s15412_s4 + $0x4] ss:$0 sm:$0xff]  ;;  %v3927_v42 = vsub.f32 %v16778_v32, %v12434_v8  ;;  %v16780_v8 = vld [vmem:[#allocation167_spill] sm:$0xff] }
 0x598   : > { %3302 = vadd.xlane.f32.xlu0 %v3198_v17  ;;  %v16779_v17 = vld [vmem:[#allocation143_spill] sm:$0xff] }
 0x599   : > { %7705 = vrsqrt.f32 %v3992_v59  ;;  %v3993_v35 = vadd.f32 1e-05, %v3865_v62  ;;  %v3423_v55 = vpop.xlane.xlu0 %3422  ;;  %v3391_v59 = vmul.f32 %v16779_v17, %v16779_v17 }
 0x59a   : > { %v3674_v20 = vsel %vm258_vm2, %v3231_v56, %v3423_v55  ;;  %3304 = vadd.xlane.f32.xlu1 %v3199_v45 }
 0x59b   : > { %v7702_v24 = vpop.eup %7701  ;;  %7707 = vrsqrt.f32 %v3993_v35  ;;  %v3738_v44 = vmul.f32 0.015625, %v3674_v20  ;;  %v3425_v28 = vpop.xlane.xlu1 %3424  ;;  %v3803_v35 = vmul.f32 %v12478_v61, %v12478_v61 }
 0x59c   : > { %v3675_v56 = vsel %vm258_vm2, %v3233_v0, %v3425_v28  ;;  %3494 = vadd.xlane.f32.xlu0 %v3390_v21  ;;  %v4118_v62 = vmul.f32 %v7702_v24, %v3926_v36  ;;  %v3200_v0 = vmul.f32 %v16780_v8, %v16780_v8  ;;  %v16781_v36 = vld [vmem:[#allocation121_spill] sm:$0xff] }
 0x59d   : > { %v7704_v45 = vpop.eup %7703  ;;  %v3866_v55 = vsub.f32 %v3738_v44, %v3802_v30  ;;  %v3739_v47 = vmul.f32 0.015625, %v3675_v56  ;;  %v3235_v20 = vpop.xlane.xlu0 %3234  ;;  %v12510_v24 = vmul.f32 0.015625, %v16781_v36  ;;  %v16782_v44 = vld [vmem:[#allocation33_spill] sm:$0xff]  ;;  %v16787_v36 = vld [vmem:[#allocation60_spill] sm:$0xff] }
 0x59e   : > { %3496 = vadd.xlane.f32.xlu1 %v3391_v59  ;;  %v4119_v21 = vmul.f32 %v7704_v45, %v3927_v42  ;;  %v4186_v28 = vmul.f32 %v12491_v57, %v4118_v62  ;;  %v3201_v56 = vmul.f32 %v16782_v44, %v16782_v44  ;;  %v16784_v45 = vld [vmem:[#allocation32_spill] sm:$0xff] }
 0x59f   : > { %v3994_v32 = vadd.f32 1e-05, %v3866_v55  ;;  %v3867_v17 = vsub.f32 %v3739_v47, %v3803_v35  ;;  %v3237_v30 = vpop.xlane.xlu1 %3236  ;;  %v3392_v8 = vmul.f32 %v16784_v45, %v16784_v45  ;;  %v16785_v35 = vld [vmem:[#allocation44_spill] sm:$0xff] }
 0x5a0   : > { %3306 = vadd.xlane.f32.xlu0 %v3200_v0  ;;  %v4187_v10 = vmul.f32 %v12491_v57, %v4119_v21  ;;  %v4254_v59 = vadd.f32 %v12504_v6, %v4186_v28  ;;  %v3928_v55 = vsub.f32 %v16785_v35, %v12451_v22  ;;  %v16786_v0 = vld [vmem:[#allocation165_spill] sm:$0xff] }
 0x5a1   : > { %7709 = vrsqrt.f32 %v3994_v32  ;;  %v3995_v42 = vadd.f32 1e-05, %v3867_v17  ;;  %v3427_v62 = vpop.xlane.xlu0 %3426  ;;  %v3393_v21 = vmul.f32 %v16786_v0, %v16786_v0  ;;  %v3929_v32 = vsub.f32 %v16787_v36, %v12456_v12 }
 0x5a2   : > { %v3676_v47 = vsel %vm258_vm2, %v3235_v20, %v3427_v62  ;;  %3308 = vadd.xlane.f32.xlu1 %v3201_v56  ;;  %v4255_v28 = vadd.f32 %v12504_v6, %v4187_v10  ;;  %v3804_v17 = vmul.f32 %v12510_v24, %v12510_v24  ;;  %v4318_v56 = vmax.f32 %v4254_v59, 0.0 }
 0x5a3   : > { %v7706_v49 = vpop.eup %7705  ;;  %7711 = vrsqrt.f32 %v3995_v42  ;;  %v3740_v44 = vmul.f32 0.015625, %v3676_v47  ;;  %v3429_v45 = vpop.xlane.xlu1 %3428  ;;  %v3805_v10 = vmul.f32 %v12517_v13, %v12517_v13  ;;  %v3202_v42 = vmul.f32 %v11779_v29, %v11779_v29 }
 0x5a4   : > { %v4120_v22 = vmul.f32 %v7706_v49, %v3928_v55  ;;  %v3677_v20 = vsel %vm258_vm2, %v3237_v30, %v3429_v45  ;;  %3498 = vadd.xlane.f32.xlu0 %v3392_v8  ;;  %v4319_v62 = vmax.f32 %v4255_v28, 0.0  ;;  %v12540_v30 = vmul.f32 0.015625, %v11807_v16  ;;  %v16788_v16 = vld [vmem:[#allocation182_spill] sm:$0xff] }
 0x5a5   : > { %v7708_v35 = vpop.eup %7707  ;;  %v3868_v0 = vsub.f32 %v3740_v44, %v3804_v17  ;;  %v3741_v33 = vmul.f32 0.015625, %v3677_v20  ;;  %v3239_v12 = vpop.xlane.xlu0 %3238  ;;  %v3203_v49 = vmul.f32 %v11785_v14, %v11785_v14  ;;  %v12547_v29 = vmul.f32 0.015625, %v11820_v52  ;;  %v16790_v14 = vld [vmem:[#allocation181_spill] sm:$0xff] }
 0x5a6   : > { %v4121_v36 = vmul.f32 %v7708_v35, %v3929_v32  ;;  %3500 = vadd.xlane.f32.xlu1 %v3393_v21  ;;  %v4382_v47 = vpack.c.bf16 %v4319_v62, %v4318_v56  ;;  %v4188_v55 = vmul.f32 %v12491_v57, %v4120_v22  ;;  %v3394_v45 = vmul.f32 %v16788_v16, %v16788_v16  ;;  %v16791_v35 = vld [vmem:[#allocation78_spill] sm:$0xff] }
 0x5a7   : > { %v3996_v59 = vadd.f32 1e-05, %v3868_v0  ;;  %v3869_v8 = vsub.f32 %v3741_v33, %v3805_v10  ;;  %v3241_v28 = vpop.xlane.xlu1 %3240  ;;  %v16789_v33 = vld [vmem:[#allocation36_spill] sm:$0xff]  ;;  %v3395_v56 = vmul.f32 %v16790_v14, %v16790_v14  ;;  %v3931_v10 = vsub.f32 %v16791_v35, %v12478_v61 }
 0x5a8   : > { %3310 = vadd.xlane.f32.xlu0 %v3202_v42  ;;  %7377 = vmatprep.mubr.bf16.mxu0 %v4382_v47  ;;  %v4189_v32 = vmul.f32 %v12491_v57, %v4121_v36  ;;  %v4256_v21 = vadd.f32 %v12504_v6, %v4188_v55  ;;  %v3930_v22 = vsub.f32 %v16789_v33, %v12473_v40 }
 0x5a9   : > { %7713 = vrsqrt.f32 %v3996_v59  ;;  %v3997_v17 = vadd.f32 1e-05, %v3869_v8  ;;  %v3431_v44 = vpop.xlane.xlu0 %3430  ;;  %v3806_v0 = vmul.f32 %v12540_v30, %v12540_v30  ;;  %v3807_v8 = vmul.f32 %v12547_v29, %v12547_v29 }
 0x5aa   : > { %v3678_v20 = vsel %vm258_vm2, %v3239_v12, %v3431_v44  ;;  %3312 = vadd.xlane.f32.xlu1 %v3203_v49  ;;  %v4257_v62 = vadd.f32 %v12504_v6, %v4189_v32  ;;  %v4320_v12 = vmax.f32 %v4256_v21, 0.0  ;;  %v16792_v44 = vld [vmem:[#allocation49_spill] sm:$0xff] }
 0x5ab   : > { %v7710_v52 = vpop.eup %7709  ;;  %7715 = vrsqrt.f32 %v3997_v17  ;;  %v3742_v36 = vmul.f32 0.015625, %v3678_v20  ;;  %v3433_v42 = vpop.xlane.xlu1 %3432  ;;  %v3204_v17 = vmul.f32 %v16792_v44, %v16792_v44 }
 0x5ac   : > { %v3679_v40 = vsel %vm258_vm2, %v3241_v28, %v3433_v42  ;;  %3502 = vadd.xlane.f32.xlu0 %v3394_v45  ;;  %v4321_v47 = vmax.f32 %v4257_v62, 0.0  ;;  %v4122_v55 = vmul.f32 %v7710_v52, %v3930_v22  ;;  %v16793_v28 = vld [vmem:[#allocation134_spill] sm:$0xff]  ;;  %v16794_v62 = vld [vmem:[#allocation48_spill] sm:$0xff] }
 0x5ad   : > { %v7712_v59 = vpop.eup %7711  ;;  %v3870_v49 = vsub.f32 %v3742_v36, %v3806_v0  ;;  %v3743_v32 = vmul.f32 0.015625, %v3679_v40  ;;  %v3243_v61 = vpop.xlane.xlu0 %3242  ;;  %v12570_v45 = vmul.f32 0.015625, %v16793_v28  ;;  %v3205_v52 = vmul.f32 %v16794_v62, %v16794_v62  ;;  %v16795_v0 = vld [vmem:[#allocation22_spill] sm:$0xff]  ;;  %v16796_v40 = vld [vmem:[#allocation169_spill] sm:$0xff] }
 0x5ae   : > { %3504 = vadd.xlane.f32.xlu1 %v3395_v56  ;;  %v4383_v16 = vpack.c.bf16 %v4321_v47, %v4320_v12  ;;  %v4123_v33 = vmul.f32 %v7712_v59, %v3931_v10  ;;  %v4190_v20 = vmul.f32 %v12491_v57, %v4122_v55  ;;  %v12577_v36 = vmul.f32 0.015625, %v16795_v0  ;;  %v16797_v47 = vld [vmem:[#allocation57_spill] sm:$0xff] }
 0x5af   : > { %v3998_v21 = vadd.f32 1e-05, %v3870_v49  ;;  %v3871_v22 = vsub.f32 %v3743_v32, %v3807_v8  ;;  %v3245_v14 = vpop.xlane.xlu1 %3244  ;;  %v3396_v12 = vmul.f32 %v16796_v40, %v16796_v40  ;;  %v3932_v55 = vsub.f32 %v16797_v47, %v12510_v24  ;;  %v16798_v8 = vld [vmem:[#allocation67_spill] sm:$0xff] }
 0x5b0   : > { %3314 = vadd.xlane.f32.xlu0 %v3204_v17  ;;  %7378 = vmatmul.mubr.bf16.vlgmr.msra.gmra.mrb[64].mxu0 %v4383_v16  ;;  %v4191_v56 = vmul.f32 %v12491_v57, %v4123_v33  ;;  %v4258_v35 = vadd.f32 %v12504_v6, %v4190_v20  ;;  %v3397_v49 = vmul.f32 %v16798_v8, %v16798_v8  ;;  %v16799_v17 = vld [vmem:[#allocation71_spill] sm:$0xff] }
 0x5b1   : > { %7717 = vrsqrt.f32 %v3998_v21  ;;  %v3999_v10 = vadd.f32 1e-05, %v3871_v22  ;;  %v3435_v42 = vpop.xlane.xlu0 %3434  ;;  %v3933_v16 = vsub.f32 %v16799_v17, %v12517_v13  ;;  %v3808_v33 = vmul.f32 %v12570_v45, %v12570_v45  ;;  %v16800_v17 = vld [vmem:[#allocation45_spill] sm:$0xff] }
 0x5b2   : > { %v3680_v59 = vsel %vm258_vm2, %v3243_v61, %v3435_v42  ;;  %3316 = vadd.xlane.f32.xlu1 %v3205_v52  ;;  %v4259_v32 = vadd.f32 %v12504_v6, %v4191_v56  ;;  %v4322_v61 = vmax.f32 %v4258_v35, 0.0  ;;  %v3809_v52 = vmul.f32 %v12577_v36, %v12577_v36 }
 0x5b3   : > { %v7714_v44 = vpop.eup %7713  ;;  %7719 = vrsqrt.f32 %v3999_v10  ;;  %v3744_v20 = vmul.f32 0.015625, %v3680_v59  ;;  %v3437_v28 = vpop.xlane.xlu1 %3436  ;;  %v3206_v10 = vmul.f32 %v11855_v54, %v11855_v54  ;;  %v3207_v59 = vmul.f32 %v11861_v31, %v11861_v31  ;;  %v16801_v31 = vld [vmem:[#allocation82_spill] sm:$0xff] }
 0x5b4   : > { %v3681_v24 = vsel %vm258_vm2, %v3245_v14, %v3437_v28  ;;  %3506 = vadd.xlane.f32.xlu0 %v3396_v12  ;;  %v4323_v21 = vmax.f32 %v4259_v32, 0.0  ;;  %v4124_v22 = vmul.f32 %v7714_v44, %v3932_v55  ;;  %v12600_v14 = vmul.f32 0.015625, %v11883_v53 }
 0x5b5   : > { %v7716_v62 = vpop.eup %7715  ;;  %v3872_v56 = vsub.f32 %v3744_v20, %v3808_v33  ;;  %v3745_v0 = vmul.f32 0.015625, %v3681_v24  ;;  %v3247_v13 = vpop.xlane.xlu0 %3246  ;;  %v12607_v54 = vmul.f32 0.015625, %v11896_v3  ;;  %v3398_v53 = vmul.f32 %v11888_v50, %v11888_v50  ;;  %v16802_v24 = vld [vmem:[#allocation3_spill] sm:$0xff] }
 0x5b6   : > { %3508 = vadd.xlane.f32.xlu1 %v3397_v49  ;;  %v4384_v42 = vpack.c.bf16 %v4323_v21, %v4322_v61  ;;  %v4125_v40 = vmul.f32 %v7716_v62, %v3933_v16  ;;  %v4192_v47 = vmul.f32 %v12491_v57, %v4124_v22  ;;  %v3934_v16 = vsub.f32 %v16800_v17, %v12540_v30 }
 0x5b7   : > { %v4000_v35 = vadd.f32 1e-05, %v3872_v56  ;;  %v3873_v12 = vsub.f32 %v3745_v0, %v3809_v52  ;;  %v3249_v55 = vpop.xlane.xlu1 %3248  ;;  %v3399_v20 = vmul.f32 %v16801_v31, %v16801_v31  ;;  %v3935_v61 = vsub.f32 %v16802_v24, %v12547_v29  ;;  %v16806_v31 = vld [vmem:[#allocation171_spill] sm:$0xff]  ;;  %v16807_v24 = vld [vmem:[#allocation109_spill] sm:$0xff] }
 0x5b8   : > { %3318 = vadd.xlane.f32.xlu0 %v3206_v10  ;;  %7381 = vmatprep.mubr.bf16.mxu0 %v4384_v42  ;;  %v4193_v8 = vmul.f32 %v12491_v57, %v4125_v40  ;;  %v4260_v49 = vadd.f32 %v12504_v6, %v4192_v47  ;;  %v3810_v21 = vmul.f32 %v12600_v14, %v12600_v14  ;;  %v16803_v40 = vld [vmem:[#allocation65_spill] sm:$0xff] }
 0x5b9   : > { %7721 = vrsqrt.f32 %v4000_v35  ;;  %v4001_v32 = vadd.f32 1e-05, %v3873_v12  ;;  %v3439_v44 = vpop.xlane.xlu0 %3438  ;;  %v3208_v47 = vmul.f32 %v16803_v40, %v16803_v40 }
 0x5ba   : > { %v3682_v33 = vsel %vm258_vm2, %v3247_v13, %v3439_v44  ;;  %3320 = vadd.xlane.f32.xlu1 %v3207_v59  ;;  %v4261_v28 = vadd.f32 %v12504_v6, %v4193_v8  ;;  %v4324_v62 = vmax.f32 %v4260_v49, 0.0  ;;  %v3811_v13 = vmul.f32 %v12607_v54, %v12607_v54 }
 0x5bb   : > { %v7718_v3 = vpop.eup %7717  ;;  %7723 = vrsqrt.f32 %v4001_v32  ;;  %v3746_v50 = vmul.f32 0.015625, %v3682_v33  ;;  %v3441_v22 = vpop.xlane.xlu1 %3440 }
 0x5bc   : > { %v3683_v30 = vsel %vm258_vm2, %v3249_v55, %v3441_v22  ;;  %3510 = vadd.xlane.f32.xlu0 %v3398_v53  ;;  %v4325_v52 = vmax.f32 %v4261_v28, 0.0  ;;  %v4126_v56 = vmul.f32 %v7718_v3, %v3934_v16  ;;  %v16804_v55 = vld [vmem:[#allocation144_spill] sm:$0xff] }
 0x5bd   : > { %v7720_v0 = vpop.eup %7719  ;;  %v3874_v10 = vsub.f32 %v3746_v50, %v3810_v21  ;;  %v3747_v42 = vmul.f32 0.015625, %v3683_v30  ;;  %v3251_v29 = vpop.xlane.xlu0 %3250  ;;  %v12630_v8 = vmul.f32 0.015625, %v16804_v55  ;;  %v16805_v53 = vld [vmem:[#allocation64_spill] sm:$0xff]  ;;  %v16808_v21 = vld [vmem:[#allocation79_spill] sm:$0xff] }
 0x5be   : > { %3512 = vadd.xlane.f32.xlu1 %v3399_v20  ;;  %v4385_v35 = vpack.c.bf16 %v4325_v52, %v4324_v62  ;;  %v4127_v12 = vmul.f32 %v7720_v0, %v3935_v61  ;;  %v4194_v59 = vmul.f32 %v12491_v57, %v4126_v56  ;;  %v3209_v17 = vmul.f32 %v16805_v53, %v16805_v53  ;;  %v16809_v30 = vld [vmem:[#allocation83_spill] sm:$0xff]  ;;  %v16810_v0 = vld [vmem:[#allocation5_spill] sm:$0xff] }
 0x5bf   : > { %v4002_v49 = vadd.f32 1e-05, %v3874_v10  ;;  %v3875_v32 = vsub.f32 %v3747_v42, %v3811_v13  ;;  %v3253_v44 = vpop.xlane.xlu1 %3252  ;;  %v12637_v20 = vmul.f32 0.015625, %v16806_v31  ;;  %v3400_v61 = vmul.f32 %v16807_v24, %v16807_v24  ;;  %v16812_v24 = vld [vmem:[#allocation81_spill] sm:$0xff] }
 0x5c0   : > { %3322 = vadd.xlane.f32.xlu0 %v3208_v47  ;;  %7382 = vmatmul.mubr.bf16.gmra.mrb[68].mxu0 %v4385_v35  ;;  %v4195_v16 = vmul.f32 %v12491_v57, %v4127_v12  ;;  %v4262_v33 = vadd.f32 %v12504_v6, %v4194_v59  ;;  %v3936_v50 = vsub.f32 %v16808_v21, %v12570_v45 }
 0x5c1   : > { %7725 = vrsqrt.f32 %v4002_v49  ;;  %v4003_v28 = vadd.f32 1e-05, %v3875_v32  ;;  %v3443_v3 = vpop.xlane.xlu0 %3442  ;;  %v3401_v62 = vmul.f32 %v16809_v30, %v16809_v30  ;;  %v3937_v13 = vsub.f32 %v16810_v0, %v12577_v36  ;;  %v16815_v0 = vld [vmem:[#allocation137_spill] sm:$0xff] }
 0x5c2   : > { %v3684_v22 = vsel %vm258_vm2, %v3251_v29, %v3443_v3  ;;  %3324 = vadd.xlane.f32.xlu1 %v3209_v17  ;;  %v4263_v52 = vadd.f32 %v12504_v6, %v4195_v16  ;;  %v3812_v10 = vmul.f32 %v12630_v8, %v12630_v8  ;;  %v4326_v29 = vmax.f32 %v4262_v33, 0.0 }
 0x5c3   : > { %v7722_v56 = vpop.eup %7721  ;;  %7727 = vrsqrt.f32 %v4003_v28  ;;  %v3748_v42 = vmul.f32 0.015625, %v3684_v22  ;;  %v3445_v40 = vpop.xlane.xlu1 %3444  ;;  %v3813_v59 = vmul.f32 %v12637_v20, %v12637_v20  ;;  %v3210_v32 = vmul.f32 %v11931_v7, %v11931_v7  ;;  %v16813_v7 = vld [vmem:[#allocation190_spill] sm:$0xff] }
 0x5c4   : > { %v3685_v45 = vsel %vm258_vm2, %v3253_v44, %v3445_v40  ;;  %3514 = vadd.xlane.f32.xlu0 %v3400_v61  ;;  %v4327_v47 = vmax.f32 %v4263_v52, 0.0  ;;  %v4128_v35 = vmul.f32 %v7722_v56, %v3936_v50  ;;  %v16811_v44 = vld [vmem:[#allocation95_spill] sm:$0xff]  ;;  %v3211_v61 = vmul.f32 %v16812_v24, %v16812_v24  ;;  %v16814_v52 = vld [vmem:[#allocation80_spill] sm:$0xff] }
 0x5c5   : > { %v7724_v12 = vpop.eup %7723  ;;  %v3876_v55 = vsub.f32 %v3748_v42, %v3812_v10  ;;  %v3749_v49 = vmul.f32 0.015625, %v3685_v45  ;;  %v3255_v36 = vpop.xlane.xlu0 %3254  ;;  %v12660_v31 = vmul.f32 0.015625, %v16811_v44  ;;  %v12667_v22 = vmul.f32 0.015625, %v16813_v7  ;;  %v16816_v42 = vld [vmem:[#allocation180_spill] sm:$0xff] }
 0x5c6   : > { %3516 = vadd.xlane.f32.xlu1 %v3401_v62  ;;  %v4386_v53 = vpack.c.bf16 %v4327_v47, %v4326_v29  ;;  %v4129_v17 = vmul.f32 %v7724_v12, %v3937_v13  ;;  %v4196_v16 = vmul.f32 %v12491_v57, %v4128_v35  ;;  %v3402_v56 = vmul.f32 %v16814_v52, %v16814_v52  ;;  %v16817_v47 = vld [vmem:[#allocation29_spill] sm:$0xff] }
 0x5c7   : > { %v4004_v33 = vadd.f32 1e-05, %v3876_v55  ;;  %v3877_v28 = vsub.f32 %v3749_v49, %v3813_v59  ;;  %v3257_v3 = vpop.xlane.xlu1 %3256  ;;  %v3938_v13 = vsub.f32 %v16815_v0, %v12600_v14  ;;  %v3403_v40 = vmul.f32 %v16816_v42, %v16816_v42 }
 0x5c8   : > { %3326 = vadd.xlane.f32.xlu0 %v3210_v32  ;;  %7385 = vmatprep.mubr.bf16.mxu0 %v4386_v53  ;;  %v4197_v21 = vmul.f32 %v12491_v57, %v4129_v17  ;;  %v4264_v50 = vadd.f32 %v12504_v6, %v4196_v16  ;;  %v3939_v35 = vsub.f32 %v16817_v47, %v12607_v54 }
 0x5c9   : > { %7729 = vrsqrt.f32 %v4004_v33  ;;  %v4005_v30 = vadd.f32 1e-05, %v3877_v28  ;;  %v3447_v62 = vpop.xlane.xlu0 %3446  ;;  %v3814_v12 = vmul.f32 %v12660_v31, %v12660_v31  ;;  %v3815_v17 = vmul.f32 %v12667_v22, %v12667_v22 }
 0x5ca   : > { %v3686_v10 = vsel %vm258_vm2, %v3255_v36, %v3447_v62  ;;  %3328 = vadd.xlane.f32.xlu1 %v3211_v61  ;;  %v4265_v45 = vadd.f32 %v12504_v6, %v4197_v21  ;;  %v4328_v49 = vmax.f32 %v4264_v50, 0.0  ;;  %v3212_v33 = vmul.f32 %v11915_v63, %v11915_v63  ;;  %v16819_v63 = vld [vmem:[#allocation155_spill] sm:$0xff] }
 0x5cb   : > { %v7726_v29 = vpop.eup %7725  ;;  %7731 = vrsqrt.f32 %v4005_v30  ;;  %v3750_v59 = vmul.f32 0.015625, %v3686_v10  ;;  %v3449_v55 = vpop.xlane.xlu1 %3448  ;;  %v3213_v62 = vmul.f32 %v11925_v46, %v11925_v46  ;;  %v12697_v0 = vmul.f32 0.015625, %v16819_v63  ;;  %v16822_v63 = vld [vmem:[#allocation85_spill] sm:$0xff] }
 0x5cc   : > { %v3687_v14 = vsel %vm258_vm2, %v3257_v3, %v3449_v55  ;;  %3518 = vadd.xlane.f32.xlu0 %v3402_v56  ;;  %v4329_v36 = vmax.f32 %v4265_v45, 0.0  ;;  %v4130_v32 = vmul.f32 %v7726_v29, %v3938_v13  ;;  %v16818_v3 = vld [vmem:[#allocation51_spill] sm:$0xff]  ;;  %v3404_v42 = vmul.f32 %v12060_v9, %v12060_v9 }
 0x5cd   : > { %v7728_v53 = vpop.eup %7727  ;;  %v3878_v16 = vsub.f32 %v3750_v59, %v3814_v12  ;;  %v3751_v44 = vmul.f32 0.015625, %v3687_v14  ;;  %v3259_v54 = vpop.xlane.xlu0 %3258  ;;  %v12690_v21 = vmul.f32 0.015625, %v16818_v3  ;;  %v3405_v46 = vmul.f32 %v12069_v58, %v12069_v58  ;;  %v16821_v12 = vld [vmem:[#allocation43_spill] sm:$0xff] }
 0x5ce   : > { %3520 = vadd.xlane.f32.xlu1 %v3403_v40  ;;  %v4387_v28 = vpack.c.bf16 %v4329_v36, %v4328_v49  ;;  %v4131_v24 = vmul.f32 %v7728_v53, %v3939_v35  ;;  %v4198_v61 = vmul.f32 %v12491_v57, %v4130_v32  ;;  %v16820_v40 = vld [vmem:[#allocation73_spill] sm:$0xff]  ;;  %v3941_v59 = vsub.f32 %v16821_v12, %v12637_v20 }
 0x5cf   : > { %v4006_v50 = vadd.f32 1e-05, %v3878_v16  ;;  %v3879_v7 = vsub.f32 %v3751_v44, %v3815_v17  ;;  %v3261_v30 = vpop.xlane.xlu1 %3260  ;;  %v3940_v45 = vsub.f32 %v16820_v40, %v12630_v8  ;;  %v3816_v55 = vmul.f32 %v12690_v21, %v12690_v21 }
 0x5d0   : > { %3330 = vadd.xlane.f32.xlu0 %v3212_v33  ;;  %7386 = vmatmul.mubr.bf16.gmra.mrb[72].mxu0 %v4387_v28  ;;  %v4199_v52 = vmul.f32 %v12491_v57, %v4131_v24  ;;  %v4266_v56 = vadd.f32 %v12504_v6, %v4198_v61  ;;  %v3817_v53 = vmul.f32 %v12697_v0, %v12697_v0  ;;  %v12720_v24 = vmul.f32 0.015625, %v12055_v48 }
 0x5d1   : > { %7733 = vrsqrt.f32 %v4006_v50  ;;  %v4007_v13 = vadd.f32 1e-05, %v3879_v7  ;;  %v3451_v10 = vpop.xlane.xlu0 %3450  ;;  %v3214_v44 = vmul.f32 %v12001_v5, %v12001_v5  ;;  %v3215_v7 = vmul.f32 %v12011_v43, %v12011_v43  ;;  %v16823_v43 = vld [vmem:[#allocation53_spill] sm:$0xff] }
 0x5d2   : > { %v3688_v29 = vsel %vm258_vm2, %v3259_v54, %v3451_v10  ;;  %3332 = vadd.xlane.f32.xlu1 %v3213_v62  ;;  %v4267_v47 = vadd.f32 %v12504_v6, %v4199_v52  ;;  %v4330_v49 = vmax.f32 %v4266_v56, 0.0  ;;  %v12727_v5 = vmul.f32 0.015625, %v12064_v15 }
 0x5d3   : > { %v7730_v35 = vpop.eup %7729  ;;  %7735 = vrsqrt.f32 %v4007_v13  ;;  %v3752_v9 = vmul.f32 0.015625, %v3688_v29  ;;  %v3453_v14 = vpop.xlane.xlu1 %3452  ;;  %v3406_v48 = vmul.f32 %v12074_v51, %v12074_v51  ;;  %v3942_v13 = vsub.f32 %v16822_v63, %v12660_v31 }
 0x5d4   : > { %v3689_v8 = vsel %vm258_vm2, %v3261_v30, %v3453_v14  ;;  %3522 = vadd.xlane.f32.xlu0 %v3404_v42  ;;  %v4331_v36 = vmax.f32 %v4267_v47, 0.0  ;;  %v4132_v32 = vmul.f32 %v7730_v35, %v3940_v45  ;;  %v3407_v42 = vmul.f32 %v16823_v43, %v16823_v43  ;;  %v16824_v45 = vld [vmem:[#allocation103_spill] sm:$0xff]  ;;  %v16830_v43 = vld [vmem:[#allocation77_spill] sm:$0xff] }
 0x5d5   : > { %v7732_v58 = vpop.eup %7731  ;;  %v3880_v17 = vsub.f32 %v3752_v9, %v3816_v55  ;;  %v3753_v16 = vmul.f32 0.015625, %v3689_v8  ;;  %v3263_v20 = vpop.xlane.xlu0 %3262  ;;  %v3943_v29 = vsub.f32 %v16824_v45, %v12667_v22  ;;  %v3819_v9 = vmul.f32 %v12727_v5, %v12727_v5 }
 0x5d6   : > { %3524 = vadd.xlane.f32.xlu1 %v3405_v46  ;;  %v4388_v54 = vpack.c.bf16 %v4331_v36, %v4330_v49  ;;  %v4133_v33 = vmul.f32 %v7732_v58, %v3941_v59  ;;  %v4200_v28 = vmul.f32 %v12491_v57, %v4132_v32  ;;  %v3818_v46 = vmul.f32 %v12720_v24, %v12720_v24  ;;  %v16825_v49 = vld [vmem:[#allocation94_spill] sm:$0xff] }
 0x5d7   : > { %v4008_v61 = vadd.f32 1e-05, %v3880_v17  ;;  %v3881_v3 = vsub.f32 %v3753_v16, %v3817_v53  ;;  %v3265_v50 = vpop.xlane.xlu1 %3264  ;;  %v3216_v36 = vmul.f32 %v16825_v49, %v16825_v49  ;;  %v16826_v17 = vld [vmem:[#allocation188_spill] sm:$0xff] }
 0x5d8   : > { %3334 = vadd.xlane.f32.xlu0 %v3214_v44  ;;  %7389 = vmatprep.mubr.bf16.mxu0 %v4388_v54  ;;  %v4201_v30 = vmul.f32 %v12491_v57, %v4133_v33  ;;  %v4268_v62 = vadd.f32 %v12504_v6, %v4200_v28  ;;  %v12750_v16 = vmul.f32 0.015625, %v16826_v17  ;;  %v3217_v33 = vmul.f32 %v11991_v41, %v11991_v41 }
 0x5d9   : > { %7737 = vrsqrt.f32 %v4008_v61  ;;  %v4009_v52 = vadd.f32 1e-05, %v3881_v3  ;;  %v3455_v56 = vpop.xlane.xlu0 %3454  ;;  %v16827_v3 = vld [vmem:[#allocation192_spill] sm:$0xff]  ;;  %v3409_v41 = vmul.f32 %v12092_v27, %v12092_v27 }
 0x5da   : > { %v3690_v10 = vsel %vm258_vm2, %v3263_v20, %v3455_v56  ;;  %3336 = vadd.xlane.f32.xlu1 %v3215_v7  ;;  %v4269_v40 = vadd.f32 %v12504_v6, %v4201_v30  ;;  %v4332_v35 = vmax.f32 %v4268_v62, 0.0  ;;  %v16828_v62 = vld [vmem:[#allocation195_spill] sm:$0xff] }
 0x5db   : > { %v7734_v15 = vpop.eup %7733  ;;  %7739 = vrsqrt.f32 %v4009_v52  ;;  %v3754_v51 = vmul.f32 0.015625, %v3690_v10  ;;  %v3457_v47 = vpop.xlane.xlu1 %3456  ;;  %v3408_v52 = vmul.f32 %v16828_v62, %v16828_v62  ;;  %v16829_v56 = vld [vmem:[#allocation87_spill] sm:$0xff] }
 0x5dc   : > { %v3691_v31 = vsel %vm258_vm2, %v3265_v50, %v3457_v47  ;;  %3526 = vadd.xlane.f32.xlu0 %v3406_v48  ;;  %v4333_v12 = vmax.f32 %v4269_v40, 0.0  ;;  %v4134_v59 = vmul.f32 %v7734_v15, %v3942_v13  ;;  %v12757_v50 = vmul.f32 0.015625, %v16827_v3 }
 0x5dd   : > { %v7736_v55 = vpop.eup %7735  ;;  %v3882_v14 = vsub.f32 %v3754_v51, %v3818_v46  ;;  %v3755_v8 = vmul.f32 0.015625, %v3691_v31  ;;  %v3267_v22 = vpop.xlane.xlu0 %3266  ;;  %v3944_v48 = vsub.f32 %v16829_v56, %v12690_v21  ;;  %v3820_v40 = vmul.f32 %v12750_v16, %v12750_v16 }
 0x5de   : > { %3528 = vadd.xlane.f32.xlu1 %v3407_v42  ;;  %v4389_v32 = vpack.c.bf16 %v4333_v12, %v4332_v35  ;;  %v4135_v58 = vmul.f32 %v7736_v55, %v3943_v29  ;;  %v4202_v53 = vmul.f32 %v12491_v57, %v4134_v59  ;;  %v3945_v42 = vsub.f32 %v16830_v43, %v12697_v0  ;;  %v16831_v12 = vld [vmem:[#allocation189_spill] sm:$0xff]  ;;  %v16832_v59 = vld [vmem:[#allocation184_spill] sm:$0xff] }
 0x5df   : > { %v4010_v20 = vadd.f32 1e-05, %v3882_v14  ;;  %v3883_v44 = vsub.f32 %v3755_v8, %v3819_v9  ;;  %v3269_v54 = vpop.xlane.xlu1 %3268  ;;  %v3821_v47 = vmul.f32 %v12757_v50, %v12757_v50  ;;  %v12778_v55 = vsub.f32 %v16832_v59, %v16831_v12 }
 0x5e0   : > { %3338 = vadd.xlane.f32.xlu0 %v3216_v36  ;;  %7390 = vmatmul.mubr.bf16.gmra.mrb[76].mxu0 %v4389_v32  ;;  %v4203_v28 = vmul.f32 %v12491_v57, %v4135_v58  ;;  %v4270_v61 = vadd.f32 %v12504_v6, %v4202_v53  ;;  %v16833_v58 = vld [vmem:[#allocation92_spill] sm:$0xff]  ;;  %v16834_v53 = vld [vmem:[#allocation186_spill] sm:$0xff] }
 0x5e1   : > { %7741 = vrsqrt.f32 %v4010_v20  ;;  %v4011_v7 = vadd.f32 1e-05, %v3883_v44  ;;  %v3459_v30 = vpop.xlane.xlu0 %3458  ;;  %v12787_v17 = vsub.f32 %v16834_v53, %v16833_v58 }
 0x5e2   : > { %v3692_v63 = vsel %vm258_vm2, %v3267_v22, %v3459_v30  ;;  %3340 = vadd.xlane.f32.xlu1 %v3217_v33  ;;  %v4271_v13 = vadd.f32 %v12504_v6, %v4203_v28  ;;  %v4334_v29 = vmax.f32 %v4270_v61, 0.0  ;;  %v12782_v22 = vmul.f32 0.015625, %v12114_v19  ;;  %v16835_v61 = vld [vmem:[#allocation13_spill] sm:$0xff] }
 0x5e3   : > { %v7738_v10 = vpop.eup %7737  ;;  %7743 = vrsqrt.f32 %v4011_v7  ;;  %v3756_v15 = vmul.f32 0.015625, %v3692_v63  ;;  %v3461_v45 = vpop.xlane.xlu1 %3460  ;;  %v3218_v28 = vmul.f32 %v12041_v1, %v12041_v1  ;;  %v3946_v3 = vsub.f32 %v16835_v61, %v12720_v24 }
 0x5e4   : > { %v3693_v21 = vsel %vm258_vm2, %v3269_v54, %v3461_v45  ;;  %3530 = vadd.xlane.f32.xlu0 %v3408_v52  ;;  %v4335_v46 = vmax.f32 %v4271_v13, 0.0  ;;  %v4136_v51 = vmul.f32 %v7738_v10, %v3944_v48  ;;  %v12792_v54 = vmul.f32 0.015625, %v12121_v25  ;;  %v16836_v52 = vld [vmem:[#allocation170_spill] sm:$0xff] }
 0x5e5   : > { %v7740_v27 = vpop.eup %7739  ;;  %v3884_v31 = vsub.f32 %v3756_v15, %v3820_v40  ;;  %v3757_v35 = vmul.f32 0.015625, %v3693_v21  ;;  %v3271_v0 = vpop.xlane.xlu0 %3270  ;;  %v3219_v30 = vmul.f32 %v12051_v4, %v12051_v4  ;;  %v3947_v56 = vsub.f32 %v16836_v52, %v12727_v5 }
 0x5e6   : > { %3532 = vadd.xlane.f32.xlu1 %v3409_v41  ;;  %v4390_v9 = vpack.c.bf16 %v4335_v46, %v4334_v29  ;;  %v4137_v14 = vmul.f32 %v7740_v27, %v3945_v42  ;;  %v4204_v8 = vmul.f32 %v12491_v57, %v4136_v51  ;;  %v3822_v1 = vmul.f32 %v12782_v22, %v12782_v22 }
 0x5e7   : > { %v4012_v49 = vadd.f32 1e-05, %v3884_v31  ;;  %v3885_v36 = vsub.f32 %v3757_v35, %v3821_v47  ;;  %v3273_v32 = vpop.xlane.xlu1 %3272  ;;  %v3823_v43 = vmul.f32 %v12792_v54, %v12792_v54  ;;  %v3410_v15 = vmul.f32 %v12101_v60, %v12101_v60  ;;  %v16837_v60 = vld [vmem:[#allocation107_spill] sm:$0xff] }
 0x5e8   : > { %3154 = vadd.xlane.f32.xlu0 %v12778_v55  ;;  %7393 = vmatprep.mubr.bf16.mxu0 %v4390_v9  ;;  %v4205_v20 = vmul.f32 %v12491_v57, %v4137_v14  ;;  %v4272_v44 = vadd.f32 %v12504_v6, %v4204_v8  ;;  %v12816_v46 = vmul.f32 0.015625, %v12096_v39  ;;  %v3411_v31 = vmul.f32 %v12110_v34, %v12110_v34 }
 0x5e9   : > { %7745 = vrsqrt.f32 %v4012_v49  ;;  %v4013_v19 = vadd.f32 1e-05, %v3885_v36  ;;  %v3463_v33 = vpop.xlane.xlu0 %3462  ;;  %v12823_v9 = vmul.f32 0.015625, %v16837_v60  ;;  %v3220_v39 = vmul.f32 %v16831_v12, %v16831_v12  ;;  %v16838_v49 = vld [vmem:[#allocation98_spill] sm:$0xff] }
 0x5ea   : > { %v3694_v7 = vsel %vm258_vm2, %v3271_v0, %v3463_v33  ;;  %3156 = vadd.xlane.f32.xlu1 %v12787_v17  ;;  %v4273_v25 = vadd.f32 %v12504_v6, %v4205_v20  ;;  %v4336_v41 = vmax.f32 %v4272_v44, 0.0  ;;  %v3948_v36 = vsub.f32 %v16838_v49, %v12750_v16 }
 0x5eb   : > { %v7742_v62 = vpop.eup %7741  ;;  %7747 = vrsqrt.f32 %v4013_v19  ;;  %v3758_v48 = vmul.f32 0.015625, %v3694_v7  ;;  %v3465_v24 = vpop.xlane.xlu1 %3464  ;;  %v3221_v34 = vmul.f32 %v16833_v58, %v16833_v58  ;;  %v16839_v19 = vld [vmem:[#allocation101_spill] sm:$0xff] }
 0x5ec   : > { %v3695_v63 = vsel %vm258_vm2, %v3273_v32, %v3465_v24  ;;  %3342 = vadd.xlane.f32.xlu0 %v3218_v28  ;;  %v4337_v13 = vmax.f32 %v4273_v25, 0.0  ;;  %v4138_v10 = vmul.f32 %v7742_v62, %v3946_v3  ;;  %v3949_v33 = vsub.f32 %v16839_v19, %v12757_v50 }
 0x5ed   : > { %v7744_v4 = vpop.eup %7743  ;;  %v3886_v42 = vsub.f32 %v3758_v48, %v3822_v1  ;;  %v3759_v40 = vmul.f32 0.015625, %v3695_v63  ;;  %v3275_v5 = vpop.xlane.xlu0 %3274  ;;  %v3824_v28 = vmul.f32 %v12816_v46, %v12816_v46  ;;  %v3825_v25 = vmul.f32 %v12823_v9, %v12823_v9 }
 0x5ee   : > { %3344 = vadd.xlane.f32.xlu1 %v3219_v30  ;;  %v4391_v45 = vpack.c.bf16 %v4337_v13, %v4336_v41  ;;  %v4139_v21 = vmul.f32 %v7744_v4, %v3947_v56  ;;  %v4206_v29 = vmul.f32 %v12491_v57, %v4138_v10  ;;  %v3412_v56 = vmul.f32 %v12778_v55, %v12778_v55 }
 0x5ef   : > { %v4014_v51 = vadd.f32 1e-05, %v3886_v42  ;;  %v3887_v27 = vsub.f32 %v3759_v40, %v3823_v43  ;;  %v3277_v47 = vpop.xlane.xlu1 %3276  ;;  %v12846_v63 = vmul.f32 0.015625, %v12150_v23  ;;  %v3413_v4 = vmul.f32 %v12787_v17, %v12787_v17  ;;  %v16840_v23 = vld [vmem:[#allocation52_spill] sm:$0xff] }
 0x5f0   : > { %3534 = vadd.xlane.f32.xlu0 %v3410_v15  ;;  %7394 = vmatmul.mubr.bf16.gmra.mrb[80].mxu0 %v4391_v45  ;;  %v4207_v35 = vmul.f32 %v12491_v57, %v4139_v21  ;;  %v4274_v0 = vadd.f32 %v12504_v6, %v4206_v29  ;;  %v12853_v55 = vmul.f32 0.015625, %v12156_v38  ;;  %v3950_v15 = vsub.f32 %v16840_v23, %v12782_v22  ;;  %v16841_v29 = vld [vmem:[#allocation42_spill] sm:$0xff] }
 0x5f1   : > { %7749 = vrsqrt.f32 %v4014_v51  ;;  %v4015_v14 = vadd.f32 1e-05, %v3887_v27  ;;  %v3467_v8 = vpop.xlane.xlu0 %3466  ;;  %v3951_v51 = vsub.f32 %v16841_v29, %v12792_v54  ;;  %v3826_v38 = vmul.f32 %v12846_v63, %v12846_v63 }
 0x5f2   : > { %v3696_v32 = vsel %vm258_vm2, %v3275_v5, %v3467_v8  ;;  %3536 = vadd.xlane.f32.xlu1 %v3411_v31  ;;  %v4275_v20 = vadd.f32 %v12504_v6, %v4207_v35  ;;  %v4338_v3 = vmax.f32 %v4274_v0, 0.0 }
 0x5f3   : > { %v7746_v44 = vpop.eup %7745  ;;  %7751 = vrsqrt.f32 %v4015_v14  ;;  %v3760_v12 = vmul.f32 0.015625, %v3696_v32  ;;  %v3469_v61 = vpop.xlane.xlu1 %3468  ;;  %v3827_v14 = vmul.f32 %v12853_v55, %v12853_v55 }
 0x5f4   : > { %v3697_v16 = vsel %vm258_vm2, %v3277_v47, %v3469_v61  ;;  %3346 = vadd.xlane.f32.xlu0 %v3220_v39  ;;  %v4339_v7 = vmax.f32 %v4275_v20, 0.0  ;;  %v4140_v30 = vmul.f32 %v7746_v44, %v3948_v36 }
 0x5f5   : > { %v7748_v58 = vpop.eup %7747  ;;  %v3888_v62 = vsub.f32 %v3760_v12, %v3824_v28  ;;  %v3761_v52 = vmul.f32 0.015625, %v3697_v16  ;;  %v3279_v50 = vpop.xlane.xlu0 %3278  ;;  %v12875_v12 = vmul.f32 0.015625, %v12144_v2 }
 0x5f6   : > { %3348 = vadd.xlane.f32.xlu1 %v3221_v34  ;;  %v4392_v1 = vpack.c.bf16 %v4339_v7, %v4338_v3  ;;  %v4141_v48 = vmul.f32 %v7748_v58, %v3949_v33  ;;  %v4208_v24 = vmul.f32 %v12491_v57, %v4140_v30  ;;  %v12870_v34 = vmul.f32 0.015625, %v12138_v26  ;;  %v16842_v3 = vld [vmem:[#allocation111_spill] sm:$0xff] }
 0x5f7   : > { %v4016_v41 = vadd.f32 1e-05, %v3888_v62  ;;  %v3889_v13 = vsub.f32 %v3761_v52, %v3825_v25  ;;  %v3281_v10 = vpop.xlane.xlu1 %3280  ;;  %v3952_v7 = vsub.f32 %v16842_v3, %v12816_v46  ;;  %v16843_v25 = vld [vmem:[#allocation11_spill] sm:$0xff] }
 0x5f8   : > { %3538 = vadd.xlane.f32.xlu0 %v3412_v56  ;;  %7397 = vmatprep.mubr.bf16.mxu0 %v4392_v1  ;;  %v4209_v43 = vmul.f32 %v12491_v57, %v4141_v48  ;;  %v4276_v42 = vadd.f32 %v12504_v6, %v4208_v24  ;;  %v3828_v62 = vmul.f32 %v12870_v34, %v12870_v34 }
 0x5f9   : > { %7753 = vrsqrt.f32 %v4016_v41  ;;  %v4017_v40 = vadd.f32 1e-05, %v3889_v13  ;;  %v3471_v5 = vpop.xlane.xlu0 %3470 }
 0x5fa   : > { %v3698_v45 = vsel %vm258_vm2, %v3279_v50, %v3471_v5  ;;  %3540 = vadd.xlane.f32.xlu1 %v3413_v4  ;;  %v4277_v21 = vadd.f32 %v12504_v6, %v4209_v43  ;;  %v4340_v22 = vmax.f32 %v4276_v42, 0.0  ;;  %v12893_v4 = vld [vmem:[%s15412_s4 + $0x4] ss:$0 sm:$0xff]  ;;  %v12897_v42 = vmul.f32 0.015625, %v12185_v11 }
 0x5fb   : > { %v7750_v17 = vpop.eup %7749  ;;  %7755 = vrsqrt.f32 %v4017_v40  ;;  %v3762_v27 = vmul.f32 0.015625, %v3698_v45  ;;  %v3473_v47 = vpop.xlane.xlu1 %3472  ;;  %v12903_v45 = vld [vmem:[%s15412_s4 + $0x5] ss:$0 sm:$0xff] }
 0x5fc   : > { %v3699_v31 = vsel %vm258_vm2, %v3281_v10, %v3473_v47  ;;  %v4341_v35 = vmax.f32 %v4277_v21, 0.0  ;;  %v4142_v0 = vmul.f32 %v7750_v17, %v3950_v15  ;;  %v12907_v17 = vmul.f32 0.015625, %v12191_v18 }
 0x5fd   : > { %v7752_v60 = vpop.eup %7751  ;;  %v3890_v8 = vsub.f32 %v3762_v27, %v3826_v38  ;;  %v3763_v39 = vmul.f32 0.015625, %v3699_v31  ;;  %v3283_v49 = vpop.xlane.xlu0 %3282 }
 0x5fe   : > { %v4393_v54 = vpack.c.bf16 %v4341_v35, %v4340_v22  ;;  %v4143_v36 = vmul.f32 %v7752_v60, %v3951_v51  ;;  %v4210_v32 = vmul.f32 %v12491_v57, %v4142_v0  ;;  %v16844_v51 = vld [vmem:[#allocation15_spill] sm:$0xff]  ;;  %v3830_v0 = vmul.f32 %v12897_v42, %v12897_v42 }
 0x5ff   : > { %v4018_v20 = vadd.f32 1e-05, %v3890_v8  ;;  %v3891_v44 = vsub.f32 %v3763_v39, %v3827_v14  ;;  %v3285_v19 = vpop.xlane.xlu1 %3284  ;;  %v3954_v38 = vsub.f32 %v16844_v51, %v12846_v63  ;;  %v16845_v22 = vld [vmem:[#allocation179_spill] sm:$0xff] }
 0x600   : > { %7398 = vmatmul.mubr.bf16.gmra.mrb[84].mxu0 %v4393_v54  ;;  %v4211_v33 = vmul.f32 %v12491_v57, %v4143_v36  ;;  %v4278_v28 = vadd.f32 %v12504_v6, %v4210_v32  ;;  %v3953_v57 = vsub.f32 %v16843_v25, %v12823_v9  ;;  %v3955_v35 = vsub.f32 %v16845_v22, %v12853_v55  ;;  %v16851_v22 = vld [vmem:[#allocation41_spill] sm:$0xff] }
 0x601   : > { %7757 = vrsqrt.f32 %v4018_v20  ;;  %v4019_v61 = vadd.f32 1e-05, %v3891_v44  ;;  %v3475_v16 = vpop.xlane.xlu0 %3474  ;;  %v3831_v54 = vmul.f32 %v12907_v17, %v12907_v17 }
 0x602   : > { %v3700_v26 = vsel %vm258_vm2, %v3283_v49, %v3475_v16  ;;  %v4279_v30 = vadd.f32 %v12504_v6, %v4211_v33  ;;  %v4342_v56 = vmax.f32 %v4278_v28, 0.0  ;;  %v3829_v6 = vmul.f32 %v12875_v12, %v12875_v12  ;;  %v16846_v33 = vld [vmem:[#allocation197_spill] sm:$0xff] }
 0x603   : > { %v7754_v58 = vpop.eup %7753  ;;  %7759 = vrsqrt.f32 %v4019_v61  ;;  %v3764_v2 = vmul.f32 0.015625, %v3700_v26  ;;  %v3477_v52 = vpop.xlane.xlu1 %3476  ;;  %v12924_v28 = vmul.f32 0.015625, %v16846_v33 }
 0x604   : > { %v3701_v50 = vsel %vm258_vm2, %v3285_v19, %v3477_v52  ;;  %v4343_v46 = vmax.f32 %v4279_v30, 0.0  ;;  %v4144_v1 = vmul.f32 %v7754_v58, %v3952_v7  ;;  %v16847_v30 = vld [vmem:[#allocation47_spill] sm:$0xff] }
 0x605   : > { %v7756_v48 = vpop.eup %7755  ;;  %v3892_v24 = vsub.f32 %v3764_v2, %v3828_v62  ;;  %v3765_v41 = vmul.f32 0.015625, %v3701_v50  ;;  %v3287_v13 = vpop.xlane.xlu0 %3286  ;;  %v12929_v58 = vmul.f32 0.015625, %v16847_v30  ;;  %v16848_v62 = vld [vmem:[#allocation123_spill] sm:$0xff] }
 0x606   : > { %v4394_v9 = vpack.c.bf16 %v4343_v46, %v4342_v56  ;;  %v4145_v10 = vmul.f32 %v7756_v48, %v3953_v57  ;;  %v4212_v43 = vmul.f32 %v12893_v4, %v4144_v1  ;;  %v3956_v2 = vsub.f32 %v16848_v62, %v12870_v34  ;;  %v16849_v46 = vld [vmem:[#allocation151_spill] sm:$0xff] }
 0x607   : > { %v4020_v40 = vadd.f32 1e-05, %v3892_v24  ;;  %v3893_v5 = vsub.f32 %v3765_v41, %v3829_v6  ;;  %v3289_v23 = vpop.xlane.xlu1 %3288  ;;  %v3957_v1 = vsub.f32 %v16849_v46, %v12875_v12  ;;  %v3832_v48 = vmul.f32 %v12924_v28, %v12924_v28  ;;  %v16855_v46 = vld [vmem:[#allocation196_spill] sm:$0xff] }
 0x608   : > { %7401 = vmatprep.mubr.bf16.mxu0 %v4394_v9  ;;  %v4213_v15 = vmul.f32 %v12893_v4, %v4145_v10  ;;  %v4280_v21 = vadd.f32 %v12903_v45, %v4212_v43  ;;  %v3833_v43 = vmul.f32 %v12929_v58, %v12929_v58 }
 0x609   : > { %7761 = vrsqrt.f32 %v4020_v40  ;;  %v4021_v29 = vadd.f32 1e-05, %v3893_v5  ;;  %v3479_v11 = vpop.xlane.xlu0 %3478 }
 0x60a   : > { %v3702_v27 = vsel %vm258_vm2, %v3287_v13, %v3479_v11  ;;  %v4281_v47 = vadd.f32 %v12903_v45, %v4213_v15  ;;  %v4344_v8 = vmax.f32 %v4280_v21, 0.0 }
 0x60b   : > { %v7758_v31 = vpop.eup %7757  ;;  %7763 = vrsqrt.f32 %v4021_v29  ;;  %v3766_v18 = vmul.f32 0.015625, %v3702_v27  ;;  %v3481_v60 = vpop.xlane.xlu1 %3480  ;;  %v16850_v29 = vld [vmem:[#allocation198_spill] sm:$0xff] }
 0x60c   : > { %v3703_v14 = vsel %vm258_vm2, %v3289_v23, %v3481_v60  ;;  %v4345_v63 = vmax.f32 %v4281_v47, 0.0  ;;  %v4146_v39 = vmul.f32 %v7758_v31, %v3954_v38  ;;  %v12946_v11 = vmul.f32 0.015625, %v16850_v29  ;;  %v16852_v60 = vld [vmem:[#allocation96_spill] sm:$0xff] }
 0x60d   : > { %v7760_v49 = vpop.eup %7759  ;;  %v3894_v36 = vsub.f32 %v3766_v18, %v3830_v0  ;;  %v3767_v32 = vmul.f32 0.015625, %v3703_v14  ;;  %v3291_v20 = vpop.xlane.xlu0 %3290  ;;  %v3958_v14 = vsub.f32 %v16852_v60, %v12897_v42 }
 0x60e   : > { %v4395_v55 = vpack.c.bf16 %v4345_v63, %v4344_v8  ;;  %v4147_v44 = vmul.f32 %v7760_v49, %v3955_v35  ;;  %v4214_v19 = vmul.f32 %v12893_v4, %v4146_v39  ;;  %v12951_v35 = vmul.f32 0.015625, %v16851_v22  ;;  %v16853_v49 = vld [vmem:[#allocation160_spill] sm:$0xff] }
 0x60f   : > { %v4022_v61 = vadd.f32 1e-05, %v3894_v36  ;;  %v3895_v16 = vsub.f32 %v3767_v32, %v3831_v54  ;;  %v3293_v3 = vpop.xlane.xlu1 %3292  ;;  %v3959_v54 = vsub.f32 %v16853_v49, %v12907_v17  ;;  %v3834_v36 = vmul.f32 %v12946_v11, %v12946_v11  ;;  %v16859_v49 = vld [vmem:[#allocation194_spill] sm:$0xff] }
 0x610   : > { %7402 = vmatmul.mubr.bf16.gmra.mrb[88].mxu0 %v4395_v55  ;;  %v4215_v7 = vmul.f32 %v12893_v4, %v4147_v44  ;;  %v4282_v26 = vadd.f32 %v12903_v45, %v4214_v19 }
 0x611   : > { %7765 = vrsqrt.f32 %v4022_v61  ;;  %v4023_v25 = vadd.f32 1e-05, %v3895_v16  ;;  %v3483_v57 = vpop.xlane.xlu0 %3482  ;;  %v3835_v61 = vmul.f32 %v12951_v35, %v12951_v35 }
 0x612   : > { %v3704_v52 = vsel %vm258_vm2, %v3291_v20, %v3483_v57  ;;  %v4283_v50 = vadd.f32 %v12903_v45, %v4215_v7  ;;  %v4346_v13 = vmax.f32 %v4282_v26, 0.0 }
 0x613   : > { %v7762_v56 = vpop.eup %7761  ;;  %7767 = vrsqrt.f32 %v4023_v25  ;;  %v3768_v6 = vmul.f32 0.015625, %v3704_v52  ;;  %v3485_v24 = vpop.xlane.xlu1 %3484  ;;  %v16854_v25 = vld [vmem:[#allocation106_spill] sm:$0xff] }
 0x614   : > { %v3705_v41 = vsel %vm258_vm2, %v3293_v3, %v3485_v24  ;;  %v4347_v34 = vmax.f32 %v4283_v50, 0.0  ;;  %v4148_v9 = vmul.f32 %v7762_v56, %v3956_v2  ;;  %v12968_v57 = vmul.f32 0.015625, %v16854_v25  ;;  %v16856_v24 = vld [vmem:[#allocation21_spill] sm:$0xff] }
 0x615   : > { %v7764_v10 = vpop.eup %7763  ;;  %v3896_v40 = vsub.f32 %v3768_v6, %v3832_v48  ;;  %v3769_v5 = vmul.f32 0.015625, %v3705_v41  ;;  %v3295_v23 = vpop.xlane.xlu0 %3294  ;;  %v3960_v41 = vsub.f32 %v16856_v24, %v12924_v28 }
 0x616   : > { %v4396_v12 = vpack.c.bf16 %v4347_v34, %v4346_v13  ;;  %v4149_v15 = vmul.f32 %v7764_v10, %v3957_v1  ;;  %v4216_v21 = vmul.f32 %v12893_v4, %v4148_v9  ;;  %v12973_v1 = vmul.f32 0.015625, %v16855_v46  ;;  %v16857_v10 = vld [vmem:[#allocation20_spill] sm:$0xff] }
 0x617   : > { %v4024_v51 = vadd.f32 1e-05, %v3896_v40  ;;  %v3897_v38 = vsub.f32 %v3769_v5, %v3833_v43  ;;  %v3297_v27 = vpop.xlane.xlu1 %3296  ;;  %v3961_v43 = vsub.f32 %v16857_v10, %v12929_v58  ;;  %v3836_v40 = vmul.f32 %v12968_v57, %v12968_v57  ;;  %v16863_v10 = vld [vmem:[#allocation63_spill] sm:$0xff] }
 0x618   : > { %7405 = vmatprep.mubr.bf16.mxu0 %v4396_v12  ;;  %v4217_v47 = vmul.f32 %v12893_v4, %v4149_v15  ;;  %v4284_v31 = vadd.f32 %v12903_v45, %v4216_v21 }
 0x619   : > { %7769 = vrsqrt.f32 %v4024_v51  ;;  %v4025_v0 = vadd.f32 1e-05, %v3897_v38  ;;  %v3487_v18 = vpop.xlane.xlu0 %3486  ;;  %v3837_v51 = vmul.f32 %v12973_v1, %v12973_v1 }
 0x61a   : > { %v3706_v8 = vsel %vm258_vm2, %v3295_v23, %v3487_v18  ;;  %v4285_v63 = vadd.f32 %v12903_v45, %v4217_v47  ;;  %v4348_v44 = vmax.f32 %v4284_v31, 0.0 }
 0x61b   : > { %v7766_v39 = vpop.eup %7765  ;;  %7771 = vrsqrt.f32 %v4025_v0  ;;  %v3770_v32 = vmul.f32 0.015625, %v3706_v8  ;;  %v3489_v20 = vpop.xlane.xlu1 %3488  ;;  %v16858_v0 = vld [vmem:[#allocation105_spill] sm:$0xff] }
 0x61c   : > { %v3707_v55 = vsel %vm258_vm2, %v3297_v27, %v3489_v20  ;;  %v4349_v42 = vmax.f32 %v4285_v63, 0.0  ;;  %v4150_v19 = vmul.f32 %v7766_v39, %v3958_v14  ;;  %v12990_v18 = vmul.f32 0.015625, %v16858_v0  ;;  %v16860_v20 = vld [vmem:[#allocation112_spill] sm:$0xff] }
 0x61d   : > { %v7768_v33 = vpop.eup %7767  ;;  %v3898_v16 = vsub.f32 %v3770_v32, %v3834_v36  ;;  %v3771_v3 = vmul.f32 0.015625, %v3707_v55  ;;  %v3299_v7 = vpop.xlane.xlu0 %3298  ;;  %v3962_v55 = vsub.f32 %v16860_v20, %v12946_v11 }
 0x61e   : > { %v4397_v17 = vpack.c.bf16 %v4349_v42, %v4348_v44  ;;  %v4151_v26 = vmul.f32 %v7768_v33, %v3959_v54  ;;  %v4218_v30 = vmul.f32 %v12893_v4, %v4150_v19  ;;  %v12995_v54 = vmul.f32 0.015625, %v16859_v49  ;;  %v16861_v33 = vld [vmem:[#allocation164_spill] sm:$0xff] }
 0x61f   : > { %v4026_v62 = vadd.f32 1e-05, %v3898_v16  ;;  %v3899_v2 = vsub.f32 %v3771_v3, %v3835_v61  ;;  %v3301_v52 = vpop.xlane.xlu1 %3300  ;;  %v3963_v61 = vsub.f32 %v16861_v33, %v12951_v35  ;;  %v3838_v16 = vmul.f32 %v12990_v18, %v12990_v18  ;;  %v16867_v33 = vld [vmem:[#allocation204_spill] sm:$0xff] }
 0x620   : > { %7406 = vmatmul.mubr.bf16.gmra.mrb[92].mxu0 %v4397_v17  ;;  %v4219_v50 = vmul.f32 %v12893_v4, %v4151_v26  ;;  %v4286_v56 = vadd.f32 %v12903_v45, %v4218_v30 }
 0x621   : > { %7773 = vrsqrt.f32 %v4026_v62  ;;  %v4027_v48 = vadd.f32 1e-05, %v3899_v2  ;;  %v3491_v6 = vpop.xlane.xlu0 %3490  ;;  %v3839_v62 = vmul.f32 %v12995_v54, %v12995_v54 }
 0x622   : > { %v3708_v13 = vsel %vm258_vm2, %v3299_v7, %v3491_v6  ;;  %v4287_v34 = vadd.f32 %v12903_v45, %v4219_v50  ;;  %v4350_v15 = vmax.f32 %v4286_v56, 0.0 }
 0x623   : > { %v7770_v9 = vpop.eup %7769  ;;  %7775 = vrsqrt.f32 %v4027_v48  ;;  %v3772_v5 = vmul.f32 0.015625, %v3708_v13  ;;  %v3493_v23 = vpop.xlane.xlu1 %3492  ;;  %v16862_v48 = vld [vmem:[#allocation199_spill] sm:$0xff] }
 0x624   : > { %v3709_v12 = vsel %vm258_vm2, %v3301_v52, %v3493_v23  ;;  %v4351_v28 = vmax.f32 %v4287_v34, 0.0  ;;  %v4152_v21 = vmul.f32 %v7770_v9, %v3960_v41  ;;  %v13012_v6 = vmul.f32 0.015625, %v16862_v48  ;;  %v16864_v23 = vld [vmem:[#allocation27_spill] sm:$0xff] }
 0x625   : > { %v7772_v29 = vpop.eup %7771  ;;  %v3900_v38 = vsub.f32 %v3772_v5, %v3836_v40  ;;  %v3773_v27 = vmul.f32 0.015625, %v3709_v12  ;;  %v3303_v47 = vpop.xlane.xlu0 %3302  ;;  %v3964_v12 = vsub.f32 %v16864_v23, %v12968_v57 }
 0x626   : > { %v4398_v58 = vpack.c.bf16 %v4351_v28, %v4350_v15  ;;  %v4153_v31 = vmul.f32 %v7772_v29, %v3961_v43  ;;  %v4220_v22 = vmul.f32 %v12893_v4, %v4152_v21  ;;  %v13017_v43 = vmul.f32 0.015625, %v16863_v10  ;;  %v16865_v29 = vld [vmem:[#allocation26_spill] sm:$0xff] }
 0x627   : > { %v4028_v60 = vadd.f32 1e-05, %v3900_v38  ;;  %v3901_v14 = vsub.f32 %v3773_v27, %v3837_v51  ;;  %v3305_v8 = vpop.xlane.xlu1 %3304  ;;  %v3965_v51 = vsub.f32 %v16865_v29, %v12973_v1  ;;  %v3840_v38 = vmul.f32 %v13012_v6, %v13012_v6  ;;  %v16871_v29 = vld [vmem:[#allocation104_spill] sm:$0xff] }
 0x628   : > { %7409 = vmatprep.mubr.bf16.mxu0 %v4398_v58  ;;  %v4221_v63 = vmul.f32 %v12893_v4, %v4153_v31  ;;  %v4288_v39 = vadd.f32 %v12903_v45, %v4220_v22 }
 0x629   : > { %7777 = vrsqrt.f32 %v4028_v60  ;;  %v4029_v36 = vadd.f32 1e-05, %v3901_v14  ;;  %v3495_v32 = vpop.xlane.xlu0 %3494  ;;  %v3841_v60 = vmul.f32 %v13017_v43, %v13017_v43 }
 0x62a   : > { %v3710_v44 = vsel %vm258_vm2, %v3303_v47, %v3495_v32  ;;  %v4289_v42 = vadd.f32 %v12903_v45, %v4221_v63  ;;  %v4352_v26 = vmax.f32 %v4288_v39, 0.0 }
 0x62b   : > { %v7774_v19 = vpop.eup %7773  ;;  %7779 = vrsqrt.f32 %v4029_v36  ;;  %v3774_v3 = vmul.f32 0.015625, %v3710_v44  ;;  %v3497_v7 = vpop.xlane.xlu1 %3496  ;;  %v16866_v36 = vld [vmem:[#allocation193_spill] sm:$0xff] }
 0x62c   : > { %v3711_v17 = vsel %vm258_vm2, %v3305_v8, %v3497_v7  ;;  %v4353_v11 = vmax.f32 %v4289_v42, 0.0  ;;  %v4154_v30 = vmul.f32 %v7774_v19, %v3962_v55  ;;  %v13034_v32 = vmul.f32 0.015625, %v16866_v36  ;;  %v16868_v7 = vld [vmem:[#allocation124_spill] sm:$0xff] }
 0x62d   : > { %v7776_v25 = vpop.eup %7775  ;;  %v3902_v2 = vsub.f32 %v3774_v3, %v3838_v16  ;;  %v3775_v52 = vmul.f32 0.015625, %v3711_v17  ;;  %v3307_v50 = vpop.xlane.xlu0 %3306  ;;  %v3966_v17 = vsub.f32 %v16868_v7, %v12990_v18 }
 0x62e   : > { %v4399_v35 = vpack.c.bf16 %v4353_v11, %v4352_v26  ;;  %v4155_v56 = vmul.f32 %v7776_v25, %v3963_v61  ;;  %v4222_v46 = vmul.f32 %v12893_v4, %v4154_v30  ;;  %v13039_v61 = vmul.f32 0.015625, %v16867_v33  ;;  %v16869_v25 = vld [vmem:[#allocation168_spill] sm:$0xff] }
 0x62f   : > { %v4030_v24 = vadd.f32 1e-05, %v3902_v2  ;;  %v3903_v41 = vsub.f32 %v3775_v52, %v3839_v62  ;;  %v3309_v13 = vpop.xlane.xlu1 %3308  ;;  %v3967_v62 = vsub.f32 %v16869_v25, %v12995_v54  ;;  %v3842_v2 = vmul.f32 %v13034_v32, %v13034_v32  ;;  %v16875_v25 = vld [vmem:[#allocation203_spill] sm:$0xff] }
 0x630   : > { %7410 = vmatmul.mubr.bf16.gmra.mrb[96].mxu0 %v4399_v35  ;;  %v4223_v34 = vmul.f32 %v12893_v4, %v4155_v56  ;;  %v4290_v9 = vadd.f32 %v12903_v45, %v4222_v46 }
 0x631   : > { %7781 = vrsqrt.f32 %v4030_v24  ;;  %v4031_v40 = vadd.f32 1e-05, %v3903_v41  ;;  %v3499_v5 = vpop.xlane.xlu0 %3498  ;;  %v3843_v24 = vmul.f32 %v13039_v61, %v13039_v61 }
 0x632   : > { %v3712_v15 = vsel %vm258_vm2, %v3307_v50, %v3499_v5  ;;  %v4291_v28 = vadd.f32 %v12903_v45, %v4223_v34  ;;  %v4354_v31 = vmax.f32 %v4290_v9, 0.0 }
 0x633   : > { %v7778_v21 = vpop.eup %7777  ;;  %7783 = vrsqrt.f32 %v4031_v40  ;;  %v3776_v27 = vmul.f32 0.015625, %v3712_v15  ;;  %v3501_v47 = vpop.xlane.xlu1 %3500  ;;  %v16870_v40 = vld [vmem:[#allocation89_spill] sm:$0xff] }
 0x634   : > { %v3713_v58 = vsel %vm258_vm2, %v3309_v13, %v3501_v47  ;;  %v4355_v57 = vmax.f32 %v4291_v28, 0.0  ;;  %v4156_v22 = vmul.f32 %v7778_v21, %v3964_v12  ;;  %v13056_v5 = vmul.f32 0.015625, %v16870_v40  ;;  %v16872_v47 = vld [vmem:[#allocation35_spill] sm:$0xff] }
 0x635   : > { %v7780_v0 = vpop.eup %7779  ;;  %v3904_v14 = vsub.f32 %v3776_v27, %v3840_v38  ;;  %v3777_v8 = vmul.f32 0.015625, %v3713_v58  ;;  %v3311_v63 = vpop.xlane.xlu0 %3310  ;;  %v3968_v58 = vsub.f32 %v16872_v47, %v13012_v6 }
 0x636   : > { %v4400_v1 = vpack.c.bf16 %v4355_v57, %v4354_v31  ;;  %v4157_v39 = vmul.f32 %v7780_v0, %v3965_v51  ;;  %v4224_v49 = vmul.f32 %v12893_v4, %v4156_v22  ;;  %v13061_v51 = vmul.f32 0.015625, %v16871_v29  ;;  %v16873_v0 = vld [vmem:[#allocation34_spill] sm:$0xff] }
 0x637   : > { %v4032_v20 = vadd.f32 1e-05, %v3904_v14  ;;  %v3905_v55 = vsub.f32 %v3777_v8, %v3841_v60  ;;  %v3313_v44 = vpop.xlane.xlu1 %3312  ;;  %v3969_v60 = vsub.f32 %v16873_v0, %v13017_v43  ;;  %v3844_v14 = vmul.f32 %v13056_v5, %v13056_v5  ;;  %v16879_v0 = vld [vmem:[#allocation148_spill] sm:$0xff] }
 0x638   : > { %7413 = vmatprep.mubr.bf16.mxu0 %v4400_v1  ;;  %v4225_v42 = vmul.f32 %v12893_v4, %v4157_v39  ;;  %v4292_v19 = vadd.f32 %v12903_v45, %v4224_v49 }
 0x639   : > { %7785 = vrsqrt.f32 %v4032_v20  ;;  %v4033_v16 = vadd.f32 1e-05, %v3905_v55  ;;  %v3503_v3 = vpop.xlane.xlu0 %3502  ;;  %v3845_v20 = vmul.f32 %v13061_v51, %v13061_v51 }
 0x63a   : > { %v3714_v26 = vsel %vm258_vm2, %v3311_v63, %v3503_v3  ;;  %v4293_v11 = vadd.f32 %v12903_v45, %v4225_v42  ;;  %v4356_v56 = vmax.f32 %v4292_v19, 0.0 }
 0x63b   : > { %v7782_v30 = vpop.eup %7781  ;;  %7787 = vrsqrt.f32 %v4033_v16  ;;  %v3778_v52 = vmul.f32 0.015625, %v3714_v26  ;;  %v3505_v50 = vpop.xlane.xlu1 %3504  ;;  %v16874_v16 = vld [vmem:[#allocation119_spill] sm:$0xff] }
 0x63c   : > { %v3715_v35 = vsel %vm258_vm2, %v3313_v44, %v3505_v50  ;;  %v4357_v18 = vmax.f32 %v4293_v11, 0.0  ;;  %v4158_v46 = vmul.f32 %v7782_v30, %v3966_v17  ;;  %v13078_v3 = vmul.f32 0.015625, %v16874_v16  ;;  %v16876_v50 = vld [vmem:[#allocation30_spill] sm:$0xff] }
 0x63d   : > { %v7784_v48 = vpop.eup %7783  ;;  %v3906_v41 = vsub.f32 %v3778_v52, %v3842_v2  ;;  %v3779_v13 = vmul.f32 0.015625, %v3715_v35  ;;  %v3315_v34 = vpop.xlane.xlu0 %3314  ;;  %v3970_v35 = vsub.f32 %v16876_v50, %v13034_v32 }
 0x63e   : > { %v4401_v54 = vpack.c.bf16 %v4357_v18, %v4356_v56  ;;  %v4159_v9 = vmul.f32 %v7784_v48, %v3967_v62  ;;  %v4226_v10 = vmul.f32 %v12893_v4, %v4158_v46  ;;  %v13083_v62 = vmul.f32 0.015625, %v16875_v25  ;;  %v16877_v48 = vld [vmem:[#allocation136_spill] sm:$0xff] }
 0x63f   : > { %v4034_v23 = vadd.f32 1e-05, %v3906_v41  ;;  %v3907_v12 = vsub.f32 %v3779_v13, %v3843_v24  ;;  %v3317_v15 = vpop.xlane.xlu1 %3316  ;;  %v3971_v24 = vsub.f32 %v16877_v48, %v13039_v61  ;;  %v3846_v41 = vmul.f32 %v13078_v3, %v13078_v3  ;;  %v16883_v48 = vld [vmem:[#allocation202_spill] sm:$0xff] }
 0x640   : > { %7414 = vmatmul.mubr.bf16.gmra.mrb[100].mxu0 %v4401_v54  ;;  %v4227_v28 = vmul.f32 %v12893_v4, %v4159_v9  ;;  %v4294_v21 = vadd.f32 %v12903_v45, %v4226_v10 }
 0x641   : > { %7789 = vrsqrt.f32 %v4034_v23  ;;  %v4035_v38 = vadd.f32 1e-05, %v3907_v12  ;;  %v3507_v27 = vpop.xlane.xlu0 %3506  ;;  %v3847_v23 = vmul.f32 %v13083_v62, %v13083_v62 }
 0x642   : > { %v3716_v31 = vsel %vm258_vm2, %v3315_v34, %v3507_v27  ;;  %v4295_v57 = vadd.f32 %v12903_v45, %v4227_v28  ;;  %v4358_v39 = vmax.f32 %v4294_v21, 0.0 }
 0x643   : > { %v7786_v22 = vpop.eup %7785  ;;  %7791 = vrsqrt.f32 %v4035_v38  ;;  %v3780_v8 = vmul.f32 0.015625, %v3716_v31  ;;  %v3509_v63 = vpop.xlane.xlu1 %3508  ;;  %v16878_v38 = vld [vmem:[#allocation207_spill] sm:$0xff] }
 0x644   : > { %v3717_v1 = vsel %vm258_vm2, %v3317_v15, %v3509_v63  ;;  %v4359_v6 = vmax.f32 %v4295_v57, 0.0  ;;  %v4160_v49 = vmul.f32 %v7786_v22, %v3968_v58  ;;  %v13100_v27 = vmul.f32 0.015625, %v16878_v38  ;;  %v16880_v63 = vld [vmem:[#allocation50_spill] sm:$0xff] }
 0x645   : > { %v7788_v36 = vpop.eup %7787  ;;  %v3908_v55 = vsub.f32 %v3780_v8, %v3844_v14  ;;  %v3781_v44 = vmul.f32 0.015625, %v3717_v1  ;;  %v3319_v42 = vpop.xlane.xlu0 %3318  ;;  %v3972_v1 = vsub.f32 %v16880_v63, %v13056_v5 }
 0x646   : > { %v4402_v43 = vpack.c.bf16 %v4359_v6, %v4358_v39  ;;  %v4161_v19 = vmul.f32 %v7788_v36, %v3969_v60  ;;  %v4228_v33 = vmul.f32 %v12893_v4, %v4160_v49  ;;  %v13105_v60 = vmul.f32 0.015625, %v16879_v0  ;;  %v16881_v36 = vld [vmem:[#allocation23_spill] sm:$0xff] }
 0x647   : > { %v4036_v7 = vadd.f32 1e-05, %v3908_v55  ;;  %v3909_v17 = vsub.f32 %v3781_v44, %v3845_v20  ;;  %v3321_v26 = vpop.xlane.xlu1 %3320  ;;  %v3973_v20 = vsub.f32 %v16881_v36, %v13061_v51  ;;  %v3848_v55 = vmul.f32 %v13100_v27, %v13100_v27  ;;  %v16887_v36 = vld [vmem:[#allocation116_spill] sm:$0xff] }
 0x648   : > { %7417 = vmatprep.mubr.bf16.mxu0 %v4402_v43  ;;  %v4229_v11 = vmul.f32 %v12893_v4, %v4161_v19  ;;  %v4296_v30 = vadd.f32 %v12903_v45, %v4228_v33 }
 0x649   : > { %7793 = vrsqrt.f32 %v4036_v7  ;;  %v4037_v2 = vadd.f32 1e-05, %v3909_v17  ;;  %v3511_v52 = vpop.xlane.xlu0 %3510  ;;  %v3849_v7 = vmul.f32 %v13105_v60, %v13105_v60 }
 0x64a   : > { %v3718_v56 = vsel %vm258_vm2, %v3319_v42, %v3511_v52  ;;  %v4297_v18 = vadd.f32 %v12903_v45, %v4229_v11  ;;  %v4360_v9 = vmax.f32 %v4296_v30, 0.0 }
 0x64b   : > { %v7790_v46 = vpop.eup %7789  ;;  %7795 = vrsqrt.f32 %v4037_v2  ;;  %v3782_v13 = vmul.f32 0.015625, %v3718_v56  ;;  %v3513_v34 = vpop.xlane.xlu1 %3512  ;;  %v16882_v2 = vld [vmem:[#allocation118_spill] sm:$0xff] }
 0x64c   : > { %v3719_v54 = vsel %vm258_vm2, %v3321_v26, %v3513_v34  ;;  %v4361_v32 = vmax.f32 %v4297_v18, 0.0  ;;  %v4162_v10 = vmul.f32 %v7790_v46, %v3970_v35  ;;  %v13122_v52 = vmul.f32 0.015625, %v16882_v2  ;;  %v16884_v34 = vld [vmem:[#allocation28_spill] sm:$0xff] }
 0x64d   : > { %v7792_v40 = vpop.eup %7791  ;;  %v3910_v12 = vsub.f32 %v3782_v13, %v3846_v41  ;;  %v3783_v15 = vmul.f32 0.015625, %v3719_v54  ;;  %v3323_v28 = vpop.xlane.xlu0 %3322  ;;  %v3974_v54 = vsub.f32 %v16884_v34, %v13078_v3 }
 0x64e   : > { %v4403_v61 = vpack.c.bf16 %v4361_v32, %v4360_v9  ;;  %v4163_v21 = vmul.f32 %v7792_v40, %v3971_v24  ;;  %v4230_v29 = vmul.f32 %v12893_v4, %v4162_v10  ;;  %v13127_v24 = vmul.f32 0.015625, %v16883_v48  ;;  %v16885_v40 = vld [vmem:[#allocation156_spill] sm:$0xff] }
 0x64f   : > { %v4038_v47 = vadd.f32 1e-05, %v3910_v12  ;;  %v3911_v58 = vsub.f32 %v3783_v15, %v3847_v23  ;;  %v3325_v31 = vpop.xlane.xlu1 %3324  ;;  %v3975_v23 = vsub.f32 %v16885_v40, %v13083_v62  ;;  %v3850_v12 = vmul.f32 %v13122_v52, %v13122_v52  ;;  %v16891_v40 = vld [vmem:[#allocation131_spill] sm:$0xff] }
 0x650   : > { %7418 = vmatmul.mubr.bf16.gmra.mrb[104].mxu0 %v4403_v61  ;;  %v4231_v57 = vmul.f32 %v12893_v4, %v4163_v21  ;;  %v4298_v22 = vadd.f32 %v12903_v45, %v4230_v29 }
 0x651   : > { %7797 = vrsqrt.f32 %v4038_v47  ;;  %v4039_v14 = vadd.f32 1e-05, %v3911_v58  ;;  %v3515_v8 = vpop.xlane.xlu0 %3514  ;;  %v3851_v47 = vmul.f32 %v13127_v24, %v13127_v24 }
 0x652   : > { %v3720_v39 = vsel %vm258_vm2, %v3323_v28, %v3515_v8  ;;  %v4299_v6 = vadd.f32 %v12903_v45, %v4231_v57  ;;  %v4362_v19 = vmax.f32 %v4298_v22, 0.0 }
 0x653   : > { %v7794_v49 = vpop.eup %7793  ;;  %7799 = vrsqrt.f32 %v4039_v14  ;;  %v3784_v44 = vmul.f32 0.015625, %v3720_v39  ;;  %v3517_v42 = vpop.xlane.xlu1 %3516  ;;  %v16886_v14 = vld [vmem:[#allocation201_spill] sm:$0xff] }
 0x654   : > { %v3721_v43 = vsel %vm258_vm2, %v3325_v31, %v3517_v42  ;;  %v4363_v5 = vmax.f32 %v4299_v6, 0.0  ;;  %v4164_v33 = vmul.f32 %v7794_v49, %v3972_v1  ;;  %v13144_v8 = vmul.f32 0.015625, %v16886_v14  ;;  %v16888_v42 = vld [vmem:[#allocation66_spill] sm:$0xff] }
 0x655   : > { %v7796_v16 = vpop.eup %7795  ;;  %v3912_v17 = vsub.f32 %v3784_v44, %v3848_v55  ;;  %v3785_v26 = vmul.f32 0.015625, %v3721_v43  ;;  %v3327_v11 = vpop.xlane.xlu0 %3326  ;;  %v3976_v43 = vsub.f32 %v16888_v42, %v13100_v27 }
 0x656   : > { %v4404_v51 = vpack.c.bf16 %v4363_v5, %v4362_v19  ;;  %v4165_v30 = vmul.f32 %v7796_v16, %v3973_v20  ;;  %v4232_v25 = vmul.f32 %v12893_v4, %v4164_v33  ;;  %v13149_v20 = vmul.f32 0.015625, %v16887_v36  ;;  %v16889_v16 = vld [vmem:[#allocation31_spill] sm:$0xff] }
 0x657   : > { %v4040_v50 = vadd.f32 1e-05, %v3912_v17  ;;  %v3913_v35 = vsub.f32 %v3785_v26, %v3849_v7  ;;  %v3329_v56 = vpop.xlane.xlu1 %3328  ;;  %v3977_v7 = vsub.f32 %v16889_v16, %v13105_v60  ;;  %v3852_v17 = vmul.f32 %v13144_v8, %v13144_v8  ;;  %v16895_v16 = vld [vmem:[#allocation130_spill] sm:$0xff] }
 0x658   : > { %7421 = vmatprep.mubr.bf16.mxu0 %v4404_v51  ;;  %v4233_v18 = vmul.f32 %v12893_v4, %v4165_v30  ;;  %v4300_v46 = vadd.f32 %v12903_v45, %v4232_v25 }
 0x659   : > { %7801 = vrsqrt.f32 %v4040_v50  ;;  %v4041_v41 = vadd.f32 1e-05, %v3913_v35  ;;  %v3519_v13 = vpop.xlane.xlu0 %3518  ;;  %v3853_v50 = vmul.f32 %v13149_v20, %v13149_v20 }
 0x65a   : > { %v3722_v9 = vsel %vm258_vm2, %v3327_v11, %v3519_v13  ;;  %v4301_v32 = vadd.f32 %v12903_v45, %v4233_v18  ;;  %v4364_v21 = vmax.f32 %v4300_v46, 0.0 }
 0x65b   : > { %v7798_v10 = vpop.eup %7797  ;;  %7803 = vrsqrt.f32 %v4041_v41  ;;  %v3786_v15 = vmul.f32 0.015625, %v3722_v9  ;;  %v3521_v28 = vpop.xlane.xlu1 %3520  ;;  %v16890_v41 = vld [vmem:[#allocation200_spill] sm:$0xff] }
 0x65c   : > { %v3723_v61 = vsel %vm258_vm2, %v3329_v56, %v3521_v28  ;;  %v4365_v3 = vmax.f32 %v4301_v32, 0.0  ;;  %v4166_v29 = vmul.f32 %v7798_v10, %v3974_v54  ;;  %v13166_v13 = vmul.f32 0.015625, %v16890_v41  ;;  %v16892_v28 = vld [vmem:[#allocation176_spill] sm:$0xff] }
 0x65d   : > { %v7800_v38 = vpop.eup %7799  ;;  %v3914_v58 = vsub.f32 %v3786_v15, %v3850_v12  ;;  %v3787_v31 = vmul.f32 0.015625, %v3723_v61  ;;  %v3331_v57 = vpop.xlane.xlu0 %3330  ;;  %v3978_v61 = vsub.f32 %v16892_v28, %v13122_v52 }
 0x65e   : > { %v4405_v62 = vpack.c.bf16 %v4365_v3, %v4364_v21  ;;  %v4167_v22 = vmul.f32 %v7800_v38, %v3975_v23  ;;  %v4234_v0 = vmul.f32 %v12893_v4, %v4166_v29  ;;  %v13171_v23 = vmul.f32 0.015625, %v16891_v40  ;;  %v16893_v38 = vld [vmem:[#allocation177_spill] sm:$0xff] }
 0x65f   : > { %v4042_v63 = vadd.f32 1e-05, %v3914_v58  ;;  %v3915_v1 = vsub.f32 %v3787_v31, %v3851_v47  ;;  %v3333_v39 = vpop.xlane.xlu1 %3332  ;;  %v3979_v47 = vsub.f32 %v16893_v38, %v13127_v24  ;;  %v3854_v58 = vmul.f32 %v13166_v13, %v13166_v13  ;;  %v16898_v38 = vld [vmem:[#allocation191_spill] sm:$0xff] }
 0x660   : > { %7422 = vmatmul.mubr.bf16.gmra.mrb[108].mxu0 %v4405_v62  ;;  %v4235_v6 = vmul.f32 %v12893_v4, %v4167_v22  ;;  %v4302_v49 = vadd.f32 %v12903_v45, %v4234_v0 }
 0x661   : > { %7805 = vrsqrt.f32 %v4042_v63  ;;  %v4043_v55 = vadd.f32 1e-05, %v3915_v1  ;;  %v3523_v44 = vpop.xlane.xlu0 %3522  ;;  %v3855_v63 = vmul.f32 %v13171_v23, %v13171_v23 }
 0x662   : > { %v3724_v19 = vsel %vm258_vm2, %v3331_v57, %v3523_v44  ;;  %v4303_v5 = vadd.f32 %v12903_v45, %v4235_v6  ;;  %v4366_v30 = vmax.f32 %v4302_v49, 0.0 }
 0x663   : > { %v7802_v33 = vpop.eup %7801  ;;  %7807 = vrsqrt.f32 %v4043_v55  ;;  %v3788_v26 = vmul.f32 0.015625, %v3724_v19  ;;  %v3525_v11 = vpop.xlane.xlu1 %3524  ;;  %v16894_v55 = vld [vmem:[#allocation209_spill] sm:$0xff] }
 0x664   : > { %v3725_v51 = vsel %vm258_vm2, %v3333_v39, %v3525_v11  ;;  %v4367_v27 = vmax.f32 %v4303_v5, 0.0  ;;  %v4168_v25 = vmul.f32 %v7802_v33, %v3976_v43  ;;  %v13188_v44 = vmul.f32 0.015625, %v16894_v55  ;;  %v16896_v11 = vld [vmem:[#allocation187_spill] sm:$0xff] }
 0x665   : > { %v7804_v2 = vpop.eup %7803  ;;  %v3916_v35 = vsub.f32 %v3788_v26, %v3852_v17  ;;  %v3789_v56 = vmul.f32 0.015625, %v3725_v51  ;;  %v3335_v18 = vpop.xlane.xlu0 %3334  ;;  %v3980_v51 = vsub.f32 %v16896_v11, %v13144_v8 }
 0x666   : > { %v4406_v60 = vpack.c.bf16 %v4367_v27, %v4366_v30  ;;  %v4169_v46 = vmul.f32 %v7804_v2, %v3977_v7  ;;  %v4236_v48 = vmul.f32 %v12893_v4, %v4168_v25  ;;  %v13193_v7 = vmul.f32 0.015625, %v16895_v16  ;;  %v16897_v2 = vld [vmem:[#allocation185_spill] sm:$0xff] }
 0x667   : > { %v4044_v34 = vadd.f32 1e-05, %v3916_v35  ;;  %v3917_v54 = vsub.f32 %v3789_v56, %v3853_v50  ;;  %v3337_v9 = vpop.xlane.xlu1 %3336  ;;  %v3981_v50 = vsub.f32 %v16897_v2, %v13149_v20  ;;  %v3856_v35 = vmul.f32 %v13188_v44, %v13188_v44 }
 0x668   : > { %7425 = vmatprep.mubr.bf16.mxu0 %v4406_v60  ;;  %v4237_v32 = vmul.f32 %v12893_v4, %v4169_v46  ;;  %v4304_v10 = vadd.f32 %v12903_v45, %v4236_v48 }
 0x669   : > { %7809 = vrsqrt.f32 %v4044_v34  ;;  %v4045_v12 = vadd.f32 1e-05, %v3917_v54  ;;  %v3527_v15 = vpop.xlane.xlu0 %3526  ;;  %v3857_v34 = vmul.f32 %v13193_v7, %v13193_v7 }
 0x66a   : > { %v3726_v21 = vsel %vm258_vm2, %v3335_v18, %v3527_v15  ;;  %v4305_v3 = vadd.f32 %v12903_v45, %v4237_v32  ;;  %v4368_v22 = vmax.f32 %v4304_v10, 0.0 }
 0x66b   : > { %v7806_v29 = vpop.eup %7805  ;;  %7811 = vrsqrt.f32 %v4045_v12  ;;  %v3790_v31 = vmul.f32 0.015625, %v3726_v21  ;;  %v3529_v57 = vpop.xlane.xlu1 %3528 }
 0x66c   : > { %v3727_v62 = vsel %vm258_vm2, %v3337_v9, %v3529_v57  ;;  %v4369_v52 = vmax.f32 %v4305_v3, 0.0  ;;  %v4170_v0 = vmul.f32 %v7806_v29, %v3978_v61  ;;  %v16899_v57 = vld [vmem:[#allocation208_spill] sm:$0xff] }
 0x66d   : > { %v7808_v14 = vpop.eup %7807  ;;  %v3918_v1 = vsub.f32 %v3790_v31, %v3854_v58  ;;  %v3791_v39 = vmul.f32 0.015625, %v3727_v62  ;;  %v3339_v6 = vpop.xlane.xlu0 %3338  ;;  %v13215_v62 = vmul.f32 0.015625, %v16899_v57 }
 0x66e   : > { %v4407_v24 = vpack.c.bf16 %v4369_v52, %v4368_v22  ;;  %v4171_v49 = vmul.f32 %v7808_v14, %v3979_v47  ;;  %v4238_v36 = vmul.f32 %v12893_v4, %v4170_v0  ;;  %v3982_v47 = vsub.f32 %v16898_v38, %v13166_v13  ;;  %v16900_v52 = vld [vmem:[#allocation212_spill] sm:$0xff] }
 0x66f   : > { %v4046_v42 = vadd.f32 1e-05, %v3918_v1  ;;  %v3919_v43 = vsub.f32 %v3791_v39, %v3855_v63  ;;  %v3341_v19 = vpop.xlane.xlu1 %3340  ;;  %v3983_v0 = vsub.f32 %v16900_v52, %v13171_v23  ;;  %v3858_v23 = vmul.f32 %v13215_v62, %v13215_v62 }
 0x670   : > { %7426 = vmatmul.mubr.bf16.gmra.mrb[112].mxu0 %v4407_v24  ;;  %v4239_v5 = vmul.f32 %v12893_v4, %v4171_v49  ;;  %v4306_v33 = vadd.f32 %v12903_v45, %v4238_v36  ;;  %v16902_v49 = vld [vmem:[#allocation37_spill] sm:$0xff] }
 0x671   : > { %7813 = vrsqrt.f32 %v4046_v42  ;;  %v4047_v17 = vadd.f32 1e-05, %v3919_v43  ;;  %v3531_v26 = vpop.xlane.xlu0 %3530 }
 0x672   : > { %v3728_v30 = vsel %vm258_vm2, %v3339_v6, %v3531_v26  ;;  %v4307_v27 = vadd.f32 %v12903_v45, %v4239_v5  ;;  %v4370_v46 = vmax.f32 %v4306_v33, 0.0  ;;  %v16901_v6 = vld [vmem:[#allocation127_spill] sm:$0xff]  ;;  %v16903_v5 = vld [vmem:[#allocation117_spill] sm:$0xff] }
 0x673   : > { %v7810_v25 = vpop.eup %7809  ;;  %7815 = vrsqrt.f32 %v4047_v17  ;;  %v3792_v56 = vmul.f32 0.015625, %v3728_v30  ;;  %v3533_v18 = vpop.xlane.xlu1 %3532  ;;  %v13220_v24 = vmul.f32 0.015625, %v16901_v6 }
 0x674   : > { %v3729_v60 = vsel %vm258_vm2, %v3341_v19, %v3533_v18  ;;  %v4371_v8 = vmax.f32 %v4307_v27, 0.0  ;;  %v4172_v48 = vmul.f32 %v7810_v25, %v3980_v51 }
 0x675   : > { %v7812_v41 = vpop.eup %7811  ;;  %v3920_v54 = vsub.f32 %v3792_v56, %v3856_v35  ;;  %v3793_v9 = vmul.f32 0.015625, %v3729_v60  ;;  %v3155_v32 = vpop.xlane.xlu0 %3154  ;;  %v3859_v30 = vmul.f32 %v13220_v24, %v13220_v24  ;;  %v16904_v35 = vld [vmem:[#allocation183_spill] sm:$0xff]  ;;  %v13248_v60 = vld [vmem:[%s15412_s4 + $0x6] ss:$0 sm:$0xff] }
 0x676   : > { %v4408_v20 = vpack.c.bf16 %v4371_v8, %v4370_v46  ;;  %v4173_v10 = vmul.f32 %v7812_v41, %v3981_v50  ;;  %v4240_v40 = vmul.f32 %v12893_v4, %v4172_v48  ;;  %v3604_v13 = vsel %vm258_vm2, %v16902_v49, %v3155_v32 }
 0x677   : > { %v4048_v12 = vadd.f32 1e-05, %v3920_v54  ;;  %v3921_v15 = vsub.f32 %v3793_v9, %v3857_v34  ;;  %v3157_v28 = vpop.xlane.xlu1 %3156  ;;  %v13239_v27 = vmul.f32 0.015625, %v3604_v13  ;;  %v3984_v56 = vsub.f32 %v16904_v35, %v13188_v44  ;;  %v16905_v54 = vld [vmem:[#allocation211_spill] sm:$0xff]  ;;  %v8091_v13 = vld [vmem:[%s15412_s4 + $0x5] ss:$0 sm:$0xff] }
 0x678   : > { %7429 = vmatprep.mubr.bf16.mxu0 %v4408_v20  ;;  %v4241_v61 = vmul.f32 %v12893_v4, %v4173_v10  ;;  %v4308_v21 = vadd.f32 %v12903_v45, %v4240_v40  ;;  %v3605_v33 = vsel %vm258_vm2, %v16903_v5, %v3157_v28  ;;  %v3985_v9 = vsub.f32 %v16905_v54, %v13193_v7 }
 0x679   : > { %7817 = vrsqrt.f32 %v4048_v12  ;;  %v4049_v3 = vadd.f32 1e-05, %v3921_v15  ;;  %v3343_v29 = vpop.xlane.xlu0 %3342  ;;  %v13243_v18 = vmul.f32 0.015625, %v3605_v33  ;;  %v3860_v12 = vmul.f32 %v13239_v27, %v13239_v27  ;;  %v16914_v33 = vld [vmem:[#allocation93_spill] sm:$0xff] }
 0x67a   : > { %v4309_v58 = vadd.f32 %v12903_v45, %v4241_v61  ;;  %v4372_v14 = vmax.f32 %v4308_v21, 0.0 }
 0x67b   : > { %v7814_v31 = vpop.eup %7813  ;;  %7819 = vrsqrt.f32 %v4049_v3  ;;  %v3345_v22 = vpop.xlane.xlu1 %3344  ;;  %v3861_v21 = vmul.f32 %v13243_v18, %v13243_v18 }
 0x67c   : > { %v4373_v63 = vmax.f32 %v4309_v58, 0.0  ;;  %v4174_v1 = vmul.f32 %v7814_v31, %v3982_v47 }
 0x67d   : > { %v7816_v39 = vpop.eup %7815  ;;  %v3535_v36 = vpop.xlane.xlu0 %3534 }
 0x67e   : > { %v3730_v55 = vsel %vm258_vm2, %v3343_v29, %v3535_v36  ;;  %v4409_v42 = vpack.c.bf16 %v4373_v63, %v4372_v14  ;;  %v4175_v43 = vmul.f32 %v7816_v39, %v3983_v0  ;;  %v4242_v19 = vmul.f32 %v12893_v4, %v4174_v1  ;;  %v8090_v0 = vld [vmem:[%s15412_s4 + $0x4] ss:$0 sm:$0xff] }
 0x67f   : > { %v3794_v16 = vmul.f32 0.015625, %v3730_v55  ;;  %v3537_v17 = vpop.xlane.xlu1 %3536 }
 0x680   : > { %v3731_v26 = vsel %vm258_vm2, %v3345_v22, %v3537_v17  ;;  %7430 = vmatmul.mubr.bf16.gmra.mrb[116].mxu0 %v4409_v42  ;;  %v4243_v11 = vmul.f32 %v12893_v4, %v4175_v43  ;;  %v4310_v51 = vadd.f32 %v12903_v45, %v4242_v19 }
 0x681   : > { %v3922_v25 = vsub.f32 %v3794_v16, %v3858_v23  ;;  %v3795_v2 = vmul.f32 0.015625, %v3731_v26  ;;  %v3347_v50 = vpop.xlane.xlu0 %3346  ;;  %v3986_v16 = vsub.f32 %v16914_v33, %v13215_v62 }
 0x682   : > { %v4311_v4 = vadd.f32 %v12903_v45, %v4243_v11  ;;  %v4374_v20 = vmax.f32 %v4310_v51, 0.0  ;;  %v16915_v51 = vld [vmem:[#allocation61_spill] sm:$0xff] }
 0x683   : > { %v7818_v46 = vpop.eup %7817  ;;  %v4050_v8 = vadd.f32 1e-05, %v3922_v25  ;;  %v3923_v48 = vsub.f32 %v3795_v2, %v3859_v30  ;;  %v3349_v41 = vpop.xlane.xlu1 %3348  ;;  %v3987_v30 = vsub.f32 %v16915_v51, %v13220_v24 }
 0x684   : > { %v7379_v34 = vpop.f32.mrb[64].mxu0  ;;  %v4375_v44 = vmax.f32 %v4311_v4, 0.0  ;;  %v4176_v10 = vmul.f32 %v7818_v46, %v3984_v56 }
 0x685   : > { %v4518_v32 = vpop.f32.mrb[65].mxu0  ;;  %v7820_v40 = vpop.eup %7819  ;;  %7821 = vrsqrt.f32 %v4050_v8  ;;  %v4051_v15 = vadd.f32 1e-05, %v3923_v48  ;;  %v13261_v7 = vadd.f32 %v7379_v34, %v13248_v60  ;;  %v3988_v34 = vsub.f32 %v16832_v59, %v13239_v27 }
 0x686   : > { %v13256_v45 = vadd.f32 %v13248_v60, %v4518_v32  ;;  %v7380_v28 = vpop.f32.mrb[66].mxu0  ;;  %v3539_v61 = vpop.xlane.xlu0 %3538  ;;  %v4410_v38 = vpack.c.bf16 %v4375_v44, %v4374_v20  ;;  %v4177_v52 = vmul.f32 %v7820_v40, %v3985_v9  ;;  %v4244_v14 = vmul.f32 %v8090_v0, %v4176_v10 }
 0x687   : > { %16907 = vst [vmem:[#allocation125_spill] sm:$0xff] %v13261_v7  ;;  %v3732_v3 = vsel %vm258_vm2, %v3347_v50, %v3539_v61  ;;  %v4521_v29 = vpop.f32.mrb[67].mxu0  ;;  %7823 = vrsqrt.f32 %v4051_v15  ;;  %v3541_v31 = vpop.xlane.xlu1 %3540  ;;  %v13280_v63 = vadd.f32 %v7380_v28, %v13248_v60  ;;  %v13294_v43 = vsel %vm258_vm2, %v13261_v7, 0.0 }
 0x688   : > { %16906 = vst [vmem:[#allocation206_spill] sm:$0xff] %v13256_v45  ;;  %v3796_v47 = vmul.f32 0.015625, %v3732_v3  ;;  %v13266_v58 = vadd.f32 %v13248_v60, %v4521_v29  ;;  %v13271_v57 = vsel %vm258_vm2, %v13256_v45, 0.0  ;;  %v3733_v22 = vsel %vm258_vm2, %v3349_v41, %v3541_v31  ;;  %7433 = vmatprep.mubr.bf16.mxu0 %v4410_v38  ;;  %16912 = vst [vmem:[#allocation38_spill] sm:$0xff] %v13294_v43 }
 0x689   : > { %16909 = vst [vmem:[#allocation142_spill] sm:$0xff] %v13271_v57  ;;  %4903 = vadd.xlane.f32.xlu0 %v13271_v57  ;;  %16910 = vst [vmem:[#allocation213_spill] sm:$0xff] %v13280_v63  ;;  %v3797_v39 = vmul.f32 0.015625, %v3733_v22  ;;  %v4245_v49 = vmul.f32 %v8090_v0, %v4177_v52  ;;  %v4312_v36 = vadd.f32 %v8091_v13, %v4244_v14  ;;  %v13300_v5 = vsel %vm258_vm2, %v13280_v63, 0.0 }
 0x68a   : > { %16908 = vst [vmem:[#allocation205_spill] sm:$0xff] %v13266_v58  ;;  %v3924_v1 = vsub.f32 %v3796_v47, %v3860_v12  ;;  %v13285_v6 = vsel %vm258_vm2, %v13266_v58, 0.0  ;;  %16913 = vst [vmem:[#allocation138_spill] sm:$0xff] %v13300_v5  ;;  %v3989_v10 = vsub.f32 %v16834_v53, %v13243_v18 }
 0x68b   : > { %16911 = vst [vmem:[#allocation141_spill] sm:$0xff] %v13285_v6  ;;  %4905 = vadd.xlane.f32.xlu1 %v13285_v6  ;;  %v3925_v42 = vsub.f32 %v3797_v39, %v3861_v21  ;;  %v4313_v19 = vadd.f32 %v8091_v13, %v4245_v49  ;;  %v4376_v17 = vmax.f32 %v4312_v36, 0.0 }
 0x68c   : > { %v4052_v55 = vadd.f32 1e-05, %v3924_v1 }
 0x68d   : > { %4907 = vadd.xlane.f32.xlu0 %v13294_v43  ;;  %v4053_v23 = vadd.f32 1e-05, %v3925_v42  ;;  %v4377_v26 = vmax.f32 %v4313_v19, 0.0 }
 0x68e   : > { %7825 = vrsqrt.f32 %v4052_v55 }
 0x68f   : > { %4909 = vadd.xlane.f32.xlu1 %v13300_v5  ;;  %v7822_v11 = vpop.eup %7821  ;;  %7827 = vrsqrt.f32 %v4053_v23  ;;  %v4411_v25 = vpack.c.bf16 %v4377_v26, %v4376_v17 }
 0x690   : > { %v4178_v2 = vmul.f32 %v7822_v11, %v3986_v16 }
 0x691   : > { %v7824_v50 = vpop.eup %7823  ;;  %7434 = vmatmul.mubr.bf16.gmra.mrb[120].mxu0 %v4411_v25 }
 0x692   : > { %v4179_v35 = vmul.f32 %v7824_v50, %v3987_v30  ;;  %v4246_v56 = vmul.f32 %v8090_v0, %v4178_v2 }
 0x693   : > { %v7383_v4 = vpop.f32.mrb[68].mxu0 }
 0x694   : > { %v4534_v46 = vpop.f32.mrb[69].mxu0  ;;  %v4247_v8 = vmul.f32 %v8090_v0, %v4179_v35  ;;  %v4314_v48 = vadd.f32 %v8091_v13, %v4246_v56  ;;  %v13313_v32 = vadd.f32 %v7383_v4, %v13248_v60 }
 0x695   : > { %v13308_v62 = vadd.f32 %v13248_v60, %v4534_v46  ;;  %v7384_v41 = vpop.f32.mrb[70].mxu0 }
 0x696   : > { %v4537_v54 = vpop.f32.mrb[71].mxu0  ;;  %v4315_v9 = vadd.f32 %v8091_v13, %v4247_v8  ;;  %16917 = vst [vmem:[#allocation135_spill] sm:$0xff] %v13313_v32  ;;  %v4378_v59 = vmax.f32 %v4314_v48, 0.0  ;;  %v13327_v15 = vadd.f32 %v7384_v41, %v13248_v60  ;;  %v13338_v53 = vsel %vm258_vm2, %v13313_v32, 0.0 }
 0x697   : > { %16916 = vst [vmem:[#allocation46_spill] sm:$0xff] %v13308_v62  ;;  %v13316_v20 = vadd.f32 %v13248_v60, %v4537_v54  ;;  %v13321_v44 = vsel %vm258_vm2, %v13308_v62, 0.0 }
 0x698   : > { %v7826_v24 = vpop.eup %7825  ;;  %4911 = vadd.xlane.f32.xlu0 %v13321_v44  ;;  %v4379_v27 = vmax.f32 %v4315_v9, 0.0  ;;  %16919 = vst [vmem:[#allocation55_spill] sm:$0xff] %v13327_v15  ;;  %v13344_v38 = vsel %vm258_vm2, %v13327_v15, 0.0 }
 0x699   : > { %16918 = vst [vmem:[#allocation210_spill] sm:$0xff] %v13316_v20  ;;  %v4180_v40 = vmul.f32 %v7826_v24, %v3988_v34  ;;  %v7828_v12 = vpop.eup %7827  ;;  %v13332_v28 = vsel %vm258_vm2, %v13316_v20, 0.0 }
 0x69a   : > { %4913 = vadd.xlane.f32.xlu1 %v13332_v28  ;;  %v4412_v61 = vpack.c.bf16 %v4379_v27, %v4378_v59  ;;  %v4181_v21 = vmul.f32 %v7828_v12, %v3989_v10 }
 0x69b   : > { %v4248_v3 = vmul.f32 %v8090_v0, %v4180_v40 }
 0x69c   : > { %4915 = vadd.xlane.f32.xlu0 %v13338_v53  ;;  %7437 = vmatprep.mubr.bf16.mxu0 %v4412_v61  ;;  %v4249_v18 = vmul.f32 %v8090_v0, %v4181_v21 }
 0x69d   : > { %v4316_v29 = vadd.f32 %v8091_v13, %v4248_v3 }
 0x69e   : > { %4917 = vadd.xlane.f32.xlu1 %v13344_v38  ;;  %v4317_v47 = vadd.f32 %v8091_v13, %v4249_v18 }
 0x69f   : > { %v4380_v31 = vmax.f32 %v4316_v29, 0.0 }
 0x6a0   : > { %v4381_v22 = vmax.f32 %v4317_v47, 0.0 }
 0x6a2   : > { %v4413_v52 = vpack.c.bf16 %v4381_v22, %v4380_v31 }
 0x6a3   : > { %v7387_v14 = vpop.f32.mrb[72].mxu0 }
 0x6a4   : > { %v4550_v1 = vpop.f32.mrb[73].mxu0  ;;  %7438 = vmatmul.mubr.bf16.gmra.mrb[124].mxu0 %v4413_v52  ;;  %v13351_v36 = vadd.f32 %v7387_v14, %v13248_v60 }
 0x6a5   : > { %v13348_v39 = vadd.f32 %v13248_v60, %v4550_v1  ;;  %v7388_v49 = vpop.f32.mrb[74].mxu0 }
 0x6a6   : > { %v4553_v0 = vpop.f32.mrb[75].mxu0  ;;  %v13363_v42 = vadd.f32 %v7388_v49, %v13248_v60  ;;  %v13374_v23 = vsel %vm258_vm2, %v13351_v36, 0.0 }
 0x6a7   : > { %v13354_v55 = vadd.f32 %v13248_v60, %v4553_v0  ;;  %v13359_v13 = vsel %vm258_vm2, %v13348_v39, 0.0 }
 0x6a8   : > { %4919 = vadd.xlane.f32.xlu0 %v13359_v13  ;;  %v13380_v33 = vsel %vm258_vm2, %v13363_v42, 0.0 }
 0x6a9   : > { %v13368_v19 = vsel %vm258_vm2, %v13354_v55, 0.0 }
 0x6aa   : > { %4921 = vadd.xlane.f32.xlu1 %v13368_v19 }
 0x6ac   : > { %4923 = vadd.xlane.f32.xlu0 %v13374_v23 }
 0x6ae   : > { %4925 = vadd.xlane.f32.xlu1 %v13380_v33 }
 0x6b3   : > { %v7391_v16 = vpop.f32.mrb[76].mxu0 }
 0x6b4   : > { %v4566_v17 = vpop.f32.mrb[77].mxu0  ;;  %v13387_v30 = vadd.f32 %v7391_v16, %v13248_v60 }
 0x6b5   : > { %v13384_v26 = vadd.f32 %v13248_v60, %v4566_v17  ;;  %v7392_v11 = vpop.f32.mrb[78].mxu0 }
 0x6b6   : > { %v4569_v51 = vpop.f32.mrb[79].mxu0  ;;  %v13399_v50 = vadd.f32 %v7392_v11, %v13248_v60  ;;  %v13410_v56 = vsel %vm258_vm2, %v13387_v30, 0.0 }
 0x6b7   : > { %v13390_v25 = vadd.f32 %v13248_v60, %v4569_v51  ;;  %v13395_v2 = vsel %vm258_vm2, %v13384_v26, 0.0 }
 0x6b8   : > { %4927 = vadd.xlane.f32.xlu0 %v13395_v2  ;;  %v13416_v4 = vsel %vm258_vm2, %v13399_v50, 0.0 }
 0x6b9   : > { %v13404_v35 = vsel %vm258_vm2, %v13390_v25, 0.0 }
 0x6ba   : > { %4929 = vadd.xlane.f32.xlu1 %v13404_v35 }
 0x6bc   : > { %4931 = vadd.xlane.f32.xlu0 %v13410_v56 }
 0x6be   : > { %4933 = vadd.xlane.f32.xlu1 %v13416_v4 }
 0x6c3   : > { %v7395_v46 = vpop.f32.mrb[80].mxu0 }
 0x6c4   : > { %v4582_v8 = vpop.f32.mrb[81].mxu0  ;;  %v13423_v54 = vadd.f32 %v7395_v46, %v13248_v60 }
 0x6c5   : > { %v13420_v48 = vadd.f32 %v13248_v60, %v4582_v8  ;;  %v7396_v41 = vpop.f32.mrb[82].mxu0 }
 0x6c6   : > { %v4585_v34 = vpop.f32.mrb[83].mxu0  ;;  %16920 = vst [vmem:[#allocation153_spill] sm:$0xff] %v13423_v54  ;;  %v13435_v10 = vadd.f32 %v7396_v41, %v13248_v60  ;;  %v13446_v27 = vsel %vm258_vm2, %v13423_v54, 0.0 }
 0x6c7   : > { %v13426_v9 = vadd.f32 %v13248_v60, %v4585_v34  ;;  %v13431_v24 = vsel %vm258_vm2, %v13420_v48, 0.0 }
 0x6c8   : > { %4935 = vadd.xlane.f32.xlu0 %v13431_v24  ;;  %16921 = vst [vmem:[#allocation154_spill] sm:$0xff] %v13435_v10  ;;  %v13452_v40 = vsel %vm258_vm2, %v13435_v10, 0.0 }
 0x6c9   : > { %v13440_v59 = vsel %vm258_vm2, %v13426_v9, 0.0 }
 0x6ca   : > { %4937 = vadd.xlane.f32.xlu1 %v13440_v59 }
 0x6cc   : > { %4939 = vadd.xlane.f32.xlu0 %v13446_v27 }
 0x6ce   : > { %4941 = vadd.xlane.f32.xlu1 %v13452_v40 }
 0x6d3   : > { %v7399_v12 = vpop.f32.mrb[84].mxu0 }
 0x6d4   : > { %v4598_v61 = vpop.f32.mrb[85].mxu0  ;;  %v13459_v29 = vadd.f32 %v7399_v12, %v13248_v60 }
 0x6d5   : > { %v13456_v21 = vadd.f32 %v13248_v60, %v4598_v61  ;;  %v7400_v3 = vpop.f32.mrb[86].mxu0 }
 0x6d6   : > { %v4601_v18 = vpop.f32.mrb[87].mxu0  ;;  %16923 = vst [vmem:[#allocation75_spill] sm:$0xff] %v13459_v29  ;;  %v13471_v22 = vadd.f32 %v7400_v3, %v13248_v60  ;;  %v13482_v14 = vsel %vm258_vm2, %v13459_v29, 0.0 }
 0x6d7   : > { %16922 = vst [vmem:[#allocation62_spill] sm:$0xff] %v13456_v21  ;;  %v13462_v47 = vadd.f32 %v13248_v60, %v4601_v18  ;;  %v13467_v31 = vsel %vm258_vm2, %v13456_v21, 0.0 }
 0x6d8   : > { %4943 = vadd.xlane.f32.xlu0 %v13467_v31  ;;  %16925 = vst [vmem:[#allocation74_spill] sm:$0xff] %v13471_v22  ;;  %v13488_v1 = vsel %vm258_vm2, %v13471_v22, 0.0 }
 0x6d9   : > { %16924 = vst [vmem:[#allocation150_spill] sm:$0xff] %v13462_v47  ;;  %v13476_v52 = vsel %vm258_vm2, %v13462_v47, 0.0 }
 0x6da   : > { %4945 = vadd.xlane.f32.xlu1 %v13476_v52 }
 0x6dc   : > { %4947 = vadd.xlane.f32.xlu0 %v13482_v14 }
 0x6de   : > { %4949 = vadd.xlane.f32.xlu1 %v13488_v1 }
 0x6e3   : > { %v7403_v49 = vpop.f32.mrb[88].mxu0 }
 0x6e4   : > { %v4614_v0 = vpop.f32.mrb[89].mxu0  ;;  %v13495_v51 = vadd.f32 %v7403_v49, %v13248_v60 }
 0x6e5   : > { %v13492_v16 = vadd.f32 %v13248_v60, %v4614_v0  ;;  %v7404_v17 = vpop.f32.mrb[90].mxu0 }
 0x6e6   : > { %v4617_v11 = vpop.f32.mrb[91].mxu0  ;;  %16927 = vst [vmem:[#allocation4_spill] sm:$0xff] %v13495_v51  ;;  %v13507_v41 = vadd.f32 %v7404_v17, %v13248_v60  ;;  %v13518_v12 = vsel %vm258_vm2, %v13495_v51, 0.0 }
 0x6e7   : > { %16926 = vst [vmem:[#allocation152_spill] sm:$0xff] %v13492_v16  ;;  %v13498_v46 = vadd.f32 %v13248_v60, %v4617_v11  ;;  %v13503_v8 = vsel %vm258_vm2, %v13492_v16, 0.0 }
 0x6e8   : > { %4951 = vadd.xlane.f32.xlu0 %v13503_v8  ;;  %16929 = vst [vmem:[#allocation39_spill] sm:$0xff] %v13507_v41  ;;  %v13524_v61 = vsel %vm258_vm2, %v13507_v41, 0.0 }
 0x6e9   : > { %16928 = vst [vmem:[#allocation133_spill] sm:$0xff] %v13498_v46  ;;  %v13512_v34 = vsel %vm258_vm2, %v13498_v46, 0.0 }
 0x6ea   : > { %4953 = vadd.xlane.f32.xlu1 %v13512_v34 }
 0x6ec   : > { %4955 = vadd.xlane.f32.xlu0 %v13518_v12 }
 0x6ee   : > { %4957 = vadd.xlane.f32.xlu1 %v13524_v61 }
 0x6f3   : > { %v7407_v3 = vpop.f32.mrb[92].mxu0 }
 0x6f4   : > { %v4630_v18 = vpop.f32.mrb[93].mxu0  ;;  %v13531_v11 = vadd.f32 %v7407_v3, %v13248_v60 }
 0x6f5   : > { %v13528_v49 = vadd.f32 %v13248_v60, %v4630_v18  ;;  %v7408_v0 = vpop.f32.mrb[94].mxu0 }
 0x6f6   : > { %v4633_v17 = vpop.f32.mrb[95].mxu0  ;;  %16931 = vst [vmem:[#allocation72_spill] sm:$0xff] %v13531_v11  ;;  %v13543_v7 = vadd.f32 %v7408_v0, %v13248_v60  ;;  %v13554_v3 = vsel %vm258_vm2, %v13531_v11, 0.0 }
 0x6f7   : > { %16930 = vst [vmem:[#allocation149_spill] sm:$0xff] %v13528_v49  ;;  %v13534_v63 = vadd.f32 %v13248_v60, %v4633_v17  ;;  %v13539_v5 = vsel %vm258_vm2, %v13528_v49, 0.0 }
 0x6f8   : > { %4959 = vadd.xlane.f32.xlu0 %v13539_v5  ;;  %16933 = vst [vmem:[#allocation91_spill] sm:$0xff] %v13543_v7  ;;  %v13560_v17 = vsel %vm258_vm2, %v13543_v7, 0.0 }
 0x6f9   : > { %16932 = vst [vmem:[#allocation90_spill] sm:$0xff] %v13534_v63  ;;  %v13548_v18 = vsel %vm258_vm2, %v13534_v63, 0.0 }
 0x6fa   : > { %4961 = vadd.xlane.f32.xlu1 %v13548_v18 }
 0x6fc   : > { %4963 = vadd.xlane.f32.xlu0 %v13554_v3 }
 0x6fe   : > { %4965 = vadd.xlane.f32.xlu1 %v13560_v17 }
 0x703   : > { %v7411_v0 = vpop.f32.mrb[96].mxu0 }
 0x704   : > { %v4646_v43 = vpop.f32.mrb[97].mxu0  ;;  %v13569_v57 = vadd.f32 %v7411_v0, %v13248_v60 }
 0x705   : > { %v13564_v58 = vadd.f32 %v13248_v60, %v4646_v43  ;;  %v13566_v6 = vpop.f32.mrb[98].mxu0 }
 0x706   : > { %16935 = vst [vmem:[#allocation8_spill] sm:$0xff] %v13566_v6  ;;  %v4649_v45 = vpop.f32.mrb[99].mxu0  ;;  %16936 = vst [vmem:[#allocation2_spill] sm:$0xff] %v13569_v57  ;;  %v13589_v0 = vsel %vm258_vm2, %v13569_v57, 0.0 }
 0x707   : > { %16934 = vst [vmem:[#allocation86_spill] sm:$0xff] %v13564_v58  ;;  %v13572_v11 = vadd.f32 %v13248_v60, %v4649_v45  ;;  %v13577_v7 = vsel %vm258_vm2, %v13564_v58, 0.0  ;;  %16939 = vst [vmem:[#allocation69_spill] sm:$0xff] %v13589_v0  ;;  %v4843_v60 = vsub.f32 %v13308_v62, %v13321_v44  ;;  %v4844_v45 = vsub.f32 %v13316_v20, %v13332_v28 }
 0x708   : > { %4967 = vadd.xlane.f32.xlu0 %v13577_v7 }
 0x709   : > { %16937 = vst [vmem:[#allocation132_spill] sm:$0xff] %v13572_v11  ;;  %v13583_v43 = vsel %vm258_vm2, %v13572_v11, 0.0  ;;  %v4845_v11 = vsub.f32 %v13313_v32, %v13338_v53  ;;  %v5164_v32 = vmul.f32 %v13332_v28, %v13332_v28  ;;  %v5355_v58 = vmul.f32 %v4843_v60, %v4843_v60 }
 0x70a   : > { %16938 = vst [vmem:[#allocation9_spill] sm:$0xff] %v13583_v43  ;;  %4969 = vadd.xlane.f32.xlu1 %v13583_v43  ;;  %v4846_v43 = vsub.f32 %v13327_v15, %v13344_v38  ;;  %v5356_v15 = vmul.f32 %v4844_v45, %v4844_v45 }
 0x70c   : > { %4971 = vadd.xlane.f32.xlu0 %v13589_v0  ;;  %v5163_v0 = vmul.f32 %v13321_v44, %v13321_v44  ;;  %v5166_v44 = vmul.f32 %v13344_v38, %v13344_v38  ;;  %v5167_v38 = vmul.f32 %v13359_v13, %v13359_v13 }
 0x70e   : > { %5039 = vadd.xlane.f32.xlu1 %v4843_v60  ;;  %v7565_v60 = vld [vmem:[%s15411_s3] sm:$0xff]  }
 0x70f   : > { %7521 = vmatprep.subr.bf16.mxu1 %v7565_v60  ;;  %7441 = vmatprep.subr.bf16.mxu0 %v7565_v60 }
 0x710   : > { %5041 = vadd.xlane.f32.xlu0 %v4844_v45  ;;  %7529 = vmatpush3.bf16.msra.mxu1 %v7565_v60 }
 0x711   : > { %7442 = vmatpush3.bf16.msra.mxu0 %v7565_v60  ;;  %v4853_v60 = vsub.f32 %v13387_v30, %v13410_v56 }
 0x712   : > { %5043 = vadd.xlane.f32.xlu1 %v4845_v11 }
 0x713   : > { %v13600_v6 = vpop.f32.mrb[100].mxu0 }
 0x714   : > { %16940 = vst [vmem:[#allocation7_spill] sm:$0xff] %v13600_v6  ;;  %5045 = vadd.xlane.f32.xlu0 %v4846_v43  ;;  %v13602_v57 = vpop.f32.mrb[101].mxu0  ;;  %v5165_v6 = vmul.f32 %v13338_v53, %v13338_v53  ;;  %v4850_v53 = vsub.f32 %v13363_v42, %v13380_v33 }
 0x715   : > { %v13606_v62 = vpop.f32.mrb[102].mxu0 }
 0x716   : > { %16941 = vst [vmem:[#allocation59_spill] sm:$0xff] %v13606_v62  ;;  %5231 = vadd.xlane.f32.xlu1 %v5163_v0  ;;  %v13608_v20 = vpop.f32.mrb[103].mxu0  ;;  %v5357_v62 = vmul.f32 %v4845_v11, %v4845_v11  ;;  %v5358_v0 = vmul.f32 %v4846_v43, %v4846_v43  ;;  %v5168_v11 = vmul.f32 %v13368_v19, %v13368_v19 }
 0x717   : > { %16942 = vst [vmem:[#allocation173_spill] sm:$0xff] %v13608_v20 }
 0x718   : > { %5233 = vadd.xlane.f32.xlu0 %v5164_v32 }
 0x71a   : > { %5423 = vadd.xlane.f32.xlu1 %v5355_v58  ;;  %v4847_v58 = vsub.f32 %v13348_v39, %v13359_v13  ;;  %v5169_v13 = vmul.f32 %v13374_v23, %v13374_v23 }
 0x71c   : > { %5425 = vadd.xlane.f32.xlu0 %v5356_v15  ;;  %v5359_v43 = vmul.f32 %v4847_v58, %v4847_v58 }
 0x71e   : > { %5235 = vadd.xlane.f32.xlu1 %v5165_v6  ;;  %v4848_v6 = vsub.f32 %v13354_v55, %v13368_v19 }
 0x720   : > { %5237 = vadd.xlane.f32.xlu0 %v5166_v44  ;;  %v5360_v45 = vmul.f32 %v4848_v6, %v4848_v6 }
 0x722   : > { %5427 = vadd.xlane.f32.xlu1 %v5357_v62  ;;  %v4849_v62 = vsub.f32 %v13351_v36, %v13374_v23  ;;  %v4852_v23 = vsub.f32 %v13390_v25, %v13404_v35 }
 0x723   : > { %v13616_v20 = vpop.f32.mrb[104].mxu0 }
 0x724   : > { %5429 = vadd.xlane.f32.xlu0 %v5358_v0  ;;  %v13618_v28 = vpop.f32.mrb[105].mxu0 }
 0x725   : > { %v13622_v32 = vpop.f32.mrb[106].mxu0 }
 0x726   : > { %5047 = vadd.xlane.f32.xlu1 %v4847_v58  ;;  %v13624_v15 = vpop.f32.mrb[107].mxu0 }
 0x728   : > { %5049 = vadd.xlane.f32.xlu0 %v4848_v6  ;;  %v5170_v6 = vmul.f32 %v13380_v33, %v13380_v33  ;;  %v4854_v33 = vsub.f32 %v13399_v50, %v13416_v4 }
 0x72a   : > { %5051 = vadd.xlane.f32.xlu1 %v4849_v62 }
 0x72c   : > { %5053 = vadd.xlane.f32.xlu0 %v4850_v53 }
 0x72e   : > { %5239 = vadd.xlane.f32.xlu1 %v5167_v38  ;;  %v5361_v38 = vmul.f32 %v4849_v62, %v4849_v62 }
 0x730   : > { %5241 = vadd.xlane.f32.xlu0 %v5168_v11  ;;  %v5362_v11 = vmul.f32 %v4850_v53, %v4850_v53  ;;  %v5171_v53 = vmul.f32 %v13395_v2, %v13395_v2 }
 0x732   : > { %5431 = vadd.xlane.f32.xlu1 %v5359_v43  ;;  %v4851_v43 = vsub.f32 %v13384_v26, %v13395_v2  ;;  %v13679_v2 = vpop.xlane.xlu1 %4905 }
 0x733   : > { %v13639_v44 = vpop.f32.mrb[108].mxu0  ;;  %16952 = vst [vmem:[#allocation68_spill] sm:$0xff] %v13679_v2  ;;  %v7572_v2 = vld [vmem:[%s15411_s3 + $0x38] sm:$0xff]  }
 0x734   : > { %16943 = vst [vmem:[#allocation99_spill] sm:$0xff] %v13639_v44  ;;  %5433 = vadd.xlane.f32.xlu0 %v5360_v45  ;;  %v13641_v0 = vpop.f32.mrb[109].mxu0 }
 0x735   : > { %16944 = vst [vmem:[#allocation102_spill] sm:$0xff] %v13641_v0  ;;  %v13645_v19 = vpop.f32.mrb[110].mxu0 }
 0x736   : > { %16945 = vst [vmem:[#allocation172_spill] sm:$0xff] %v13645_v19  ;;  %5243 = vadd.xlane.f32.xlu1 %v5169_v13  ;;  %v13647_v58 = vpop.f32.mrb[111].mxu0  ;;  %v7566_v13 = vld [vmem:[%s15411_s3 + $0x8] sm:$0xff]   ;;  %v5363_v19 = vmul.f32 %v4851_v43, %v4851_v43 }
 0x737   : > { %16946 = vst [vmem:[#allocation6_spill] sm:$0xff] %v13647_v58  ;;  %7522 = vmatprep.subr.bf16.mxu1 %v7566_v13  ;;  %7443 = vmatprep.subr.bf16.mxu0 %v7566_v13 }
 0x738   : > { %5245 = vadd.xlane.f32.xlu0 %v5170_v6  ;;  %v7567_v6 = vld [vmem:[%s15411_s3 + $0x10] sm:$0xff]   ;;  %7530 = vmatpush3.bf16.msra.mxu1 %v7566_v13 }
 0x739   : > { %7523 = vmatprep.subr.bf16.mxu1 %v7567_v6  ;;  %7444 = vmatpush3.bf16.msra.mxu0 %v7566_v13  ;;  %v5365_v13 = vmul.f32 %v4853_v60, %v4853_v60 }
 0x73a   : > { %5435 = vadd.xlane.f32.xlu1 %v5361_v38  ;;  %v13671_v38 = vpop.xlane.xlu0 %4903  ;;  %7445 = vmatprep.subr.bf16.mxu0 %v7567_v6 }
 0x73b   : > { %16949 = vst [vmem:[#allocation12_spill] sm:$0xff] %v13671_v38  ;;  %v7568_v38 = vld [vmem:[%s15411_s3 + $0x18] sm:$0xff]  }
 0x73c   : > { %5437 = vadd.xlane.f32.xlu0 %v5362_v11  ;;  %7531 = vmatpush3.bf16.msra.mxu1 %v7567_v6 }
 0x73d   : > { %7524 = vmatprep.subr.bf16.mxu1 %v7568_v38  ;;  %7446 = vmatpush3.bf16.msra.mxu0 %v7567_v6  ;;  %v5366_v6 = vmul.f32 %v4854_v33, %v4854_v33 }
 0x73e   : > { %5055 = vadd.xlane.f32.xlu1 %v4851_v43  ;;  %v7569_v43 = vld [vmem:[%s15411_s3 + $0x20] sm:$0xff]   ;;  %7447 = vmatprep.subr.bf16.mxu0 %v7568_v38 }
 0x740   : > { %5057 = vadd.xlane.f32.xlu0 %v4852_v23  ;;  %7532 = vmatpush3.bf16.msra.mxu1 %v7568_v38 }
 0x741   : > { %7525 = vmatprep.subr.bf16.mxu1 %v7569_v43  ;;  %7448 = vmatpush3.bf16.msra.mxu0 %v7568_v38 }
 0x742   : > { %5059 = vadd.xlane.f32.xlu1 %v4853_v60  ;;  %7449 = vmatprep.subr.bf16.mxu0 %v7569_v43  ;;  %v4855_v60 = vsub.f32 %v13420_v48, %v13431_v24 }
 0x743   : > { %v13659_v45 = vpop.f32.mrb[112].mxu0 }
 0x744   : > { %16947 = vst [vmem:[#allocation40_spill] sm:$0xff] %v13659_v45  ;;  %5061 = vadd.xlane.f32.xlu0 %v4854_v33  ;;  %v13661_v62 = vpop.f32.mrb[113].mxu0  ;;  %7533 = vmatpush3.bf16.msra.mxu1 %v7569_v43 }
 0x745   : > { %16948 = vst [vmem:[#allocation115_spill] sm:$0xff] %v13661_v62  ;;  %v13673_v11 = vpop.f32.mrb[114].mxu0  ;;  %v5172_v62 = vmul.f32 %v13404_v35, %v13404_v35  ;;  %v5173_v35 = vmul.f32 %v13410_v56, %v13410_v56  ;;  %v7570_v56 = vld [vmem:[%s15411_s3 + $0x28] sm:$0xff]   ;;  %7450 = vmatpush3.bf16.msra.mxu0 %v7569_v43 }
 0x746   : > { %16950 = vst [vmem:[#allocation110_spill] sm:$0xff] %v13673_v11  ;;  %5247 = vadd.xlane.f32.xlu1 %v5171_v53  ;;  %v13675_v45 = vpop.f32.mrb[115].mxu0  ;;  %v5364_v53 = vmul.f32 %v4852_v23, %v4852_v23  ;;  %v13684_v11 = vpop.xlane.xlu0 %4907  ;;  %7526 = vmatprep.subr.bf16.mxu1 %v7570_v56 }
 0x747   : > { %16951 = vst [vmem:[#allocation174_spill] sm:$0xff] %v13675_v45  ;;  %16953 = vst [vmem:[#allocation114_spill] sm:$0xff] %v13684_v11  ;;  %7451 = vmatprep.subr.bf16.mxu0 %v7570_v56  ;;  %v4857_v11 = vsub.f32 %v13423_v54, %v13446_v27  ;;  %v5367_v45 = vmul.f32 %v4855_v60, %v4855_v60 }
 0x748   : > { %5249 = vadd.xlane.f32.xlu0 %v5172_v62  ;;  %v13691_v62 = vpop.xlane.xlu1 %4909  ;;  %7534 = vmatpush3.bf16.msra.mxu1 %v7570_v56 }
 0x749   : > { %16954 = vst [vmem:[#allocation54_spill] sm:$0xff] %v13691_v62  ;;  %7452 = vmatpush3.bf16.msra.mxu0 %v7570_v56 }
 0x74a   : > { %5439 = vadd.xlane.f32.xlu1 %v5363_v19  ;;  %v5174_v19 = vmul.f32 %v13416_v4, %v13416_v4  ;;  %v13695_v23 = vpop.xlane.xlu0 %4911 }
 0x74c   : > { %5441 = vadd.xlane.f32.xlu0 %v5364_v53  ;;  %v13700_v53 = vpop.xlane.xlu1 %4913 }
 0x74e   : > { %5251 = vadd.xlane.f32.xlu1 %v5173_v35  ;;  %v13711_v62 = vpop.xlane.xlu0 %4915 }
 0x750   : > { %5253 = vadd.xlane.f32.xlu0 %v5174_v19  ;;  %v7571_v19 = vld [vmem:[%s15411_s3 + $0x30] sm:$0xff]  }
 0x751   : > { %7527 = vmatprep.subr.bf16.mxu1 %v7571_v19  ;;  %7453 = vmatprep.subr.bf16.mxu0 %v7571_v19 }
 0x752   : > { %5443 = vadd.xlane.f32.xlu1 %v5365_v13  ;;  %v4856_v13 = vsub.f32 %v13426_v9, %v13440_v59  ;;  %v13726_v43 = vpop.xlane.xlu0 %4919  ;;  %7535 = vmatpush3.bf16.msra.mxu1 %v7571_v19 }
 0x753   : > { %v13702_v35 = vpop.f32.mrb[116].mxu0  ;;  %7528 = vmatprep.subr.bf16.mxu1 %v7572_v2  ;;  %7454 = vmatpush3.bf16.msra.mxu0 %v7571_v19 }
 0x754   : > { %16955 = vst [vmem:[#allocation178_spill] sm:$0xff] %v13702_v35  ;;  %5445 = vadd.xlane.f32.xlu0 %v5366_v6  ;;  %v13704_v4 = vpop.f32.mrb[117].mxu0  ;;  %v13719_v6 = vpop.xlane.xlu1 %4917  ;;  %7455 = vmatprep.subr.bf16.mxu0 %v7572_v2  ;;  %v5368_v58 = vmul.f32 %v4856_v13, %v4856_v13 }
 0x755   : > { %16956 = vst [vmem:[#allocation128_spill] sm:$0xff] %v13704_v4  ;;  %v13713_v38 = vpop.f32.mrb[118].mxu0  ;;  %v5176_v4 = vmul.f32 %v13440_v59, %v13440_v59 }
 0x756   : > { %16957 = vst [vmem:[#allocation129_spill] sm:$0xff] %v13713_v38  ;;  %5063 = vadd.xlane.f32.xlu1 %v4855_v60  ;;  %v13715_v33 = vpop.f32.mrb[119].mxu0  ;;  %v4858_v38 = vsub.f32 %v13435_v10, %v13452_v40  ;;  %v13736_v56 = vpop.xlane.xlu0 %4923  ;;  %7536 = vmatpush3.bf16.msra.mxu1 %v7572_v2 }
 0x757   : > { %16958 = vst [vmem:[#allocation122_spill] sm:$0xff] %v13715_v33  ;;  %v5175_v33 = vmul.f32 %v13431_v24, %v13431_v24  ;;  %7456 = vmatpush3.bf16.msra.mxu0 %v7572_v2  ;;  %v5177_v24 = vmul.f32 %v13446_v27, %v13446_v27  ;;  %v5369_v2 = vmul.f32 %v4857_v11, %v4857_v11 }
 0x758   : > { %5065 = vadd.xlane.f32.xlu0 %v4856_v13  ;;  %v13730_v35 = vpop.xlane.xlu1 %4921  ;;  %v5370_v27 = vmul.f32 %v4858_v38, %v4858_v38 }
 0x75a   : > { %5067 = vadd.xlane.f32.xlu1 %v4857_v11  ;;  %v13740_v0 = vpop.xlane.xlu0 %4927  ;;  %v4861_v11 = vsub.f32 %v13459_v29, %v13482_v14 }
 0x75c   : > { %5069 = vadd.xlane.f32.xlu0 %v4858_v38  ;;  %v13738_v44 = vpop.xlane.xlu1 %4925  ;;  %v4862_v38 = vsub.f32 %v13471_v22, %v13488_v1 }
 0x75e   : > { %5255 = vadd.xlane.f32.xlu1 %v5175_v33 }
 0x760   : > { %5257 = vadd.xlane.f32.xlu0 %v5176_v4  ;;  %v13744_v19 = vpop.xlane.xlu1 %4929  ;;  %v5178_v4 = vmul.f32 %v13452_v40, %v13452_v40  ;;  %v4860_v40 = vsub.f32 %v13462_v47, %v13476_v52 }
 0x762   : > { %5447 = vadd.xlane.f32.xlu1 %v5367_v45  ;;  %v5372_v54 = vmul.f32 %v4860_v40, %v4860_v40 }
 0x764   : > { %5449 = vadd.xlane.f32.xlu0 %v5368_v58  ;;  %v13746_v59 = vpop.f32.mrb[120].mxu0  ;;  %v13756_v58 = vpop.xlane.xlu0 %4931 }
 0x765   : > { %16959 = vst [vmem:[#allocation16_spill] sm:$0xff] %v13746_v59  ;;  %v13748_v33 = vpop.f32.mrb[121].mxu0  ;;  %v13758_v13 = vpop.xlane.xlu1 %4933  ;;  %v4859_v59 = vsub.f32 %v13456_v21, %v13467_v31 }
 0x766   : > { %16960 = vst [vmem:[#allocation10_spill] sm:$0xff] %v13748_v33  ;;  %5259 = vadd.xlane.f32.xlu1 %v5177_v24  ;;  %v13752_v60 = vpop.f32.mrb[122].mxu0 }
 0x767   : > { %16961 = vst [vmem:[#allocation175_spill] sm:$0xff] %v13752_v60  ;;  %v13754_v45 = vpop.f32.mrb[123].mxu0  ;;  %v5371_v22 = vmul.f32 %v4859_v59, %v4859_v59 }
 0x768   : > { %16962 = vst [vmem:[#allocation17_spill] sm:$0xff] %v13754_v45  ;;  %5261 = vadd.xlane.f32.xlu0 %v5178_v4  ;;  %v13762_v24 = vpop.xlane.xlu0 %4935  ;;  %v5180_v45 = vmul.f32 %v13476_v52, %v13476_v52  ;;  %v5181_v52 = vmul.f32 %v13482_v14, %v13482_v14  ;;  %v4864_v14 = vsub.f32 %v13498_v46, %v13512_v34 }
 0x769   : > { %v13766_v60 = vpop.xlane.xlu1 %4937 }
 0x76a   : > { %5451 = vadd.xlane.f32.xlu1 %v5369_v2  ;;  %v5179_v2 = vmul.f32 %v13467_v31, %v13467_v31  ;;  %v5376_v46 = vmul.f32 %v4864_v14, %v4864_v14 }
 0x76c   : > { %5453 = vadd.xlane.f32.xlu0 %v5370_v27  ;;  %v13772_v4 = vpop.xlane.xlu0 %4939 }
 0x76d   : > { %v13776_v27 = vpop.xlane.xlu1 %4941 }
 0x76e   : > { %5071 = vadd.xlane.f32.xlu1 %v4859_v59  ;;  %v5373_v59 = vmul.f32 %v4861_v11, %v4861_v11 }
 0x770   : > { %5073 = vadd.xlane.f32.xlu0 %v4860_v40  ;;  %v13780_v33 = vpop.xlane.xlu0 %4943 }
 0x771   : > { %v13786_v21 = vpop.xlane.xlu1 %4945 }
 0x772   : > { %5075 = vadd.xlane.f32.xlu1 %v4861_v11 }
 0x774   : > { %5077 = vadd.xlane.f32.xlu0 %v4862_v38 }
 0x776   : > { %5263 = vadd.xlane.f32.xlu1 %v5179_v2  ;;  %v13794_v2 = vpop.xlane.xlu0 %4947 }
 0x777   : > { %v13782_v47 = vpop.f32.mrb[124].mxu0  ;;  %16967 = vst [vmem:[#allocation97_spill] sm:$0xff] %v13794_v2 }
 0x778   : > { %16963 = vst [vmem:[#allocation147_spill] sm:$0xff] %v13782_v47  ;;  %5265 = vadd.xlane.f32.xlu0 %v5180_v45  ;;  %v13784_v29 = vpop.f32.mrb[125].mxu0  ;;  %v5182_v45 = vmul.f32 %v13488_v1, %v13488_v1  ;;  %v13798_v47 = vpop.xlane.xlu1 %4949  ;;  %v4865_v1 = vsub.f32 %v13495_v51, %v13518_v12 }
 0x779   : > { %16964 = vst [vmem:[#allocation146_spill] sm:$0xff] %v13784_v29  ;;  %v13788_v10 = vpop.f32.mrb[126].mxu0  ;;  %16968 = vst [vmem:[#allocation76_spill] sm:$0xff] %v13798_v47 }
 0x77a   : > { %16965 = vst [vmem:[#allocation14_spill] sm:$0xff] %v13788_v10  ;;  %5455 = vadd.xlane.f32.xlu1 %v5371_v22  ;;  %v13790_v31 = vpop.f32.mrb[127].mxu0  ;;  %v13800_v29 = vpop.xlane.xlu0 %4951  ;;  %v5374_v22 = vmul.f32 %v4862_v38, %v4862_v38  ;;  %v4866_v38 = vsub.f32 %v13507_v41, %v13524_v61  ;;  %v5185_v41 = vmul.f32 %v13518_v12, %v13518_v12 }
 0x77b   : > { %16966 = vst [vmem:[#allocation140_spill] sm:$0xff] %v13790_v31  ;;  %16969 = vst [vmem:[#allocation145_spill] sm:$0xff] %v13800_v29 }
 0x77c   : > { %5457 = vadd.xlane.f32.xlu0 %v5372_v54  ;;  %v13802_v10 = vpop.xlane.xlu1 %4953  ;;  %v4863_v54 = vsub.f32 %v13492_v16, %v13503_v8 }
 0x77d   : > { %16970 = vst [vmem:[#allocation70_spill] sm:$0xff] %v13802_v10 }
 0x77e   : > { %5267 = vadd.xlane.f32.xlu1 %v5181_v52  ;;  %v13808_v40 = vpop.xlane.xlu0 %4955  ;;  %v5375_v31 = vmul.f32 %v4863_v54, %v4863_v54 }
 0x77f   : > { %16971 = vst [vmem:[#allocation139_spill] sm:$0xff] %v13808_v40 }
 0x780   : > { %5269 = vadd.xlane.f32.xlu0 %v5182_v45  ;;  %v13812_v11 = vpop.xlane.xlu1 %4957  ;;  %v5183_v45 = vmul.f32 %v13503_v8, %v13503_v8  ;;  %v5186_v8 = vmul.f32 %v13524_v61, %v13524_v61  ;;  %v16980_v61 = vld [vmem:[#allocation72_spill] sm:$0xff] }
 0x781   : > { %16972 = vst [vmem:[#allocation88_spill] sm:$0xff] %v13812_v11 }
 0x782   : > { %5459 = vadd.xlane.f32.xlu1 %v5373_v59 }
 0x784   : > { %5461 = vadd.xlane.f32.xlu0 %v5374_v22  ;;  %v5184_v22 = vmul.f32 %v13512_v34, %v13512_v34  ;;  %v5377_v34 = vmul.f32 %v4865_v1, %v4865_v1 }
 0x785   : > { %v13816_v52 = vpop.xlane.xlu0 %4959 }
 0x786   : > { %5079 = vadd.xlane.f32.xlu1 %v4863_v54  ;;  %16973 = vst [vmem:[#allocation18_spill] sm:$0xff] %v13816_v52 }
 0x787   : > { %v13820_v59 = vpop.xlane.xlu1 %4961 }
 0x788   : > { %5081 = vadd.xlane.f32.xlu0 %v4864_v14  ;;  %16974 = vst [vmem:[#allocation158_spill] sm:$0xff] %v13820_v59 }
 0x789   : > { %v13824_v51 = vpop.xlane.xlu0 %4963 }
 0x78a   : > { %5083 = vadd.xlane.f32.xlu1 %v4865_v1  ;;  %16975 = vst [vmem:[#allocation113_spill] sm:$0xff] %v13824_v51  ;;  %v13928_v51 = vld [vmem:[%s15412_s4 + $0x8] ss:$0 sm:$0xff] }
 0x78b   : > { %v13826_v16 = vpop.xlane.xlu1 %4965 }
 0x78c   : > { %5085 = vadd.xlane.f32.xlu0 %v4866_v38  ;;  %16976 = vst [vmem:[#allocation159_spill] sm:$0xff] %v13826_v16 }
 0x78e   : > { %5271 = vadd.xlane.f32.xlu1 %v5183_v45 }
 0x790   : > { %5273 = vadd.xlane.f32.xlu0 %v5184_v22 }
 0x792   : > { %5463 = vadd.xlane.f32.xlu1 %v5375_v31  ;;  %v5378_v31 = vmul.f32 %v4866_v38, %v4866_v38 }
 0x794   : > { %5465 = vadd.xlane.f32.xlu0 %v5376_v46  ;;  %v4867_v46 = vsub.f32 %v13528_v49, %v13539_v5 }
 0x795   : > { %v13830_v52 = vpop.xlane.xlu0 %4967 }
 0x796   : > { %16977 = vst [vmem:[#allocation19_spill] sm:$0xff] %v13830_v52  ;;  %5275 = vadd.xlane.f32.xlu1 %v5185_v41  ;;  %v4868_v41 = vsub.f32 %v13534_v63, %v13548_v18  ;;  %v5187_v52 = vmul.f32 %v13539_v5, %v13539_v5  ;;  %v5379_v16 = vmul.f32 %v4867_v46, %v4867_v46 }
 0x797   : > { %v13834_v45 = vpop.xlane.xlu1 %4969 }
 0x798   : > { %16978 = vst [vmem:[#allocation84_spill] sm:$0xff] %v13834_v45  ;;  %5277 = vadd.xlane.f32.xlu0 %v5186_v8  ;;  %v4869_v8 = vsub.f32 %v16980_v61, %v13554_v3 }
 0x799   : > { %v13836_v54 = vpop.xlane.xlu0 %4971 }
 0x79a   : > { %16979 = vst [vmem:[#allocation157_spill] sm:$0xff] %v13836_v54  ;;  %5467 = vadd.xlane.f32.xlu1 %v5377_v34  ;;  %v16981_v34 = vld [vmem:[#allocation91_spill] sm:$0xff] }
 0x79b   : > { %v5040_v14 = vpop.xlane.xlu1 %5039 }
 0x79c   : > { %5469 = vadd.xlane.f32.xlu0 %v5378_v31  ;;  %v5547_v38 = vsel %vm258_vm2, %v13695_v23, %v5040_v14  ;;  %v4870_v31 = vsub.f32 %v16981_v34, %v13560_v17  ;;  %v5188_v23 = vmul.f32 %v13548_v18, %v13548_v18 }
 0x79d   : > { %v5042_v12 = vpop.xlane.xlu0 %5041  ;;  %v13854_v63 = vmul.f32 0.015625, %v5547_v38 }
 0x79e   : > { %5087 = vadd.xlane.f32.xlu1 %v4867_v46  ;;  %v5548_v45 = vsel %vm258_vm2, %v13700_v53, %v5042_v12 }
 0x79f   : > { %v5044_v22 = vpop.xlane.xlu1 %5043  ;;  %v13858_v14 = vmul.f32 0.015625, %v5548_v45  ;;  %v5803_v53 = vmul.f32 %v13854_v63, %v13854_v63  ;;  %v5380_v45 = vmul.f32 %v4868_v41, %v4868_v41 }
 0x7a0   : > { %5089 = vadd.xlane.f32.xlu0 %v4868_v41  ;;  %v5190_v41 = vmul.f32 %v13560_v17, %v13560_v17  ;;  %v5382_v17 = vmul.f32 %v4870_v31, %v4870_v31 }
 0x7a1   : > { %v5046_v1 = vpop.xlane.xlu0 %5045  ;;  %v5804_v38 = vmul.f32 %v13858_v14, %v13858_v14 }
 0x7a2   : > { %5091 = vadd.xlane.f32.xlu1 %v4869_v8 }
 0x7a3   : > { %v5232_v54 = vpop.xlane.xlu1 %5231 }
 0x7a4   : > { %5093 = vadd.xlane.f32.xlu0 %v4870_v31 }
 0x7a5   : > { %v5234_v61 = vpop.xlane.xlu0 %5233 }
 0x7a6   : > { %5279 = vadd.xlane.f32.xlu1 %v5187_v52  ;;  %v5549_v52 = vsel %vm258_vm2, %v13711_v62, %v5044_v22 }
 0x7a7   : > { %v5424_v49 = vpop.xlane.xlu1 %5423  ;;  %v13876_v62 = vmul.f32 0.015625, %v5549_v52 }
 0x7a8   : > { %v5675_v34 = vsel %vm258_vm2, %v5232_v54, %v5424_v49  ;;  %5281 = vadd.xlane.f32.xlu0 %v5188_v23  ;;  %v5189_v23 = vmul.f32 %v13554_v3, %v13554_v3 }
 0x7a9   : > { %v5739_v12 = vmul.f32 0.015625, %v5675_v34  ;;  %v5426_v5 = vpop.xlane.xlu0 %5425  ;;  %v5550_v34 = vsel %vm258_vm2, %v13719_v6, %v5046_v1  ;;  %v5381_v1 = vmul.f32 %v4869_v8, %v4869_v8  ;;  %v5805_v3 = vmul.f32 %v13876_v62, %v13876_v62  ;;  %v16982_v8 = vld [vmem:[#allocation86_spill] sm:$0xff] }
 0x7aa   : > { %v5676_v18 = vsel %vm258_vm2, %v5234_v61, %v5426_v5  ;;  %5471 = vadd.xlane.f32.xlu1 %v5379_v16 }
 0x7ab   : > { %v5867_v49 = vsub.f32 %v5739_v12, %v5803_v53  ;;  %v5740_v54 = vmul.f32 0.015625, %v5676_v18  ;;  %v5236_v46 = vpop.xlane.xlu1 %5235  ;;  %v13880_v53 = vmul.f32 0.015625, %v5550_v34 }
 0x7ac   : > { %5473 = vadd.xlane.f32.xlu0 %v5380_v45 }
 0x7ad   : > { %v5995_v22 = vadd.f32 1e-05, %v5867_v49  ;;  %v5868_v61 = vsub.f32 %v5740_v54, %v5804_v38  ;;  %v5238_v16 = vpop.xlane.xlu0 %5237  ;;  %v5806_v38 = vmul.f32 %v13880_v53, %v13880_v53 }
 0x7ae   : > { %5283 = vadd.xlane.f32.xlu1 %v5189_v23  ;;  %v13895_v23 = vld [vmem:[%s15412_s4 + $0x6] ss:$0 sm:$0xff] }
 0x7af   : > { %7829 = vrsqrt.f32 %v5995_v22  ;;  %v5996_v12 = vadd.f32 1e-05, %v5868_v61  ;;  %v5428_v5 = vpop.xlane.xlu1 %5427  ;;  %v16983_v22 = vld [vmem:[#allocation8_spill] sm:$0xff] }
 0x7b0   : > { %v5677_v6 = vsel %vm258_vm2, %v5236_v46, %v5428_v5  ;;  %5285 = vadd.xlane.f32.xlu0 %v5190_v41  ;;  %v4871_v46 = vsub.f32 %v16982_v8, %v13577_v7  ;;  %v13899_v61 = vadd.f32 %v13895_v23, %v16983_v22  ;;  %v16986_v5 = vld [vmem:[#allocation132_spill] sm:$0xff] }
 0x7b1   : > { %7831 = vrsqrt.f32 %v5996_v12  ;;  %v5741_v52 = vmul.f32 0.015625, %v5677_v6  ;;  %v5430_v18 = vpop.xlane.xlu0 %5429  ;;  %v16985_v12 = vld [vmem:[#allocation9_spill] sm:$0xff] }
 0x7b2   : > { %v5678_v45 = vsel %vm258_vm2, %v5238_v16, %v5430_v18  ;;  %5475 = vadd.xlane.f32.xlu1 %v5381_v1  ;;  %16984 = vst [vmem:[#allocation162_spill] sm:$0xff] %v13899_v61  ;;  %v4872_v6 = vsub.f32 %v16986_v5, %v16985_v12 }
 0x7b3   : > { %v5869_v49 = vsub.f32 %v5741_v52, %v5805_v3  ;;  %v5742_v54 = vmul.f32 0.015625, %v5678_v45  ;;  %v5048_v34 = vpop.xlane.xlu1 %5047  ;;  %v16987_v52 = vld [vmem:[#allocation46_spill] sm:$0xff] }
 0x7b4   : > { %5477 = vadd.xlane.f32.xlu0 %v5382_v17  ;;  %v5931_v18 = vsub.f32 %v16987_v52, %v13854_v63  ;;  %v5551_v63 = vsel %vm258_vm2, %v13726_v43, %v5048_v34  ;;  %v5384_v47 = vmul.f32 %v4872_v6, %v4872_v6 }
 0x7b5   : > { %v5997_v31 = vadd.f32 1e-05, %v5869_v49  ;;  %v5870_v16 = vsub.f32 %v5742_v54, %v5806_v38  ;;  %v5050_v41 = vpop.xlane.xlu0 %5049  ;;  %v13908_v49 = vsel %vm258_vm2, %v13899_v61, 0.0  ;;  %v13913_v38 = vld [vmem:[%s15412_s4 + $0x7] ss:$0 sm:$0xff] }
 0x7b6   : > { %5095 = vadd.xlane.f32.xlu1 %v4871_v46  ;;  %v16988_v54 = vld [vmem:[#allocation210_spill] sm:$0xff]  ;;  %v13936_v43 = vsub.f32 %v13899_v61, %v13908_v49  ;;  %v5383_v61 = vmul.f32 %v4871_v46, %v4871_v46 }
 0x7b7   : > { %7833 = vrsqrt.f32 %v5997_v31  ;;  %v5998_v1 = vadd.f32 1e-05, %v5870_v16  ;;  %v5052_v3 = vpop.xlane.xlu1 %5051  ;;  %v5932_v22 = vsub.f32 %v16988_v54, %v13858_v14  ;;  %v16989_v31 = vld [vmem:[#allocation69_spill] sm:$0xff]  ;;  %v16990_v16 = vld [vmem:[#allocation2_spill] sm:$0xff]  ;;  %v5552_v14 = vsel %vm258_vm2, %v13730_v35, %v5050_v41 }
 0x7b8   : > { %5097 = vadd.xlane.f32.xlu0 %v4872_v6  ;;  %v13946_v41 = vmul.f32 0.015625, %v5552_v14 }
 0x7b9   : > { %v7830_v45 = vpop.eup %7829  ;;  %7835 = vrsqrt.f32 %v5998_v1  ;;  %v5054_v17 = vpop.xlane.xlu0 %5053  ;;  %v13923_v1 = vsub.f32 %v16990_v16, %v16989_v31  ;;  %v5191_v16 = vmul.f32 %v13577_v7, %v13577_v7 }
 0x7ba   : > { %4973 = vadd.xlane.f32.xlu1 %v13908_v49  ;;  %v6123_v52 = vmul.f32 %v7830_v45, %v5931_v18  ;;  %v13939_v45 = vmul.f32 0.015625, %v5551_v63 }
 0x7bb   : > { %v7832_v5 = vpop.eup %7831  ;;  %v5240_v8 = vpop.xlane.xlu1 %5239 }
 0x7bc   : > { %5099 = vadd.xlane.f32.xlu0 %v13923_v1  ;;  %v6124_v34 = vmul.f32 %v7832_v5, %v5932_v22  ;;  %v6191_v18 = vmul.f32 %v13913_v38, %v6123_v52  ;;  %v5192_v5 = vmul.f32 %v16985_v12, %v16985_v12  ;;  %v16991_v22 = vld [vmem:[#allocation135_spill] sm:$0xff]  ;;  %v5807_v14 = vmul.f32 %v13939_v45, %v13939_v45 }
 0x7bd   : > { %v5242_v54 = vpop.xlane.xlu0 %5241  ;;  %v5933_v63 = vsub.f32 %v16991_v22, %v13876_v62  ;;  %v5553_v12 = vsel %vm258_vm2, %v13736_v56, %v5052_v3  ;;  %v5554_v56 = vsel %vm258_vm2, %v13738_v44, %v5054_v17 }
 0x7be   : > { %5101 = vadd.xlane.f32.xlu1 %v13936_v43  ;;  %v6192_v59 = vmul.f32 %v13913_v38, %v6124_v34  ;;  %v6259_v35 = vadd.f32 %v13928_v51, %v6191_v18  ;;  %v16992_v34 = vld [vmem:[#allocation55_spill] sm:$0xff] }
 0x7bf   : > { %v5432_v11 = vpop.xlane.xlu1 %5431  ;;  %v5934_v18 = vsub.f32 %v16992_v34, %v13880_v53  ;;  %v5808_v53 = vmul.f32 %v13946_v41, %v13946_v41 }
 0x7c0   : > { %v5679_v52 = vsel %vm258_vm2, %v5240_v8, %v5432_v11  ;;  %5287 = vadd.xlane.f32.xlu0 %v5191_v16  ;;  %v6260_v7 = vadd.f32 %v13928_v51, %v6192_v59  ;;  %v6323_v8 = vmax.f32 %v6259_v35, 0.0 }
 0x7c1   : > { %v7834_v40 = vpop.eup %7833  ;;  %v5743_v10 = vmul.f32 0.015625, %v5679_v52  ;;  %v5434_v62 = vpop.xlane.xlu0 %5433 }
 0x7c2   : > { %v6125_v22 = vmul.f32 %v7834_v40, %v5933_v63  ;;  %v5680_v11 = vsel %vm258_vm2, %v5242_v54, %v5434_v62  ;;  %5289 = vadd.xlane.f32.xlu1 %v5192_v5  ;;  %v6324_v59 = vmax.f32 %v6260_v7, 0.0  ;;  %v13970_v54 = vmul.f32 0.015625, %v5553_v12 }
 0x7c3   : > { %v7836_v46 = vpop.eup %7835  ;;  %v5871_v16 = vsub.f32 %v5743_v10, %v5807_v14  ;;  %v5744_v34 = vmul.f32 0.015625, %v5680_v11  ;;  %v5244_v29 = vpop.xlane.xlu1 %5243  ;;  %v5193_v10 = vmul.f32 %v16989_v31, %v16989_v31  ;;  %v13976_v7 = vmul.f32 0.015625, %v5554_v56 }
 0x7c4   : > { %v6126_v2 = vmul.f32 %v7836_v46, %v5934_v18  ;;  %5479 = vadd.xlane.f32.xlu0 %v5383_v61  ;;  %v6385_v40 = vpack.c.bf16 %v6324_v59, %v6323_v8  ;;  %v6193_v3 = vmul.f32 %v13913_v38, %v6125_v22  ;;  %v5809_v31 = vmul.f32 %v13970_v54, %v13970_v54 }
 0x7c5   : > { %v5999_v35 = vadd.f32 1e-05, %v5871_v16  ;;  %v5872_v5 = vsub.f32 %v5744_v34, %v5808_v53  ;;  %v5246_v63 = vpop.xlane.xlu0 %5245  ;;  %v5385_v62 = vmul.f32 %v13923_v1, %v13923_v1  ;;  %v5810_v11 = vmul.f32 %v13976_v7, %v13976_v7  ;;  %v16993_v34 = vld [vmem:[#allocation173_spill] sm:$0xff] }
 0x7c6   : > { %5481 = vadd.xlane.f32.xlu1 %v5384_v47  ;;  %7461 = vmatprep.mubr.bf16.mxu1 %v6385_v40  ;;  %v6194_v6 = vmul.f32 %v13913_v38, %v6126_v2  ;;  %v6261_v52 = vadd.f32 %v13928_v51, %v6193_v3  ;;  %v5194_v47 = vmul.f32 %v13908_v49, %v13908_v49 }
 0x7c7   : > { %7837 = vrsqrt.f32 %v5999_v35  ;;  %v6000_v44 = vadd.f32 1e-05, %v5872_v5  ;;  %v5436_v61 = vpop.xlane.xlu1 %5435  ;;  %v13991_v49 = vadd.f32 %v13895_v23, %v13602_v57  ;;  %v5386_v53 = vmul.f32 %v13936_v43, %v13936_v43  ;;  %v16994_v57 = vld [vmem:[#allocation7_spill] sm:$0xff] }
 0x7c8   : > { %v5681_v17 = vsel %vm258_vm2, %v5244_v29, %v5436_v61  ;;  %5291 = vadd.xlane.f32.xlu0 %v5193_v10  ;;  %v6262_v18 = vadd.f32 %v13928_v51, %v6194_v6  ;;  %v6325_v29 = vmax.f32 %v6261_v52, 0.0  ;;  %v13999_v1 = vadd.f32 %v13895_v23, %v16993_v34 }
 0x7c9   : > { %7839 = vrsqrt.f32 %v6000_v44  ;;  %v5745_v2 = vmul.f32 0.015625, %v5681_v17  ;;  %v5438_v14 = vpop.xlane.xlu0 %5437  ;;  %v14003_v35 = vadd.f32 %v13895_v23, %v16994_v57  ;;  %v4811_v43 = vsel %vm258_vm2, %v13991_v49, 0.0 }
 0x7ca   : > { %v5682_v12 = vsel %vm258_vm2, %v5246_v63, %v5438_v14  ;;  %5293 = vadd.xlane.f32.xlu1 %v5194_v47  ;;  %v6326_v22 = vmax.f32 %v6262_v18, 0.0  ;;  %v5935_v10 = vsub.f32 %v13348_v39, %v13939_v45  ;;  %v14013_v44 = vsel %vm258_vm2, %v13999_v1, 0.0  ;;  %v16995_v18 = vld [vmem:[#allocation59_spill] sm:$0xff] }
 0x7cb   : > { %v5873_v8 = vsub.f32 %v5745_v2, %v5809_v31  ;;  %v5746_v59 = vmul.f32 0.015625, %v5682_v12  ;;  %v5056_v46 = vpop.xlane.xlu1 %5055  ;;  %v5936_v61 = vsub.f32 %v13354_v55, %v13946_v41  ;;  %v14022_v39 = vsub.f32 %v13991_v49, %v4811_v43 }
 0x7cc   : > { %5483 = vadd.xlane.f32.xlu0 %v5385_v62  ;;  %v6386_v16 = vpack.c.bf16 %v6326_v22, %v6325_v29  ;;  %v5555_v17 = vsel %vm258_vm2, %v13740_v0, %v5056_v46  ;;  %v14026_v31 = vadd.f32 %v13895_v23, %v16995_v18  ;;  %v14031_v55 = vsel %vm258_vm2, %v14003_v35, 0.0 }
 0x7cd   : > { %v6001_v56 = vadd.f32 1e-05, %v5873_v8  ;;  %v5874_v40 = vsub.f32 %v5746_v59, %v5810_v11  ;;  %v5058_v3 = vpop.xlane.xlu0 %5057  ;;  %v14039_v41 = vsub.f32 %v13999_v1, %v14013_v44  ;;  %v14042_v62 = vmul.f32 0.015625, %v5555_v17 }
 0x7ce   : > { %5485 = vadd.xlane.f32.xlu1 %v5386_v53  ;;  %7462 = vmatmul.mubr.bf16.vlgmr.msra.gmra.mrb[64].mxu1 %v6386_v16  ;;  %v5556_v0 = vsel %vm258_vm2, %v13744_v19, %v5058_v3  ;;  %v14051_v59 = vsub.f32 %v14003_v35, %v14031_v55  ;;  %v5937_v46 = vsub.f32 %v13351_v36, %v13970_v54  ;;  %v14061_v16 = vsel %vm258_vm2, %v14026_v31, 0.0 }
 0x7cf   : > { %7841 = vrsqrt.f32 %v6001_v56  ;;  %v6002_v5 = vadd.f32 1e-05, %v5874_v40  ;;  %v5060_v63 = vpop.xlane.xlu1 %5059  ;;  %v14047_v8 = vmul.f32 0.015625, %v5556_v0  ;;  %v5938_v40 = vsub.f32 %v13363_v42, %v13976_v7 }
 0x7d0   : > { %4975 = vadd.xlane.f32.xlu0 %v4811_v43  ;;  %v5811_v3 = vmul.f32 %v14042_v62, %v14042_v62  ;;  %v5557_v36 = vsel %vm258_vm2, %v13756_v58, %v5060_v63  ;;  %v4878_v58 = vsub.f32 %v14026_v31, %v14061_v16 }
 0x7d1   : > { %v7838_v6 = vpop.eup %7837  ;;  %7843 = vrsqrt.f32 %v6002_v5  ;;  %v5062_v52 = vpop.xlane.xlu0 %5061  ;;  %v5812_v42 = vmul.f32 %v14047_v8, %v14047_v8 }
 0x7d2   : > { %4977 = vadd.xlane.f32.xlu1 %v14013_v44  ;;  %v6127_v45 = vmul.f32 %v7838_v6, %v5935_v10  ;;  %v5558_v63 = vsel %vm258_vm2, %v13758_v13, %v5062_v52 }
 0x7d3   : > { %v7840_v47 = vpop.eup %7839  ;;  %v5248_v2 = vpop.xlane.xlu1 %5247 }
 0x7d4   : > { %5103 = vadd.xlane.f32.xlu0 %v14022_v39  ;;  %v6128_v14 = vmul.f32 %v7840_v47, %v5936_v61  ;;  %v6195_v12 = vmul.f32 %v13913_v38, %v6127_v45 }
 0x7d5   : > { %v5250_v29 = vpop.xlane.xlu0 %5249 }
 0x7d6   : > { %5105 = vadd.xlane.f32.xlu1 %v14039_v41  ;;  %v6196_v22 = vmul.f32 %v13913_v38, %v6128_v14  ;;  %v6263_v11 = vadd.f32 %v13928_v51, %v6195_v12  ;;  %v14083_v14 = vmul.f32 0.015625, %v5557_v36 }
 0x7d7   : > { %v5440_v19 = vpop.xlane.xlu1 %5439 }
 0x7d8   : > { %v5683_v53 = vsel %vm258_vm2, %v5248_v2, %v5440_v19  ;;  %4979 = vadd.xlane.f32.xlu0 %v14031_v55  ;;  %v6264_v34 = vadd.f32 %v13928_v51, %v6196_v22  ;;  %v6327_v10 = vmax.f32 %v6263_v11, 0.0  ;;  %v5195_v11 = vmul.f32 %v4811_v43, %v4811_v43 }
 0x7d9   : > { %v7842_v56 = vpop.eup %7841  ;;  %v5747_v54 = vmul.f32 0.015625, %v5683_v53  ;;  %v5442_v57 = vpop.xlane.xlu0 %5441  ;;  %v14087_v53 = vmul.f32 0.015625, %v5558_v63  ;;  %v5813_v43 = vmul.f32 %v14083_v14, %v14083_v14 }
 0x7da   : > { %v5684_v5 = vsel %vm258_vm2, %v5250_v29, %v5442_v57  ;;  %4981 = vadd.xlane.f32.xlu1 %v14061_v16  ;;  %v6328_v6 = vmax.f32 %v6264_v34, 0.0  ;;  %v6129_v61 = vmul.f32 %v7842_v56, %v5937_v46  ;;  %v5196_v56 = vmul.f32 %v14013_v44, %v14013_v44 }
 0x7db   : > { %v7844_v17 = vpop.eup %7843  ;;  %v5875_v7 = vsub.f32 %v5747_v54, %v5811_v3  ;;  %v5748_v45 = vmul.f32 0.015625, %v5684_v5  ;;  %v5252_v47 = vpop.xlane.xlu1 %5251  ;;  %v5387_v57 = vmul.f32 %v14022_v39, %v14022_v39  ;;  %v5814_v44 = vmul.f32 %v14087_v53, %v14087_v53 }
 0x7dc   : > { %5107 = vadd.xlane.f32.xlu0 %v14051_v59  ;;  %v6387_v18 = vpack.c.bf16 %v6328_v6, %v6327_v10  ;;  %v6130_v2 = vmul.f32 %v7844_v17, %v5938_v40  ;;  %v6197_v0 = vmul.f32 %v13913_v38, %v6129_v61  ;;  %v5197_v39 = vmul.f32 %v14031_v55, %v14031_v55 }
 0x7dd   : > { %v6003_v12 = vadd.f32 1e-05, %v5875_v7  ;;  %v5876_v29 = vsub.f32 %v5748_v45, %v5812_v42  ;;  %v5254_v22 = vpop.xlane.xlu0 %5253  ;;  %v5388_v42 = vmul.f32 %v14039_v41, %v14039_v41  ;;  %v5198_v41 = vmul.f32 %v14061_v16, %v14061_v16 }
 0x7de   : > { %5109 = vadd.xlane.f32.xlu1 %v4878_v58  ;;  %7465 = vmatprep.mubr.bf16.mxu1 %v6387_v18  ;;  %v6198_v19 = vmul.f32 %v13913_v38, %v6130_v2  ;;  %v6265_v46 = vadd.f32 %v13928_v51, %v6197_v0  ;;  %v14108_v0 = vadd.f32 %v13895_v23, %v13618_v28 }
 0x7df   : > { %7845 = vrsqrt.f32 %v6003_v12  ;;  %v6004_v13 = vadd.f32 1e-05, %v5876_v29  ;;  %v5444_v52 = vpop.xlane.xlu1 %5443  ;;  %v5939_v12 = vsub.f32 %v13384_v26, %v14042_v62  ;;  %v5940_v55 = vsub.f32 %v13390_v25, %v14047_v8 }
 0x7e0   : > { %v5685_v34 = vsel %vm258_vm2, %v5252_v47, %v5444_v52  ;;  %5295 = vadd.xlane.f32.xlu0 %v5195_v11  ;;  %v6266_v40 = vadd.f32 %v13928_v51, %v6198_v19  ;;  %v6329_v5 = vmax.f32 %v6265_v46, 0.0  ;;  %v5389_v28 = vmul.f32 %v14051_v59, %v14051_v59 }
 0x7e1   : > { %7847 = vrsqrt.f32 %v6004_v13  ;;  %v5749_v3 = vmul.f32 0.015625, %v5685_v34  ;;  %v5446_v36 = vpop.xlane.xlu0 %5445  ;;  %v14123_v62 = vadd.f32 %v13895_v23, %v13624_v15  ;;  %v5390_v46 = vmul.f32 %v4878_v58, %v4878_v58 }
 0x7e2   : > { %v5686_v54 = vsel %vm258_vm2, %v5254_v22, %v5446_v36  ;;  %5297 = vadd.xlane.f32.xlu1 %v5196_v56  ;;  %v6330_v10 = vmax.f32 %v6266_v40, 0.0 }
 0x7e3   : > { %v5877_v6 = vsub.f32 %v5749_v3, %v5813_v43  ;;  %v5750_v61 = vmul.f32 0.015625, %v5686_v54  ;;  %v5064_v17 = vpop.xlane.xlu1 %5063  ;;  %v5941_v43 = vsub.f32 %v13387_v30, %v14083_v14 }
 0x7e4   : > { %5487 = vadd.xlane.f32.xlu0 %v5387_v57  ;;  %v6388_v7 = vpack.c.bf16 %v6330_v10, %v6329_v5  ;;  %v5559_v11 = vsel %vm258_vm2, %v13762_v24, %v5064_v17  ;;  %v14131_v24 = vsel %vm258_vm2, %v14108_v0, 0.0  ;;  %v5942_v57 = vsub.f32 %v13399_v50, %v14087_v53 }
 0x7e5   : > { %v6005_v45 = vadd.f32 1e-05, %v5877_v6  ;;  %v5878_v47 = vsub.f32 %v5750_v61, %v5814_v44  ;;  %v5066_v63 = vpop.xlane.xlu0 %5065  ;;  %v14134_v13 = vmul.f32 0.015625, %v5559_v11  ;;  %v14146_v40 = vsub.f32 %v14108_v0, %v14131_v24 }
 0x7e6   : > { %5489 = vadd.xlane.f32.xlu1 %v5388_v42  ;;  %7466 = vmatmul.mubr.bf16.gmra.mrb[68].mxu1 %v6388_v7  ;;  %v5560_v25 = vsel %vm258_vm2, %v13766_v60, %v5066_v63  ;;  %v14140_v60 = vadd.f32 %v13895_v23, %v13616_v20  ;;  %v14156_v20 = vsel %vm258_vm2, %v14123_v62, 0.0 }
 0x7e7   : > { %7849 = vrsqrt.f32 %v6005_v45  ;;  %v6006_v18 = vadd.f32 1e-05, %v5878_v47  ;;  %v5068_v2 = vpop.xlane.xlu1 %5067  ;;  %v14142_v34 = vmul.f32 0.015625, %v5560_v25  ;;  %v5815_v5 = vmul.f32 %v14134_v13, %v14134_v13 }
 0x7e8   : > { %5299 = vadd.xlane.f32.xlu0 %v5197_v39  ;;  %v5561_v30 = vsel %vm258_vm2, %v13772_v4, %v5068_v2  ;;  %v14173_v4 = vsub.f32 %v14123_v62, %v14156_v20  ;;  %v14182_v2 = vadd.f32 %v13895_v23, %v13622_v32  ;;  %v4817_v32 = vsel %vm258_vm2, %v14140_v60, 0.0 }
 0x7e9   : > { %v7846_v29 = vpop.eup %7845  ;;  %7851 = vrsqrt.f32 %v6006_v18  ;;  %v5070_v22 = vpop.xlane.xlu0 %5069  ;;  %v5816_v50 = vmul.f32 %v14142_v34, %v14142_v34 }
 0x7ea   : > { %5301 = vadd.xlane.f32.xlu1 %v5198_v41  ;;  %v6131_v19 = vmul.f32 %v7846_v29, %v5939_v12  ;;  %v5562_v47 = vsel %vm258_vm2, %v13776_v27, %v5070_v22  ;;  %v14184_v12 = vmul.f32 0.015625, %v5561_v30 }
 0x7eb   : > { %v7848_v26 = vpop.eup %7847  ;;  %v5256_v16 = vpop.xlane.xlu1 %5255  ;;  %v14189_v11 = vmul.f32 0.015625, %v5562_v47 }
 0x7ec   : > { %5491 = vadd.xlane.f32.xlu0 %v5389_v28  ;;  %v6132_v8 = vmul.f32 %v7848_v26, %v5940_v55  ;;  %v6199_v59 = vmul.f32 %v13913_v38, %v6131_v19 }
 0x7ed   : > { %v5258_v52 = vpop.xlane.xlu0 %5257 }
 0x7ee   : > { %5493 = vadd.xlane.f32.xlu1 %v5390_v46  ;;  %v6200_v15 = vmul.f32 %v13913_v38, %v6132_v8  ;;  %v6267_v58 = vadd.f32 %v13928_v51, %v6199_v59  ;;  %v5817_v46 = vmul.f32 %v14184_v12, %v14184_v12  ;;  %v4818_v59 = vsel %vm258_vm2, %v14182_v2, 0.0 }
 0x7ef   : > { %v5448_v56 = vpop.xlane.xlu1 %5447 }
 0x7f0   : > { %v5687_v3 = vsel %vm258_vm2, %v5256_v16, %v5448_v56  ;;  %4983 = vadd.xlane.f32.xlu0 %v14131_v24  ;;  %v6268_v36 = vadd.f32 %v13928_v51, %v6200_v15  ;;  %v6331_v6 = vmax.f32 %v6267_v58, 0.0  ;;  %v4881_v15 = vsub.f32 %v14140_v60, %v4817_v32 }
 0x7f1   : > { %v7850_v54 = vpop.eup %7849  ;;  %v5751_v14 = vmul.f32 0.015625, %v5687_v3  ;;  %v5450_v10 = vpop.xlane.xlu0 %5449 }
 0x7f2   : > { %v5688_v44 = vsel %vm258_vm2, %v5258_v52, %v5450_v10  ;;  %4985 = vadd.xlane.f32.xlu1 %v14156_v20  ;;  %v6332_v61 = vmax.f32 %v6268_v36, 0.0  ;;  %v6133_v17 = vmul.f32 %v7850_v54, %v5941_v43  ;;  %v5818_v43 = vmul.f32 %v14189_v11, %v14189_v11 }
 0x7f3   : > { %v7852_v42 = vpop.eup %7851  ;;  %v5879_v53 = vsub.f32 %v5751_v14, %v5815_v5  ;;  %v5752_v7 = vmul.f32 0.015625, %v5688_v44  ;;  %v5260_v45 = vpop.xlane.xlu1 %5259  ;;  %v5199_v44 = vmul.f32 %v14131_v24, %v14131_v24 }
 0x7f4   : > { %5111 = vadd.xlane.f32.xlu0 %v14146_v40  ;;  %v6389_v63 = vpack.c.bf16 %v6332_v61, %v6331_v6  ;;  %v6134_v39 = vmul.f32 %v7852_v42, %v5942_v57  ;;  %v6201_v18 = vmul.f32 %v13913_v38, %v6133_v17  ;;  %v4882_v57 = vsub.f32 %v14182_v2, %v4818_v59 }
 0x7f5   : > { %v6007_v41 = vadd.f32 1e-05, %v5879_v53  ;;  %v5880_v29 = vsub.f32 %v5752_v7, %v5816_v50  ;;  %v5262_v55 = vpop.xlane.xlu0 %5261  ;;  %v5943_v17 = vsub.f32 %v13420_v48, %v14134_v13  ;;  %v5200_v42 = vmul.f32 %v14156_v20, %v14156_v20 }
 0x7f6   : > { %5113 = vadd.xlane.f32.xlu1 %v14173_v4  ;;  %7469 = vmatprep.mubr.bf16.mxu1 %v6389_v63  ;;  %v6202_v27 = vmul.f32 %v13913_v38, %v6134_v39  ;;  %v6269_v22 = vadd.f32 %v13928_v51, %v6201_v18  ;;  %v5944_v7 = vsub.f32 %v13426_v9, %v14142_v34 }
 0x7f7   : > { %7853 = vrsqrt.f32 %v6007_v41  ;;  %v6008_v28 = vadd.f32 1e-05, %v5880_v29  ;;  %v5452_v19 = vpop.xlane.xlu1 %5451  ;;  %v5392_v63 = vmul.f32 %v14173_v4, %v14173_v4  ;;  %v5201_v18 = vmul.f32 %v4817_v32, %v4817_v32 }
 0x7f8   : > { %v5689_v26 = vsel %vm258_vm2, %v5260_v45, %v5452_v19  ;;  %4987 = vadd.xlane.f32.xlu0 %v4817_v32  ;;  %v6270_v16 = vadd.f32 %v13928_v51, %v6202_v27  ;;  %v6333_v58 = vmax.f32 %v6269_v22, 0.0  ;;  %v5391_v45 = vmul.f32 %v14146_v40, %v14146_v40  ;;  %v16996_v22 = vld [vmem:[#allocation153_spill] sm:$0xff] }
 0x7f9   : > { %7855 = vrsqrt.f32 %v6008_v28  ;;  %v5753_v25 = vmul.f32 0.015625, %v5689_v26  ;;  %v5454_v8 = vpop.xlane.xlu0 %5453  ;;  %v5393_v27 = vmul.f32 %v4881_v15, %v4881_v15  ;;  %v5945_v4 = vsub.f32 %v16996_v22, %v14184_v12 }
 0x7fa   : > { %v5690_v52 = vsel %vm258_vm2, %v5262_v55, %v5454_v8  ;;  %4989 = vadd.xlane.f32.xlu1 %v4818_v59  ;;  %v6334_v56 = vmax.f32 %v6270_v16, 0.0  ;;  %v5394_v19 = vmul.f32 %v4882_v57, %v4882_v57  ;;  %v16997_v16 = vld [vmem:[#allocation154_spill] sm:$0xff]  ;;  %v16998_v8 = vld [vmem:[#allocation97_spill] sm:$0xff] }
 0x7fb   : > { %v5881_v3 = vsub.f32 %v5753_v25, %v5817_v46  ;;  %v5754_v36 = vmul.f32 0.015625, %v5690_v52  ;;  %v5072_v54 = vpop.xlane.xlu1 %5071  ;;  %v5946_v46 = vsub.f32 %v16997_v16, %v14189_v11 }
 0x7fc   : > { %5115 = vadd.xlane.f32.xlu0 %v4881_v15  ;;  %v6390_v5 = vpack.c.bf16 %v6334_v56, %v6333_v58  ;;  %v5563_v24 = vsel %vm258_vm2, %v13780_v33, %v5072_v54 }
 0x7fd   : > { %v6009_v30 = vadd.f32 1e-05, %v5881_v3  ;;  %v5882_v14 = vsub.f32 %v5754_v36, %v5818_v43  ;;  %v5074_v10 = vpop.xlane.xlu0 %5073  ;;  %v14227_v39 = vmul.f32 0.015625, %v5563_v24  ;;  %v16999_v36 = vld [vmem:[#allocation102_spill] sm:$0xff] }
 0x7fe   : > { %5117 = vadd.xlane.f32.xlu1 %v4882_v57  ;;  %7470 = vmatmul.mubr.bf16.gmra.mrb[72].mxu1 %v6390_v5  ;;  %v5564_v20 = vsel %vm258_vm2, %v13786_v21, %v5074_v10  ;;  %v5202_v21 = vmul.f32 %v4818_v59, %v4818_v59  ;;  %v14249_v11 = vadd.f32 %v13895_v23, %v16999_v36 }
 0x7ff   : > { %7857 = vrsqrt.f32 %v6009_v30  ;;  %v6010_v6 = vadd.f32 1e-05, %v5882_v14  ;;  %v5076_v61 = vpop.xlane.xlu1 %5075  ;;  %v14231_v29 = vmul.f32 0.015625, %v5564_v20  ;;  %v5819_v25 = vmul.f32 %v14227_v39, %v14227_v39  ;;  %v17000_v14 = vld [vmem:[#allocation76_spill] sm:$0xff] }
 0x800   : > { %5303 = vadd.xlane.f32.xlu0 %v5199_v44  ;;  %v5565_v59 = vsel %vm258_vm2, %v16998_v8, %v5076_v61  ;;  %v17003_v8 = vld [vmem:[#allocation172_spill] sm:$0xff] }
 0x801   : > { %v7854_v50 = vpop.eup %7853  ;;  %7859 = vrsqrt.f32 %v6010_v6  ;;  %v5078_v53 = vpop.xlane.xlu0 %5077  ;;  %v5820_v54 = vmul.f32 %v14231_v29, %v14231_v29 }
 0x802   : > { %5305 = vadd.xlane.f32.xlu1 %v5200_v42  ;;  %v6135_v47 = vmul.f32 %v7854_v50, %v5943_v17  ;;  %v5566_v10 = vsel %vm258_vm2, %v17000_v14, %v5078_v53  ;;  %v17001_v17 = vld [vmem:[#allocation6_spill] sm:$0xff]  ;;  %v14261_v50 = vmul.f32 0.015625, %v5565_v59  ;;  %v14290_v59 = vadd.f32 %v13895_v23, %v17003_v8 }
 0x803   : > { %v7856_v48 = vpop.eup %7855  ;;  %v5264_v13 = vpop.xlane.xlu1 %5263  ;;  %v14259_v42 = vadd.f32 %v13895_v23, %v17001_v17 }
 0x804   : > { %5495 = vadd.xlane.f32.xlu0 %v5391_v45  ;;  %v6136_v9 = vmul.f32 %v7856_v48, %v5944_v7  ;;  %v6203_v34 = vmul.f32 %v13913_v38, %v6135_v47  ;;  %v14265_v48 = vmul.f32 0.015625, %v5566_v10  ;;  %v17006_v10 = vld [vmem:[#allocation145_spill] sm:$0xff] }
 0x805   : > { %v5266_v33 = vpop.xlane.xlu0 %5265 }
 0x806   : > { %5497 = vadd.xlane.f32.xlu1 %v5392_v63  ;;  %v6204_v40 = vmul.f32 %v13913_v38, %v6136_v9  ;;  %v6271_v41 = vadd.f32 %v13928_v51, %v6203_v34  ;;  %v4819_v63 = vsel %vm258_vm2, %v14249_v11, 0.0 }
 0x807   : > { %v5456_v55 = vpop.xlane.xlu1 %5455 }
 0x808   : > { %v5691_v28 = vsel %vm258_vm2, %v5264_v13, %v5456_v55  ;;  %5307 = vadd.xlane.f32.xlu0 %v5201_v18  ;;  %v6272_v26 = vadd.f32 %v13928_v51, %v6204_v40  ;;  %v6335_v58 = vmax.f32 %v6271_v41, 0.0  ;;  %v4820_v41 = vsel %vm258_vm2, %v14259_v42, 0.0 }
 0x809   : > { %v7858_v32 = vpop.eup %7857  ;;  %v5755_v52 = vmul.f32 0.015625, %v5691_v28  ;;  %v5458_v12 = vpop.xlane.xlu0 %5457 }
 0x80a   : > { %v5692_v15 = vsel %vm258_vm2, %v5266_v33, %v5458_v12  ;;  %5309 = vadd.xlane.f32.xlu1 %v5202_v21  ;;  %v6336_v56 = vmax.f32 %v6272_v26, 0.0  ;;  %v6137_v43 = vmul.f32 %v7858_v32, %v5945_v4  ;;  %v5821_v33 = vmul.f32 %v14261_v50, %v14261_v50  ;;  %v17002_v4 = vld [vmem:[#allocation99_spill] sm:$0xff] }
 0x80b   : > { %v7860_v3 = vpop.eup %7859  ;;  %v5883_v57 = vsub.f32 %v5755_v52, %v5819_v25  ;;  %v5756_v5 = vmul.f32 0.015625, %v5692_v15  ;;  %v5268_v30 = vpop.xlane.xlu1 %5267  ;;  %v4883_v21 = vsub.f32 %v14249_v11, %v4819_v63  ;;  %v14283_v28 = vadd.f32 %v13895_v23, %v17002_v4 }
 0x80c   : > { %5499 = vadd.xlane.f32.xlu0 %v5393_v27  ;;  %v6391_v44 = vpack.c.bf16 %v6336_v56, %v6335_v58  ;;  %v6138_v6 = vmul.f32 %v7860_v3, %v5946_v46  ;;  %v6205_v61 = vmul.f32 %v13913_v38, %v6137_v43  ;;  %v4884_v46 = vsub.f32 %v14259_v42, %v4820_v41  ;;  %v17004_v3 = vld [vmem:[#allocation62_spill] sm:$0xff] }
 0x80d   : > { %v6011_v7 = vadd.f32 1e-05, %v5883_v57  ;;  %v5884_v24 = vsub.f32 %v5756_v5, %v5820_v54  ;;  %v5270_v45 = vpop.xlane.xlu0 %5269  ;;  %v4821_v43 = vsel %vm258_vm2, %v14283_v28, 0.0  ;;  %v5947_v36 = vsub.f32 %v17004_v3, %v14227_v39 }
 0x80e   : > { %5501 = vadd.xlane.f32.xlu1 %v5394_v19  ;;  %7473 = vmatprep.mubr.bf16.mxu1 %v6391_v44  ;;  %v6206_v47 = vmul.f32 %v13913_v38, %v6138_v6  ;;  %v6273_v53 = vadd.f32 %v13928_v51, %v6205_v61  ;;  %v5822_v19 = vmul.f32 %v14265_v48, %v14265_v48  ;;  %v14300_v5 = vsel %vm258_vm2, %v14290_v59, 0.0 }
 0x80f   : > { %7861 = vrsqrt.f32 %v6011_v7  ;;  %v6012_v13 = vadd.f32 1e-05, %v5884_v24  ;;  %v5460_v20 = vpop.xlane.xlu1 %5459  ;;  %v14309_v39 = vsub.f32 %v14283_v28, %v4821_v43  ;;  %v17007_v7 = vld [vmem:[#allocation70_spill] sm:$0xff]  ;;  %v5395_v4 = vmul.f32 %v4883_v21, %v4883_v21 }
 0x810   : > { %v5693_v9 = vsel %vm258_vm2, %v5268_v30, %v5460_v20  ;;  %4991 = vadd.xlane.f32.xlu0 %v4819_v63  ;;  %v6274_v34 = vadd.f32 %v13928_v51, %v6206_v47  ;;  %v6337_v27 = vmax.f32 %v6273_v53, 0.0  ;;  %v17005_v30 = vld [vmem:[#allocation150_spill] sm:$0xff]  ;;  %v5203_v20 = vmul.f32 %v4819_v63, %v4819_v63 }
 0x811   : > { %7863 = vrsqrt.f32 %v6012_v13  ;;  %v5757_v18 = vmul.f32 0.015625, %v5693_v9  ;;  %v5462_v40 = vpop.xlane.xlu0 %5461  ;;  %v5948_v14 = vsub.f32 %v17005_v30, %v14231_v29  ;;  %v14317_v29 = vsub.f32 %v14290_v59, %v14300_v5  ;;  %v17009_v63 = vld [vmem:[#allocation74_spill] sm:$0xff] }
 0x812   : > { %v5694_v55 = vsel %vm258_vm2, %v5270_v45, %v5462_v40  ;;  %4993 = vadd.xlane.f32.xlu1 %v4820_v41  ;;  %v6338_v22 = vmax.f32 %v6274_v34, 0.0  ;;  %v5204_v40 = vmul.f32 %v4820_v41, %v4820_v41  ;;  %v5396_v30 = vmul.f32 %v4884_v46, %v4884_v46 }
 0x813   : > { %v5885_v26 = vsub.f32 %v5757_v18, %v5821_v33  ;;  %v5758_v32 = vmul.f32 0.015625, %v5694_v55  ;;  %v5080_v16 = vpop.xlane.xlu1 %5079  ;;  %v17008_v55 = vld [vmem:[#allocation75_spill] sm:$0xff] }
 0x814   : > { %5119 = vadd.xlane.f32.xlu0 %v4883_v21  ;;  %v6392_v25 = vpack.c.bf16 %v6338_v22, %v6337_v27  ;;  %v5567_v44 = vsel %vm258_vm2, %v17006_v10, %v5080_v16  ;;  %v5949_v27 = vsub.f32 %v17008_v55, %v14261_v50 }
 0x815   : > { %v6013_v52 = vadd.f32 1e-05, %v5885_v26  ;;  %v5886_v12 = vsub.f32 %v5758_v32, %v5822_v19  ;;  %v5082_v15 = vpop.xlane.xlu0 %5081  ;;  %v14320_v53 = vmul.f32 0.015625, %v5567_v44  ;;  %v5950_v32 = vsub.f32 %v17009_v63, %v14265_v48 }
 0x816   : > { %5121 = vadd.xlane.f32.xlu1 %v4884_v46  ;;  %7474 = vmatmul.mubr.bf16.gmra.mrb[76].mxu1 %v6392_v25  ;;  %v5568_v24 = vsel %vm258_vm2, %v17007_v7, %v5082_v15  ;;  %v17010_v25 = vld [vmem:[#allocation139_spill] sm:$0xff] }
 0x817   : > { %7865 = vrsqrt.f32 %v6013_v52  ;;  %v6014_v58 = vadd.f32 1e-05, %v5886_v12  ;;  %v5084_v56 = vpop.xlane.xlu1 %5083  ;;  %v14325_v33 = vmul.f32 0.015625, %v5568_v24  ;;  %v5823_v16 = vmul.f32 %v14320_v53, %v14320_v53 }
 0x818   : > { %4995 = vadd.xlane.f32.xlu0 %v4821_v43  ;;  %v5569_v41 = vsel %vm258_vm2, %v17010_v25, %v5084_v56 }
 0x819   : > { %v7862_v54 = vpop.eup %7861  ;;  %7867 = vrsqrt.f32 %v6014_v58  ;;  %v5086_v57 = vpop.xlane.xlu0 %5085  ;;  %v5824_v48 = vmul.f32 %v14325_v33, %v14325_v33 }
 0x81a   : > { %4997 = vadd.xlane.f32.xlu1 %v14300_v5  ;;  %v6139_v6 = vmul.f32 %v7862_v54, %v5947_v36 }
 0x81b   : > { %v7864_v61 = vpop.eup %7863  ;;  %v5272_v17 = vpop.xlane.xlu1 %5271 }
 0x81c   : > { %5123 = vadd.xlane.f32.xlu0 %v14309_v39  ;;  %v6140_v45 = vmul.f32 %v7864_v61, %v5948_v14  ;;  %v6207_v47 = vmul.f32 %v13913_v38, %v6139_v6  ;;  %v17011_v14 = vld [vmem:[#allocation88_spill] sm:$0xff]  ;;  %v14347_v61 = vmul.f32 0.015625, %v5569_v41  ;;  %v5398_v41 = vmul.f32 %v14317_v29, %v14317_v29 }
 0x81d   : > { %v5274_v13 = vpop.xlane.xlu0 %5273  ;;  %v5570_v56 = vsel %vm258_vm2, %v17011_v14, %v5086_v57 }
 0x81e   : > { %5125 = vadd.xlane.f32.xlu1 %v14317_v29  ;;  %v6208_v9 = vmul.f32 %v13913_v38, %v6140_v45  ;;  %v6275_v34 = vadd.f32 %v13928_v51, %v6207_v47  ;;  %v5205_v45 = vmul.f32 %v4821_v43, %v4821_v43  ;;  %v5825_v43 = vmul.f32 %v14347_v61, %v14347_v61 }
 0x81f   : > { %v5464_v18 = vpop.xlane.xlu1 %5463 }
 0x820   : > { %v5695_v22 = vsel %vm258_vm2, %v5272_v17, %v5464_v18  ;;  %5311 = vadd.xlane.f32.xlu0 %v5203_v20  ;;  %v6276_v19 = vadd.f32 %v13928_v51, %v6208_v9  ;;  %v6339_v21 = vmax.f32 %v6275_v34, 0.0  ;;  %v5206_v34 = vmul.f32 %v14300_v5, %v14300_v5 }
 0x821   : > { %v7866_v26 = vpop.eup %7865  ;;  %v5759_v8 = vmul.f32 0.015625, %v5695_v22  ;;  %v5466_v50 = vpop.xlane.xlu0 %5465  ;;  %v5397_v22 = vmul.f32 %v14309_v39, %v14309_v39 }
 0x822   : > { %v5696_v52 = vsel %vm258_vm2, %v5274_v13, %v5466_v50  ;;  %5313 = vadd.xlane.f32.xlu1 %v5204_v40  ;;  %v6340_v12 = vmax.f32 %v6276_v19, 0.0  ;;  %v6141_v15 = vmul.f32 %v7866_v26, %v5949_v27  ;;  %v14351_v13 = vmul.f32 0.015625, %v5570_v56  ;;  %v17012_v26 = vld [vmem:[#allocation115_spill] sm:$0xff]  ;;  %v17013_v50 = vld [vmem:[#allocation174_spill] sm:$0xff]  ;;  %v17016_v56 = vld [vmem:[#allocation133_spill] sm:$0xff] }
 0x823   : > { %v7868_v58 = vpop.eup %7867  ;;  %v5887_v3 = vsub.f32 %v5759_v8, %v5823_v16  ;;  %v5760_v36 = vmul.f32 0.015625, %v5696_v52  ;;  %v5276_v54 = vpop.xlane.xlu1 %5275  ;;  %v14366_v5 = vadd.f32 %v13895_v23, %v17012_v26  ;;  %v14374_v39 = vadd.f32 %v13895_v23, %v17013_v50  ;;  %v17020_v26 = vld [vmem:[#allocation4_spill] sm:$0xff] }
 0x824   : > { %5503 = vadd.xlane.f32.xlu0 %v5395_v4  ;;  %v6393_v10 = vpack.c.bf16 %v6340_v12, %v6339_v21  ;;  %v6142_v44 = vmul.f32 %v7868_v58, %v5950_v32  ;;  %v6209_v6 = vmul.f32 %v13913_v38, %v6141_v15  ;;  %v5826_v63 = vmul.f32 %v14351_v13, %v14351_v13  ;;  %v17014_v15 = vld [vmem:[#allocation40_spill] sm:$0xff] }
 0x825   : > { %v6015_v17 = vadd.f32 1e-05, %v5887_v3  ;;  %v5888_v7 = vsub.f32 %v5760_v36, %v5824_v48  ;;  %v5278_v24 = vpop.xlane.xlu0 %5277  ;;  %v14378_v58 = vadd.f32 %v13895_v23, %v17014_v15  ;;  %v14383_v29 = vsel %vm258_vm2, %v14366_v5, 0.0  ;;  %v17015_v36 = vld [vmem:[#allocation152_spill] sm:$0xff] }
 0x826   : > { %5505 = vadd.xlane.f32.xlu1 %v5396_v30  ;;  %7477 = vmatprep.mubr.bf16.mxu1 %v6393_v10  ;;  %v6210_v47 = vmul.f32 %v13913_v38, %v6142_v44  ;;  %v6277_v46 = vadd.f32 %v13928_v51, %v6209_v6  ;;  %v14391_v23 = vsel %vm258_vm2, %v14374_v39, 0.0  ;;  %v5952_v10 = vsub.f32 %v17016_v56, %v14325_v33  ;;  %v17017_v44 = vld [vmem:[#allocation18_spill] sm:$0xff] }
 0x827   : > { %7869 = vrsqrt.f32 %v6015_v17  ;;  %v6016_v57 = vadd.f32 1e-05, %v5888_v7  ;;  %v5468_v20 = vpop.xlane.xlu1 %5467 }
 0x828   : > { %v5697_v9 = vsel %vm258_vm2, %v5276_v54, %v5468_v20  ;;  %5315 = vadd.xlane.f32.xlu0 %v5205_v45  ;;  %v6278_v18 = vadd.f32 %v13928_v51, %v6210_v47  ;;  %v6341_v4 = vmax.f32 %v6277_v46, 0.0  ;;  %v5951_v54 = vsub.f32 %v17015_v36, %v14320_v53  ;;  %v17018_v45 = vld [vmem:[#allocation110_spill] sm:$0xff] }
 0x829   : > { %7871 = vrsqrt.f32 %v6016_v57  ;;  %v5761_v40 = vmul.f32 0.015625, %v5697_v9  ;;  %v5470_v55 = vpop.xlane.xlu0 %5469  ;;  %v14401_v53 = vsub.f32 %v14366_v5, %v14383_v29  ;;  %v14415_v46 = vsel %vm258_vm2, %v14378_v58, 0.0  ;;  %v17019_v57 = vld [vmem:[#allocation158_spill] sm:$0xff] }
 0x82a   : > { %v5698_v27 = vsel %vm258_vm2, %v5278_v24, %v5470_v55  ;;  %5317 = vadd.xlane.f32.xlu1 %v5206_v34  ;;  %v6342_v19 = vmax.f32 %v6278_v18, 0.0  ;;  %v14406_v24 = vld [vmem:[%s15412_s4 + $0x6] ss:$0 sm:$0xff]  ;;  %v14423_v9 = vsub.f32 %v14374_v39, %v14391_v23  ;;  %v14432_v55 = vld [vmem:[%s15412_s4 + $0x7] ss:$0 sm:$0xff] }
 0x82b   : > { %v5889_v32 = vsub.f32 %v5761_v40, %v5825_v43  ;;  %v5762_v16 = vmul.f32 0.015625, %v5698_v27  ;;  %v5088_v25 = vpop.xlane.xlu1 %5087  ;;  %v14410_v33 = vadd.f32 %v14406_v24, %v17018_v45 }
 0x82c   : > { %5507 = vadd.xlane.f32.xlu0 %v5397_v22  ;;  %v6394_v8 = vpack.c.bf16 %v6342_v19, %v6341_v4  ;;  %v5571_v6 = vsel %vm258_vm2, %v17017_v44, %v5088_v25 }
 0x82d   : > { %v6017_v52 = vadd.f32 1e-05, %v5889_v32  ;;  %v5890_v21 = vsub.f32 %v5762_v16, %v5826_v63  ;;  %v5090_v12 = vpop.xlane.xlu0 %5089  ;;  %v14426_v43 = vmul.f32 0.015625, %v5571_v6  ;;  %v5953_v63 = vsub.f32 %v17020_v26, %v14347_v61  ;;  %v17021_v61 = vld [vmem:[#allocation39_spill] sm:$0xff] }
 0x82e   : > { %5509 = vadd.xlane.f32.xlu1 %v5398_v41  ;;  %7478 = vmatmul.mubr.bf16.gmra.mrb[80].mxu1 %v6394_v8  ;;  %v5572_v20 = vsel %vm258_vm2, %v17019_v57, %v5090_v12  ;;  %v14450_v16 = vsel %vm258_vm2, %v14410_v33, 0.0  ;;  %v5954_v8 = vsub.f32 %v17021_v61, %v14351_v13 }
 0x82f   : > { %7873 = vrsqrt.f32 %v6017_v52  ;;  %v6018_v48 = vadd.f32 1e-05, %v5890_v21  ;;  %v5092_v3 = vpop.xlane.xlu1 %5091  ;;  %v14436_v4 = vmul.f32 0.015625, %v5572_v20  ;;  %v5827_v50 = vmul.f32 %v14426_v43, %v14426_v43  ;;  %v17022_v52 = vld [vmem:[#allocation113_spill] sm:$0xff] }
 0x830   : > { %4999 = vadd.xlane.f32.xlu0 %v14383_v29  ;;  %v5573_v21 = vsel %vm258_vm2, %v17022_v52, %v5092_v3  ;;  %v4890_v3 = vsub.f32 %v14410_v33, %v14450_v16  ;;  %v5399_v52 = vmul.f32 %v14401_v53, %v14401_v53 }
 0x831   : > { %v7870_v30 = vpop.eup %7869  ;;  %7875 = vrsqrt.f32 %v6018_v48  ;;  %v5094_v14 = vpop.xlane.xlu0 %5093  ;;  %v5828_v13 = vmul.f32 %v14436_v4, %v14436_v4  ;;  %v14477_v20 = vmul.f32 0.015625, %v5573_v21 }
 0x832   : > { %5001 = vadd.xlane.f32.xlu1 %v14391_v23  ;;  %v6143_v17 = vmul.f32 %v7870_v30, %v5951_v54 }
 0x833   : > { %v7872_v7 = vpop.eup %7871  ;;  %v5280_v47 = vpop.xlane.xlu1 %5279 }
 0x834   : > { %5127 = vadd.xlane.f32.xlu0 %v14401_v53  ;;  %v6144_v34 = vmul.f32 %v7872_v7, %v5952_v10  ;;  %v6211_v18 = vmul.f32 %v13913_v38, %v6143_v17  ;;  %v14440_v38 = vsub.f32 %v14378_v58, %v14415_v46  ;;  %v17023_v17 = vld [vmem:[#allocation159_spill] sm:$0xff]  ;;  %v5209_v53 = vmul.f32 %v14415_v46, %v14415_v46 }
 0x835   : > { %v5282_v40 = vpop.xlane.xlu0 %5281  ;;  %v5574_v7 = vsel %vm258_vm2, %v17023_v17, %v5094_v14  ;;  %v17024_v17 = vld [vmem:[#allocation149_spill] sm:$0xff] }
 0x836   : > { %5129 = vadd.xlane.f32.xlu1 %v14423_v9  ;;  %v6212_v27 = vmul.f32 %v14432_v55, %v6144_v34  ;;  %v6279_v22 = vadd.f32 %v13928_v51, %v6211_v18  ;;  %v14455_v51 = vld [vmem:[%s15412_s4 + $0x8] ss:$0 sm:$0xff] }
 0x837   : > { %v5472_v19 = vpop.xlane.xlu1 %5471 }
 0x838   : > { %v5699_v32 = vsel %vm258_vm2, %v5280_v47, %v5472_v19  ;;  %5003 = vadd.xlane.f32.xlu0 %v14415_v46  ;;  %v6280_v25 = vadd.f32 %v14455_v51, %v6212_v27  ;;  %v6343_v36 = vmax.f32 %v6279_v22, 0.0  ;;  %v5207_v27 = vmul.f32 %v14383_v29, %v14383_v29 }
 0x839   : > { %v7874_v41 = vpop.eup %7873  ;;  %v5763_v12 = vmul.f32 0.015625, %v5699_v32  ;;  %v5474_v15 = vpop.xlane.xlu0 %5473  ;;  %v14483_v19 = vmul.f32 0.015625, %v5574_v7  ;;  %v5829_v29 = vmul.f32 %v14477_v20, %v14477_v20  ;;  %v5955_v7 = vsub.f32 %v17024_v17, %v14426_v43 }
 0x83a   : > { %v5700_v48 = vsel %vm258_vm2, %v5282_v40, %v5474_v15  ;;  %5005 = vadd.xlane.f32.xlu1 %v14450_v16  ;;  %v6344_v54 = vmax.f32 %v6280_v25, 0.0  ;;  %v6145_v30 = vmul.f32 %v7874_v41, %v5953_v63  ;;  %v5208_v25 = vmul.f32 %v14391_v23, %v14391_v23 }
 0x83b   : > { %v7876_v56 = vpop.eup %7875  ;;  %v5891_v10 = vsub.f32 %v5763_v12, %v5827_v50  ;;  %v5764_v44 = vmul.f32 0.015625, %v5700_v48  ;;  %v5284_v6 = vpop.xlane.xlu1 %5283  ;;  %v5830_v23 = vmul.f32 %v14483_v19, %v14483_v19 }
 0x83c   : > { %5131 = vadd.xlane.f32.xlu0 %v14440_v38  ;;  %v6395_v45 = vpack.c.bf16 %v6344_v54, %v6343_v36  ;;  %v6146_v47 = vmul.f32 %v7876_v56, %v5954_v8  ;;  %v6213_v57 = vmul.f32 %v14432_v55, %v6145_v30  ;;  %v5400_v54 = vmul.f32 %v14423_v9, %v14423_v9 }
 0x83d   : > { %v6019_v34 = vadd.f32 1e-05, %v5891_v10  ;;  %v5892_v18 = vsub.f32 %v5764_v44, %v5828_v13  ;;  %v5286_v40 = vpop.xlane.xlu0 %5285 }
 0x83e   : > { %5133 = vadd.xlane.f32.xlu1 %v4890_v3  ;;  %7481 = vmatprep.mubr.bf16.mxu1 %v6395_v45  ;;  %v6214_v22 = vmul.f32 %v14432_v55, %v6146_v47  ;;  %v6281_v14 = vadd.f32 %v14455_v51, %v6213_v57  ;;  %v5210_v45 = vmul.f32 %v14450_v16, %v14450_v16  ;;  %v17025_v57 = vld [vmem:[#allocation128_spill] sm:$0xff] }
 0x83f   : > { %7877 = vrsqrt.f32 %v6019_v34  ;;  %v6020_v26 = vadd.f32 1e-05, %v5892_v18  ;;  %v5476_v63 = vpop.xlane.xlu1 %5475  ;;  %v14508_v34 = vadd.f32 %v14406_v24, %v17025_v57  ;;  %v17026_v18 = vld [vmem:[#allocation90_spill] sm:$0xff] }
 0x840   : > { %v5701_v32 = vsel %vm258_vm2, %v5284_v6, %v5476_v63  ;;  %5319 = vadd.xlane.f32.xlu0 %v5207_v27  ;;  %v6282_v41 = vadd.f32 %v14455_v51, %v6214_v22  ;;  %v6345_v21 = vmax.f32 %v6281_v14, 0.0  ;;  %v5956_v46 = vsub.f32 %v17026_v18, %v14436_v4  ;;  %v17028_v63 = vld [vmem:[#allocation19_spill] sm:$0xff] }
 0x841   : > { %7879 = vrsqrt.f32 %v6020_v26  ;;  %v5765_v61 = vmul.f32 0.015625, %v5701_v32  ;;  %v5478_v8 = vpop.xlane.xlu0 %5477  ;;  %v5402_v14 = vmul.f32 %v4890_v3, %v4890_v3  ;;  %v17027_v26 = vld [vmem:[#allocation122_spill] sm:$0xff]  ;;  %v14528_v3 = vsel %vm258_vm2, %v14508_v34, 0.0 }
 0x842   : > { %v5702_v50 = vsel %vm258_vm2, %v5286_v40, %v5478_v8  ;;  %5321 = vadd.xlane.f32.xlu1 %v5208_v25  ;;  %v6346_v12 = vmax.f32 %v6282_v41, 0.0  ;;  %v5401_v40 = vmul.f32 %v14440_v38, %v14440_v38  ;;  %v14516_v16 = vadd.f32 %v14406_v24, %v17027_v26 }
 0x843   : > { %v5893_v15 = vsub.f32 %v5765_v61, %v5829_v29  ;;  %v5766_v48 = vmul.f32 0.015625, %v5702_v50  ;;  %v5096_v36 = vpop.xlane.xlu1 %5095  ;;  %v17029_v29 = vld [vmem:[#allocation84_spill] sm:$0xff] }
 0x844   : > { %5511 = vadd.xlane.f32.xlu0 %v5399_v52  ;;  %v6396_v30 = vpack.c.bf16 %v6346_v12, %v6345_v21  ;;  %v5575_v32 = vsel %vm258_vm2, %v17028_v63, %v5096_v36  ;;  %v17030_v21 = vld [vmem:[#allocation72_spill] sm:$0xff]  ;;  %v17031_v36 = vld [vmem:[#allocation178_spill] sm:$0xff]  ;;  %v17034_v63 = vld [vmem:[#allocation129_spill] sm:$0xff] }
 0x845   : > { %v6021_v56 = vadd.f32 1e-05, %v5893_v15  ;;  %v5894_v13 = vsub.f32 %v5766_v48, %v5830_v23  ;;  %v5098_v10 = vpop.xlane.xlu0 %5097  ;;  %v14532_v50 = vmul.f32 0.015625, %v5575_v32  ;;  %v5957_v12 = vsub.f32 %v17030_v21, %v14477_v20 }
 0x846   : > { %5513 = vadd.xlane.f32.xlu1 %v5400_v54  ;;  %7482 = vmatmul.mubr.bf16.gmra.mrb[84].mxu1 %v6396_v30  ;;  %v5576_v38 = vsel %vm258_vm2, %v17029_v29, %v5098_v10  ;;  %v14540_v23 = vsel %vm258_vm2, %v14516_v16, 0.0  ;;  %v14545_v54 = vadd.f32 %v14406_v24, %v17031_v36  ;;  %v17032_v30 = vld [vmem:[#allocation91_spill] sm:$0xff]  ;;  %v14553_v10 = vsub.f32 %v14508_v34, %v14528_v3 }
 0x847   : > { %7881 = vrsqrt.f32 %v6021_v56  ;;  %v6022_v44 = vadd.f32 1e-05, %v5894_v13  ;;  %v4974_v6 = vpop.xlane.xlu1 %4973  ;;  %v5958_v56 = vsub.f32 %v17032_v30, %v14483_v19  ;;  %v14549_v13 = vmul.f32 0.015625, %v5576_v38  ;;  %v17033_v19 = vld [vmem:[#allocation157_spill] sm:$0xff] }
 0x848   : > { %5323 = vadd.xlane.f32.xlu0 %v5209_v53  ;;  %v14573_v32 = vadd.f32 %v14406_v24, %v17034_v63 }
 0x849   : > { %v7878_v9 = vpop.eup %7877  ;;  %7883 = vrsqrt.f32 %v6022_v44  ;;  %v5100_v47 = vpop.xlane.xlu0 %5099 }
 0x84a   : > { %5325 = vadd.xlane.f32.xlu1 %v5210_v45  ;;  %v6147_v27 = vmul.f32 %v7878_v9, %v5955_v7  ;;  %v5831_v9 = vmul.f32 %v14532_v50, %v14532_v50  ;;  %v5577_v57 = vsel %vm258_vm2, %v17033_v19, %v5100_v47  ;;  %v5832_v47 = vmul.f32 %v14549_v13, %v14549_v13 }
 0x84b   : > { %v7880_v43 = vpop.eup %7879  ;;  %v5102_v22 = vpop.xlane.xlu1 %5101  ;;  %v4830_v30 = vsel %vm258_vm2, %v14573_v32, 0.0 }
 0x84c   : > { %5515 = vadd.xlane.f32.xlu0 %v5401_v40  ;;  %v6148_v25 = vmul.f32 %v7880_v43, %v5956_v46  ;;  %v6215_v4 = vmul.f32 %v14432_v55, %v6147_v27  ;;  %v14565_v40 = vsub.f32 %v14516_v16, %v14540_v23  ;;  %v5578_v29 = vsel %vm258_vm2, %v4974_v6, %v5102_v22 }
 0x84d   : > { %v5288_v41 = vpop.xlane.xlu0 %5287  ;;  %v14588_v6 = vmul.f32 0.015625, %v5578_v29  ;;  %v4894_v19 = vsub.f32 %v14573_v32, %v4830_v30  ;;  %v17035_v29 = vld [vmem:[#allocation86_spill] sm:$0xff] }
 0x84e   : > { %5517 = vadd.xlane.f32.xlu1 %v5402_v14  ;;  %v6216_v61 = vmul.f32 %v14432_v55, %v6148_v25  ;;  %v6283_v8 = vadd.f32 %v14455_v51, %v6215_v4 }
 0x84f   : > { %v5290_v52 = vpop.xlane.xlu1 %5289 }
 0x850   : > { %5007 = vadd.xlane.f32.xlu0 %v14528_v3  ;;  %v6284_v15 = vadd.f32 %v14455_v51, %v6216_v61  ;;  %v6347_v44 = vmax.f32 %v6283_v8, 0.0  ;;  %v14582_v8 = vmul.f32 0.015625, %v5577_v57 }
 0x851   : > { %v7882_v48 = vpop.eup %7881  ;;  %v5480_v20 = vpop.xlane.xlu0 %5479 }
 0x852   : > { %v5703_v53 = vsel %vm258_vm2, %v5288_v41, %v5480_v20  ;;  %5009 = vadd.xlane.f32.xlu1 %v14540_v23  ;;  %v6348_v17 = vmax.f32 %v6284_v15, 0.0  ;;  %v6149_v7 = vmul.f32 %v7882_v48, %v5957_v12  ;;  %v4829_v15 = vsel %vm258_vm2, %v14545_v54, 0.0 }
 0x853   : > { %v7884_v45 = vpop.eup %7883  ;;  %v5767_v18 = vmul.f32 0.015625, %v5703_v53  ;;  %v5482_v46 = vpop.xlane.xlu1 %5481  ;;  %v4893_v20 = vsub.f32 %v14545_v54, %v4829_v15 }
 0x854   : > { %v5704_v27 = vsel %vm258_vm2, %v5290_v52, %v5482_v46  ;;  %5135 = vadd.xlane.f32.xlu0 %v14553_v10  ;;  %v6397_v43 = vpack.c.bf16 %v6348_v17, %v6347_v44  ;;  %v6150_v14 = vmul.f32 %v7884_v45, %v5958_v56  ;;  %v6217_v26 = vmul.f32 %v14432_v55, %v6149_v7 }
 0x855   : > { %v5895_v25 = vsub.f32 %v5767_v18, %v5831_v9  ;;  %v5768_v4 = vmul.f32 0.015625, %v5704_v27  ;;  %v5292_v41 = vpop.xlane.xlu0 %5291  ;;  %v5833_v17 = vmul.f32 %v14582_v8, %v14582_v8  ;;  %v5834_v18 = vmul.f32 %v14588_v6, %v14588_v6 }
 0x856   : > { %5137 = vadd.xlane.f32.xlu1 %v14565_v40  ;;  %7485 = vmatprep.mubr.bf16.mxu1 %v6397_v43  ;;  %v6218_v38 = vmul.f32 %v14432_v55, %v6150_v14  ;;  %v6285_v61 = vadd.f32 %v14455_v51, %v6217_v26  ;;  %v5211_v14 = vmul.f32 %v14528_v3, %v14528_v3 }
 0x857   : > { %v6023_v52 = vadd.f32 1e-05, %v5895_v25  ;;  %v5896_v21 = vsub.f32 %v5768_v4, %v5832_v47  ;;  %v5294_v12 = vpop.xlane.xlu1 %5293  ;;  %v5212_v25 = vmul.f32 %v14540_v23, %v14540_v23  ;;  %v5404_v23 = vmul.f32 %v14565_v40, %v14565_v40 }
 0x858   : > { %5011 = vadd.xlane.f32.xlu0 %v4829_v15  ;;  %v6286_v48 = vadd.f32 %v14455_v51, %v6218_v38  ;;  %v6349_v53 = vmax.f32 %v6285_v61, 0.0  ;;  %v5959_v38 = vsub.f32 %v17035_v29, %v14532_v50  ;;  %v5403_v61 = vmul.f32 %v14553_v10, %v14553_v10 }
 0x859   : > { %7885 = vrsqrt.f32 %v6023_v52  ;;  %v6024_v22 = vadd.f32 1e-05, %v5896_v21  ;;  %v5484_v36 = vpop.xlane.xlu0 %5483  ;;  %v17036_v21 = vld [vmem:[#allocation132_spill] sm:$0xff]  ;;  %v5214_v10 = vmul.f32 %v4830_v30, %v4830_v30  ;;  %v5405_v40 = vmul.f32 %v4893_v20, %v4893_v20 }
 0x85a   : > { %v5705_v56 = vsel %vm258_vm2, %v5292_v41, %v5484_v36  ;;  %5013 = vadd.xlane.f32.xlu1 %v4830_v30  ;;  %v6350_v44 = vmax.f32 %v6286_v48, 0.0 }
 0x85b   : > { %7887 = vrsqrt.f32 %v6024_v22  ;;  %v5769_v7 = vmul.f32 0.015625, %v5705_v56  ;;  %v5486_v45 = vpop.xlane.xlu1 %5485  ;;  %v5213_v56 = vmul.f32 %v4829_v15, %v4829_v15  ;;  %v17038_v15 = vld [vmem:[#allocation10_spill] sm:$0xff] }
 0x85c   : > { %v5706_v9 = vsel %vm258_vm2, %v5294_v12, %v5486_v45  ;;  %5139 = vadd.xlane.f32.xlu0 %v4893_v20  ;;  %v6398_v57 = vpack.c.bf16 %v6350_v44, %v6349_v53  ;;  %v5960_v12 = vsub.f32 %v17036_v21, %v14549_v13  ;;  %v17037_v45 = vld [vmem:[#allocation2_spill] sm:$0xff] }
 0x85d   : > { %v5897_v46 = vsub.f32 %v5769_v7, %v5833_v17  ;;  %v5770_v27 = vmul.f32 0.015625, %v5706_v9  ;;  %v4976_v43 = vpop.xlane.xlu0 %4975  ;;  %v5961_v9 = vsub.f32 %v17037_v45, %v14582_v8 }
 0x85e   : > { %5141 = vadd.xlane.f32.xlu1 %v4894_v19  ;;  %7486 = vmatmul.mubr.bf16.gmra.mrb[88].mxu1 %v6398_v57 }
 0x85f   : > { %v6025_v26 = vadd.f32 1e-05, %v5897_v46  ;;  %v5898_v63 = vsub.f32 %v5770_v27, %v5834_v18  ;;  %v4978_v47 = vpop.xlane.xlu1 %4977  ;;  %v14623_v46 = vadd.f32 %v14406_v24, %v17038_v15  ;;  %v17039_v27 = vld [vmem:[#allocation17_spill] sm:$0xff] }
 0x860   : > { %5327 = vadd.xlane.f32.xlu0 %v5211_v14  ;;  %v14627_v30 = vadd.f32 %v14406_v24, %v17039_v27  ;;  %v17040_v14 = vld [vmem:[#allocation162_spill] sm:$0xff] }
 0x861   : > { %7889 = vrsqrt.f32 %v6025_v26  ;;  %v6026_v4 = vadd.f32 1e-05, %v5898_v63  ;;  %v5104_v41 = vpop.xlane.xlu0 %5103  ;;  %v5962_v26 = vsub.f32 %v17040_v14, %v14588_v6  ;;  %v17042_v14 = vld [vmem:[#allocation175_spill] sm:$0xff] }
 0x862   : > { %5329 = vadd.xlane.f32.xlu1 %v5212_v25  ;;  %v5406_v25 = vmul.f32 %v4894_v19, %v4894_v19  ;;  %v5579_v8 = vsel %vm258_vm2, %v4976_v43, %v5104_v41  ;;  %v4831_v43 = vsel %vm258_vm2, %v14623_v46, 0.0  ;;  %v4832_v41 = vsel %vm258_vm2, %v14627_v30, 0.0 }
 0x863   : > { %v7886_v52 = vpop.eup %7885  ;;  %7891 = vrsqrt.f32 %v6026_v4  ;;  %v5106_v3 = vpop.xlane.xlu1 %5105  ;;  %v14636_v6 = vmul.f32 0.015625, %v5579_v8 }
 0x864   : > { %5519 = vadd.xlane.f32.xlu0 %v5403_v61  ;;  %v6151_v48 = vmul.f32 %v7886_v52, %v5959_v38  ;;  %v5580_v52 = vsel %vm258_vm2, %v4978_v47, %v5106_v3 }
 0x865   : > { %v7888_v22 = vpop.eup %7887  ;;  %v4980_v36 = vpop.xlane.xlu0 %4979 }
 0x866   : > { %5521 = vadd.xlane.f32.xlu1 %v5404_v23  ;;  %v6152_v50 = vmul.f32 %v7888_v22, %v5960_v12  ;;  %v6219_v53 = vmul.f32 %v14432_v55, %v6151_v48  ;;  %v14646_v48 = vmul.f32 0.015625, %v5580_v52 }
 0x867   : > { %v4982_v44 = vpop.xlane.xlu1 %4981 }
 0x868   : > { %5331 = vadd.xlane.f32.xlu0 %v5213_v56  ;;  %v6220_v17 = vmul.f32 %v14432_v55, %v6152_v50  ;;  %v6287_v7 = vadd.f32 %v14455_v51, %v6219_v53  ;;  %v4895_v50 = vsub.f32 %v14623_v46, %v4831_v43 }
 0x869   : > { %v5108_v13 = vpop.xlane.xlu0 %5107 }
 0x86a   : > { %5333 = vadd.xlane.f32.xlu1 %v5214_v10  ;;  %v6288_v57 = vadd.f32 %v14455_v51, %v6220_v17  ;;  %v6351_v20 = vmax.f32 %v6287_v7, 0.0  ;;  %v17041_v10 = vld [vmem:[#allocation16_spill] sm:$0xff]  ;;  %v5835_v7 = vmul.f32 %v14636_v6, %v14636_v6 }
 0x86b   : > { %v7890_v18 = vpop.eup %7889  ;;  %v5110_v63 = vpop.xlane.xlu1 %5109  ;;  %v14654_v17 = vadd.f32 %v14406_v24, %v17041_v10 }
 0x86c   : > { %5523 = vadd.xlane.f32.xlu0 %v5405_v40  ;;  %v6352_v4 = vmax.f32 %v6288_v57, 0.0  ;;  %v6153_v29 = vmul.f32 %v7890_v18, %v5961_v9  ;;  %v4896_v40 = vsub.f32 %v14627_v30, %v4832_v41  ;;  %v5581_v57 = vsel %vm258_vm2, %v4980_v36, %v5108_v13 }
 0x86d   : > { %v7892_v38 = vpop.eup %7891  ;;  %v5296_v61 = vpop.xlane.xlu0 %5295  ;;  %v14671_v13 = vmul.f32 0.015625, %v5581_v57 }
 0x86e   : > { %5525 = vadd.xlane.f32.xlu1 %v5406_v25  ;;  %v6399_v21 = vpack.c.bf16 %v6352_v4, %v6351_v20  ;;  %v6154_v12 = vmul.f32 %v7892_v38, %v5962_v26  ;;  %v6221_v23 = vmul.f32 %v14432_v55, %v6153_v29  ;;  %v14665_v26 = vadd.f32 %v14406_v24, %v17042_v14 }
 0x86f   : > { %v5298_v19 = vpop.xlane.xlu1 %5297  ;;  %v5836_v25 = vmul.f32 %v14646_v48, %v14646_v48  ;;  %v5582_v29 = vsel %vm258_vm2, %v4982_v44, %v5110_v63 }
 0x870   : > { %5015 = vadd.xlane.f32.xlu0 %v4831_v43  ;;  %7489 = vmatprep.mubr.bf16.mxu1 %v6399_v21  ;;  %v6222_v47 = vmul.f32 %v14432_v55, %v6154_v12  ;;  %v6289_v3 = vadd.f32 %v14455_v51, %v6221_v23  ;;  %v4833_v21 = vsel %vm258_vm2, %v14654_v17, 0.0  ;;  %v14676_v12 = vmul.f32 0.015625, %v5582_v29 }
 0x871   : > { %v5488_v22 = vpop.xlane.xlu0 %5487  ;;  %v4834_v44 = vsel %vm258_vm2, %v14665_v26, 0.0  ;;  %v5407_v29 = vmul.f32 %v4895_v50, %v4895_v50 }
 0x872   : > { %v5707_v56 = vsel %vm258_vm2, %v5296_v61, %v5488_v22  ;;  %5017 = vadd.xlane.f32.xlu1 %v4832_v41  ;;  %v6290_v53 = vadd.f32 %v14455_v51, %v6222_v47  ;;  %v6353_v15 = vmax.f32 %v6289_v3, 0.0  ;;  %v4897_v47 = vsub.f32 %v14654_v17, %v4833_v21 }
 0x873   : > { %v5771_v45 = vmul.f32 0.015625, %v5707_v56  ;;  %v5490_v9 = vpop.xlane.xlu1 %5489  ;;  %v5837_v3 = vmul.f32 %v14671_v13, %v14671_v13  ;;  %v4898_v10 = vsub.f32 %v14665_v26, %v4834_v44 }
 0x874   : > { %v5708_v18 = vsel %vm258_vm2, %v5298_v19, %v5490_v9  ;;  %5143 = vadd.xlane.f32.xlu0 %v4895_v50  ;;  %v6354_v27 = vmax.f32 %v6290_v53, 0.0 }
 0x875   : > { %v5899_v8 = vsub.f32 %v5771_v45, %v5835_v7  ;;  %v5772_v20 = vmul.f32 0.015625, %v5708_v18  ;;  %v5300_v4 = vpop.xlane.xlu0 %5299  ;;  %v5838_v7 = vmul.f32 %v14676_v12, %v14676_v12  ;;  %v5215_v18 = vmul.f32 %v4831_v43, %v4831_v43 }
 0x876   : > { %5145 = vadd.xlane.f32.xlu1 %v4896_v40  ;;  %v6400_v36 = vpack.c.bf16 %v6354_v27, %v6353_v15  ;;  %v5408_v43 = vmul.f32 %v4896_v40, %v4896_v40 }
 0x877   : > { %v6027_v38 = vadd.f32 1e-05, %v5899_v8  ;;  %v5900_v61 = vsub.f32 %v5772_v20, %v5836_v25  ;;  %v5302_v52 = vpop.xlane.xlu1 %5301  ;;  %v5216_v25 = vmul.f32 %v4832_v41, %v4832_v41  ;;  %v5217_v41 = vmul.f32 %v4833_v21, %v4833_v21 }
 0x878   : > { %5019 = vadd.xlane.f32.xlu0 %v4833_v21  ;;  %7490 = vmatmul.mubr.bf16.gmra.mrb[92].mxu1 %v6400_v36  ;;  %v17043_v21 = vld [vmem:[#allocation146_spill] sm:$0xff] }
 0x879   : > { %7893 = vrsqrt.f32 %v6027_v38  ;;  %v6028_v23 = vadd.f32 1e-05, %v5900_v61  ;;  %v5492_v19 = vpop.xlane.xlu0 %5491  ;;  %v5964_v61 = vsub.f32 %v13999_v1, %v14646_v48  ;;  %v5965_v1 = vsub.f32 %v14003_v35, %v14671_v13 }
 0x87a   : > { %v5709_v63 = vsel %vm258_vm2, %v5300_v4, %v5492_v19  ;;  %5021 = vadd.xlane.f32.xlu1 %v4834_v44  ;;  %v5963_v4 = vsub.f32 %v13991_v49, %v14636_v6  ;;  %v5218_v49 = vmul.f32 %v4834_v44, %v4834_v44  ;;  %v5409_v48 = vmul.f32 %v4897_v47, %v4897_v47 }
 0x87b   : > { %7895 = vrsqrt.f32 %v6028_v23  ;;  %v5773_v22 = vmul.f32 0.015625, %v5709_v63  ;;  %v5494_v56 = vpop.xlane.xlu1 %5493  ;;  %v5966_v44 = vsub.f32 %v14026_v31, %v14676_v12 }
 0x87c   : > { %v5710_v53 = vsel %vm258_vm2, %v5302_v52, %v5494_v56  ;;  %5147 = vadd.xlane.f32.xlu0 %v4897_v47 }
 0x87d   : > { %v5901_v45 = vsub.f32 %v5773_v22, %v5837_v3  ;;  %v5774_v9 = vmul.f32 0.015625, %v5710_v53  ;;  %v4984_v57 = vpop.xlane.xlu0 %4983 }
 0x87e   : > { %5149 = vadd.xlane.f32.xlu1 %v4898_v10 }
 0x87f   : > { %v6029_v15 = vadd.f32 1e-05, %v5901_v45  ;;  %v5902_v27 = vsub.f32 %v5774_v9, %v5838_v7  ;;  %v4986_v14 = vpop.xlane.xlu1 %4985  ;;  %v14703_v7 = vadd.f32 %v14406_v24, %v17043_v21  ;;  %v5410_v9 = vmul.f32 %v4898_v10, %v4898_v10 }
 0x880   : > { %5335 = vadd.xlane.f32.xlu0 %v5215_v18 }
 0x881   : > { %7897 = vrsqrt.f32 %v6029_v15  ;;  %v6030_v8 = vadd.f32 1e-05, %v5902_v27  ;;  %v5112_v20 = vpop.xlane.xlu0 %5111  ;;  %v17044_v27 = vld [vmem:[#allocation140_spill] sm:$0xff] }
 0x882   : > { %5337 = vadd.xlane.f32.xlu1 %v5216_v25  ;;  %v5583_v18 = vsel %vm258_vm2, %v4984_v57, %v5112_v20  ;;  %v14711_v25 = vadd.f32 %v14406_v24, %v17044_v27  ;;  %v14721_v20 = vsel %vm258_vm2, %v14703_v7, 0.0  ;;  %v17049_v27 = vld [vmem:[#allocation147_spill] sm:$0xff] }
 0x883   : > { %v7894_v36 = vpop.eup %7893  ;;  %7899 = vrsqrt.f32 %v6030_v8  ;;  %v5114_v38 = vpop.xlane.xlu1 %5113 }
 0x884   : > { %5527 = vadd.xlane.f32.xlu0 %v5407_v29  ;;  %v6155_v52 = vmul.f32 %v7894_v36, %v5963_v4  ;;  %v5584_v4 = vsel %vm258_vm2, %v4986_v14, %v5114_v38  ;;  %v14716_v29 = vmul.f32 0.015625, %v5583_v18 }
 0x885   : > { %v7896_v23 = vpop.eup %7895  ;;  %v4988_v19 = vpop.xlane.xlu0 %4987  ;;  %v14726_v38 = vmul.f32 0.015625, %v5584_v4 }
 0x886   : > { %5529 = vadd.xlane.f32.xlu1 %v5408_v43  ;;  %v6156_v63 = vmul.f32 %v7896_v23, %v5964_v61  ;;  %v6223_v3 = vmul.f32 %v14432_v55, %v6155_v52  ;;  %v14731_v43 = vsel %vm258_vm2, %v14711_v25, 0.0  ;;  %v17045_v23 = vld [vmem:[#allocation142_spill] sm:$0xff] }
 0x887   : > { %v4990_v22 = vpop.xlane.xlu1 %4989  ;;  %v5840_v18 = vmul.f32 %v14726_v38, %v14726_v38 }
 0x888   : > { %5339 = vadd.xlane.f32.xlu0 %v5217_v41  ;;  %v6224_v6 = vmul.f32 %v14432_v55, %v6156_v63  ;;  %v6291_v50 = vadd.f32 %v14455_v51, %v6223_v3  ;;  %v17046_v41 = vld [vmem:[#allocation206_spill] sm:$0xff] }
 0x889   : > { %v5116_v56 = vpop.xlane.xlu0 %5115  ;;  %v14738_v63 = vsub.f32 %v17046_v41, %v17045_v23 }
 0x88a   : > { %5341 = vadd.xlane.f32.xlu1 %v5218_v49  ;;  %v6292_v40 = vadd.f32 %v14455_v51, %v6224_v6  ;;  %v6355_v15 = vmax.f32 %v6291_v50, 0.0  ;;  %v5839_v49 = vmul.f32 %v14716_v29, %v14716_v29 }
 0x88b   : > { %v7898_v53 = vpop.eup %7897  ;;  %v5118_v45 = vpop.xlane.xlu1 %5117 }
 0x88c   : > { %5531 = vadd.xlane.f32.xlu0 %v5409_v48  ;;  %v6356_v35 = vmax.f32 %v6292_v40, 0.0  ;;  %v6157_v13 = vmul.f32 %v7898_v53, %v5965_v1  ;;  %v17047_v1 = vld [vmem:[#allocation141_spill] sm:$0xff]  ;;  %v5585_v53 = vsel %vm258_vm2, %v4988_v19, %v5116_v56  ;;  %v14759_v19 = vsub.f32 %v14703_v7, %v14721_v20 }
 0x88d   : > { %v7900_v47 = vpop.eup %7899  ;;  %v5304_v8 = vpop.xlane.xlu0 %5303  ;;  %v17048_v48 = vld [vmem:[#allocation205_spill] sm:$0xff]  ;;  %v14765_v4 = vmul.f32 0.015625, %v5585_v53 }
 0x88e   : > { %5533 = vadd.xlane.f32.xlu1 %v5410_v9  ;;  %v6401_v31 = vpack.c.bf16 %v6356_v35, %v6355_v15  ;;  %v6158_v12 = vmul.f32 %v7900_v47, %v5966_v44  ;;  %v6225_v10 = vmul.f32 %v14432_v55, %v6157_v13  ;;  %v14745_v40 = vsub.f32 %v17048_v48, %v17047_v1 }
 0x88f   : > { %v5306_v57 = vpop.xlane.xlu1 %5305  ;;  %v5586_v47 = vsel %vm258_vm2, %v4990_v22, %v5118_v45  ;;  %v14770_v22 = vsub.f32 %v14711_v25, %v14731_v43  ;;  %v17051_v45 = vld [vmem:[#allocation14_spill] sm:$0xff] }
 0x890   : > { %5023 = vadd.xlane.f32.xlu0 %v14721_v20  ;;  %7493 = vmatprep.mubr.bf16.mxu1 %v6401_v31  ;;  %v6226_v36 = vmul.f32 %v14432_v55, %v6158_v12  ;;  %v6293_v14 = vadd.f32 %v14455_v51, %v6225_v10 }
 0x891   : > { %v5496_v61 = vpop.xlane.xlu0 %5495 }
 0x892   : > { %v5711_v52 = vsel %vm258_vm2, %v5304_v8, %v5496_v61  ;;  %5025 = vadd.xlane.f32.xlu1 %v14731_v43  ;;  %v6294_v3 = vadd.f32 %v14455_v51, %v6226_v36  ;;  %v6357_v44 = vmax.f32 %v6293_v14, 0.0  ;;  %v14763_v8 = vadd.f32 %v14406_v24, %v17049_v27 }
 0x893   : > { %v5775_v6 = vmul.f32 0.015625, %v5711_v52  ;;  %v5498_v50 = vpop.xlane.xlu1 %5497  ;;  %v14776_v36 = vmul.f32 0.015625, %v5586_v47 }
 0x894   : > { %v5712_v21 = vsel %vm258_vm2, %v5306_v57, %v5498_v50  ;;  %5031 = vadd.xlane.f32.xlu0 %v14738_v63  ;;  %v6358_v9 = vmax.f32 %v6294_v3, 0.0  ;;  %17050 = vst [vmem:[#allocation126_spill] sm:$0xff] %v14763_v8  ;;  %v14774_v57 = vadd.f32 %v14406_v24, %v17051_v45  ;;  %v5841_v3 = vmul.f32 %v14765_v4, %v14765_v4 }
 0x895   : > { %v5903_v15 = vsub.f32 %v5775_v6, %v5839_v49  ;;  %v5776_v35 = vmul.f32 0.015625, %v5712_v21  ;;  %v5308_v13 = vpop.xlane.xlu0 %5307  ;;  %v14786_v24 = vsel %vm258_vm2, %v14763_v8, 0.0  ;;  %v5842_v53 = vmul.f32 %v14776_v36, %v14776_v36 }
 0x896   : > { %5033 = vadd.xlane.f32.xlu1 %v14745_v40  ;;  %v6402_v56 = vpack.c.bf16 %v6358_v9, %v6357_v44  ;;  %17052 = vst [vmem:[#allocation163_spill] sm:$0xff] %v14774_v57 }
 0x897   : > { %v6031_v31 = vadd.f32 1e-05, %v5903_v15  ;;  %v5904_v12 = vsub.f32 %v5776_v35, %v5840_v18  ;;  %v5310_v10 = vpop.xlane.xlu1 %5309  ;;  %v14796_v18 = vsel %vm258_vm2, %v14774_v57, 0.0  ;;  %v17053_v15 = vld [vmem:[#allocation38_spill] sm:$0xff]  ;;  %v17054_v35 = vld [vmem:[#allocation125_spill] sm:$0xff] }
 0x898   : > { %5151 = vadd.xlane.f32.xlu0 %v14759_v19  ;;  %7494 = vmatmul.mubr.bf16.gmra.mrb[96].mxu1 %v6402_v56 }
 0x899   : > { %7901 = vrsqrt.f32 %v6031_v31  ;;  %v6032_v14 = vadd.f32 1e-05, %v5904_v12  ;;  %v5500_v61 = vpop.xlane.xlu0 %5499  ;;  %v14806_v31 = vld [vmem:[%s15413_s5] ss:$0 sm:$0xff] }
 0x89a   : > { %v5713_v52 = vsel %vm258_vm2, %v5308_v13, %v5500_v61  ;;  %5153 = vadd.xlane.f32.xlu1 %v14770_v22  ;;  %v14801_v13 = vsub.f32 %v17054_v35, %v17053_v15  ;;  %v17055_v12 = vld [vmem:[#allocation138_spill] sm:$0xff] }
 0x89b   : > { %7903 = vrsqrt.f32 %v6032_v14  ;;  %v5777_v49 = vmul.f32 0.015625, %v5713_v52  ;;  %v5502_v6 = vpop.xlane.xlu1 %5501 }
 0x89c   : > { %v5714_v50 = vsel %vm258_vm2, %v5310_v10, %v5502_v6  ;;  %5027 = vadd.xlane.f32.xlu0 %v14786_v24  ;;  %v17056_v10 = vld [vmem:[#allocation213_spill] sm:$0xff] }
 0x89d   : > { %v5905_v21 = vsub.f32 %v5777_v49, %v5841_v3  ;;  %v5778_v44 = vmul.f32 0.015625, %v5714_v50  ;;  %v4992_v9 = vpop.xlane.xlu0 %4991  ;;  %v14811_v45 = vsub.f32 %v17056_v10, %v17055_v12  ;;  %v5967_v3 = vsub.f32 %v14108_v0, %v14716_v29 }
 0x89e   : > { %5029 = vadd.xlane.f32.xlu1 %v14796_v18  ;;  %v14819_v50 = vsub.f32 %v14763_v8, %v14786_v24  ;;  %v5968_v0 = vsub.f32 %v14123_v62, %v14726_v38 }
 0x89f   : > { %v6033_v47 = vadd.f32 1e-05, %v5905_v21  ;;  %v5906_v56 = vsub.f32 %v5778_v44, %v5842_v53  ;;  %v4994_v27 = vpop.xlane.xlu1 %4993 }
 0x8a0   : > { %5035 = vadd.xlane.f32.xlu0 %v14801_v13 }
 0x8a1   : > { %7905 = vrsqrt.f32 %v6033_v47  ;;  %v6034_v14 = vadd.f32 1e-05, %v5906_v56  ;;  %v7463_v61 = vpop.f32.mrb[64].mxu1  ;;  %v5120_v52 = vpop.xlane.xlu0 %5119  ;;  %v14824_v56 = vsub.f32 %v14774_v57, %v14796_v18 }
 0x8a2   : > { %v6545_v49 = vadd.f32 %v7463_v61, %v14806_v31  ;;  %5037 = vadd.xlane.f32.xlu1 %v14811_v45  ;;  %v6536_v6 = vpop.f32.mrb[65].mxu1 }
 0x8a3   : > { %v7902_v53 = vpop.eup %7901  ;;  %7907 = vrsqrt.f32 %v6034_v14  ;;  %v6537_v21 = vadd.f32 %v14806_v31, %v6536_v6  ;;  %v5122_v44 = vpop.xlane.xlu1 %5121  ;;  %v5159_v6 = vmul.f32 %v17045_v23, %v17045_v23 }
 0x8a4   : > { %v7464_v47 = vpop.f32.mrb[66].mxu1  ;;  %7909 = vtanh.f32 %v6545_v49  ;;  %5155 = vadd.xlane.f32.xlu0 %v14819_v50  ;;  %v6159_v8 = vmul.f32 %v7902_v53, %v5967_v3  ;;  %v5160_v3 = vmul.f32 %v17047_v1, %v17047_v1 }
 0x8a5   : > { %v6548_v29 = vadd.f32 %v7464_v47, %v14806_v31  ;;  %v6539_v61 = vpop.f32.mrb[67].mxu1  ;;  %v7904_v10 = vpop.eup %7903  ;;  %7911 = vtanh.f32 %v6537_v21  ;;  %v5969_v47 = vsub.f32 %v14140_v60, %v14765_v4  ;;  %v5587_v60 = vsel %vm258_vm2, %v4992_v9, %v5120_v52 }
 0x8a6   : > { %v14830_v14 = vpop.xlane.xlu0 %4995  ;;  %v6540_v57 = vadd.f32 %v14806_v31, %v6539_v61  ;;  %5157 = vadd.xlane.f32.xlu1 %v14824_v56  ;;  %v6160_v62 = vmul.f32 %v7904_v10, %v5968_v0  ;;  %v6227_v38 = vmul.f32 %v14432_v55, %v6159_v8  ;;  %v5219_v10 = vmul.f32 %v14721_v20, %v14721_v20 }
 0x8a7   : > { %7913 = vtanh.f32 %v6548_v29  ;;  %v4998_v49 = vpop.xlane.xlu1 %4997  ;;  %v5220_v29 = vmul.f32 %v14731_v43, %v14731_v43  ;;  %v5351_v43 = vmul.f32 %v14738_v63, %v14738_v63  ;;  %v5352_v63 = vmul.f32 %v14745_v40, %v14745_v40 }
 0x8a8   : > { %7915 = vtanh.f32 %v6540_v57  ;;  %5223 = vadd.xlane.f32.xlu0 %v5159_v6  ;;  %v6228_v53 = vmul.f32 %v14432_v55, %v6160_v62  ;;  %v6295_v21 = vadd.f32 %v14455_v51, %v6227_v38  ;;  %v5970_v57 = vsub.f32 %v14182_v2, %v14776_v36 }
 0x8a9   : > { %v5588_v62 = vsel %vm258_vm2, %v4994_v27, %v5122_v44 }
 0x8aa   : > { %v5124_v23 = vpop.xlane.xlu0 %5123  ;;  %5225 = vadd.xlane.f32.xlu1 %v5160_v3  ;;  %v6296_v8 = vadd.f32 %v14455_v51, %v6228_v53  ;;  %v6359_v20 = vmax.f32 %v6295_v21, 0.0  ;;  %v14866_v53 = vmul.f32 0.015625, %v5587_v60 }
 0x8ab   : > { %v7906_v0 = vpop.eup %7905  ;;  %v5126_v1 = vpop.xlane.xlu1 %5125 }
 0x8ac   : > { %5343 = vadd.xlane.f32.xlu0 %v5219_v10  ;;  %v6360_v4 = vmax.f32 %v6296_v8, 0.0  ;;  %v6161_v2 = vmul.f32 %v7906_v0, %v5969_v47  ;;  %v14874_v10 = vmul.f32 0.015625, %v5588_v62 }
 0x8ad   : > { %v7908_v36 = vpop.eup %7907 }
 0x8ae   : > { %v5312_v61 = vpop.xlane.xlu0 %5311  ;;  %v7910_v6 = vpop.eup %7909  ;;  %5345 = vadd.xlane.f32.xlu1 %v5220_v29  ;;  %v6403_v38 = vpack.c.bf16 %v6360_v4, %v6359_v20  ;;  %v6162_v3 = vmul.f32 %v7908_v36, %v5970_v57  ;;  %v6229_v9 = vmul.f32 %v14432_v55, %v6161_v2  ;;  %v5411_v29 = vmul.f32 %v14759_v19, %v14759_v19 }
 0x8af   : > { %v7912_v52 = vpop.eup %7911  ;;  %6846 = vst.msk [vmem:[%s14855_s18 + $0x30] sm:$0xff] %vm6839_vm3, %v7910_v6  ;;  %v5314_v21 = vpop.xlane.xlu1 %5313  ;;  %v5412_v4 = vmul.f32 %v14770_v22, %v14770_v22  ;;  %v5589_v2 = vsel %vm258_vm2, %v14830_v14, %v5124_v23  ;;  %v5161_v22 = vmul.f32 %v17053_v15, %v17053_v15 }
 0x8b0   : > { %6844 = vst.msk [vmem:[%s14855_s18 + $0x20] sm:$0xff] %vm6839_vm3, %v7912_v52  ;;  %5415 = vadd.xlane.f32.xlu0 %v5351_v43  ;;  %7497 = vmatprep.mubr.bf16.mxu1 %v6403_v38  ;;  %v6230_v27 = vmul.f32 %v14432_v55, %v6162_v3  ;;  %v6297_v44 = vadd.f32 %v14455_v51, %v6229_v9  ;;  %v14900_v23 = vmul.f32 0.015625, %v5589_v2 }
 0x8b1   : > { %v7914_v47 = vpop.eup %7913  ;;  %v5843_v55 = vmul.f32 %v14866_v53, %v14866_v53  ;;  %v5590_v43 = vsel %vm258_vm2, %v4998_v49, %v5126_v1  ;;  %v5162_v49 = vmul.f32 %v17055_v12, %v17055_v12 }
 0x8b2   : > { %6847 = vst.msk [vmem:[%s14855_s18 + $0x38] sm:$0xff] %vm6839_vm3, %v7914_v47  ;;  %v5504_v8 = vpop.xlane.xlu0 %5503  ;;  %v7916_v0 = vpop.eup %7915  ;;  %5417 = vadd.xlane.f32.xlu1 %v5352_v63  ;;  %v6298_v60 = vadd.f32 %v14455_v51, %v6230_v27  ;;  %v6361_v19 = vmax.f32 %v6297_v44, 0.0  ;;  %v5845_v12 = vmul.f32 %v14900_v23, %v14900_v23 }
 0x8b3   : > { %v5715_v57 = vsel %vm258_vm2, %v5312_v61, %v5504_v8  ;;  %6845 = vst.msk [vmem:[%s14855_s18 + $0x28] sm:$0xff] %vm6839_vm3, %v7916_v0  ;;  %v5506_v20 = vpop.xlane.xlu1 %5505  ;;  %v5844_v61 = vmul.f32 %v14874_v10, %v14874_v10  ;;  %v5221_v8 = vmul.f32 %v14786_v24, %v14786_v24  ;;  %v5222_v0 = vmul.f32 %v14796_v18, %v14796_v18 }
 0x8b4   : > { %v5779_v40 = vmul.f32 0.015625, %v5715_v57  ;;  %v5716_v36 = vsel %vm258_vm2, %v5314_v21, %v5506_v20  ;;  %5535 = vadd.xlane.f32.xlu0 %v5411_v29  ;;  %v6362_v51 = vmax.f32 %v6298_v60, 0.0  ;;  %v14902_v21 = vmul.f32 0.015625, %v5590_v43 }
 0x8b5   : > { %v5780_v62 = vmul.f32 0.015625, %v5716_v36 }
 0x8b6   : > { %v5907_v6 = vsub.f32 %v5779_v40, %v5843_v55  ;;  %v5316_v38 = vpop.xlane.xlu0 %5315  ;;  %5537 = vadd.xlane.f32.xlu1 %v5412_v4  ;;  %v6404_v14 = vpack.c.bf16 %v6362_v51, %v6361_v19  ;;  %v5846_v40 = vmul.f32 %v14902_v21, %v14902_v21  ;;  %v5353_v51 = vmul.f32 %v14801_v13, %v14801_v13 }
 0x8b7   : > { %v5908_v9 = vsub.f32 %v5780_v62, %v5844_v61  ;;  %v5318_v52 = vpop.xlane.xlu1 %5317  ;;  %v5354_v62 = vmul.f32 %v14811_v45, %v14811_v45  ;;  %v5414_v45 = vmul.f32 %v14824_v56, %v14824_v56 }
 0x8b8   : > { %v6035_v3 = vadd.f32 1e-05, %v5907_v6  ;;  %5227 = vadd.xlane.f32.xlu0 %v5161_v22  ;;  %7498 = vmatmul.mubr.bf16.gmra.mrb[100].mxu1 %v6404_v14  ;;  %v5971_v14 = vsub.f32 %v14249_v11, %v14866_v53 }
 0x8b9   : > { %v6036_v1 = vadd.f32 1e-05, %v5908_v9  ;;  %v7467_v47 = vpop.f32.mrb[68].mxu1 }
 0x8ba   : > { %7917 = vrsqrt.f32 %v6035_v3  ;;  %v5508_v63 = vpop.xlane.xlu0 %5507  ;;  %v6561_v27 = vadd.f32 %v7467_v47, %v14806_v31  ;;  %5229 = vadd.xlane.f32.xlu1 %v5162_v49  ;;  %v6552_v44 = vpop.f32.mrb[69].mxu1  ;;  %v5413_v3 = vmul.f32 %v14819_v50, %v14819_v50  ;;  %v14937_v47 = vld [vmem:[%s15412_s4 + $0x7] ss:$0 sm:$0xff] }
 0x8bb   : > { %v5717_v15 = vsel %vm258_vm2, %v5316_v38, %v5508_v63  ;;  %7919 = vrsqrt.f32 %v6036_v1  ;;  %v6553_v29 = vadd.f32 %v14806_v31, %v6552_v44  ;;  %v5510_v60 = vpop.xlane.xlu1 %5509  ;;  %v7468_v55 = vpop.f32.mrb[70].mxu1 }
 0x8bc   : > { %v5781_v57 = vmul.f32 0.015625, %v5717_v15  ;;  %7921 = vtanh.f32 %v6561_v27  ;;  %v5718_v20 = vsel %vm258_vm2, %v5318_v52, %v5510_v60  ;;  %v6564_v24 = vadd.f32 %v7468_v55, %v14806_v31  ;;  %v6555_v4 = vpop.f32.mrb[71].mxu1  ;;  %5347 = vadd.xlane.f32.xlu0 %v5221_v8  ;;  %v14948_v15 = vld [vmem:[%s15412_s4 + $0x8] ss:$0 sm:$0xff] }
 0x8bd   : > { %7923 = vtanh.f32 %v6553_v29  ;;  %v5782_v2 = vmul.f32 0.015625, %v5718_v20  ;;  %v6556_v36 = vadd.f32 %v14806_v31, %v6555_v4  ;;  %v5972_v52 = vsub.f32 %v14259_v42, %v14874_v10 }
 0x8be   : > { %v5909_v18 = vsub.f32 %v5781_v57, %v5845_v12  ;;  %v5000_v19 = vpop.xlane.xlu0 %4999  ;;  %7925 = vtanh.f32 %v6564_v24  ;;  %5349 = vadd.xlane.f32.xlu1 %v5222_v0  ;;  %v5973_v12 = vsub.f32 %v14283_v28, %v14900_v23  ;;  %v5974_v20 = vsub.f32 %v14290_v59, %v14902_v21 }
 0x8bf   : > { %v5910_v43 = vsub.f32 %v5782_v2, %v5846_v40  ;;  %7927 = vtanh.f32 %v6556_v36  ;;  %v5002_v6 = vpop.xlane.xlu1 %5001 }
 0x8c0   : > { %v6037_v61 = vadd.f32 1e-05, %v5909_v18  ;;  %5419 = vadd.xlane.f32.xlu0 %v5353_v51 }
 0x8c1   : > { %v6038_v38 = vadd.f32 1e-05, %v5910_v43 }
 0x8c2   : > { %7929 = vrsqrt.f32 %v6037_v61  ;;  %v5128_v22 = vpop.xlane.xlu0 %5127  ;;  %5421 = vadd.xlane.f32.xlu1 %v5354_v62 }
 0x8c3   : > { %7931 = vrsqrt.f32 %v6038_v38  ;;  %v5130_v9 = vpop.xlane.xlu1 %5129  ;;  %v5591_v57 = vsel %vm258_vm2, %v5000_v19, %v5128_v22 }
 0x8c4   : > { %v7918_v13 = vpop.eup %7917  ;;  %5539 = vadd.xlane.f32.xlu0 %v5413_v3  ;;  %v5592_v55 = vsel %vm258_vm2, %v5002_v6, %v5130_v9  ;;  %v14964_v28 = vmul.f32 0.015625, %v5591_v57 }
 0x8c5   : > { %v6163_v49 = vmul.f32 %v7918_v13, %v5971_v14  ;;  %v7920_v1 = vpop.eup %7919  ;;  %v14966_v36 = vmul.f32 0.015625, %v5592_v55 }
 0x8c6   : > { %v5004_v11 = vpop.xlane.xlu0 %5003  ;;  %v7922_v53 = vpop.eup %7921  ;;  %5541 = vadd.xlane.f32.xlu1 %v5414_v45  ;;  %v6164_v50 = vmul.f32 %v7920_v1, %v5972_v52  ;;  %v5847_v59 = vmul.f32 %v14964_v28, %v14964_v28 }
 0x8c7   : > { %v6231_v63 = vmul.f32 %v14937_v47, %v6163_v49  ;;  %v7924_v42 = vpop.eup %7923  ;;  %6850 = vst.msk [vmem:[%s14855_s18 + $0x50] sm:$0xff] %vm6839_vm3, %v7922_v53  ;;  %v5006_v10 = vpop.xlane.xlu1 %5005  ;;  %v5848_v22 = vmul.f32 %v14966_v36, %v14966_v36 }
 0x8c8   : > { %v7926_v56 = vpop.eup %7925  ;;  %6848 = vst.msk [vmem:[%s14855_s18 + $0x40] sm:$0xff] %vm6839_vm3, %v7924_v42  ;;  %v6232_v27 = vmul.f32 %v14937_v47, %v6164_v50 }
 0x8c9   : > { %v6299_v44 = vadd.f32 %v14948_v15, %v6231_v63  ;;  %v7928_v8 = vpop.eup %7927  ;;  %6851 = vst.msk [vmem:[%s14855_s18 + $0x58] sm:$0xff] %vm6839_vm3, %v7926_v56 }
 0x8ca   : > { %v5132_v0 = vpop.xlane.xlu0 %5131  ;;  %6849 = vst.msk [vmem:[%s14855_s18 + $0x48] sm:$0xff] %vm6839_vm3, %v7928_v8  ;;  %v6300_v29 = vadd.f32 %v14948_v15, %v6232_v27 }
 0x8cb   : > { %v5134_v40 = vpop.xlane.xlu1 %5133  ;;  %v6363_v24 = vmax.f32 %v6299_v44, 0.0  ;;  %v5593_v52 = vsel %vm258_vm2, %v5004_v11, %v5132_v0 }
 0x8cc   : > { %v7930_v60 = vpop.eup %7929  ;;  %v6364_v4 = vmax.f32 %v6300_v29, 0.0  ;;  %v5594_v0 = vsel %vm258_vm2, %v5006_v10, %v5134_v40  ;;  %v14988_v29 = vmul.f32 0.015625, %v5593_v52  ;;  %v5975_v52 = vsub.f32 %v14366_v5, %v14964_v28 }
 0x8cd   : > { %v6165_v18 = vmul.f32 %v7930_v60, %v5973_v12  ;;  %v7932_v2 = vpop.eup %7931 }
 0x8ce   : > { %v5320_v23 = vpop.xlane.xlu0 %5319  ;;  %v6405_v19 = vpack.c.bf16 %v6364_v4, %v6363_v24  ;;  %v6166_v51 = vmul.f32 %v7932_v2, %v5974_v20  ;;  %v14990_v24 = vmul.f32 0.015625, %v5594_v0  ;;  %v5849_v10 = vmul.f32 %v14988_v29, %v14988_v29 }
 0x8cf   : > { %v6233_v61 = vmul.f32 %v14937_v47, %v6165_v18  ;;  %v5322_v43 = vpop.xlane.xlu1 %5321 }
 0x8d0   : > { %7501 = vmatprep.mubr.bf16.mxu1 %v6405_v19  ;;  %v6234_v6 = vmul.f32 %v14937_v47, %v6166_v51  ;;  %v5850_v51 = vmul.f32 %v14990_v24, %v14990_v24 }
 0x8d1   : > { %v6301_v62 = vadd.f32 %v14948_v15, %v6233_v61  ;;  %v7471_v21 = vpop.f32.mrb[72].mxu1 }
 0x8d2   : > { %v5512_v38 = vpop.xlane.xlu0 %5511  ;;  %v6577_v14 = vadd.f32 %v7471_v21, %v14806_v31  ;;  %v6568_v13 = vpop.f32.mrb[73].mxu1  ;;  %v6302_v9 = vadd.f32 %v14948_v15, %v6234_v6 }
 0x8d3   : > { %v5719_v3 = vsel %vm258_vm2, %v5320_v23, %v5512_v38  ;;  %v6569_v49 = vadd.f32 %v14806_v31, %v6568_v13  ;;  %v5514_v1 = vpop.xlane.xlu1 %5513  ;;  %v7472_v53 = vpop.f32.mrb[74].mxu1  ;;  %v6365_v50 = vmax.f32 %v6301_v62, 0.0 }
 0x8d4   : > { %v5783_v45 = vmul.f32 0.015625, %v5719_v3  ;;  %7933 = vtanh.f32 %v6577_v14  ;;  %v5720_v63 = vsel %vm258_vm2, %v5322_v43, %v5514_v1  ;;  %v6580_v42 = vadd.f32 %v7472_v53, %v14806_v31  ;;  %v6571_v56 = vpop.f32.mrb[75].mxu1 }
 0x8d5   : > { %v6366_v27 = vmax.f32 %v6302_v9, 0.0  ;;  %7935 = vtanh.f32 %v6569_v49  ;;  %v5784_v8 = vmul.f32 0.015625, %v5720_v63  ;;  %v6572_v12 = vadd.f32 %v14806_v31, %v6571_v56 }
 0x8d6   : > { %v5911_v44 = vsub.f32 %v5783_v45, %v5847_v59  ;;  %v5324_v11 = vpop.xlane.xlu0 %5323  ;;  %7937 = vtanh.f32 %v6580_v42  ;;  %v5976_v1 = vsub.f32 %v14374_v39, %v14966_v36  ;;  %v5977_v39 = vsub.f32 %v14378_v58, %v14988_v29 }
 0x8d7   : > { %v6406_v57 = vpack.c.bf16 %v6366_v27, %v6365_v50  ;;  %v5912_v55 = vsub.f32 %v5784_v8, %v5848_v22  ;;  %7939 = vtanh.f32 %v6572_v12  ;;  %v5326_v20 = vpop.xlane.xlu1 %5325 }
 0x8d8   : > { %v6039_v60 = vadd.f32 1e-05, %v5911_v44 }
 0x8d9   : > { %7502 = vmatmul.mubr.bf16.gmra.mrb[104].mxu1 %v6406_v57  ;;  %v6040_v4 = vadd.f32 1e-05, %v5912_v55 }
 0x8da   : > { %7941 = vrsqrt.f32 %v6039_v60  ;;  %v5516_v18 = vpop.xlane.xlu0 %5515 }
 0x8db   : > { %v5721_v2 = vsel %vm258_vm2, %v5324_v11, %v5516_v18  ;;  %7943 = vrsqrt.f32 %v6040_v4  ;;  %v5518_v23 = vpop.xlane.xlu1 %5517 }
 0x8dc   : > { %v5785_v40 = vmul.f32 0.015625, %v5721_v2  ;;  %v5722_v19 = vsel %vm258_vm2, %v5326_v20, %v5518_v23  ;;  %v5978_v23 = vsub.f32 %v14410_v33, %v14990_v24 }
 0x8dd   : > { %v5786_v43 = vmul.f32 0.015625, %v5722_v19 }
 0x8de   : > { %v5913_v61 = vsub.f32 %v5785_v40, %v5849_v10  ;;  %v5008_v6 = vpop.xlane.xlu0 %5007  ;;  %v7934_v62 = vpop.eup %7933 }
 0x8df   : > { %v7936_v59 = vpop.eup %7935  ;;  %6854 = vst.msk [vmem:[%s14855_s18 + $0x70] sm:$0xff] %vm6839_vm3, %v7934_v62  ;;  %v5914_v38 = vsub.f32 %v5786_v43, %v5850_v51  ;;  %v5010_v22 = vpop.xlane.xlu1 %5009 }
 0x8e0   : > { %v6041_v21 = vadd.f32 1e-05, %v5913_v61  ;;  %v7938_v14 = vpop.eup %7937  ;;  %6852 = vst.msk [vmem:[%s14855_s18 + $0x60] sm:$0xff] %vm6839_vm3, %v7936_v59 }
 0x8e1   : > { %v7940_v3 = vpop.eup %7939  ;;  %6855 = vst.msk [vmem:[%s14855_s18 + $0x78] sm:$0xff] %vm6839_vm3, %v7938_v14  ;;  %v6042_v13 = vadd.f32 1e-05, %v5914_v38 }
 0x8e2   : > { %7945 = vrsqrt.f32 %v6041_v21  ;;  %v5136_v9 = vpop.xlane.xlu0 %5135  ;;  %6853 = vst.msk [vmem:[%s14855_s18 + $0x68] sm:$0xff] %vm6839_vm3, %v7940_v3 }
 0x8e3   : > { %7947 = vrsqrt.f32 %v6042_v13  ;;  %v5138_v49 = vpop.xlane.xlu1 %5137  ;;  %v5595_v36 = vsel %vm258_vm2, %v5008_v6, %v5136_v9 }
 0x8e4   : > { %v7942_v45 = vpop.eup %7941  ;;  %v5596_v58 = vsel %vm258_vm2, %v5010_v22, %v5138_v49  ;;  %v15028_v43 = vmul.f32 0.015625, %v5595_v36 }
 0x8e5   : > { %v6167_v53 = vmul.f32 %v7942_v45, %v5975_v52  ;;  %v7944_v50 = vpop.eup %7943  ;;  %v15030_v59 = vmul.f32 0.015625, %v5596_v58 }
 0x8e6   : > { %v5012_v63 = vpop.xlane.xlu0 %5011  ;;  %v6168_v42 = vmul.f32 %v7944_v50, %v5976_v1  ;;  %v5851_v14 = vmul.f32 %v15028_v43, %v15028_v43 }
 0x8e7   : > { %v6235_v56 = vmul.f32 %v14937_v47, %v6167_v53  ;;  %v5014_v27 = vpop.xlane.xlu1 %5013  ;;  %v5852_v52 = vmul.f32 %v15030_v59, %v15030_v59 }
 0x8e8   : > { %v6236_v44 = vmul.f32 %v14937_v47, %v6168_v42 }
 0x8e9   : > { %v6303_v8 = vadd.f32 %v14948_v15, %v6235_v56  ;;  %v7475_v5 = vpop.f32.mrb[76].mxu1 }
 0x8ea   : > { %v5140_v28 = vpop.xlane.xlu0 %5139  ;;  %v6593_v12 = vadd.f32 %v7475_v5, %v14806_v31  ;;  %v6584_v11 = vpop.f32.mrb[77].mxu1  ;;  %v6304_v0 = vadd.f32 %v14948_v15, %v6236_v44 }
 0x8eb   : > { %v6585_v60 = vadd.f32 %v14806_v31, %v6584_v11  ;;  %v5142_v55 = vpop.xlane.xlu1 %5141  ;;  %v7476_v20 = vpop.f32.mrb[78].mxu1  ;;  %v6367_v2 = vmax.f32 %v6303_v8, 0.0  ;;  %v5597_v45 = vsel %vm258_vm2, %v5012_v63, %v5140_v28 }
 0x8ec   : > { %v7946_v57 = vpop.eup %7945  ;;  %7949 = vtanh.f32 %v6593_v12  ;;  %v6596_v4 = vadd.f32 %v7476_v20, %v14806_v31  ;;  %v6587_v18 = vpop.f32.mrb[79].mxu1  ;;  %v6368_v10 = vmax.f32 %v6304_v0, 0.0  ;;  %v5598_v8 = vsel %vm258_vm2, %v5014_v27, %v5142_v55 }
 0x8ed   : > { %v7948_v40 = vpop.eup %7947  ;;  %7951 = vtanh.f32 %v6585_v60  ;;  %v6588_v19 = vadd.f32 %v14806_v31, %v6587_v18  ;;  %v6169_v61 = vmul.f32 %v7946_v57, %v5977_v39  ;;  %v15050_v12 = vmul.f32 0.015625, %v5597_v45 }
 0x8ee   : > { %v5328_v29 = vpop.xlane.xlu0 %5327  ;;  %7953 = vtanh.f32 %v6596_v4  ;;  %v6407_v51 = vpack.c.bf16 %v6368_v10, %v6367_v2  ;;  %v6170_v62 = vmul.f32 %v7948_v40, %v5978_v23  ;;  %v15054_v39 = vmul.f32 0.015625, %v5598_v8 }
 0x8ef   : > { %v5330_v6 = vpop.xlane.xlu1 %5329  ;;  %7955 = vtanh.f32 %v6588_v19  ;;  %v6237_v33 = vmul.f32 %v14937_v47, %v6169_v61  ;;  %v5853_v20 = vmul.f32 %v15050_v12, %v15050_v12 }
 0x8f0   : > { %7505 = vmatprep.mubr.bf16.mxu1 %v6407_v51  ;;  %v6238_v21 = vmul.f32 %v14937_v47, %v6170_v62  ;;  %v5854_v10 = vmul.f32 %v15054_v39, %v15054_v39 }
 0x8f1   : > { %v6305_v22 = vadd.f32 %v14948_v15, %v6237_v33  ;;  %v5979_v33 = vsub.f32 %v14508_v34, %v15028_v43 }
 0x8f2   : > { %v5520_v24 = vpop.xlane.xlu0 %5519  ;;  %v6306_v9 = vadd.f32 %v14948_v15, %v6238_v21 }
 0x8f3   : > { %v5723_v38 = vsel %vm258_vm2, %v5328_v29, %v5520_v24  ;;  %v5522_v13 = vpop.xlane.xlu1 %5521  ;;  %v6369_v42 = vmax.f32 %v6305_v22, 0.0 }
 0x8f4   : > { %v5787_v3 = vmul.f32 0.015625, %v5723_v38  ;;  %v5724_v49 = vsel %vm258_vm2, %v5330_v6, %v5522_v13  ;;  %v6370_v56 = vmax.f32 %v6306_v9, 0.0  ;;  %v5980_v13 = vsub.f32 %v14516_v16, %v15030_v59 }
 0x8f5   : > { %v5788_v53 = vmul.f32 0.015625, %v5724_v49 }
 0x8f6   : > { %v5915_v1 = vsub.f32 %v5787_v3, %v5851_v14  ;;  %v5332_v50 = vpop.xlane.xlu0 %5331  ;;  %v7950_v44 = vpop.eup %7949  ;;  %v6408_v0 = vpack.c.bf16 %v6370_v56, %v6369_v42  ;;  %v5981_v56 = vsub.f32 %v14545_v54, %v15050_v12 }
 0x8f7   : > { %v7952_v5 = vpop.eup %7951  ;;  %6858 = vst.msk [vmem:[%s14855_s18 + $0x90] sm:$0xff] %vm6839_vm3, %v7950_v44  ;;  %v5916_v28 = vsub.f32 %v5788_v53, %v5852_v52  ;;  %v5334_v11 = vpop.xlane.xlu1 %5333 }
 0x8f8   : > { %v6043_v63 = vadd.f32 1e-05, %v5915_v1  ;;  %v7954_v57 = vpop.eup %7953  ;;  %6856 = vst.msk [vmem:[%s14855_s18 + $0x80] sm:$0xff] %vm6839_vm3, %v7952_v5  ;;  %7506 = vmatmul.mubr.bf16.gmra.mrb[108].mxu1 %v6408_v0  ;;  %v5982_v5 = vsub.f32 %v14573_v32, %v15054_v39 }
 0x8f9   : > { %6859 = vst.msk [vmem:[%s14855_s18 + $0x98] sm:$0xff] %vm6839_vm3, %v7954_v57  ;;  %v6044_v36 = vadd.f32 1e-05, %v5916_v28  ;;  %v7956_v60 = vpop.eup %7955 }
 0x8fa   : > { %7957 = vrsqrt.f32 %v6043_v63  ;;  %v5524_v27 = vpop.xlane.xlu0 %5523  ;;  %6857 = vst.msk [vmem:[%s14855_s18 + $0x88] sm:$0xff] %vm6839_vm3, %v7956_v60 }
 0x8fb   : > { %v5725_v55 = vsel %vm258_vm2, %v5332_v50, %v5524_v27  ;;  %7959 = vrsqrt.f32 %v6044_v36  ;;  %v5526_v18 = vpop.xlane.xlu1 %5525 }
 0x8fc   : > { %v5789_v4 = vmul.f32 0.015625, %v5725_v55  ;;  %v5726_v2 = vsel %vm258_vm2, %v5334_v11, %v5526_v18 }
 0x8fd   : > { %v5790_v23 = vmul.f32 0.015625, %v5726_v2 }
 0x8fe   : > { %v5917_v40 = vsub.f32 %v5789_v4, %v5853_v20  ;;  %v5016_v58 = vpop.xlane.xlu0 %5015 }
 0x8ff   : > { %v5918_v19 = vsub.f32 %v5790_v23, %v5854_v10  ;;  %v5018_v51 = vpop.xlane.xlu1 %5017 }
 0x900   : > { %v6045_v29 = vadd.f32 1e-05, %v5917_v40 }
 0x901   : > { %v6046_v61 = vadd.f32 1e-05, %v5918_v19  ;;  %v7479_v6 = vpop.f32.mrb[80].mxu1 }
 0x902   : > { %7961 = vrsqrt.f32 %v6045_v29  ;;  %v5144_v62 = vpop.xlane.xlu0 %5143  ;;  %v6609_v24 = vadd.f32 %v7479_v6, %v14806_v31  ;;  %v6600_v21 = vpop.f32.mrb[81].mxu1 }
 0x903   : > { %7963 = vrsqrt.f32 %v6046_v61  ;;  %v6601_v22 = vadd.f32 %v14806_v31, %v6600_v21  ;;  %v5146_v14 = vpop.xlane.xlu1 %5145  ;;  %v7480_v3 = vpop.f32.mrb[82].mxu1  ;;  %v5599_v28 = vsel %vm258_vm2, %v5016_v58, %v5144_v62 }
 0x904   : > { %v7958_v38 = vpop.eup %7957  ;;  %7965 = vtanh.f32 %v6609_v24  ;;  %v6612_v9 = vadd.f32 %v7480_v3, %v14806_v31  ;;  %v6603_v52 = vpop.f32.mrb[83].mxu1  ;;  %v5600_v54 = vsel %vm258_vm2, %v5018_v51, %v5146_v14  ;;  %v15091_v39 = vmul.f32 0.015625, %v5599_v28 }
 0x905   : > { %v6171_v45 = vmul.f32 %v7958_v38, %v5979_v33  ;;  %v7960_v49 = vpop.eup %7959  ;;  %7967 = vtanh.f32 %v6601_v22  ;;  %v6604_v43 = vadd.f32 %v14806_v31, %v6603_v52  ;;  %v15097_v40 = vmul.f32 0.015625, %v5600_v54 }
 0x906   : > { %v5020_v34 = vpop.xlane.xlu0 %5019  ;;  %7969 = vtanh.f32 %v6612_v9  ;;  %v6172_v1 = vmul.f32 %v7960_v49, %v5980_v13  ;;  %v5855_v51 = vmul.f32 %v15091_v39, %v15091_v39 }
 0x907   : > { %v6239_v53 = vmul.f32 %v14937_v47, %v6171_v45  ;;  %v5022_v50 = vpop.xlane.xlu1 %5021  ;;  %7971 = vtanh.f32 %v6604_v43  ;;  %v5856_v38 = vmul.f32 %v15097_v40, %v15097_v40 }
 0x908   : > { %v6240_v42 = vmul.f32 %v14937_v47, %v6172_v1 }
 0x909   : > { %v6307_v16 = vadd.f32 %v14948_v15, %v6239_v53 }
 0x90a   : > { %v5148_v59 = vpop.xlane.xlu0 %5147  ;;  %v6308_v44 = vadd.f32 %v14948_v15, %v6240_v42 }
 0x90b   : > { %v5150_v63 = vpop.xlane.xlu1 %5149  ;;  %v6371_v11 = vmax.f32 %v6307_v16, 0.0  ;;  %v5601_v62 = vsel %vm258_vm2, %v5020_v34, %v5148_v59 }
 0x90c   : > { %v7962_v8 = vpop.eup %7961  ;;  %v6372_v0 = vmax.f32 %v6308_v44, 0.0  ;;  %v5602_v22 = vsel %vm258_vm2, %v5022_v50, %v5150_v63  ;;  %v15116_v52 = vmul.f32 0.015625, %v5601_v62 }
 0x90d   : > { %v6173_v57 = vmul.f32 %v7962_v8, %v5981_v56  ;;  %v7964_v36 = vpop.eup %7963  ;;  %v15118_v43 = vmul.f32 0.015625, %v5602_v22 }
 0x90e   : > { %v5336_v27 = vpop.xlane.xlu0 %5335  ;;  %v7966_v60 = vpop.eup %7965  ;;  %v6409_v12 = vpack.c.bf16 %v6372_v0, %v6371_v11  ;;  %v6174_v55 = vmul.f32 %v7964_v36, %v5982_v5  ;;  %v5857_v56 = vmul.f32 %v15116_v52, %v15116_v52 }
 0x90f   : > { %v6241_v20 = vmul.f32 %v14937_v47, %v6173_v57  ;;  %v7968_v32 = vpop.eup %7967  ;;  %6862 = vst.msk [vmem:[%s14855_s18 + $0xb0] sm:$0xff] %vm6839_vm3, %v7966_v60  ;;  %v5338_v4 = vpop.xlane.xlu1 %5337  ;;  %v5858_v28 = vmul.f32 %v15118_v43, %v15118_v43 }
 0x910   : > { %v7970_v18 = vpop.eup %7969  ;;  %6860 = vst.msk [vmem:[%s14855_s18 + $0xa0] sm:$0xff] %vm6839_vm3, %v7968_v32  ;;  %7509 = vmatprep.mubr.bf16.mxu1 %v6409_v12  ;;  %v6242_v2 = vmul.f32 %v14937_v47, %v6174_v55 }
 0x911   : > { %v6309_v10 = vadd.f32 %v14948_v15, %v6241_v20  ;;  %6863 = vst.msk [vmem:[%s14855_s18 + $0xb8] sm:$0xff] %vm6839_vm3, %v7970_v18  ;;  %v7972_v58 = vpop.eup %7971  ;;  %v5983_v18 = vsub.f32 %v14623_v46, %v15091_v39 }
 0x912   : > { %v5528_v23 = vpop.xlane.xlu0 %5527  ;;  %v6310_v19 = vadd.f32 %v14948_v15, %v6242_v2  ;;  %6861 = vst.msk [vmem:[%s14855_s18 + $0xa8] sm:$0xff] %vm6839_vm3, %v7972_v58 }
 0x913   : > { %v5727_v29 = vsel %vm258_vm2, %v5336_v27, %v5528_v23  ;;  %v5530_v6 = vpop.xlane.xlu1 %5529  ;;  %v6373_v24 = vmax.f32 %v6309_v10, 0.0  ;;  %v5984_v23 = vsub.f32 %v14627_v30, %v15097_v40 }
 0x914   : > { %v5791_v61 = vmul.f32 0.015625, %v5727_v29  ;;  %v5728_v33 = vsel %vm258_vm2, %v5338_v4, %v5530_v6  ;;  %v6374_v21 = vmax.f32 %v6310_v19, 0.0 }
 0x915   : > { %v5792_v3 = vmul.f32 0.015625, %v5728_v33 }
 0x916   : > { %v5919_v14 = vsub.f32 %v5791_v61, %v5855_v51  ;;  %v5340_v13 = vpop.xlane.xlu0 %5339  ;;  %v6410_v9 = vpack.c.bf16 %v6374_v21, %v6373_v24  ;;  %v5985_v21 = vsub.f32 %v14654_v17, %v15116_v52 }
 0x917   : > { %v5920_v49 = vsub.f32 %v5792_v3, %v5856_v38  ;;  %v5342_v34 = vpop.xlane.xlu1 %5341  ;;  %v5986_v3 = vsub.f32 %v14665_v26, %v15118_v43 }
 0x918   : > { %v6047_v45 = vadd.f32 1e-05, %v5919_v14  ;;  %7510 = vmatmul.mubr.bf16.gmra.mrb[112].mxu1 %v6410_v9 }
 0x919   : > { %v6048_v1 = vadd.f32 1e-05, %v5920_v49  ;;  %v7483_v53 = vpop.f32.mrb[84].mxu1 }
 0x91a   : > { %7973 = vrsqrt.f32 %v6047_v45  ;;  %v5532_v42 = vpop.xlane.xlu0 %5531  ;;  %v6625_v16 = vadd.f32 %v7483_v53, %v14806_v31  ;;  %v6616_v59 = vpop.f32.mrb[85].mxu1 }
 0x91b   : > { %v5729_v50 = vsel %vm258_vm2, %v5340_v13, %v5532_v42  ;;  %7975 = vrsqrt.f32 %v6048_v1  ;;  %v6617_v8 = vadd.f32 %v14806_v31, %v6616_v59  ;;  %v5534_v5 = vpop.xlane.xlu1 %5533  ;;  %v7484_v63 = vpop.f32.mrb[86].mxu1 }
 0x91c   : > { %v5793_v44 = vmul.f32 0.015625, %v5729_v50  ;;  %7977 = vtanh.f32 %v6625_v16  ;;  %v5730_v11 = vsel %vm258_vm2, %v5342_v34, %v5534_v5  ;;  %v6628_v0 = vadd.f32 %v7484_v63, %v14806_v31  ;;  %v6619_v57 = vpop.f32.mrb[87].mxu1 }
 0x91d   : > { %7979 = vtanh.f32 %v6617_v8  ;;  %v5794_v27 = vmul.f32 0.015625, %v5730_v11  ;;  %v6620_v60 = vadd.f32 %v14806_v31, %v6619_v57 }
 0x91e   : > { %v5921_v36 = vsub.f32 %v5793_v44, %v5857_v56  ;;  %v15132_v54 = vpop.xlane.xlu0 %5023  ;;  %7981 = vtanh.f32 %v6628_v0 }
 0x91f   : > { %v5922_v55 = vsub.f32 %v5794_v27, %v5858_v28  ;;  %7983 = vtanh.f32 %v6620_v60  ;;  %v15134_v20 = vpop.xlane.xlu1 %5025 }
 0x920   : > { %v6049_v12 = vadd.f32 1e-05, %v5921_v36  ;;  %v15178_v36 = vld [vmem:[%s15413_s5] ss:$0 sm:$0xff] }
 0x921   : > { %v6050_v32 = vadd.f32 1e-05, %v5922_v55  ;;  %v17057_v55 = vld [vmem:[#allocation12_spill] sm:$0xff] }
 0x922   : > { %7985 = vrsqrt.f32 %v6049_v12  ;;  %v5032_v4 = vpop.xlane.xlu0 %5031 }
 0x923   : > { %7987 = vrsqrt.f32 %v6050_v32  ;;  %v5034_v10 = vpop.xlane.xlu1 %5033  ;;  %v5543_v32 = vsel %vm258_vm2, %v17057_v55, %v5032_v4 }
 0x924   : > { %v7974_v2 = vpop.eup %7973 }
 0x925   : > { %v6175_v58 = vmul.f32 %v7974_v2, %v5983_v18  ;;  %v7976_v29 = vpop.eup %7975  ;;  %v17058_v18 = vld [vmem:[#allocation68_spill] sm:$0xff] }
 0x926   : > { %v5152_v19 = vpop.xlane.xlu0 %5151  ;;  %v7978_v51 = vpop.eup %7977  ;;  %v6176_v61 = vmul.f32 %v7976_v29, %v5984_v23  ;;  %v5544_v2 = vsel %vm258_vm2, %v17058_v18, %v5034_v10  ;;  %v15187_v23 = vmul.f32 0.015625, %v5543_v32 }
 0x927   : > { %v6243_v6 = vmul.f32 %v14937_v47, %v6175_v58  ;;  %v7980_v62 = vpop.eup %7979  ;;  %6866 = vst.msk [vmem:[%s14855_s18 + $0xd0] sm:$0xff] %vm6839_vm3, %v7978_v51  ;;  %v5154_v33 = vpop.xlane.xlu1 %5153  ;;  %v5603_v29 = vsel %vm258_vm2, %v15132_v54, %v5152_v19  ;;  %v15192_v51 = vmul.f32 0.015625, %v5544_v2 }
 0x928   : > { %v7982_v46 = vpop.eup %7981  ;;  %6864 = vst.msk [vmem:[%s14855_s18 + $0xc0] sm:$0xff] %vm6839_vm3, %v7980_v62  ;;  %v6244_v39 = vmul.f32 %v14937_v47, %v6176_v61  ;;  %v5604_v4 = vsel %vm258_vm2, %v15134_v20, %v5154_v33  ;;  %v5927_v32 = vsub.f32 %v17046_v41, %v15187_v23 }
 0x929   : > { %v6311_v24 = vadd.f32 %v14948_v15, %v6243_v6  ;;  %v7984_v30 = vpop.eup %7983  ;;  %6867 = vst.msk [vmem:[%s14855_s18 + $0xd8] sm:$0xff] %vm6839_vm3, %v7982_v46  ;;  %v5799_v46 = vmul.f32 %v15187_v23, %v15187_v23  ;;  %v5800_v33 = vmul.f32 %v15192_v51, %v15192_v51 }
 0x92a   : > { %v15149_v40 = vpop.xlane.xlu0 %5027  ;;  %6865 = vst.msk [vmem:[%s14855_s18 + $0xc8] sm:$0xff] %vm6839_vm3, %v7984_v30  ;;  %v6312_v38 = vadd.f32 %v14948_v15, %v6244_v39  ;;  %v15201_v39 = vmul.f32 0.015625, %v5603_v29  ;;  %v15205_v30 = vmul.f32 0.015625, %v5604_v4 }
 0x92b   : > { %v15156_v14 = vpop.xlane.xlu1 %5029  ;;  %v6375_v13 = vmax.f32 %v6311_v24, 0.0 }
 0x92c   : > { %v7986_v22 = vpop.eup %7985  ;;  %v6376_v9 = vmax.f32 %v6312_v38, 0.0 }
 0x92d   : > { %v6177_v45 = vmul.f32 %v7986_v22, %v5985_v21  ;;  %v7988_v49 = vpop.eup %7987 }
 0x92e   : > { %v15160_v34 = vpop.xlane.xlu0 %5035  ;;  %v6411_v1 = vpack.c.bf16 %v6376_v9, %v6375_v13  ;;  %v6178_v53 = vmul.f32 %v7988_v49, %v5986_v3  ;;  %v5859_v9 = vmul.f32 %v15201_v39, %v15201_v39 }
 0x92f   : > { %v6245_v17 = vmul.f32 %v14937_v47, %v6177_v45  ;;  %v15163_v52 = vpop.xlane.xlu1 %5037 }
 0x930   : > { %7513 = vmatprep.mubr.bf16.mxu1 %v6411_v1  ;;  %v6246_v42 = vmul.f32 %v14937_v47, %v6178_v53 }
 0x931   : > { %v6313_v16 = vadd.f32 %v14948_v15, %v6245_v17  ;;  %v7487_v50 = vpop.f32.mrb[88].mxu1  ;;  %v5860_v17 = vmul.f32 %v15205_v30, %v15205_v30 }
 0x932   : > { %v15167_v59 = vpop.xlane.xlu0 %5155  ;;  %v6641_v26 = vadd.f32 %v7487_v50, %v14806_v31  ;;  %v6632_v43 = vpop.f32.mrb[89].mxu1  ;;  %v6314_v56 = vadd.f32 %v14948_v15, %v6246_v42 }
 0x933   : > { %v6633_v44 = vadd.f32 %v14806_v31, %v6632_v43  ;;  %v15172_v8 = vpop.xlane.xlu1 %5157  ;;  %v7488_v5 = vpop.f32.mrb[90].mxu1  ;;  %v6377_v11 = vmax.f32 %v6313_v16, 0.0 }
 0x934   : > { %7989 = vtanh.f32 %v6641_v26  ;;  %v6644_v63 = vadd.f32 %v7488_v5, %v14806_v31  ;;  %v6635_v28 = vpop.f32.mrb[91].mxu1  ;;  %v6378_v0 = vmax.f32 %v6314_v56, 0.0  ;;  %v17059_v56 = vld [vmem:[#allocation114_spill] sm:$0xff]  ;;  %v5606_v18 = vsel %vm258_vm2, %v15156_v14, %v15172_v8 }
 0x935   : > { %7991 = vtanh.f32 %v6633_v44  ;;  %v6636_v27 = vadd.f32 %v15178_v36, %v6635_v28  ;;  %v5545_v44 = vsel %vm258_vm2, %v17059_v56, %v15160_v34 }
 0x936   : > { %v5224_v57 = vpop.xlane.xlu0 %5223  ;;  %7993 = vtanh.f32 %v6644_v63  ;;  %v6412_v60 = vpack.c.bf16 %v6378_v0, %v6377_v11  ;;  %v15229_v11 = vmul.f32 0.015625, %v5545_v44 }
 0x937   : > { %v5226_v12 = vpop.xlane.xlu1 %5225  ;;  %7995 = vtanh.f32 %v6636_v27  ;;  %v17060_v27 = vld [vmem:[#allocation54_spill] sm:$0xff] }
 0x938   : > { %7514 = vmatmul.mubr.bf16.gmra.mrb[116].mxu1 %v6412_v60  ;;  %v5546_v60 = vsel %vm258_vm2, %v17060_v27, %v15163_v52 }
 0x93a   : > { %v5344_v31 = vpop.xlane.xlu0 %5343 }
 0x93b   : > { %v5346_v58 = vpop.xlane.xlu1 %5345 }
 0x93e   : > { %v5416_v61 = vpop.xlane.xlu0 %5415  ;;  %v7990_v6 = vpop.eup %7989 }
 0x93f   : > { %v5671_v10 = vsel %vm258_vm2, %v5224_v57, %v5416_v61  ;;  %v7992_v62 = vpop.eup %7991  ;;  %6870 = vst.msk [vmem:[%s14855_s18 + $0xf0] sm:$0xff] %vm6839_vm3, %v7990_v6  ;;  %v5418_v19 = vpop.xlane.xlu1 %5417 }
 0x940   : > { %v5735_v54 = vmul.f32 0.015625, %v5671_v10  ;;  %v7994_v24 = vpop.eup %7993  ;;  %6868 = vst.msk [vmem:[%s14855_s18 + $0xe0] sm:$0xff] %vm6839_vm3, %v7992_v62  ;;  %v5672_v20 = vsel %vm258_vm2, %v5226_v12, %v5418_v19  ;;  %v5605_v12 = vsel %vm258_vm2, %v15149_v40, %v15167_v59  ;;  %v5987_v40 = vsub.f32 %v14703_v7, %v15201_v39 }
 0x941   : > { %6871 = vst.msk [vmem:[%s14855_s18 + $0xf8] sm:$0xff] %vm6839_vm3, %v7994_v24  ;;  %v5736_v38 = vmul.f32 0.015625, %v5672_v20  ;;  %v7996_v3 = vpop.eup %7995  ;;  %v5801_v59 = vmul.f32 %v15229_v11, %v15229_v11  ;;  %v15255_v29 = vmul.f32 0.015625, %v5605_v12  ;;  %v15260_v7 = vmul.f32 0.015625, %v5606_v18 }
 0x942   : > { %v5863_v21 = vsub.f32 %v5735_v54, %v5799_v46  ;;  %v5536_v22 = vpop.xlane.xlu0 %5535  ;;  %6869 = vst.msk [vmem:[%s14855_s18 + $0xe8] sm:$0xff] %vm6839_vm3, %v7996_v3  ;;  %v5988_v62 = vsub.f32 %v14711_v25, %v15205_v30 }
 0x943   : > { %v5731_v13 = vsel %vm258_vm2, %v5344_v31, %v5536_v22  ;;  %v5864_v49 = vsub.f32 %v5736_v38, %v5800_v33  ;;  %v5538_v53 = vpop.xlane.xlu1 %5537  ;;  %v5928_v31 = vsub.f32 %v17048_v48, %v15192_v51  ;;  %v5862_v3 = vmul.f32 %v15260_v7, %v15260_v7 }
 0x944   : > { %v5991_v45 = vadd.f32 1e-05, %v5863_v21  ;;  %v5795_v1 = vmul.f32 0.015625, %v5731_v13  ;;  %v5732_v42 = vsel %vm258_vm2, %v5346_v58, %v5538_v53  ;;  %v15252_v58 = vmul.f32 0.015625, %v5546_v60 }
 0x945   : > { %v5992_v16 = vadd.f32 1e-05, %v5864_v49  ;;  %v5796_v26 = vmul.f32 0.015625, %v5732_v42  ;;  %v5861_v21 = vmul.f32 %v15255_v29, %v15255_v29 }
 0x946   : > { %7997 = vrsqrt.f32 %v5991_v45  ;;  %v5923_v50 = vsub.f32 %v5795_v1, %v5859_v9  ;;  %v5228_v43 = vpop.xlane.xlu0 %5227  ;;  %v5802_v19 = vmul.f32 %v15252_v58, %v15252_v58 }
 0x947   : > { %7999 = vrsqrt.f32 %v5992_v16  ;;  %v5924_v63 = vsub.f32 %v5796_v26, %v5860_v17  ;;  %v5230_v28 = vpop.xlane.xlu1 %5229 }
 0x948   : > { %v6051_v5 = vadd.f32 1e-05, %v5923_v50 }
 0x949   : > { %v6052_v0 = vadd.f32 1e-05, %v5924_v63 }
 0x94a   : > { %8001 = vrsqrt.f32 %v6051_v5  ;;  %v5348_v57 = vpop.xlane.xlu0 %5347 }
 0x94b   : > { %8003 = vrsqrt.f32 %v6052_v0  ;;  %v5350_v34 = vpop.xlane.xlu1 %5349  ;;  %v7491_v55 = vpop.f32.mrb[92].mxu1 }
 0x94c   : > { %v6657_v52 = vadd.f32 %v15178_v36, %v7491_v55  ;;  %v6648_v2 = vpop.f32.mrb[93].mxu1 }
 0x94d   : > { %v6649_v41 = vadd.f32 %v15178_v36, %v6648_v2  ;;  %v7492_v23 = vpop.f32.mrb[94].mxu1 }
 0x94e   : > { %v5420_v48 = vpop.xlane.xlu0 %5419  ;;  %8005 = vtanh.f32 %v6657_v52  ;;  %v6660_v14 = vadd.f32 %v15178_v36, %v7492_v23  ;;  %v6651_v51 = vpop.f32.mrb[95].mxu1  ;;  %v17061_v23 = vld [vmem:[#allocation213_spill] sm:$0xff] }
 0x94f   : > { %v5673_v8 = vsel %vm258_vm2, %v5228_v43, %v5420_v48  ;;  %8007 = vtanh.f32 %v6649_v41  ;;  %v6652_v6 = vadd.f32 %v15178_v36, %v6651_v51  ;;  %v5422_v10 = vpop.xlane.xlu1 %5421  ;;  %v5930_v48 = vsub.f32 %v17061_v23, %v15252_v58  ;;  %v17062_v51 = vld [vmem:[#allocation126_spill] sm:$0xff] }
 0x950   : > { %v7998_v4 = vpop.eup %7997  ;;  %v5737_v61 = vmul.f32 0.015625, %v5673_v8  ;;  %8009 = vtanh.f32 %v6660_v14  ;;  %v5674_v46 = vsel %vm258_vm2, %v5230_v28, %v5422_v10 }
 0x951   : > { %v6119_v39 = vmul.f32 %v7998_v4, %v5927_v32  ;;  %v8000_v54 = vpop.eup %7999  ;;  %8011 = vtanh.f32 %v6652_v6  ;;  %v5738_v20 = vmul.f32 0.015625, %v5674_v46  ;;  %v5989_v4 = vsub.f32 %v17062_v51, %v15255_v29 }
 0x952   : > { %v5865_v24 = vsub.f32 %v5737_v61, %v5801_v59  ;;  %v5540_v33 = vpop.xlane.xlu0 %5539  ;;  %v6120_v25 = vmul.f32 %v8000_v54, %v5928_v31 }
 0x953   : > { %v5733_v38 = vsel %vm258_vm2, %v5348_v57, %v5540_v33  ;;  %v6187_v30 = vmul.f32 %v14937_v47, %v6119_v39  ;;  %v5866_v9 = vsub.f32 %v5738_v20, %v5802_v19  ;;  %v5542_v49 = vpop.xlane.xlu1 %5541 }
 0x954   : > { %v8002_v22 = vpop.eup %8001  ;;  %v5993_v13 = vadd.f32 1e-05, %v5865_v24  ;;  %v5797_v45 = vmul.f32 0.015625, %v5733_v38  ;;  %v5734_v1 = vsel %vm258_vm2, %v5350_v34, %v5542_v49  ;;  %v6188_v53 = vmul.f32 %v14937_v47, %v6120_v25 }
 0x955   : > { %v6255_v17 = vadd.f32 %v14948_v15, %v6187_v30  ;;  %v6179_v42 = vmul.f32 %v8002_v22, %v5987_v40  ;;  %v8004_v16 = vpop.eup %8003  ;;  %v5994_v50 = vadd.f32 1e-05, %v5866_v9  ;;  %v5798_v43 = vmul.f32 0.015625, %v5734_v1 }
 0x956   : > { %8013 = vrsqrt.f32 %v5993_v13  ;;  %v5925_v26 = vsub.f32 %v5797_v45, %v5861_v21  ;;  %v6256_v56 = vadd.f32 %v14948_v15, %v6188_v53  ;;  %v6180_v44 = vmul.f32 %v8004_v16, %v5988_v62  ;;  %v17063_v62 = vld [vmem:[#allocation163_spill] sm:$0xff] }
 0x957   : > { %v6247_v5 = vmul.f32 %v14937_v47, %v6179_v42  ;;  %8015 = vrsqrt.f32 %v5994_v50  ;;  %v5926_v63 = vsub.f32 %v5798_v43, %v5862_v3  ;;  %v6319_v0 = vmax.f32 %v6255_v17, 0.0 }
 0x958   : > { %v6053_v37 = vadd.f32 1e-05, %v5925_v26  ;;  %v8006_v28 = vpop.eup %8005  ;;  %v6320_v57 = vmax.f32 %v6256_v56, 0.0  ;;  %v6248_v27 = vmul.f32 %v14937_v47, %v6180_v44  ;;  %v5929_v40 = vsub.f32 %v17054_v35, %v15229_v11 }
 0x959   : > { %v6315_v60 = vadd.f32 %v14948_v15, %v6247_v5  ;;  %v8008_v12 = vpop.eup %8007  ;;  %6874 = vst.msk [vmem:[%s14855_s18 + $0x110] sm:$0xff] %vm6839_vm3, %v8006_v28  ;;  %v6054_v34 = vadd.f32 1e-05, %v5926_v63  ;;  %v5990_v46 = vsub.f32 %v17063_v62, %v15260_v7 }
 0x95a   : > { %8017 = vrsqrt.f32 %v6053_v37  ;;  %v8010_v55 = vpop.eup %8009  ;;  %6872 = vst.msk [vmem:[%s14855_s18 + $0x100] sm:$0xff] %vm6839_vm3, %v8008_v12  ;;  %v6383_v32 = vpack.c.bf16 %v6320_v57, %v6319_v0  ;;  %v6316_v31 = vadd.f32 %v14948_v15, %v6248_v27 }
 0x95b   : > { %v8012_v18 = vpop.eup %8011  ;;  %6875 = vst.msk [vmem:[%s14855_s18 + $0x118] sm:$0xff] %vm6839_vm3, %v8010_v55  ;;  %8019 = vrsqrt.f32 %v6054_v34  ;;  %v6379_v52 = vmax.f32 %v6315_v60, 0.0 }
 0x95c   : > { %6873 = vst.msk [vmem:[%s14855_s18 + $0x108] sm:$0xff] %vm6839_vm3, %v8012_v18  ;;  %7457 = vmatprep.mubr.bf16.mxu0 %v6383_v32  ;;  %v6380_v2 = vmax.f32 %v6316_v31, 0.0 }
 0x95e   : > { %v6413_v59 = vpack.c.bf16 %v6380_v2, %v6379_v52 }
 0x960   : > { %v8014_v41 = vpop.eup %8013  ;;  %7517 = vmatprep.mubr.bf16.mxu1 %v6413_v59 }
 0x961   : > { %v6121_v14 = vmul.f32 %v8014_v41, %v5929_v40  ;;  %v8016_v8 = vpop.eup %8015 }
 0x962   : > { %v6122_v61 = vmul.f32 %v8016_v8, %v5930_v48 }
 0x963   : > { %v6189_v6 = vmul.f32 %v14937_v47, %v6121_v14 }
 0x964   : > { %v8018_v10 = vpop.eup %8017  ;;  %v6190_v35 = vmul.f32 %v14937_v47, %v6122_v61 }
 0x965   : > { %v6257_v11 = vadd.f32 %v14948_v15, %v6189_v6  ;;  %v6181_v39 = vmul.f32 %v8018_v10, %v5989_v4  ;;  %v8020_v54 = vpop.eup %8019 }
 0x966   : > { %v6258_v58 = vadd.f32 %v14948_v15, %v6190_v35  ;;  %v6182_v19 = vmul.f32 %v8020_v54, %v5990_v46 }
 0x967   : > { %v6249_v24 = vmul.f32 %v14937_v47, %v6181_v39  ;;  %v6321_v20 = vmax.f32 %v6257_v11, 0.0 }
 0x968   : > { %v6322_v29 = vmax.f32 %v6258_v58, 0.0  ;;  %v6250_v33 = vmul.f32 %v14937_v47, %v6182_v19 }
 0x969   : > { %v6317_v21 = vadd.f32 %v14948_v15, %v6249_v24 }
 0x96a   : > { %v6384_v38 = vpack.c.bf16 %v6322_v29, %v6321_v20  ;;  %v6318_v7 = vadd.f32 %v14948_v15, %v6250_v33 }
 0x96b   : > { %v7495_v25 = vpop.f32.mrb[96].mxu1  ;;  %v6381_v3 = vmax.f32 %v6317_v21, 0.0 }
 0x96c   : > { %v6673_v30 = vadd.f32 %v15178_v36, %v7495_v25  ;;  %7458 = vmatmul.mubr.bf16.vlgmr.msra.gmra.mrb[128].mxu0 %v6384_v38  ;;  %v6664_v22 = vpop.f32.mrb[97].mxu1  ;;  %v6382_v13 = vmax.f32 %v6318_v7, 0.0 }
 0x96d   : > { %v6665_v9 = vadd.f32 %v15178_v36, %v6664_v22  ;;  %v7496_v45 = vpop.f32.mrb[98].mxu1 }
 0x96e   : > { %8021 = vtanh.f32 %v6673_v30  ;;  %v6676_v47 = vadd.f32 %v15178_v36, %v7496_v45  ;;  %v6667_v49 = vpop.f32.mrb[99].mxu1  ;;  %v6414_v1 = vpack.c.bf16 %v6382_v13, %v6381_v3 }
 0x96f   : > { %8023 = vtanh.f32 %v6665_v9  ;;  %v6668_v15 = vadd.f32 %v15178_v36, %v6667_v49 }
 0x970   : > { %8025 = vtanh.f32 %v6676_v47  ;;  %7518 = vmatmul.mubr.bf16.gmra.mrb[120].mxu1 %v6414_v1 }
 0x971   : > { %8027 = vtanh.f32 %v6668_v15 }
 0x978   : > { %v8022_v53 = vpop.eup %8021 }
 0x979   : > { %v8024_v17 = vpop.eup %8023  ;;  %6878 = vst.msk [vmem:[%s14855_s18 + $0x130] sm:$0xff] %vm6839_vm3, %v8022_v53 }
 0x97a   : > { %v8026_v42 = vpop.eup %8025  ;;  %6876 = vst.msk [vmem:[%s14855_s18 + $0x120] sm:$0xff] %vm6839_vm3, %v8024_v17 }
 0x97b   : > { %v8028_v16 = vpop.eup %8027  ;;  %6879 = vst.msk [vmem:[%s14855_s18 + $0x138] sm:$0xff] %vm6839_vm3, %v8026_v42 }
 0x97c   : > { %6877 = vst.msk [vmem:[%s14855_s18 + $0x128] sm:$0xff] %vm6839_vm3, %v8028_v16 }
 0x98b   : > { %v7499_v50 = vpop.f32.mrb[100].mxu1 }
 0x98c   : > { %v6689_v26 = vadd.f32 %v15178_v36, %v7499_v50  ;;  %v6680_v43 = vpop.f32.mrb[101].mxu1 }
 0x98d   : > { %v6681_v56 = vadd.f32 %v15178_v36, %v6680_v43  ;;  %v7500_v44 = vpop.f32.mrb[102].mxu1 }
 0x98e   : > { %8029 = vtanh.f32 %v6689_v26  ;;  %v6692_v5 = vadd.f32 %v15178_v36, %v7500_v44  ;;  %v6683_v37 = vpop.f32.mrb[103].mxu1 }
 0x98f   : > { %8031 = vtanh.f32 %v6681_v56  ;;  %v6684_v63 = vadd.f32 %v15178_v36, %v6683_v37 }
 0x990   : > { %8033 = vtanh.f32 %v6692_v5 }
 0x991   : > { %8035 = vtanh.f32 %v6684_v63 }
 0x998   : > { %v8030_v28 = vpop.eup %8029 }
 0x999   : > { %v8032_v0 = vpop.eup %8031  ;;  %6882 = vst.msk [vmem:[%s14855_s18 + $0x150] sm:$0xff] %vm6839_vm3, %v8030_v28 }
 0x99a   : > { %v8034_v57 = vpop.eup %8033  ;;  %6880 = vst.msk [vmem:[%s14855_s18 + $0x140] sm:$0xff] %vm6839_vm3, %v8032_v0 }
 0x99b   : > { %v8036_v27 = vpop.eup %8035  ;;  %6883 = vst.msk [vmem:[%s14855_s18 + $0x158] sm:$0xff] %vm6839_vm3, %v8034_v57 }
 0x99c   : > { %6881 = vst.msk [vmem:[%s14855_s18 + $0x148] sm:$0xff] %vm6839_vm3, %v8036_v27 }
 0x9ac   : > { %v7503_v60 = vpop.f32.mrb[104].mxu1 }
 0x9ad   : > { %v6705_v12 = vadd.f32 %v15178_v36, %v7503_v60  ;;  %v6696_v34 = vpop.f32.mrb[105].mxu1 }
 0x9ae   : > { %v6697_v55 = vadd.f32 %v15178_v36, %v6696_v34  ;;  %v7504_v32 = vpop.f32.mrb[106].mxu1 }
 0x9af   : > { %8037 = vtanh.f32 %v6705_v12  ;;  %v6708_v31 = vadd.f32 %v15178_v36, %v7504_v32  ;;  %v6699_v18 = vpop.f32.mrb[107].mxu1 }
 0x9b0   : > { %8039 = vtanh.f32 %v6697_v55  ;;  %v6700_v52 = vadd.f32 %v15178_v36, %v6699_v18 }
 0x9b1   : > { %8041 = vtanh.f32 %v6708_v31 }
 0x9b2   : > { %8043 = vtanh.f32 %v6700_v52 }
 0x9b9   : > { %v8038_v2 = vpop.eup %8037 }
 0x9ba   : > { %v8040_v40 = vpop.eup %8039  ;;  %6886 = vst.msk [vmem:[%s14855_s18 + $0x170] sm:$0xff] %vm6839_vm3, %v8038_v2 }
 0x9bb   : > { %v8042_v59 = vpop.eup %8041  ;;  %6884 = vst.msk [vmem:[%s14855_s18 + $0x160] sm:$0xff] %vm6839_vm3, %v8040_v40 }
 0x9bc   : > { %v8044_v41 = vpop.eup %8043  ;;  %6887 = vst.msk [vmem:[%s14855_s18 + $0x178] sm:$0xff] %vm6839_vm3, %v8042_v59 }
 0x9bd   : > { %6885 = vst.msk [vmem:[%s14855_s18 + $0x168] sm:$0xff] %vm6839_vm3, %v8044_v41 }
 0x9cb   : > { %v7507_v23 = vpop.f32.mrb[108].mxu1 }
 0x9cc   : > { %v6721_v48 = vadd.f32 %v15178_v36, %v7507_v23  ;;  %v6712_v14 = vpop.f32.mrb[109].mxu1 }
 0x9cd   : > { %v6713_v8 = vadd.f32 %v15178_v36, %v6712_v14  ;;  %v7508_v51 = vpop.f32.mrb[110].mxu1 }
 0x9ce   : > { %8045 = vtanh.f32 %v6721_v48  ;;  %v6724_v4 = vadd.f32 %v15178_v36, %v7508_v51  ;;  %v6715_v61 = vpop.f32.mrb[111].mxu1 }
 0x9cf   : > { %8047 = vtanh.f32 %v6713_v8  ;;  %v6716_v6 = vadd.f32 %v15178_v36, %v6715_v61 }
 0x9d0   : > { %8049 = vtanh.f32 %v6724_v4 }
 0x9d1   : > { %8051 = vtanh.f32 %v6716_v6 }
 0x9d8   : > { %v8046_v10 = vpop.eup %8045 }
 0x9d9   : > { %v8048_v62 = vpop.eup %8047  ;;  %6890 = vst.msk [vmem:[%s14855_s18 + $0x190] sm:$0xff] %vm6839_vm3, %v8046_v10 }
 0x9da   : > { %v8050_v46 = vpop.eup %8049  ;;  %6888 = vst.msk [vmem:[%s14855_s18 + $0x180] sm:$0xff] %vm6839_vm3, %v8048_v62 }
 0x9db   : > { %v8052_v35 = vpop.eup %8051  ;;  %6891 = vst.msk [vmem:[%s14855_s18 + $0x198] sm:$0xff] %vm6839_vm3, %v8050_v46 }
 0x9dc   : > { %6889 = vst.msk [vmem:[%s14855_s18 + $0x188] sm:$0xff] %vm6839_vm3, %v8052_v35 }
 0x9eb   : > { %v7511_v11 = vpop.f32.mrb[112].mxu1 }
 0x9ec   : > { %v6737_v39 = vadd.f32 %v15178_v36, %v7511_v11  ;;  %v6728_v54 = vpop.f32.mrb[113].mxu1 }
 0x9ed   : > { %v6729_v58 = vadd.f32 %v15178_v36, %v6728_v54  ;;  %v7512_v19 = vpop.f32.mrb[114].mxu1 }
 0x9ee   : > { %8053 = vtanh.f32 %v6737_v39  ;;  %v6740_v24 = vadd.f32 %v15178_v36, %v7512_v19  ;;  %v6731_v20 = vpop.f32.mrb[115].mxu1 }
 0x9ef   : > { %8055 = vtanh.f32 %v6729_v58  ;;  %v6732_v29 = vadd.f32 %v15178_v36, %v6731_v20 }
 0x9f0   : > { %8057 = vtanh.f32 %v6740_v24 }
 0x9f1   : > { %8059 = vtanh.f32 %v6732_v29 }
 0x9f8   : > { %v8054_v33 = vpop.eup %8053 }
 0x9f9   : > { %v8056_v21 = vpop.eup %8055  ;;  %6894 = vst.msk [vmem:[%s14855_s18 + $0x1b0] sm:$0xff] %vm6839_vm3, %v8054_v33 }
 0x9fa   : > { %v8058_v38 = vpop.eup %8057  ;;  %6892 = vst.msk [vmem:[%s14855_s18 + $0x1a0] sm:$0xff] %vm6839_vm3, %v8056_v21 }
 0x9fb   : > { %v8060_v7 = vpop.eup %8059  ;;  %6895 = vst.msk [vmem:[%s14855_s18 + $0x1b8] sm:$0xff] %vm6839_vm3, %v8058_v38 }
 0x9fc   : > { %6893 = vst.msk [vmem:[%s14855_s18 + $0x1a8] sm:$0xff] %vm6839_vm3, %v8060_v7 }
 0xa0b   : > { %v7515_v25 = vpop.f32.mrb[116].mxu1 }
 0xa0c   : > { %v6753_v30 = vadd.f32 %v15178_v36, %v7515_v25  ;;  %v6744_v22 = vpop.f32.mrb[117].mxu1 }
 0xa0d   : > { %v6745_v3 = vadd.f32 %v15178_v36, %v6744_v22  ;;  %v7516_v13 = vpop.f32.mrb[118].mxu1 }
 0xa0e   : > { %8061 = vtanh.f32 %v6753_v30  ;;  %v6756_v9 = vadd.f32 %v15178_v36, %v7516_v13  ;;  %v6747_v45 = vpop.f32.mrb[119].mxu1 }
 0xa0f   : > { %8063 = vtanh.f32 %v6745_v3  ;;  %v6748_v47 = vadd.f32 %v15178_v36, %v6747_v45 }
 0xa10   : > { %8065 = vtanh.f32 %v6756_v9 }
 0xa11   : > { %8067 = vtanh.f32 %v6748_v47 }
 0xa18   : > { %v8062_v49 = vpop.eup %8061 }
 0xa19   : > { %v8064_v1 = vpop.eup %8063  ;;  %6898 = vst.msk [vmem:[%s14855_s18 + $0x1d0] sm:$0xff] %vm6839_vm3, %v8062_v49 }
 0xa1a   : > { %v8066_v15 = vpop.eup %8065  ;;  %6896 = vst.msk [vmem:[%s14855_s18 + $0x1c0] sm:$0xff] %vm6839_vm3, %v8064_v1 }
 0xa1b   : > { %v8068_v53 = vpop.eup %8067  ;;  %6899 = vst.msk [vmem:[%s14855_s18 + $0x1d8] sm:$0xff] %vm6839_vm3, %v8066_v15 }
 0xa1c   : > { %6897 = vst.msk [vmem:[%s14855_s18 + $0x1c8] sm:$0xff] %vm6839_vm3, %v8068_v53 }
 0xa3f   : > { %v7459_v17 = vpop.f32.mrb[128].mxu0 }
 0xa40   : > { %v6529_v42 = vadd.f32 %v15178_v36, %v7459_v17  ;;  %v6520_v16 = vpop.f32.mrb[129].mxu0 }
 0xa41   : > { %v6521_v50 = vadd.f32 %v15178_v36, %v6520_v16  ;;  %v7460_v26 = vpop.f32.mrb[130].mxu0 }
 0xa42   : > { %8069 = vtanh.f32 %v6529_v42  ;;  %v6532_v43 = vadd.f32 %v15178_v36, %v7460_v26  ;;  %v6523_v56 = vpop.f32.mrb[131].mxu0 }
 0xa43   : > { %8071 = vtanh.f32 %v6521_v50  ;;  %v6524_v44 = vadd.f32 %v15178_v36, %v6523_v56  ;;  %v7519_v5 = vpop.f32.mrb[120].mxu1 }
 0xa44   : > { %8073 = vtanh.f32 %v6532_v43  ;;  %v6769_v37 = vadd.f32 %v15178_v36, %v7519_v5  ;;  %v6760_v63 = vpop.f32.mrb[121].mxu1 }
 0xa45   : > { %8075 = vtanh.f32 %v6524_v44  ;;  %v6761_v28 = vadd.f32 %v15178_v36, %v6760_v63  ;;  %v7520_v0 = vpop.f32.mrb[122].mxu1 }
 0xa46   : > { %8077 = vtanh.f32 %v6769_v37  ;;  %v6772_v57 = vadd.f32 %v15178_v36, %v7520_v0  ;;  %v6763_v27 = vpop.f32.mrb[123].mxu1 }
 0xa47   : > { %8079 = vtanh.f32 %v6761_v28  ;;  %v6764_v60 = vadd.f32 %v15178_v36, %v6763_v27 }
 0xa48   : > { %8081 = vtanh.f32 %v6772_v57 }
 0xa49   : > { %8083 = vtanh.f32 %v6764_v60 }
 0xa4c   : > { %v8070_v12 = vpop.eup %8069 }
 0xa4d   : > { %v8072_v34 = vpop.eup %8071  ;;  %6842 = vst.msk [vmem:[%s14855_s18 + $0x10] sm:$0xff] %vm6839_vm3, %v8070_v12 }
 0xa4e   : > { %v8074_v55 = vpop.eup %8073  ;;  %6840 = vst.msk [vmem:[%s14855_s18] sm:$0xff] %vm6839_vm3, %v8072_v34 }
 0xa4f   : > { %v8076_v32 = vpop.eup %8075  ;;  %6843 = vst.msk [vmem:[%s14855_s18 + $0x18] sm:$0xff] %vm6839_vm3, %v8074_v55 }
 0xa50   : > { %v8078_v31 = vpop.eup %8077  ;;  %6841 = vst.msk [vmem:[%s14855_s18 + $0x8] sm:$0xff] %vm6839_vm3, %v8076_v32 }
 0xa51   : > { %v8080_v18 = vpop.eup %8079  ;;  %6902 = vst.msk [vmem:[%s14855_s18 + $0x1f0] sm:$0xff] %vm6839_vm3, %v8078_v31 }
 0xa52   : > { %v8082_v36 = vpop.eup %8081  ;;  %6900 = vst.msk [vmem:[%s14855_s18 + $0x1e0] sm:$0xff] %vm6839_vm3, %v8080_v18 }
 0xa53   : > { %v8084_v52 = vpop.eup %8083  ;;  %6903 = vst.msk [vmem:[%s14855_s18 + $0x1f8] sm:$0xff] %vm6839_vm3, %v8082_v36 }
 0xa54   : > { %6901 = vst.msk [vmem:[%s14855_s18 + $0x1e8] sm:$0xff] %vm6839_vm3, %v8084_v52 }
 0xa55 PF: > { %s16_s21 = sadd.s32 1, %s8105_s21  }
 0xa56   : > { %p13_p4 = scmp.ge.s32.totalorder %s16_s21, 6  }
 0xa58   :  { %15 = sbr.rel (!%p13_p4) target bundleno = 1 (0x1), region = 75 }

</bundles_post_ra>
